<compile_context>
chip_gen: v7x
topology: tpu7x:2x2x1
jax: 0.10.0
libtpu: 0.0.40
codegen_flags: <defaults>
</compile_context>

<pallas_src>
import functools

import jax
import jax.numpy as jnp
from jax.experimental import pallas as pl
from jax.experimental.pallas import tpu as pltpu

# ----------------------------- config ---------------------------------------
PATCH = 16                           # DINOv2 patch size
IMG = 32                             # processor output spatial size (real: 224) - kept small
D = 1024                             # hidden size of dinov2-large (matches 1024-d output)
HEADS = 8                            # small head count (real: 16); head_dim = 128
HEAD_DIM = D // HEADS
MLP = 4096                           # MLP ratio 4, as in DINOv2
LAYERS = 1                           # real model: 24 layers - kept small
S_REAL = 1 + (IMG // PATCH) ** 2     # CLS + patches = 5
S_PAD = 8                            # padded sequence length (sublane-aligned)
LN_EPS = 1e-6
VMEM_LIMIT = 32 * 1024 * 1024        # explicit scoped-VMEM budget (safe on v5e/v6e/v7x)

TN_QKV = 512                         # w_qkv streamed in (D, 512) tiles -> grid=(6,)
TC_MLP = 512                         # MLP hidden streamed in 512-chunks -> grid=(8,)
TN_PATCH = 512                       # patch-embed output tiles -> grid=(2,), parallel


# ----------------------------- shared helpers --------------------------------
def _layernorm(x, g, b):
    """Row-wise LayerNorm, used both inside kernels and for the final CLS LN."""
    mu = jnp.mean(x, axis=-1, keepdims=True)
    xc = x - mu
    var = jnp.mean(xc * xc, axis=-1, keepdims=True)
    return xc * jax.lax.rsqrt(var + LN_EPS) * g + b


# ----------------------------- Pallas kernels -------------------------------
def _ln_qkv_attn_kernel(x_ref, g_ref, lb_ref, wqkv_ref, bqkv_ref, wo_ref, bo_ref,
                        o_ref, ln_sc, qkv_sc, ctx_sc,
                        *, n_heads, head_dim, n_valid, tn):
    """LN1 + QKV matmul (streamed over N tiles) + attention + W_o + residual.

    grid = (3*D // tn,), axis 'arbitrary' (QKV tiles accumulate in VMEM scratch,
    attention epilogue runs on the last step).  Padded key rows are masked.
    """
    n = pl.program_id(0)

    # LayerNorm of the (8, D) block once, at step 0, into a bf16 scratch.
    @pl.when(n == 0)
    def _():
        ln_sc[...] = _layernorm(x_ref[...], g_ref[...], lb_ref[...]).astype(jnp.bfloat16)

    # One lane-dense QKV tile per step; write it into the resident QKV scratch.
    col0 = pl.multiple_of(n * tn, tn)
    qkv_sc[:, pl.ds(col0, tn)] = (
        jnp.dot(ln_sc[...], wqkv_ref[...], preferred_element_type=jnp.float32)
        + bqkv_ref[...])

    # Epilogue: multi-head attention + output projection + residual.
    @pl.when(n == pl.num_programs(0) - 1)
    def _():
        S = x_ref.shape[0]
        Dm = n_heads * head_dim
        scale = 1.0 / (head_dim ** 0.5)
        key_ids = jax.lax.broadcasted_iota(jnp.int32, (S, S), 1)
        neg = jnp.where(key_ids < n_valid, 0.0, -1e30).astype(jnp.float32)

        for h in range(n_heads):                    # static unrolled, 8 tiny heads
            lo, hi = h * head_dim, (h + 1) * head_dim
            qh = qkv_sc[:, lo:hi]
            kh = qkv_sc[:, Dm + lo:Dm + hi]
            vh = qkv_sc[:, 2 * Dm + lo:2 * Dm + hi]
            # Q·Kᵀ without a transpose: contract the last dims directly.
            s = jax.lax.dot_general(qh, kh, (((1,), (1,)), ((), ())),
                                    preferred_element_type=jnp.float32) * scale + neg
            m = jnp.max(s, axis=-1, keepdims=True)
            p = jnp.exp(s - m)
            p = p / jnp.sum(p, axis=-1, keepdims=True)
            ctx_sc[:, lo:hi] = jnp.dot(p, vh, preferred_element_type=jnp.float32
                                       ).astype(jnp.bfloat16)

        # Single (S, D) @ (D, D) output projection + bias + residual.
        o_ref[...] = x_ref[...] + bo_ref[...] + jnp.dot(
            ctx_sc[...], wo_ref[...], preferred_element_type=jnp.float32)


def ln_qkv_attn(x, g, b, w_qkv, b_qkv, w_o, b_o, *, tn=TN_QKV):
    S, Dm = x.shape
    threeD = w_qkv.shape[1]
    assert threeD % tn == 0
    return pl.pallas_call(
        functools.partial(_ln_qkv_attn_kernel, n_heads=HEADS, head_dim=HEAD_DIM,
                          n_valid=S_REAL, tn=tn),
        out_shape=jax.ShapeDtypeStruct((S, Dm), jnp.float32),
        grid=(threeD // tn,),
        in_specs=[
            pl.BlockSpec((S, Dm), lambda n: (0, 0)),    # x (LN input + residual), DMA once
            pl.BlockSpec((1, Dm), lambda n: (0, 0)),    # ln1 gamma
            pl.BlockSpec((1, Dm), lambda n: (0, 0)),    # ln1 beta
            pl.BlockSpec((Dm, tn), lambda n: (0, n)),   # w_qkv tile (streamed, 1 MiB bf16)
            pl.BlockSpec((1, tn), lambda n: (0, n)),    # b_qkv tile
            pl.BlockSpec((Dm, Dm), lambda n: (0, 0)),   # w_o, constant index -> DMA once
            pl.BlockSpec((1, Dm), lambda n: (0, 0)),    # b_o
        ],
        out_specs=pl.BlockSpec((S, Dm), lambda n: (0, 0)),
        scratch_shapes=[
            pltpu.VMEM((S, Dm), jnp.bfloat16),          # LN(x)
            pltpu.VMEM((S, threeD), jnp.float32),       # QKV
            pltpu.VMEM((S, Dm), jnp.bfloat16),          # attention context (all heads)
        ],
        compiler_params=pltpu.CompilerParams(
            dimension_semantics=("arbitrary",), vmem_limit_bytes=VMEM_LIMIT),
    )(x, g, b, w_qkv, b_qkv, w_o, b_o)


def _ln_mlp_kernel(x_ref, g_ref, lb_ref, wfc1_ref, bfc1_ref, wfc2_ref, bfc2_ref,
                   o_ref, ln_sc, acc_sc):
    """LN2 + fc1 + GELU + fc2 + residual, streamed over the MLP hidden dim.

    grid = (MLP // tc,), axis 'arbitrary'.  Per step: h_c = GELU(LN(x) @ w_fc1[:,c])
    and acc += h_c @ w_fc2[c,:].  Writeback on the last step.
    """
    k = pl.program_id(0)

    @pl.when(k == 0)
    def _():
        ln_sc[...] = _layernorm(x_ref[...], g_ref[...], lb_ref[...]).astype(jnp.bfloat16)
        acc_sc[...] = jnp.zeros_like(acc_sc)

    h = jnp.dot(ln_sc[...], wfc1_ref[...], preferred_element_type=jnp.float32) + bfc1_ref[...]
    # TODO(synk): DINOv2/HF use exact erf GELU; the tanh approximation is used because
    # it is guaranteed to lower on the Mosaic TPU backend (EUP tanh).
    h = jax.nn.gelu(h, approximate=True)
    acc_sc[...] += jnp.dot(h.astype(jnp.bfloat16), wfc2_ref[...],
                           preferred_element_type=jnp.float32)

    @pl.when(k == pl.num_programs(0) - 1)
    def _():
        o_ref[...] = acc_sc[...] + x_ref[...] + bfc2_ref[...]


def ln_mlp(x, g, b, w_fc1, b_fc1, w_fc2, b_fc2, *, tc=TC_MLP):
    S, Dm = x.shape
    H = w_fc1.shape[1]
    assert H % tc == 0
    return pl.pallas_call(
        _ln_mlp_kernel,
        out_shape=jax.ShapeDtypeStruct((S, Dm), jnp.float32),
        grid=(H // tc,),
        in_specs=[
            pl.BlockSpec((S, Dm), lambda k: (0, 0)),    # x (LN input + residual)
            pl.BlockSpec((1, Dm), lambda k: (0, 0)),    # ln2 gamma
            pl.BlockSpec((1, Dm), lambda k: (0, 0)),    # ln2 beta
            pl.BlockSpec((Dm, tc), lambda k: (0, k)),   # w_fc1 column chunk (1 MiB bf16)
            pl.BlockSpec((1, tc), lambda k: (0, k)),    # b_fc1 chunk
            pl.BlockSpec((tc, Dm), lambda k: (k, 0)),   # w_fc2 row chunk (1 MiB bf16)
            pl.BlockSpec((1, Dm), lambda k: (0, 0)),    # b_fc2
        ],
        out_specs=pl.BlockSpec((S, Dm), lambda k: (0, 0)),
        scratch_shapes=[
            pltpu.VMEM((S, Dm), jnp.bfloat16),          # LN(x)
            pltpu.VMEM((S, Dm), jnp.float32),           # fc2 accumulator
        ],
        compiler_params=pltpu.CompilerParams(
            dimension_semantics=("arbitrary",), vmem_limit_bytes=VMEM_LIMIT),
    )(x, g, b, w_fc1, b_fc1, w_fc2, b_fc2)


def _patch_embed_kernel(p_ref, w_ref, b_ref, clspos_ref, o_ref, *, n_valid):
    """Patch embedding + CLS + positional embedding, fused; padded rows set to 0."""
    emb = jnp.dot(p_ref[...].astype(jnp.bfloat16), w_ref[...],
                  preferred_element_type=jnp.float32) + b_ref[...]
    row = jax.lax.broadcasted_iota(jnp.int32, emb.shape, 0)
    patch_rows = (row >= 1) & (row < n_valid)
    o_ref[...] = jnp.where(patch_rows, emb, 0.0) + clspos_ref[...]


def patch_embed(patches8, w, b, clspos, *, tn=TN_PATCH):
    S, K = patches8.shape
    N = w.shape[1]
    assert N % tn == 0
    return pl.pallas_call(
        functools.partial(_patch_embed_kernel, n_valid=S_REAL),
        out_shape=jax.ShapeDtypeStruct((S, N), jnp.float32),
        grid=(N // tn,),
        in_specs=[
            pl.BlockSpec((S, K), lambda n: (0, 0)),
            pl.BlockSpec((K, tn), lambda n: (0, n)),
            pl.BlockSpec((1, tn), lambda n: (0, n)),
            pl.BlockSpec((S, tn), lambda n: (0, n)),
        ],
        out_specs=pl.BlockSpec((S, tn), lambda n: (0, n)),
        compiler_params=pltpu.CompilerParams(
            dimension_semantics=("parallel",), vmem_limit_bytes=VMEM_LIMIT),
    )(patches8, w, b, clspos)


# ----------------------------- model glue -----------------------------------
def encoder_layer(x, p):
    # LN1 + QKV + attention + W_o + residual : one pallas_call.
    x = ln_qkv_attn(x, p["ln1_g"], p["ln1_b"], p["w_qkv"], p["b_qkv"],
                    p["w_o"], p["b_o"])                                   # (S, D)
    # LN2 + fc1 + GELU + fc2 + residual : one pallas_call.
    x = ln_mlp(x, p["ln2_g"], p["ln2_b"], p["w_fc1"], p["b_fc1"],
               p["w_fc2"], p["b_fc2"])                                    # (S, D)
    return x


def body_identity_extractor_forward(img, params):
    """img: (H, W, 3) float32 in [0,1]. Returns ((1,1,D) embedding, [primary_box])."""
    # TODO(synk): YOLO person detection + HF image processor (PIL/bicubic resize) are
    # external pretrained / CPU components with no Pallas equivalent; a fixed
    # full-image box and an average-pool resize are used instead.
    H, W = img.shape[:2]
    primary_box = jnp.array([0.0, 0.0, float(W), float(H), 0.9], jnp.float32)

    # "processor": avg-pool resize (H,W)->(IMG,IMG) + ImageNet normalization.
    fh, fw = H // IMG, W // IMG
    crop = img.reshape(IMG, fh, IMG, fw, 3).mean(axis=(1, 3))
    mean = jnp.array([0.485, 0.456, 0.406], jnp.float32)
    std = jnp.array([0.229, 0.224, 0.225], jnp.float32)
    crop = (crop - mean) / std

    # patchify (conv stride=kernel=PATCH == patch-flatten + matmul), written directly
    # into a sublane-aligned (S_PAD, PATCH*PATCH*3) buffer: row 0 = CLS slot, rows 1..4
    # = patches, rows 5..7 = padding.
    g = IMG // PATCH
    patches = crop.reshape(g, PATCH, g, PATCH, 3).transpose(0, 2, 1, 3, 4)
    patches = patches.reshape(g * g, PATCH * PATCH * 3)                    # (4, 768)
    patches8 = jnp.zeros((S_PAD, PATCH * PATCH * 3), jnp.float32)
    patches8 = patches8.at[1:1 + g * g, :].set(patches)                    # (8, 768)

    # patch embed + CLS + pos, fused; padded rows come out as exact zeros.
    tokens = patch_embed(patches8, params["w_patch"], params["b_patch"],
                         params["cls_pos"])                                # (8, D)

    for layer in params["layers"]:
        tokens = encoder_layer(tokens, layer)

    # Final LayerNorm is per-token: slice the CLS row first and LN a single (1, D)
    # row in plain JAX (drops the grid=(1,) layernorm pallas_call entirely).
    cls = tokens[0:1]                                                      # (1, D)
    cls = _layernorm(cls, params["lnf_g"], params["lnf_b"])                # (1, D)
    body_embedding = cls[None]        # .unsqueeze(0)  -> (1, 1, D)
    return body_embedding, [primary_box]


# ----------------------------- parameter init --------------------------------
def init_params(key):
    def nrm(k, shape, scale=0.02, dtype=jnp.float32):
        return (scale * jax.random.normal(k, shape, jnp.float32)).astype(dtype)

    keys = iter(jax.random.split(key, 8 + 8 * LAYERS))

    cls = nrm(next(keys), (1, D))
    pos = nrm(next(keys), (S_REAL, D))
    # precombined CLS + positional embedding, padded to S_PAD rows:
    #   row 0 = cls + pos[0]; rows 1..S_REAL-1 = pos[1:]; rows S_REAL.. = 0
    cls_pos = jnp.zeros((S_PAD, D), jnp.float32)
    cls_pos = cls_pos.at[0].set(cls[0] + pos[0]).at[1:S_REAL].set(pos[1:])

    params = {
        "w_patch": nrm(next(keys), (PATCH * PATCH * 3, D), dtype=jnp.bfloat16),
        "b_patch": jnp.zeros((1, D), jnp.float32),
        "cls_pos": cls_pos,
        "lnf_g": jnp.ones((1, D), jnp.float32),
        "lnf_b": jnp.zeros((1, D), jnp.float32),
        "layers": [],
    }
    for _ in range(LAYERS):
        params["layers"].append({
            "ln1_g": jnp.ones((1, D), jnp.float32),
            "ln1_b": jnp.zeros((1, D), jnp.float32),
            "w_qkv": nrm(next(keys), (D, 3 * D), dtype=jnp.bfloat16),
            "b_qkv": jnp.zeros((1, 3 * D), jnp.float32),
            "w_o": nrm(next(keys), (D, D), dtype=jnp.bfloat16),
            "b_o": jnp.zeros((1, D), jnp.float32),
            "ln2_g": jnp.ones((1, D), jnp.float32),
            "ln2_b": jnp.zeros((1, D), jnp.float32),
            "w_fc1": nrm(next(keys), (D, MLP), dtype=jnp.bfloat16),
            "b_fc1": jnp.zeros((1, MLP), jnp.float32),
            "w_fc2": nrm(next(keys), (MLP, D), dtype=jnp.bfloat16),
            "b_fc2": jnp.zeros((1, D), jnp.float32),
        })
    return params


# ----------------------------- main ------------------------------------------
if __name__ == "__main__":
    root = jax.random.PRNGKey(0)
    pkey, ikey = jax.random.split(root)
    params = init_params(pkey)

    # small HWC image (the module consumes an HWC numpy image)
    img = jax.random.uniform(ikey, (64, 64, 3), jnp.float32)

    fwd = jax.jit(lambda im: body_identity_extractor_forward(im, params))
    body_embedding, boxes = fwd(img)
    jax.block_until_ready(body_embedding)

    assert body_embedding.shape == (1, 1, D), body_embedding.shape
    assert body_embedding.dtype == jnp.float32
    assert len(boxes) == 1 and boxes[0].shape == (5,)
    assert bool(jnp.all(jnp.isfinite(body_embedding)))
    print("KERNEL_OK")
</pallas_src>

<mosaic_0001>
module attributes {stable_mosaic.version = 11 : i64} {
  func.func @_patch_embed_kernel(%arg0: i32, %arg1: memref<8x768xf32, #tpu.memory_space<vmem>>, %arg2: memref<768x512xbf16, #tpu.memory_space<vmem>>, %arg3: memref<1x512xf32, #tpu.memory_space<vmem>>, %arg4: memref<8x512xf32, #tpu.memory_space<vmem>>, %arg5: memref<8x512xf32, #tpu.memory_space<vmem>>) attributes {dimension_semantics = [#tpu.dimension_semantics<parallel>], iteration_bounds = array<i64: 2>, scalar_prefetch = 0 : i64, scratch_operands = 0 : i64, tpu.core_type = #tpu.core_type<tc>, window_params = [{pipeline_mode = #tpu.pipeline_mode<synchronous>, transform_indices = @transform_0, window_bounds = array<i64: 8, 768>}, {transform_indices = @transform_1, window_bounds = array<i64: 768, 512>}, {transform_indices = @transform_2, window_bounds = array<i64: 1, 512>}, {transform_indices = @transform_3, window_bounds = array<i64: 8, 512>}, {transform_indices = @transform_4, window_bounds = array<i64: 8, 512>}]} {
    %c0 = arith.constant 0 : index
    %c0_0 = arith.constant 0 : index
    %0 = vector.load %arg1[%c0, %c0_0] : memref<8x768xf32, #tpu.memory_space<vmem>>, vector<8x768xf32>
    %1 = arith.truncf %0 : vector<8x768xf32> to vector<8x768xbf16>
    %c0_1 = arith.constant 0 : index
    %c0_2 = arith.constant 0 : index
    %2 = vector.load %arg2[%c0_1, %c0_2] : memref<768x512xbf16, #tpu.memory_space<vmem>>, vector<768x512xbf16>
    %cst = arith.constant dense<0.000000e+00> : vector<8x512xf32>
    %3 = tpu.matmul %1, %2, %cst {dimension_numbers = #tpu.dot_dimension_numbers<[1], [0], [0], [1], [0, 0, 1, 1], [], []>} : vector<8x768xbf16>, vector<768x512xbf16>, vector<8x512xf32> -> vector<8x512xf32>
    %c0_3 = arith.constant 0 : index
    %c0_4 = arith.constant 0 : index
    %4 = vector.load %arg3[%c0_3, %c0_4] : memref<1x512xf32, #tpu.memory_space<vmem>>, vector<1x512xf32>
    %5 = vector.broadcast %4 : vector<1x512xf32> to vector<8x512xf32>
    %6 = arith.addf %3, %5 : vector<8x512xf32>
    %7 = tpu.iota {dimensions = array<i32: 0>} : vector<8x512xi32>
    %c1_i32 = arith.constant 1 : i32
    %8 = vector.broadcast %c1_i32 : i32 to vector<8x512xi32>
    %9 = arith.cmpi sge, %7, %8 : vector<8x512xi32>
    %c5_i32 = arith.constant 5 : i32
    %10 = vector.broadcast %c5_i32 : i32 to vector<8x512xi32>
    %11 = arith.cmpi slt, %7, %10 : vector<8x512xi32>
    %12 = arith.andi %9, %11 : vector<8x512xi1>
    %cst_5 = arith.constant 0.000000e+00 : f32
    %13 = vector.broadcast %cst_5 : f32 to vector<8x512xf32>
    %14 = arith.select %12, %6, %13 : vector<8x512xi1>, vector<8x512xf32>
    %c0_6 = arith.constant 0 : index
    %c0_7 = arith.constant 0 : index
    %15 = vector.load %arg4[%c0_6, %c0_7] : memref<8x512xf32, #tpu.memory_space<vmem>>, vector<8x512xf32>
    %16 = arith.addf %14, %15 : vector<8x512xf32>
    %c0_8 = arith.constant 0 : index
    %c0_9 = arith.constant 0 : index
    %17 = vector.load %arg5[%c0_8, %c0_9] : memref<8x512xf32, #tpu.memory_space<vmem>>, vector<8x512xf32>
    tpu.vector_store %arg5[%c0_8, %c0_9], %16 {strides = array<i32>} : memref<8x512xf32, #tpu.memory_space<vmem>>, vector<8x512xf32>,
    return
  }
  func.func @transform_0(%arg0: i32) -> (i32, i32) {
    %c0_i32 = arith.constant 0 : i32
    %c0_i32_0 = arith.constant 0 : i32
    %c0_i32_1 = arith.constant 0 : i32
    return %c0_i32, %c0_i32_0 : i32, i32
  }
  func.func @transform_1(%arg0: i32) -> (i32, i32) {
    %c0_i32 = arith.constant 0 : i32
    %c0_i32_0 = arith.constant 0 : i32
    return %c0_i32, %arg0 : i32, i32
  }
  func.func @transform_2(%arg0: i32) -> (i32, i32) {
    %c0_i32 = arith.constant 0 : i32
    %c0_i32_0 = arith.constant 0 : i32
    return %c0_i32, %arg0 : i32, i32
  }
  func.func @transform_3(%arg0: i32) -> (i32, i32) {
    %c0_i32 = arith.constant 0 : i32
    %c0_i32_0 = arith.constant 0 : i32
    return %c0_i32, %arg0 : i32, i32
  }
  func.func @transform_4(%arg0: i32) -> (i32, i32) {
    %c0_i32 = arith.constant 0 : i32
    %c0_i32_0 = arith.constant 0 : i32
    return %c0_i32, %arg0 : i32, i32
  }
}

module attributes {stable_mosaic.version = 11 : i64} {
  func.func @_ln_qkv_attn_kernel(%arg0: i32, %arg1: memref<8x1024xf32, #tpu.memory_space<vmem>>, %arg2: memref<1x1024xf32, #tpu.memory_space<vmem>>, %arg3: memref<1x1024xf32, #tpu.memory_space<vmem>>, %arg4: memref<1024x512xbf16, #tpu.memory_space<vmem>>, %arg5: memref<1x512xf32, #tpu.memory_space<vmem>>, %arg6: memref<1024x1024xbf16, #tpu.memory_space<vmem>>, %arg7: memref<1x1024xf32, #tpu.memory_space<vmem>>, %arg8: memref<8x1024xf32, #tpu.memory_space<vmem>>, %arg9: memref<8x1024xbf16, #tpu.memory_space<vmem>>, %arg10: memref<8x3072xf32, #tpu.memory_space<vmem>>, %arg11: memref<8x1024xbf16, #tpu.memory_space<vmem>>) attributes {dimension_semantics = [#tpu.dimension_semantics<arbitrary>], iteration_bounds = array<i64: 6>, scalar_prefetch = 0 : i64, scratch_operands = 3 : i64, tpu.core_type = #tpu.core_type<tc>, window_params = [{pipeline_mode = #tpu.pipeline_mode<synchronous>, transform_indices = @transform_0, window_bounds = array<i64: 8, 1024>}, {pipeline_mode = #tpu.pipeline_mode<synchronous>, transform_indices = @transform_1, window_bounds = array<i64: 1, 1024>}, {pipeline_mode = #tpu.pipeline_mode<synchronous>, transform_indices = @transform_2, window_bounds = array<i64: 1, 1024>}, {transform_indices = @transform_3, window_bounds = array<i64: 1024, 512>}, {transform_indices = @transform_4, window_bounds = array<i64: 1, 512>}, {pipeline_mode = #tpu.pipeline_mode<synchronous>, transform_indices = @transform_5, window_bounds = array<i64: 1024, 1024>}, {pipeline_mode = #tpu.pipeline_mode<synchronous>, transform_indices = @transform_6, window_bounds = array<i64: 1, 1024>}, {pipeline_mode = #tpu.pipeline_mode<synchronous>, transform_indices = @transform_7, window_bounds = array<i64: 8, 1024>}]} {
    %c0_i32 = arith.constant 0 : i32
    %0 = arith.cmpi eq, %arg0, %c0_i32 : i32
    %1 = arith.extui %0 : i1 to i32
    %c0_i32_0 = arith.constant 0 : i32
    %2 = arith.cmpi ne, %1, %c0_i32_0 : i32
    scf.if %2 {
      %c0_8 = arith.constant 0 : index
      %c0_9 = arith.constant 0 : index
      %16 = vector.load %arg1[%c0_8, %c0_9] : memref<8x1024xf32, #tpu.memory_space<vmem>>, vector<8x1024xf32>
      %c0_10 = arith.constant 0 : index
      %c0_11 = arith.constant 0 : index
      %17 = vector.load %arg2[%c0_10, %c0_11] : memref<1x1024xf32, #tpu.memory_space<vmem>>, vector<1x1024xf32>
      %c0_12 = arith.constant 0 : index
      %c0_13 = arith.constant 0 : index
      %18 = vector.load %arg3[%c0_12, %c0_13] : memref<1x1024xf32, #tpu.memory_space<vmem>>, vector<1x1024xf32>
      %cst_14 = arith.constant dense<0.000000e+00> : vector<8xf32>
      %19 = vector.multi_reduction <add>, %16, %cst_14 [1] : vector<8x1024xf32> to vector<8xf32>
      %20 = vector.shape_cast %19 : vector<8xf32> to vector<8x1xf32>
      %cst_15 = arith.constant 1.024000e+03 : f32
      %21 = vector.broadcast %cst_15 : f32 to vector<8x1xf32>
      %22 = arith.divf %20, %21 : vector<8x1xf32>
      %23 = vector.broadcast %22 : vector<8x1xf32> to vector<8x1024xf32>
      %24 = arith.subf %16, %23 : vector<8x1024xf32>
      %25 = arith.mulf %24, %24 : vector<8x1024xf32>
      %cst_16 = arith.constant dense<0.000000e+00> : vector<8xf32>
      %26 = vector.multi_reduction <add>, %25, %cst_16 [1] : vector<8x1024xf32> to vector<8xf32>
      %27 = vector.shape_cast %26 : vector<8xf32> to vector<8x1xf32>
      %cst_17 = arith.constant 1.024000e+03 : f32
      %28 = vector.broadcast %cst_17 : f32 to vector<8x1xf32>
      %29 = arith.divf %27, %28 : vector<8x1xf32>
      %cst_18 = arith.constant 9.99999997E-7 : f32
      %30 = vector.broadcast %cst_18 : f32 to vector<8x1xf32>
      %31 = arith.addf %29, %30 : vector<8x1xf32>
      %32 = math.rsqrt %31 : vector<8x1xf32>
      %33 = vector.broadcast %32 : vector<8x1xf32> to vector<8x1024xf32>
      %34 = arith.mulf %24, %33 : vector<8x1024xf32>
      %35 = vector.broadcast %17 : vector<1x1024xf32> to vector<8x1024xf32>
      %36 = arith.mulf %34, %35 : vector<8x1024xf32>
      %37 = vector.broadcast %18 : vector<1x1024xf32> to vector<8x1024xf32>
      %38 = arith.addf %36, %37 : vector<8x1024xf32>
      %39 = arith.truncf %38 : vector<8x1024xf32> to vector<8x1024xbf16>
      %c0_19 = arith.constant 0 : index
      %c0_20 = arith.constant 0 : index
      %40 = vector.load %arg9[%c0_19, %c0_20] : memref<8x1024xbf16, #tpu.memory_space<vmem>>, vector<8x1024xbf16>
      tpu.vector_store %arg9[%c0_19, %c0_20], %39 {strides = array<i32>} : memref<8x1024xbf16, #tpu.memory_space<vmem>>, vector<8x1024xbf16>,
    } else {
    }
    %c512_i32 = arith.constant 512 : i32
    %3 = arith.muli %arg0, %c512_i32 : i32
    %4 = tpu.assume_multiple %3, 512 : i32
    %c0 = arith.constant 0 : index
    %c0_1 = arith.constant 0 : index
    %5 = vector.load %arg9[%c0, %c0_1] : memref<8x1024xbf16, #tpu.memory_space<vmem>>, vector<8x1024xbf16>
    %c0_2 = arith.constant 0 : index
    %c0_3 = arith.constant 0 : index
    %6 = vector.load %arg4[%c0_2, %c0_3] : memref<1024x512xbf16, #tpu.memory_space<vmem>>, vector<1024x512xbf16>
    %cst = arith.constant dense<0.000000e+00> : vector<8x512xf32>
    %7 = tpu.matmul %5, %6, %cst {dimension_numbers = #tpu.dot_dimension_numbers<[1], [0], [0], [1], [0, 0, 1, 1], [], []>} : vector<8x1024xbf16>, vector<1024x512xbf16>, vector<8x512xf32> -> vector<8x512xf32>
    %c0_4 = arith.constant 0 : index
    %c0_5 = arith.constant 0 : index
    %8 = vector.load %arg5[%c0_4, %c0_5] : memref<1x512xf32, #tpu.memory_space<vmem>>, vector<1x512xf32>
    %9 = vector.broadcast %8 : vector<1x512xf32> to vector<8x512xf32>
    %10 = arith.addf %7, %9 : vector<8x512xf32>
    %c0_6 = arith.constant 0 : index
    %11 = arith.index_cast %4 : i32 to index
    %12 = vector.load %arg10[%c0_6, %11] : memref<8x3072xf32, #tpu.memory_space<vmem>>, vector<8x512xf32>
    tpu.vector_store %arg10[%c0_6, %11], %10 {strides = array<i32>} : memref<8x3072xf32, #tpu.memory_space<vmem>>, vector<8x512xf32>,
    %c5_i32 = arith.constant 5 : i32
    %13 = arith.cmpi eq, %arg0, %c5_i32 : i32
    %14 = arith.extui %13 : i1 to i32
    %c0_i32_7 = arith.constant 0 : i32
    %15 = arith.cmpi ne, %14, %c0_i32_7 : i32
    scf.if %15 {
      %16 = tpu.iota {dimensions = array<i32: 1>} : vector<8x8xi32>
      %c5_i32_8 = arith.constant 5 : i32
      %17 = vector.broadcast %c5_i32_8 : i32 to vector<8x8xi32>
      %18 = arith.cmpi slt, %16, %17 : vector<8x8xi32>
      %cst_9 = arith.constant 0.000000e+00 : f32
      %cst_10 = arith.constant -1.000000e+30 : f32
      %19 = vector.broadcast %cst_9 : f32 to vector<8x8xf32>
      %20 = vector.broadcast %cst_10 : f32 to vector<8x8xf32>
      %21 = arith.select %18, %19, %20 : vector<8x8xi1>, vector<8x8xf32>
      %c0_11 = arith.constant 0 : index
      %c0_12 = arith.constant 0 : index
      %22 = vector.load %arg10[%c0_11, %c0_12] : memref<8x3072xf32, #tpu.memory_space<vmem>>, vector<8x128xf32>
      %c0_13 = arith.constant 0 : index
      %c1024 = arith.constant 1024 : index
      %23 = vector.load %arg10[%c0_13, %c1024] : memref<8x3072xf32, #tpu.memory_space<vmem>>, vector<8x128xf32>
      %c0_14 = arith.constant 0 : index
      %c2048 = arith.constant 2048 : index
      %24 = vector.load %arg10[%c0_14, %c2048] : memref<8x3072xf32, #tpu.memory_space<vmem>>, vector<8x128xf32>
      %cst_15 = arith.constant dense<0.000000e+00> : vector<8x8xf32>
      %25 = tpu.matmul %22, %23, %cst_15 {dimension_numbers = #tpu.dot_dimension_numbers<[1], [1], [0], [0], [0, 0, 1, 0], [], []>} : vector<8x128xf32>, vector<8x128xf32>, vector<8x8xf32> -> vector<8x8xf32>
      %cst_16 = arith.constant 0.0883883461 : f32
      %26 = vector.broadcast %cst_16 : f32 to vector<8x8xf32>
      %27 = arith.mulf %25, %26 : vector<8x8xf32>
      %28 = arith.addf %27, %21 : vector<8x8xf32>
      %cst_17 = arith.constant dense<0xFF800000> : vector<8xf32>
      %29 = vector.multi_reduction <maximumf>, %28, %cst_17 [1] : vector<8x8xf32> to vector<8xf32>
      %30 = vector.shape_cast %29 : vector<8xf32> to vector<8x1xf32>
      %31 = vector.broadcast %30 : vector<8x1xf32> to vector<8x8xf32>
      %32 = arith.subf %28, %31 : vector<8x8xf32>
      %33 = math.exp %32 : vector<8x8xf32>
      %cst_18 = arith.constant dense<0.000000e+00> : vector<8xf32>
      %34 = vector.multi_reduction <add>, %33, %cst_18 [1] : vector<8x8xf32> to vector<8xf32>
      %35 = vector.shape_cast %34 : vector<8xf32> to vector<8x1xf32>
      %36 = vector.broadcast %35 : vector<8x1xf32> to vector<8x8xf32>
      %37 = arith.divf %33, %36 : vector<8x8xf32>
      %cst_19 = arith.constant dense<0.000000e+00> : vector<8x128xf32>
      %38 = tpu.matmul %37, %24, %cst_19 {dimension_numbers = #tpu.dot_dimension_numbers<[1], [0], [0], [1], [0, 0, 1, 1], [], []>} : vector<8x8xf32>, vector<8x128xf32>, vector<8x128xf32> -> vector<8x128xf32>
      %39 = arith.truncf %38 : vector<8x128xf32> to vector<8x128xbf16>
      %c0_20 = arith.constant 0 : index
      %c0_21 = arith.constant 0 : index
      %40 = vector.load %arg11[%c0_20, %c0_21] : memref<8x1024xbf16, #tpu.memory_space<vmem>>, vector<8x128xbf16>
      tpu.vector_store %arg11[%c0_20, %c0_21], %39 {strides = array<i32>} : memref<8x1024xbf16, #tpu.memory_space<vmem>>, vector<8x128xbf16>,
      %c0_22 = arith.constant 0 : index
      %c128 = arith.constant 128 : index
      %41 = vector.load %arg10[%c0_22, %c128] : memref<8x3072xf32, #tpu.memory_space<vmem>>, vector<8x128xf32>
      %c0_23 = arith.constant 0 : index
      %c1152 = arith.constant 1152 : index
      %42 = vector.load %arg10[%c0_23, %c1152] : memref<8x3072xf32, #tpu.memory_space<vmem>>, vector<8x128xf32>
      %c0_24 = arith.constant 0 : index
      %c2176 = arith.constant 2176 : index
      %43 = vector.load %arg10[%c0_24, %c2176] : memref<8x3072xf32, #tpu.memory_space<vmem>>, vector<8x128xf32>
      %cst_25 = arith.constant dense<0.000000e+00> : vector<8x8xf32>
      %44 = tpu.matmul %41, %42, %cst_25 {dimension_numbers = #tpu.dot_dimension_numbers<[1], [1], [0], [0], [0, 0, 1, 0], [], []>} : vector<8x128xf32>, vector<8x128xf32>, vector<8x8xf32> -> vector<8x8xf32>
      %cst_26 = arith.constant 0.0883883461 : f32
      %45 = vector.broadcast %cst_26 : f32 to vector<8x8xf32>
      %46 = arith.mulf %44, %45 : vector<8x8xf32>
      %47 = arith.addf %46, %21 : vector<8x8xf32>
      %cst_27 = arith.constant dense<0xFF800000> : vector<8xf32>
      %48 = vector.multi_reduction <maximumf>, %47, %cst_27 [1] : vector<8x8xf32> to vector<8xf32>
      %49 = vector.shape_cast %48 : vector<8xf32> to vector<8x1xf32>
      %50 = vector.broadcast %49 : vector<8x1xf32> to vector<8x8xf32>
      %51 = arith.subf %47, %50 : vector<8x8xf32>
      %52 = math.exp %51 : vector<8x8xf32>
      %cst_28 = arith.constant dense<0.000000e+00> : vector<8xf32>
      %53 = vector.multi_reduction <add>, %52, %cst_28 [1] : vector<8x8xf32> to vector<8xf32>
      %54 = vector.shape_cast %53 : vector<8xf32> to vector<8x1xf32>
      %55 = vector.broadcast %54 : vector<8x1xf32> to vector<8x8xf32>
      %56 = arith.divf %52, %55 : vector<8x8xf32>
      %cst_29 = arith.constant dense<0.000000e+00> : vector<8x128xf32>
      %57 = tpu.matmul %56, %43, %cst_29 {dimension_numbers = #tpu.dot_dimension_numbers<[1], [0], [0], [1], [0, 0, 1, 1], [], []>} : vector<8x8xf32>, vector<8x128xf32>, vector<8x128xf32> -> vector<8x128xf32>
      %58 = arith.truncf %57 : vector<8x128xf32> to vector<8x128xbf16>
      %c0_30 = arith.constant 0 : index
      %c128_31 = arith.constant 128 : index
      %59 = vector.load %arg11[%c0_30, %c128_31] : memref<8x1024xbf16, #tpu.memory_space<vmem>>, vector<8x128xbf16>
      tpu.vector_store %arg11[%c0_30, %c128_31], %58 {strides = array<i32>} : memref<8x1024xbf16, #tpu.memory_space<vmem>>, vector<8x128xbf16>,
      %c0_32 = arith.constant 0 : index
      %c256 = arith.constant 256 : index
      %60 = vector.load %arg10[%c0_32, %c256] : memref<8x3072xf32, #tpu.memory_space<vmem>>, vector<8x128xf32>
      %c0_33 = arith.constant 0 : index
      %c1280 = arith.constant 1280 : index
      %61 = vector.load %arg10[%c0_33, %c1280] : memref<8x3072xf32, #tpu.memory_space<vmem>>, vector<8x128xf32>
      %c0_34 = arith.constant 0 : index
      %c2304 = arith.constant 2304 : index
      %62 = vector.load %arg10[%c0_34, %c2304] : memref<8x3072xf32, #tpu.memory_space<vmem>>, vector<8x128xf32>
      %cst_35 = arith.constant dense<0.000000e+00> : vector<8x8xf32>
      %63 = tpu.matmul %60, %61, %cst_35 {dimension_numbers = #tpu.dot_dimension_numbers<[1], [1], [0], [0], [0, 0, 1, 0], [], []>} : vector<8x128xf32>, vector<8x128xf32>, vector<8x8xf32> -> vector<8x8xf32>
      %cst_36 = arith.constant 0.0883883461 : f32
      %64 = vector.broadcast %cst_36 : f32 to vector<8x8xf32>
      %65 = arith.mulf %63, %64 : vector<8x8xf32>
      %66 = arith.addf %65, %21 : vector<8x8xf32>
      %cst_37 = arith.constant dense<0xFF800000> : vector<8xf32>
      %67 = vector.multi_reduction <maximumf>, %66, %cst_37 [1] : vector<8x8xf32> to vector<8xf32>
      %68 = vector.shape_cast %67 : vector<8xf32> to vector<8x1xf32>
      %69 = vector.broadcast %68 : vector<8x1xf32> to vector<8x8xf32>
      %70 = arith.subf %66, %69 : vector<8x8xf32>
      %71 = math.exp %70 : vector<8x8xf32>
      %cst_38 = arith.constant dense<0.000000e+00> : vector<8xf32>
      %72 = vector.multi_reduction <add>, %71, %cst_38 [1] : vector<8x8xf32> to vector<8xf32>
      %73 = vector.shape_cast %72 : vector<8xf32> to vector<8x1xf32>
      %74 = vector.broadcast %73 : vector<8x1xf32> to vector<8x8xf32>
      %75 = arith.divf %71, %74 : vector<8x8xf32>
      %cst_39 = arith.constant dense<0.000000e+00> : vector<8x128xf32>
      %76 = tpu.matmul %75, %62, %cst_39 {dimension_numbers = #tpu.dot_dimension_numbers<[1], [0], [0], [1], [0, 0, 1, 1], [], []>} : vector<8x8xf32>, vector<8x128xf32>, vector<8x128xf32> -> vector<8x128xf32>
      %77 = arith.truncf %76 : vector<8x128xf32> to vector<8x128xbf16>
      %c0_40 = arith.constant 0 : index
      %c256_41 = arith.constant 256 : index
      %78 = vector.load %arg11[%c0_40, %c256_41] : memref<8x1024xbf16, #tpu.memory_space<vmem>>, vector<8x128xbf16>
      tpu.vector_store %arg11[%c0_40, %c256_41], %77 {strides = array<i32>} : memref<8x1024xbf16, #tpu.memory_space<vmem>>, vector<8x128xbf16>,
      %c0_42 = arith.constant 0 : index
      %c384 = arith.constant 384 : index
      %79 = vector.load %arg10[%c0_42, %c384] : memref<8x3072xf32, #tpu.memory_space<vmem>>, vector<8x128xf32>
      %c0_43 = arith.constant 0 : index
      %c1408 = arith.constant 1408 : index
      %80 = vector.load %arg10[%c0_43, %c1408] : memref<8x3072xf32, #tpu.memory_space<vmem>>, vector<8x128xf32>
      %c0_44 = arith.constant 0 : index
      %c2432 = arith.constant 2432 : index
      %81 = vector.load %arg10[%c0_44, %c2432] : memref<8x3072xf32, #tpu.memory_space<vmem>>, vector<8x128xf32>
      %cst_45 = arith.constant dense<0.000000e+00> : vector<8x8xf32>
      %82 = tpu.matmul %79, %80, %cst_45 {dimension_numbers = #tpu.dot_dimension_numbers<[1], [1], [0], [0], [0, 0, 1, 0], [], []>} : vector<8x128xf32>, vector<8x128xf32>, vector<8x8xf32> -> vector<8x8xf32>
      %cst_46 = arith.constant 0.0883883461 : f32
      %83 = vector.broadcast %cst_46 : f32 to vector<8x8xf32>
      %84 = arith.mulf %82, %83 : vector<8x8xf32>
      %85 = arith.addf %84, %21 : vector<8x8xf32>
      %cst_47 = arith.constant dense<0xFF800000> : vector<8xf32>
      %86 = vector.multi_reduction <maximumf>, %85, %cst_47 [1] : vector<8x8xf32> to vector<8xf32>
      %87 = vector.shape_cast %86 : vector<8xf32> to vector<8x1xf32>
      %88 = vector.broadcast %87 : vector<8x1xf32> to vector<8x8xf32>
      %89 = arith.subf %85, %88 : vector<8x8xf32>
      %90 = math.exp %89 : vector<8x8xf32>
      %cst_48 = arith.constant dense<0.000000e+00> : vector<8xf32>
      %91 = vector.multi_reduction <add>, %90, %cst_48 [1] : vector<8x8xf32> to vector<8xf32>
      %92 = vector.shape_cast %91 : vector<8xf32> to vector<8x1xf32>
      %93 = vector.broadcast %92 : vector<8x1xf32> to vector<8x8xf32>
      %94 = arith.divf %90, %93 : vector<8x8xf32>
      %cst_49 = arith.constant dense<0.000000e+00> : vector<8x128xf32>
      %95 = tpu.matmul %94, %81, %cst_49 {dimension_numbers = #tpu.dot_dimension_numbers<[1], [0], [0], [1], [0, 0, 1, 1], [], []>} : vector<8x8xf32>, vector<8x128xf32>, vector<8x128xf32> -> vector<8x128xf32>
      %96 = arith.truncf %95 : vector<8x128xf32> to vector<8x128xbf16>
      %c0_50 = arith.constant 0 : index
      %c384_51 = arith.constant 384 : index
      %97 = vector.load %arg11[%c0_50, %c384_51] : memref<8x1024xbf16, #tpu.memory_space<vmem>>, vector<8x128xbf16>
      tpu.vector_store %arg11[%c0_50, %c384_51], %96 {strides = array<i32>} : memref<8x1024xbf16, #tpu.memory_space<vmem>>, vector<8x128xbf16>,
      %c0_52 = arith.constant 0 : index
      %c512 = arith.constant 512 : index
      %98 = vector.load %arg10[%c0_52, %c512] : memref<8x3072xf32, #tpu.memory_space<vmem>>, vector<8x128xf32>
      %c0_53 = arith.constant 0 : index
      %c1536 = arith.constant 1536 : index
      %99 = vector.load %arg10[%c0_53, %c1536] : memref<8x3072xf32, #tpu.memory_space<vmem>>, vector<8x128xf32>
      %c0_54 = arith.constant 0 : index
      %c2560 = arith.constant 2560 : index
      %100 = vector.load %arg10[%c0_54, %c2560] : memref<8x3072xf32, #tpu.memory_space<vmem>>, vector<8x128xf32>
      %cst_55 = arith.constant dense<0.000000e+00> : vector<8x8xf32>
      %101 = tpu.matmul %98, %99, %cst_55 {dimension_numbers = #tpu.dot_dimension_numbers<[1], [1], [0], [0], [0, 0, 1, 0], [], []>} : vector<8x128xf32>, vector<8x128xf32>, vector<8x8xf32> -> vector<8x8xf32>
      %cst_56 = arith.constant 0.0883883461 : f32
      %102 = vector.broadcast %cst_56 : f32 to vector<8x8xf32>
      %103 = arith.mulf %101, %102 : vector<8x8xf32>
      %104 = arith.addf %103, %21 : vector<8x8xf32>
      %cst_57 = arith.constant dense<0xFF800000> : vector<8xf32>
      %105 = vector.multi_reduction <maximumf>, %104, %cst_57 [1] : vector<8x8xf32> to vector<8xf32>
      %106 = vector.shape_cast %105 : vector<8xf32> to vector<8x1xf32>
      %107 = vector.broadcast %106 : vector<8x1xf32> to vector<8x8xf32>
      %108 = arith.subf %104, %107 : vector<8x8xf32>
      %109 = math.exp %108 : vector<8x8xf32>
      %cst_58 = arith.constant dense<0.000000e+00> : vector<8xf32>
      %110 = vector.multi_reduction <add>, %109, %cst_58 [1] : vector<8x8xf32> to vector<8xf32>
      %111 = vector.shape_cast %110 : vector<8xf32> to vector<8x1xf32>
      %112 = vector.broadcast %111 : vector<8x1xf32> to vector<8x8xf32>
      %113 = arith.divf %109, %112 : vector<8x8xf32>
      %cst_59 = arith.constant dense<0.000000e+00> : vector<8x128xf32>
      %114 = tpu.matmul %113, %100, %cst_59 {dimension_numbers = #tpu.dot_dimension_numbers<[1], [0], [0], [1], [0, 0, 1, 1], [], []>} : vector<8x8xf32>, vector<8x128xf32>, vector<8x128xf32> -> vector<8x128xf32>
      %115 = arith.truncf %114 : vector<8x128xf32> to vector<8x128xbf16>
      %c0_60 = arith.constant 0 : index
      %c512_61 = arith.constant 512 : index
      %116 = vector.load %arg11[%c0_60, %c512_61] : memref<8x1024xbf16, #tpu.memory_space<vmem>>, vector<8x128xbf16>
      tpu.vector_store %arg11[%c0_60, %c512_61], %115 {strides = array<i32>} : memref<8x1024xbf16, #tpu.memory_space<vmem>>, vector<8x128xbf16>,
      %c0_62 = arith.constant 0 : index
      %c640 = arith.constant 640 : index
      %117 = vector.load %arg10[%c0_62, %c640] : memref<8x3072xf32, #tpu.memory_space<vmem>>, vector<8x128xf32>
      %c0_63 = arith.constant 0 : index
      %c1664 = arith.constant 1664 : index
      %118 = vector.load %arg10[%c0_63, %c1664] : memref<8x3072xf32, #tpu.memory_space<vmem>>, vector<8x128xf32>
      %c0_64 = arith.constant 0 : index
      %c2688 = arith.constant 2688 : index
      %119 = vector.load %arg10[%c0_64, %c2688] : memref<8x3072xf32, #tpu.memory_space<vmem>>, vector<8x128xf32>
      %cst_65 = arith.constant dense<0.000000e+00> : vector<8x8xf32>
      %120 = tpu.matmul %117, %118, %cst_65 {dimension_numbers = #tpu.dot_dimension_numbers<[1], [1], [0], [0], [0, 0, 1, 0], [], []>} : vector<8x128xf32>, vector<8x128xf32>, vector<8x8xf32> -> vector<8x8xf32>
      %cst_66 = arith.constant 0.0883883461 : f32
      %121 = vector.broadcast %cst_66 : f32 to vector<8x8xf32>
      %122 = arith.mulf %120, %121 : vector<8x8xf32>
      %123 = arith.addf %122, %21 : vector<8x8xf32>
      %cst_67 = arith.constant dense<0xFF800000> : vector<8xf32>
      %124 = vector.multi_reduction <maximumf>, %123, %cst_67 [1] : vector<8x8xf32> to vector<8xf32>
      %125 = vector.shape_cast %124 : vector<8xf32> to vector<8x1xf32>
      %126 = vector.broadcast %125 : vector<8x1xf32> to vector<8x8xf32>
      %127 = arith.subf %123, %126 : vector<8x8xf32>
      %128 = math.exp %127 : vector<8x8xf32>
      %cst_68 = arith.constant dense<0.000000e+00> : vector<8xf32>
      %129 = vector.multi_reduction <add>, %128, %cst_68 [1] : vector<8x8xf32> to vector<8xf32>
      %130 = vector.shape_cast %129 : vector<8xf32> to vector<8x1xf32>
      %131 = vector.broadcast %130 : vector<8x1xf32> to vector<8x8xf32>
      %132 = arith.divf %128, %131 : vector<8x8xf32>
      %cst_69 = arith.constant dense<0.000000e+00> : vector<8x128xf32>
      %133 = tpu.matmul %132, %119, %cst_69 {dimension_numbers = #tpu.dot_dimension_numbers<[1], [0], [0], [1], [0, 0, 1, 1], [], []>} : vector<8x8xf32>, vector<8x128xf32>, vector<8x128xf32> -> vector<8x128xf32>
      %134 = arith.truncf %133 : vector<8x128xf32> to vector<8x128xbf16>
      %c0_70 = arith.constant 0 : index
      %c640_71 = arith.constant 640 : index
      %135 = vector.load %arg11[%c0_70, %c640_71] : memref<8x1024xbf16, #tpu.memory_space<vmem>>, vector<8x128xbf16>
      tpu.vector_store %arg11[%c0_70, %c640_71], %134 {strides = array<i32>} : memref<8x1024xbf16, #tpu.memory_space<vmem>>, vector<8x128xbf16>,
      %c0_72 = arith.constant 0 : index
      %c768 = arith.constant 768 : index
      %136 = vector.load %arg10[%c0_72, %c768] : memref<8x3072xf32, #tpu.memory_space<vmem>>, vector<8x128xf32>
      %c0_73 = arith.constant 0 : index
      %c1792 = arith.constant 1792 : index
      %137 = vector.load %arg10[%c0_73, %c1792] : memref<8x3072xf32, #tpu.memory_space<vmem>>, vector<8x128xf32>
      %c0_74 = arith.constant 0 : index
      %c2816 = arith.constant 2816 : index
      %138 = vector.load %arg10[%c0_74, %c2816] : memref<8x3072xf32, #tpu.memory_space<vmem>>, vector<8x128xf32>
      %cst_75 = arith.constant dense<0.000000e+00> : vector<8x8xf32>
      %139 = tpu.matmul %136, %137, %cst_75 {dimension_numbers = #tpu.dot_dimension_numbers<[1], [1], [0], [0], [0, 0, 1, 0], [], []>} : vector<8x128xf32>, vector<8x128xf32>, vector<8x8xf32> -> vector<8x8xf32>
      %cst_76 = arith.constant 0.0883883461 : f32
      %140 = vector.broadcast %cst_76 : f32 to vector<8x8xf32>
      %141 = arith.mulf %139, %140 : vector<8x8xf32>
      %142 = arith.addf %141, %21 : vector<8x8xf32>
      %cst_77 = arith.constant dense<0xFF800000> : vector<8xf32>
      %143 = vector.multi_reduction <maximumf>, %142, %cst_77 [1] : vector<8x8xf32> to vector<8xf32>
      %144 = vector.shape_cast %143 : vector<8xf32> to vector<8x1xf32>
      %145 = vector.broadcast %144 : vector<8x1xf32> to vector<8x8xf32>
      %146 = arith.subf %142, %145 : vector<8x8xf32>
      %147 = math.exp %146 : vector<8x8xf32>
      %cst_78 = arith.constant dense<0.000000e+00> : vector<8xf32>
      %148 = vector.multi_reduction <add>, %147, %cst_78 [1] : vector<8x8xf32> to vector<8xf32>
      %149 = vector.shape_cast %148 : vector<8xf32> to vector<8x1xf32>
      %150 = vector.broadcast %149 : vector<8x1xf32> to vector<8x8xf32>
      %151 = arith.divf %147, %150 : vector<8x8xf32>
      %cst_79 = arith.constant dense<0.000000e+00> : vector<8x128xf32>
      %152 = tpu.matmul %151, %138, %cst_79 {dimension_numbers = #tpu.dot_dimension_numbers<[1], [0], [0], [1], [0, 0, 1, 1], [], []>} : vector<8x8xf32>, vector<8x128xf32>, vector<8x128xf32> -> vector<8x128xf32>
      %153 = arith.truncf %152 : vector<8x128xf32> to vector<8x128xbf16>
      %c0_80 = arith.constant 0 : index
      %c768_81 = arith.constant 768 : index
      %154 = vector.load %arg11[%c0_80, %c768_81] : memref<8x1024xbf16, #tpu.memory_space<vmem>>, vector<8x128xbf16>
      tpu.vector_store %arg11[%c0_80, %c768_81], %153 {strides = array<i32>} : memref<8x1024xbf16, #tpu.memory_space<vmem>>, vector<8x128xbf16>,
      %c0_82 = arith.constant 0 : index
      %c896 = arith.constant 896 : index
      %155 = vector.load %arg10[%c0_82, %c896] : memref<8x3072xf32, #tpu.memory_space<vmem>>, vector<8x128xf32>
      %c0_83 = arith.constant 0 : index
      %c1920 = arith.constant 1920 : index
      %156 = vector.load %arg10[%c0_83, %c1920] : memref<8x3072xf32, #tpu.memory_space<vmem>>, vector<8x128xf32>
      %c0_84 = arith.constant 0 : index
      %c2944 = arith.constant 2944 : index
      %157 = vector.load %arg10[%c0_84, %c2944] : memref<8x3072xf32, #tpu.memory_space<vmem>>, vector<8x128xf32>
      %cst_85 = arith.constant dense<0.000000e+00> : vector<8x8xf32>
      %158 = tpu.matmul %155, %156, %cst_85 {dimension_numbers = #tpu.dot_dimension_numbers<[1], [1], [0], [0], [0, 0, 1, 0], [], []>} : vector<8x128xf32>, vector<8x128xf32>, vector<8x8xf32> -> vector<8x8xf32>
      %cst_86 = arith.constant 0.0883883461 : f32
      %159 = vector.broadcast %cst_86 : f32 to vector<8x8xf32>
      %160 = arith.mulf %158, %159 : vector<8x8xf32>
      %161 = arith.addf %160, %21 : vector<8x8xf32>
      %cst_87 = arith.constant dense<0xFF800000> : vector<8xf32>
      %162 = vector.multi_reduction <maximumf>, %161, %cst_87 [1] : vector<8x8xf32> to vector<8xf32>
      %163 = vector.shape_cast %162 : vector<8xf32> to vector<8x1xf32>
      %164 = vector.broadcast %163 : vector<8x1xf32> to vector<8x8xf32>
      %165 = arith.subf %161, %164 : vector<8x8xf32>
      %166 = math.exp %165 : vector<8x8xf32>
      %cst_88 = arith.constant dense<0.000000e+00> : vector<8xf32>
      %167 = vector.multi_reduction <add>, %166, %cst_88 [1] : vector<8x8xf32> to vector<8xf32>
      %168 = vector.shape_cast %167 : vector<8xf32> to vector<8x1xf32>
      %169 = vector.broadcast %168 : vector<8x1xf32> to vector<8x8xf32>
      %170 = arith.divf %166, %169 : vector<8x8xf32>
      %cst_89 = arith.constant dense<0.000000e+00> : vector<8x128xf32>
      %171 = tpu.matmul %170, %157, %cst_89 {dimension_numbers = #tpu.dot_dimension_numbers<[1], [0], [0], [1], [0, 0, 1, 1], [], []>} : vector<8x8xf32>, vector<8x128xf32>, vector<8x128xf32> -> vector<8x128xf32>
      %172 = arith.truncf %171 : vector<8x128xf32> to vector<8x128xbf16>
      %c0_90 = arith.constant 0 : index
      %c896_91 = arith.constant 896 : index
      %173 = vector.load %arg11[%c0_90, %c896_91] : memref<8x1024xbf16, #tpu.memory_space<vmem>>, vector<8x128xbf16>
      tpu.vector_store %arg11[%c0_90, %c896_91], %172 {strides = array<i32>} : memref<8x1024xbf16, #tpu.memory_space<vmem>>, vector<8x128xbf16>,
      %c0_92 = arith.constant 0 : index
      %c0_93 = arith.constant 0 : index
      %174 = vector.load %arg1[%c0_92, %c0_93] : memref<8x1024xf32, #tpu.memory_space<vmem>>, vector<8x1024xf32>
      %c0_94 = arith.constant 0 : index
      %c0_95 = arith.constant 0 : index
      %175 = vector.load %arg7[%c0_94, %c0_95] : memref<1x1024xf32, #tpu.memory_space<vmem>>, vector<1x1024xf32>
      %176 = vector.broadcast %175 : vector<1x1024xf32> to vector<8x1024xf32>
      %177 = arith.addf %174, %176 : vector<8x1024xf32>
      %c0_96 = arith.constant 0 : index
      %c0_97 = arith.constant 0 : index
      %178 = vector.load %arg11[%c0_96, %c0_97] : memref<8x1024xbf16, #tpu.memory_space<vmem>>, vector<8x1024xbf16>
      %c0_98 = arith.constant 0 : index
      %c0_99 = arith.constant 0 : index
      %179 = vector.load %arg6[%c0_98, %c0_99] : memref<1024x1024xbf16, #tpu.memory_space<vmem>>, vector<1024x1024xbf16>
      %cst_100 = arith.constant dense<0.000000e+00> : vector<8x1024xf32>
      %180 = tpu.matmul %178, %179, %cst_100 {dimension_numbers = #tpu.dot_dimension_numbers<[1], [0], [0], [1], [0, 0, 1, 1], [], []>} : vector<8x1024xbf16>, vector<1024x1024xbf16>, vector<8x1024xf32> -> vector<8x1024xf32>
      %181 = arith.addf %177, %180 : vector<8x1024xf32>
      %c0_101 = arith.constant 0 : index
      %c0_102 = arith.constant 0 : index
      %182 = vector.load %arg8[%c0_101, %c0_102] : memref<8x1024xf32, #tpu.memory_space<vmem>>, vector<8x1024xf32>
      tpu.vector_store %arg8[%c0_101, %c0_102], %181 {strides = array<i32>} : memref<8x1024xf32, #tpu.memory_space<vmem>>, vector<8x1024xf32>,
    } else {
    }
    return
  }
  func.func @transform_0(%arg0: i32) -> (i32, i32) {
    %c0_i32 = arith.constant 0 : i32
    %c0_i32_0 = arith.constant 0 : i32
    %c0_i32_1 = arith.constant 0 : i32
    return %c0_i32, %c0_i32_0 : i32, i32
  }
  func.func @transform_1(%arg0: i32) -> (i32, i32) {
    %c0_i32 = arith.constant 0 : i32
    %c0_i32_0 = arith.constant 0 : i32
    %c0_i32_1 = arith.constant 0 : i32
    return %c0_i32, %c0_i32_0 : i32, i32
  }
  func.func @transform_2(%arg0: i32) -> (i32, i32) {
    %c0_i32 = arith.constant 0 : i32
    %c0_i32_0 = arith.constant 0 : i32
    %c0_i32_1 = arith.constant 0 : i32
    return %c0_i32, %c0_i32_0 : i32, i32
  }
  func.func @transform_3(%arg0: i32) -> (i32, i32) {
    %c0_i32 = arith.constant 0 : i32
    %c0_i32_0 = arith.constant 0 : i32
    return %c0_i32, %arg0 : i32, i32
  }
  func.func @transform_4(%arg0: i32) -> (i32, i32) {
    %c0_i32 = arith.constant 0 : i32
    %c0_i32_0 = arith.constant 0 : i32
    return %c0_i32, %arg0 : i32, i32
  }
  func.func @transform_5(%arg0: i32) -> (i32, i32) {
    %c0_i32 = arith.constant 0 : i32
    %c0_i32_0 = arith.constant 0 : i32
    %c0_i32_1 = arith.constant 0 : i32
    return %c0_i32, %c0_i32_0 : i32, i32
  }
  func.func @transform_6(%arg0: i32) -> (i32, i32) {
    %c0_i32 = arith.constant 0 : i32
    %c0_i32_0 = arith.constant 0 : i32
    %c0_i32_1 = arith.constant 0 : i32
    return %c0_i32, %c0_i32_0 : i32, i32
  }
  func.func @transform_7(%arg0: i32) -> (i32, i32) {
    %c0_i32 = arith.constant 0 : i32
    %c0_i32_0 = arith.constant 0 : i32
    %c0_i32_1 = arith.constant 0 : i32
    return %c0_i32, %c0_i32_0 : i32, i32
  }
}

module attributes {stable_mosaic.version = 11 : i64} {
  func.func @_ln_mlp_kernel(%arg0: i32, %arg1: memref<8x1024xf32, #tpu.memory_space<vmem>>, %arg2: memref<1x1024xf32, #tpu.memory_space<vmem>>, %arg3: memref<1x1024xf32, #tpu.memory_space<vmem>>, %arg4: memref<1024x512xbf16, #tpu.memory_space<vmem>>, %arg5: memref<1x512xf32, #tpu.memory_space<vmem>>, %arg6: memref<512x1024xbf16, #tpu.memory_space<vmem>>, %arg7: memref<1x1024xf32, #tpu.memory_space<vmem>>, %arg8: memref<8x1024xf32, #tpu.memory_space<vmem>>, %arg9: memref<8x1024xbf16, #tpu.memory_space<vmem>>, %arg10: memref<8x1024xf32, #tpu.memory_space<vmem>>) attributes {dimension_semantics = [#tpu.dimension_semantics<arbitrary>], iteration_bounds = array<i64: 8>, scalar_prefetch = 0 : i64, scratch_operands = 2 : i64, tpu.core_type = #tpu.core_type<tc>, window_params = [{pipeline_mode = #tpu.pipeline_mode<synchronous>, transform_indices = @transform_0, window_bounds = array<i64: 8, 1024>}, {pipeline_mode = #tpu.pipeline_mode<synchronous>, transform_indices = @transform_1, window_bounds = array<i64: 1, 1024>}, {pipeline_mode = #tpu.pipeline_mode<synchronous>, transform_indices = @transform_2, window_bounds = array<i64: 1, 1024>}, {transform_indices = @transform_3, window_bounds = array<i64: 1024, 512>}, {transform_indices = @transform_4, window_bounds = array<i64: 1, 512>}, {transform_indices = @transform_5, window_bounds = array<i64: 512, 1024>}, {pipeline_mode = #tpu.pipeline_mode<synchronous>, transform_indices = @transform_6, window_bounds = array<i64: 1, 1024>}, {pipeline_mode = #tpu.pipeline_mode<synchronous>, transform_indices = @transform_7, window_bounds = array<i64: 8, 1024>}]} {
    %c0_i32 = arith.constant 0 : i32
    %0 = arith.cmpi eq, %arg0, %c0_i32 : i32
    %1 = arith.extui %0 : i1 to i32
    %c0_i32_0 = arith.constant 0 : i32
    %2 = arith.cmpi ne, %1, %c0_i32_0 : i32
    scf.if %2 {
      %c0_18 = arith.constant 0 : index
      %c0_19 = arith.constant 0 : index
      %31 = vector.load %arg1[%c0_18, %c0_19] : memref<8x1024xf32, #tpu.memory_space<vmem>>, vector<8x1024xf32>
      %c0_20 = arith.constant 0 : index
      %c0_21 = arith.constant 0 : index
      %32 = vector.load %arg2[%c0_20, %c0_21] : memref<1x1024xf32, #tpu.memory_space<vmem>>, vector<1x1024xf32>
      %c0_22 = arith.constant 0 : index
      %c0_23 = arith.constant 0 : index
      %33 = vector.load %arg3[%c0_22, %c0_23] : memref<1x1024xf32, #tpu.memory_space<vmem>>, vector<1x1024xf32>
      %cst_24 = arith.constant dense<0.000000e+00> : vector<8xf32>
      %34 = vector.multi_reduction <add>, %31, %cst_24 [1] : vector<8x1024xf32> to vector<8xf32>
      %35 = vector.shape_cast %34 : vector<8xf32> to vector<8x1xf32>
      %cst_25 = arith.constant 1.024000e+03 : f32
      %36 = vector.broadcast %cst_25 : f32 to vector<8x1xf32>
      %37 = arith.divf %35, %36 : vector<8x1xf32>
      %38 = vector.broadcast %37 : vector<8x1xf32> to vector<8x1024xf32>
      %39 = arith.subf %31, %38 : vector<8x1024xf32>
      %40 = arith.mulf %39, %39 : vector<8x1024xf32>
      %cst_26 = arith.constant dense<0.000000e+00> : vector<8xf32>
      %41 = vector.multi_reduction <add>, %40, %cst_26 [1] : vector<8x1024xf32> to vector<8xf32>
      %42 = vector.shape_cast %41 : vector<8xf32> to vector<8x1xf32>
      %cst_27 = arith.constant 1.024000e+03 : f32
      %43 = vector.broadcast %cst_27 : f32 to vector<8x1xf32>
      %44 = arith.divf %42, %43 : vector<8x1xf32>
      %cst_28 = arith.constant 9.99999997E-7 : f32
      %45 = vector.broadcast %cst_28 : f32 to vector<8x1xf32>
      %46 = arith.addf %44, %45 : vector<8x1xf32>
      %47 = math.rsqrt %46 : vector<8x1xf32>
      %48 = vector.broadcast %47 : vector<8x1xf32> to vector<8x1024xf32>
      %49 = arith.mulf %39, %48 : vector<8x1024xf32>
      %50 = vector.broadcast %32 : vector<1x1024xf32> to vector<8x1024xf32>
      %51 = arith.mulf %49, %50 : vector<8x1024xf32>
      %52 = vector.broadcast %33 : vector<1x1024xf32> to vector<8x1024xf32>
      %53 = arith.addf %51, %52 : vector<8x1024xf32>
      %54 = arith.truncf %53 : vector<8x1024xf32> to vector<8x1024xbf16>
      %c0_29 = arith.constant 0 : index
      %c0_30 = arith.constant 0 : index
      %55 = vector.load %arg9[%c0_29, %c0_30] : memref<8x1024xbf16, #tpu.memory_space<vmem>>, vector<8x1024xbf16>
      tpu.vector_store %arg9[%c0_29, %c0_30], %54 {strides = array<i32>} : memref<8x1024xbf16, #tpu.memory_space<vmem>>, vector<8x1024xbf16>,
      %cst_31 = arith.constant 0.000000e+00 : f32
      %56 = vector.broadcast %cst_31 : f32 to vector<8x1024xf32>
      %c0_32 = arith.constant 0 : index
      %c0_33 = arith.constant 0 : index
      %57 = vector.load %arg10[%c0_32, %c0_33] : memref<8x1024xf32, #tpu.memory_space<vmem>>, vector<8x1024xf32>
      tpu.vector_store %arg10[%c0_32, %c0_33], %56 {strides = array<i32>} : memref<8x1024xf32, #tpu.memory_space<vmem>>, vector<8x1024xf32>,
    } else {
    }
    %c0 = arith.constant 0 : index
    %c0_1 = arith.constant 0 : index
    %3 = vector.load %arg9[%c0, %c0_1] : memref<8x1024xbf16, #tpu.memory_space<vmem>>, vector<8x1024xbf16>
    %c0_2 = arith.constant 0 : index
    %c0_3 = arith.constant 0 : index
    %4 = vector.load %arg4[%c0_2, %c0_3] : memref<1024x512xbf16, #tpu.memory_space<vmem>>, vector<1024x512xbf16>
    %cst = arith.constant dense<0.000000e+00> : vector<8x512xf32>
    %5 = tpu.matmul %3, %4, %cst {dimension_numbers = #tpu.dot_dimension_numbers<[1], [0], [0], [1], [0, 0, 1, 1], [], []>} : vector<8x1024xbf16>, vector<1024x512xbf16>, vector<8x512xf32> -> vector<8x512xf32>
    %c0_4 = arith.constant 0 : index
    %c0_5 = arith.constant 0 : index
    %6 = vector.load %arg5[%c0_4, %c0_5] : memref<1x512xf32, #tpu.memory_space<vmem>>, vector<1x512xf32>
    %7 = vector.broadcast %6 : vector<1x512xf32> to vector<8x512xf32>
    %8 = arith.addf %5, %7 : vector<8x512xf32>
    %9 = arith.mulf %8, %8 : vector<8x512xf32>
    %10 = arith.mulf %8, %9 : vector<8x512xf32>
    %cst_6 = arith.constant 4.471500e-02 : f32
    %11 = vector.broadcast %cst_6 : f32 to vector<8x512xf32>
    %12 = arith.mulf %11, %10 : vector<8x512xf32>
    %13 = arith.addf %8, %12 : vector<8x512xf32>
    %cst_7 = arith.constant 0.797884583 : f32
    %14 = vector.broadcast %cst_7 : f32 to vector<8x512xf32>
    %15 = arith.mulf %14, %13 : vector<8x512xf32>
    %16 = math.tanh %15 : vector<8x512xf32>
    %cst_8 = arith.constant 1.000000e+00 : f32
    %17 = vector.broadcast %cst_8 : f32 to vector<8x512xf32>
    %18 = arith.addf %17, %16 : vector<8x512xf32>
    %cst_9 = arith.constant 5.000000e-01 : f32
    %19 = vector.broadcast %cst_9 : f32 to vector<8x512xf32>
    %20 = arith.mulf %19, %18 : vector<8x512xf32>
    %21 = arith.mulf %8, %20 : vector<8x512xf32>
    %c0_10 = arith.constant 0 : index
    %c0_11 = arith.constant 0 : index
    %22 = vector.load %arg10[%c0_10, %c0_11] : memref<8x1024xf32, #tpu.memory_space<vmem>>, vector<8x1024xf32>
    %23 = arith.truncf %21 : vector<8x512xf32> to vector<8x512xbf16>
    %c0_12 = arith.constant 0 : index
    %c0_13 = arith.constant 0 : index
    %24 = vector.load %arg6[%c0_12, %c0_13] : memref<512x1024xbf16, #tpu.memory_space<vmem>>, vector<512x1024xbf16>
    %cst_14 = arith.constant dense<0.000000e+00> : vector<8x1024xf32>
    %25 = tpu.matmul %23, %24, %cst_14 {dimension_numbers = #tpu.dot_dimension_numbers<[1], [0], [0], [1], [0, 0, 1, 1], [], []>} : vector<8x512xbf16>, vector<512x1024xbf16>, vector<8x1024xf32> -> vector<8x1024xf32>
    %26 = arith.addf %22, %25 : vector<8x1024xf32>
    %c0_15 = arith.constant 0 : index
    %c0_16 = arith.constant 0 : index
    %27 = vector.load %arg10[%c0_15, %c0_16] : memref<8x1024xf32, #tpu.memory_space<vmem>>, vector<8x1024xf32>
    tpu.vector_store %arg10[%c0_15, %c0_16], %26 {strides = array<i32>} : memref<8x1024xf32, #tpu.memory_space<vmem>>, vector<8x1024xf32>,
    %c7_i32 = arith.constant 7 : i32
    %28 = arith.cmpi eq, %arg0, %c7_i32 : i32
    %29 = arith.extui %28 : i1 to i32
    %c0_i32_17 = arith.constant 0 : i32
    %30 = arith.cmpi ne, %29, %c0_i32_17 : i32
    scf.if %30 {
      %c0_18 = arith.constant 0 : index
      %c0_19 = arith.constant 0 : index
      %31 = vector.load %arg10[%c0_18, %c0_19] : memref<8x1024xf32, #tpu.memory_space<vmem>>, vector<8x1024xf32>
      %c0_20 = arith.constant 0 : index
      %c0_21 = arith.constant 0 : index
      %32 = vector.load %arg1[%c0_20, %c0_21] : memref<8x1024xf32, #tpu.memory_space<vmem>>, vector<8x1024xf32>
      %33 = arith.addf %31, %32 : vector<8x1024xf32>
      %c0_22 = arith.constant 0 : index
      %c0_23 = arith.constant 0 : index
      %34 = vector.load %arg7[%c0_22, %c0_23] : memref<1x1024xf32, #tpu.memory_space<vmem>>, vector<1x1024xf32>
      %35 = vector.broadcast %34 : vector<1x1024xf32> to vector<8x1024xf32>
      %36 = arith.addf %33, %35 : vector<8x1024xf32>
      %c0_24 = arith.constant 0 : index
      %c0_25 = arith.constant 0 : index
      %37 = vector.load %arg8[%c0_24, %c0_25] : memref<8x1024xf32, #tpu.memory_space<vmem>>, vector<8x1024xf32>
      tpu.vector_store %arg8[%c0_24, %c0_25], %36 {strides = array<i32>} : memref<8x1024xf32, #tpu.memory_space<vmem>>, vector<8x1024xf32>,
    } else {
    }
    return
  }
  func.func @transform_0(%arg0: i32) -> (i32, i32) {
    %c0_i32 = arith.constant 0 : i32
    %c0_i32_0 = arith.constant 0 : i32
    %c0_i32_1 = arith.constant 0 : i32
    return %c0_i32, %c0_i32_0 : i32, i32
  }
  func.func @transform_1(%arg0: i32) -> (i32, i32) {
    %c0_i32 = arith.constant 0 : i32
    %c0_i32_0 = arith.constant 0 : i32
    %c0_i32_1 = arith.constant 0 : i32
    return %c0_i32, %c0_i32_0 : i32, i32
  }
  func.func @transform_2(%arg0: i32) -> (i32, i32) {
    %c0_i32 = arith.constant 0 : i32
    %c0_i32_0 = arith.constant 0 : i32
    %c0_i32_1 = arith.constant 0 : i32
    return %c0_i32, %c0_i32_0 : i32, i32
  }
  func.func @transform_3(%arg0: i32) -> (i32, i32) {
    %c0_i32 = arith.constant 0 : i32
    %c0_i32_0 = arith.constant 0 : i32
    return %c0_i32, %arg0 : i32, i32
  }
  func.func @transform_4(%arg0: i32) -> (i32, i32) {
    %c0_i32 = arith.constant 0 : i32
    %c0_i32_0 = arith.constant 0 : i32
    return %c0_i32, %arg0 : i32, i32
  }
  func.func @transform_5(%arg0: i32) -> (i32, i32) {
    %c0_i32 = arith.constant 0 : i32
    %c0_i32_0 = arith.constant 0 : i32
    return %arg0, %c0_i32 : i32, i32
  }
  func.func @transform_6(%arg0: i32) -> (i32, i32) {
    %c0_i32 = arith.constant 0 : i32
    %c0_i32_0 = arith.constant 0 : i32
    %c0_i32_1 = arith.constant 0 : i32
    return %c0_i32, %c0_i32_0 : i32, i32
  }
  func.func @transform_7(%arg0: i32) -> (i32, i32) {
    %c0_i32 = arith.constant 0 : i32
    %c0_i32_0 = arith.constant 0 : i32
    %c0_i32_1 = arith.constant 0 : i32
    return %c0_i32, %c0_i32_0 : i32, i32
  }
}

</mosaic_0001>

<bundles_post_ra>
// kernel: _lambda_.3
= control target key start
LH: loop header
LB: loop body
LE: loop exit
PB: predicated region body
PF: predicated region fallthrough
CT: control target
= control target key end

     0   :  { %s2769_s15 = smov 0   ;;  %s2771_s16 = smov 0   ;;  %s3443_s0 = inlined_call_operand.vmem [shape: f32[8,768], index: 0, kind: input, shape index: {}]   ;;  %s3444_s1 = inlined_call_operand.vmem [shape: bf16[768,1024], index: 1, kind: input, shape index: {}]   ;;  %s3445_s2 = inlined_call_operand.vmem [shape: f32[1,1024], index: 2, kind: input, shape index: {}]   ;;  %s3446_s3 = inlined_call_operand.vmem [shape: f32[8,1024], index: 3, kind: input, shape index: {}]   ;;  %s3447_s4 = inlined_call_operand.vmem [shape: f32[8,1024], index: 4, kind: output, shape index: {}]  }
   0x1   :  { %s2773_s17 = smov 0  }
   0x2 LB: > { %s2179_s18 = sadd.s32 4294967295, %s2742_s17   ;;  %s2786_s19 = sadd.s32 1, %s2742_s17   ;;  %s2742_s17 = sphi %s2773_s17, %s3452_s17   ;;  %s2738_s16 = sphi %s2771_s16, %s3451_s16   ;;  %s2734_s15 = sphi %s2769_s15, %s3450_s15  }
   0x3   : > { %s39_s20 = ssub.s32 %s2742_s17, %s2786_s19  ;;  %s42_s21 = sadd.s32 1, %s2738_s16 }
   0x4   : > { %p40_p0 = scmp.eq.s32.totalorder %s39_s20, 0  ;;  %p49_p1 = scmp.ne.s32.totalorder %s2738_s16, %s2734_s15 }
   0x5   : > { %p50_p2 = scmp.eq.s32.totalorder %s2742_s17, 0  ;;  %p2182_p4 = scmp.ge.s32.totalorder %s2742_s17, 2 }
   0x6   : > { %s2795_s22 = scalar_select %p40_p0, %s2738_s16, %s42_s21  }
   0x7   : > { %p51_p3 = por %p50_p2, %p49_p1  ;;  %156 = sbr.rel (%p2182_p4) target bundleno = 114 (0x72), region = 20 }
   0xe   : > { %159 = sbr.rel (!%p51_p3) target bundleno = 114 (0x72), region = 24  ;;  %s161_s23 = sand.u32 (%p51_p3), 1, %s2738_s16  }
   0xf   : > { %s2385_s24 = sshll.u32 (%p51_p3), %s2742_s17, 4  ;;  %s2406_s25 = smul.u32 (%p51_p3), 1536, %s161_s23 }
  0x10   : > { %s2803_s28 = scalar_lea.vmem (%p51_p3), %s3444_s1, %s2385_s24 }
  0x11   : > { %v179_v0 = vld [vmem:[%s2803_s28] sm:$0xff] (%p51_p3)  ;;  %v181_v1 = vld [vmem:[%s2803_s28 + $0x8] sm:$0xff] (%p51_p3)  ;;  %s2811_s29 = scalar_lea.vmem (%p51_p3), [#allocation2], %s2406_s25 }
  0x12   : > { %v183_v2 = vld [vmem:[%s2803_s28 + $0x20] sm:$0xff] (%p51_p3)  ;;  %v185_v3 = vld [vmem:[%s2803_s28 + $0x28] sm:$0xff] (%p51_p3)  ;;  %180 = vst [vmem:[%s2811_s29] sm:$0xff] (%p51_p3), %v179_v0  ;;  %182 = vst [vmem:[%s2811_s29 + $0x8] sm:$0xff] (%p51_p3), %v181_v1 }
  0x13   : > { %v187_v4 = vld [vmem:[%s2803_s28 + $0x40] sm:$0xff] (%p51_p3)  ;;  %v189_v5 = vld [vmem:[%s2803_s28 + $0x48] sm:$0xff] (%p51_p3)  ;;  %184 = vst [vmem:[%s2811_s29 + $0x10] sm:$0xff] (%p51_p3), %v183_v2  ;;  %186 = vst [vmem:[%s2811_s29 + $0x18] sm:$0xff] (%p51_p3), %v185_v3 }
  0x14   : > { %188 = vst [vmem:[%s2811_s29 + $0x20] sm:$0xff] (%p51_p3), %v187_v4  ;;  %190 = vst [vmem:[%s2811_s29 + $0x28] sm:$0xff] (%p51_p3), %v189_v5  ;;  %v191_v6 = vld [vmem:[%s2803_s28 + $0x60] sm:$0xff] (%p51_p3)  ;;  %v193_v7 = vld [vmem:[%s2803_s28 + $0x68] sm:$0xff] (%p51_p3) }
  0x15   : > { %v195_v8 = vld [vmem:[%s2803_s28 + $0x80] sm:$0xff]  ;;  %192 = vst [vmem:[%s2811_s29 + $0x30] sm:$0xff] %v191_v6  ;;  %194 = vst [vmem:[%s2811_s29 + $0x38] sm:$0xff] %v193_v7  ;;  %v197_v9 = vld [vmem:[%s2803_s28 + $0x88] sm:$0xff] }
  0x16   : > { %196 = vst [vmem:[%s2811_s29 + $0x40] sm:$0xff] %v195_v8  ;;  %v199_v10 = vld [vmem:[%s2803_s28 + $0xa0] sm:$0xff]  ;;  %v201_v11 = vld [vmem:[%s2803_s28 + $0xa8] sm:$0xff]  ;;  %198 = vst [vmem:[%s2811_s29 + $0x48] sm:$0xff] %v197_v9 }
  0x17   : > { %200 = vst [vmem:[%s2811_s29 + $0x50] sm:$0xff] %v199_v10  ;;  %202 = vst [vmem:[%s2811_s29 + $0x58] sm:$0xff] %v201_v11  ;;  %v203_v12 = vld [vmem:[%s2803_s28 + $0xc0] sm:$0xff]  ;;  %v205_v13 = vld [vmem:[%s2803_s28 + $0xc8] sm:$0xff] }
  0x18   : > { %v207_v14 = vld [vmem:[%s2803_s28 + $0xe0] sm:$0xff]  ;;  %204 = vst [vmem:[%s2811_s29 + $0x60] sm:$0xff] %v203_v12  ;;  %206 = vst [vmem:[%s2811_s29 + $0x68] sm:$0xff] %v205_v13  ;;  %v209_v15 = vld [vmem:[%s2803_s28 + $0xe8] sm:$0xff] }
  0x19   : > { %208 = vst [vmem:[%s2811_s29 + $0x70] sm:$0xff] %v207_v14  ;;  %v211_v16 = vld [vmem:[%s2803_s28 + $0x100] sm:$0xff]  ;;  %v213_v17 = vld [vmem:[%s2803_s28 + $0x108] sm:$0xff]  ;;  %210 = vst [vmem:[%s2811_s29 + $0x78] sm:$0xff] %v209_v15 }
  0x1a   : > { %212 = vst [vmem:[%s2811_s29 + $0x80] sm:$0xff] %v211_v16  ;;  %214 = vst [vmem:[%s2811_s29 + $0x88] sm:$0xff] %v213_v17  ;;  %v215_v18 = vld [vmem:[%s2803_s28 + $0x120] sm:$0xff]  ;;  %v217_v19 = vld [vmem:[%s2803_s28 + $0x128] sm:$0xff] }
  0x1b   : > { %v219_v20 = vld [vmem:[%s2803_s28 + $0x140] sm:$0xff]  ;;  %216 = vst [vmem:[%s2811_s29 + $0x90] sm:$0xff] %v215_v18  ;;  %218 = vst [vmem:[%s2811_s29 + $0x98] sm:$0xff] %v217_v19  ;;  %v221_v21 = vld [vmem:[%s2803_s28 + $0x148] sm:$0xff] }
  0x1c   : > { %220 = vst [vmem:[%s2811_s29 + $0xa0] sm:$0xff] %v219_v20  ;;  %v223_v22 = vld [vmem:[%s2803_s28 + $0x160] sm:$0xff]  ;;  %v225_v23 = vld [vmem:[%s2803_s28 + $0x168] sm:$0xff]  ;;  %222 = vst [vmem:[%s2811_s29 + $0xa8] sm:$0xff] %v221_v21 }
  0x1d   : > { %224 = vst [vmem:[%s2811_s29 + $0xb0] sm:$0xff] %v223_v22  ;;  %226 = vst [vmem:[%s2811_s29 + $0xb8] sm:$0xff] %v225_v23  ;;  %v227_v24 = vld [vmem:[%s2803_s28 + $0x180] sm:$0xff]  ;;  %v229_v25 = vld [vmem:[%s2803_s28 + $0x188] sm:$0xff] }
  0x1e   : > { %v231_v26 = vld [vmem:[%s2803_s28 + $0x1a0] sm:$0xff]  ;;  %228 = vst [vmem:[%s2811_s29 + $0xc0] sm:$0xff] %v227_v24  ;;  %230 = vst [vmem:[%s2811_s29 + $0xc8] sm:$0xff] %v229_v25  ;;  %v233_v27 = vld [vmem:[%s2803_s28 + $0x1a8] sm:$0xff] }
  0x1f   : > { %232 = vst [vmem:[%s2811_s29 + $0xd0] sm:$0xff] %v231_v26  ;;  %v235_v28 = vld [vmem:[%s2803_s28 + $0x1c0] sm:$0xff]  ;;  %v237_v29 = vld [vmem:[%s2803_s28 + $0x1c8] sm:$0xff]  ;;  %234 = vst [vmem:[%s2811_s29 + $0xd8] sm:$0xff] %v233_v27 }
  0x20   : > { %236 = vst [vmem:[%s2811_s29 + $0xe0] sm:$0xff] %v235_v28  ;;  %238 = vst [vmem:[%s2811_s29 + $0xe8] sm:$0xff] %v237_v29  ;;  %v239_v30 = vld [vmem:[%s2803_s28 + $0x1e0] sm:$0xff]  ;;  %v241_v31 = vld [vmem:[%s2803_s28 + $0x1e8] sm:$0xff] }
  0x21   : > { %v243_v32 = vld [vmem:[%s2803_s28 + $0x200] sm:$0xff]  ;;  %240 = vst [vmem:[%s2811_s29 + $0xf0] sm:$0xff] %v239_v30  ;;  %242 = vst [vmem:[%s2811_s29 + $0xf8] sm:$0xff] %v241_v31  ;;  %v245_v33 = vld [vmem:[%s2803_s28 + $0x208] sm:$0xff] }
  0x22   : > { %244 = vst [vmem:[%s2811_s29 + $0x100] sm:$0xff] %v243_v32  ;;  %v247_v34 = vld [vmem:[%s2803_s28 + $0x220] sm:$0xff]  ;;  %v249_v35 = vld [vmem:[%s2803_s28 + $0x228] sm:$0xff]  ;;  %246 = vst [vmem:[%s2811_s29 + $0x108] sm:$0xff] %v245_v33 }
  0x23   : > { %248 = vst [vmem:[%s2811_s29 + $0x110] sm:$0xff] %v247_v34  ;;  %250 = vst [vmem:[%s2811_s29 + $0x118] sm:$0xff] %v249_v35  ;;  %v251_v36 = vld [vmem:[%s2803_s28 + $0x240] sm:$0xff]  ;;  %v253_v37 = vld [vmem:[%s2803_s28 + $0x248] sm:$0xff] }
  0x24   : > { %v255_v38 = vld [vmem:[%s2803_s28 + $0x260] sm:$0xff]  ;;  %252 = vst [vmem:[%s2811_s29 + $0x120] sm:$0xff] %v251_v36  ;;  %254 = vst [vmem:[%s2811_s29 + $0x128] sm:$0xff] %v253_v37  ;;  %v257_v39 = vld [vmem:[%s2803_s28 + $0x268] sm:$0xff] }
  0x25   : > { %256 = vst [vmem:[%s2811_s29 + $0x130] sm:$0xff] %v255_v38  ;;  %v259_v40 = vld [vmem:[%s2803_s28 + $0x280] sm:$0xff]  ;;  %v261_v41 = vld [vmem:[%s2803_s28 + $0x288] sm:$0xff]  ;;  %258 = vst [vmem:[%s2811_s29 + $0x138] sm:$0xff] %v257_v39 }
  0x26   : > { %260 = vst [vmem:[%s2811_s29 + $0x140] sm:$0xff] %v259_v40  ;;  %262 = vst [vmem:[%s2811_s29 + $0x148] sm:$0xff] %v261_v41  ;;  %v263_v42 = vld [vmem:[%s2803_s28 + $0x2a0] sm:$0xff]  ;;  %v265_v43 = vld [vmem:[%s2803_s28 + $0x2a8] sm:$0xff] }
  0x27   : > { %v267_v44 = vld [vmem:[%s2803_s28 + $0x2c0] sm:$0xff]  ;;  %264 = vst [vmem:[%s2811_s29 + $0x150] sm:$0xff] %v263_v42  ;;  %266 = vst [vmem:[%s2811_s29 + $0x158] sm:$0xff] %v265_v43  ;;  %v269_v45 = vld [vmem:[%s2803_s28 + $0x2c8] sm:$0xff] }
  0x28   : > { %268 = vst [vmem:[%s2811_s29 + $0x160] sm:$0xff] %v267_v44  ;;  %v271_v46 = vld [vmem:[%s2803_s28 + $0x2e0] sm:$0xff]  ;;  %v273_v47 = vld [vmem:[%s2803_s28 + $0x2e8] sm:$0xff]  ;;  %270 = vst [vmem:[%s2811_s29 + $0x168] sm:$0xff] %v269_v45 }
  0x29   : > { %272 = vst [vmem:[%s2811_s29 + $0x170] sm:$0xff] %v271_v46  ;;  %274 = vst [vmem:[%s2811_s29 + $0x178] sm:$0xff] %v273_v47  ;;  %v275_v48 = vld [vmem:[%s2803_s28 + $0x300] sm:$0xff]  ;;  %v277_v49 = vld [vmem:[%s2803_s28 + $0x308] sm:$0xff] }
  0x2a   : > { %v279_v50 = vld [vmem:[%s2803_s28 + $0x320] sm:$0xff]  ;;  %276 = vst [vmem:[%s2811_s29 + $0x180] sm:$0xff] %v275_v48  ;;  %278 = vst [vmem:[%s2811_s29 + $0x188] sm:$0xff] %v277_v49  ;;  %v281_v51 = vld [vmem:[%s2803_s28 + $0x328] sm:$0xff] }
  0x2b   : > { %280 = vst [vmem:[%s2811_s29 + $0x190] sm:$0xff] %v279_v50  ;;  %v283_v52 = vld [vmem:[%s2803_s28 + $0x340] sm:$0xff]  ;;  %v285_v53 = vld [vmem:[%s2803_s28 + $0x348] sm:$0xff]  ;;  %282 = vst [vmem:[%s2811_s29 + $0x198] sm:$0xff] %v281_v51 }
  0x2c   : > { %284 = vst [vmem:[%s2811_s29 + $0x1a0] sm:$0xff] %v283_v52  ;;  %286 = vst [vmem:[%s2811_s29 + $0x1a8] sm:$0xff] %v285_v53  ;;  %v287_v54 = vld [vmem:[%s2803_s28 + $0x360] sm:$0xff]  ;;  %v289_v55 = vld [vmem:[%s2803_s28 + $0x368] sm:$0xff] }
  0x2d   : > { %v291_v56 = vld [vmem:[%s2803_s28 + $0x380] sm:$0xff]  ;;  %288 = vst [vmem:[%s2811_s29 + $0x1b0] sm:$0xff] %v287_v54  ;;  %290 = vst [vmem:[%s2811_s29 + $0x1b8] sm:$0xff] %v289_v55  ;;  %v293_v57 = vld [vmem:[%s2803_s28 + $0x388] sm:$0xff] }
  0x2e   : > { %292 = vst [vmem:[%s2811_s29 + $0x1c0] sm:$0xff] %v291_v56  ;;  %v295_v58 = vld [vmem:[%s2803_s28 + $0x3a0] sm:$0xff]  ;;  %v297_v59 = vld [vmem:[%s2803_s28 + $0x3a8] sm:$0xff]  ;;  %294 = vst [vmem:[%s2811_s29 + $0x1c8] sm:$0xff] %v293_v57 }
  0x2f   : > { %296 = vst [vmem:[%s2811_s29 + $0x1d0] sm:$0xff] %v295_v58  ;;  %298 = vst [vmem:[%s2811_s29 + $0x1d8] sm:$0xff] %v297_v59  ;;  %v299_v60 = vld [vmem:[%s2803_s28 + $0x3c0] sm:$0xff]  ;;  %v301_v61 = vld [vmem:[%s2803_s28 + $0x3c8] sm:$0xff] }
  0x30   : > { %v303_v62 = vld [vmem:[%s2803_s28 + $0x3e0] sm:$0xff]  ;;  %300 = vst [vmem:[%s2811_s29 + $0x1e0] sm:$0xff] %v299_v60  ;;  %302 = vst [vmem:[%s2811_s29 + $0x1e8] sm:$0xff] %v301_v61  ;;  %v305_v63 = vld [vmem:[%s2803_s28 + $0x3e8] sm:$0xff] }
  0x31   : > { %304 = vst [vmem:[%s2811_s29 + $0x1f0] sm:$0xff] %v303_v62  ;;  %v307_v0 = vld [vmem:[%s2803_s28 + $0x400] sm:$0xff]  ;;  %v309_v1 = vld [vmem:[%s2803_s28 + $0x408] sm:$0xff]  ;;  %306 = vst [vmem:[%s2811_s29 + $0x1f8] sm:$0xff] %v305_v63 }
  0x32   : > { %308 = vst [vmem:[%s2811_s29 + $0x200] sm:$0xff] %v307_v0  ;;  %310 = vst [vmem:[%s2811_s29 + $0x208] sm:$0xff] %v309_v1  ;;  %v311_v2 = vld [vmem:[%s2803_s28 + $0x420] sm:$0xff]  ;;  %v313_v3 = vld [vmem:[%s2803_s28 + $0x428] sm:$0xff] }
  0x33   : > { %v315_v4 = vld [vmem:[%s2803_s28 + $0x440] sm:$0xff]  ;;  %312 = vst [vmem:[%s2811_s29 + $0x210] sm:$0xff] %v311_v2  ;;  %314 = vst [vmem:[%s2811_s29 + $0x218] sm:$0xff] %v313_v3  ;;  %v317_v5 = vld [vmem:[%s2803_s28 + $0x448] sm:$0xff] }
  0x34   : > { %316 = vst [vmem:[%s2811_s29 + $0x220] sm:$0xff] %v315_v4  ;;  %v319_v6 = vld [vmem:[%s2803_s28 + $0x460] sm:$0xff]  ;;  %v321_v7 = vld [vmem:[%s2803_s28 + $0x468] sm:$0xff]  ;;  %318 = vst [vmem:[%s2811_s29 + $0x228] sm:$0xff] %v317_v5 }
  0x35   : > { %320 = vst [vmem:[%s2811_s29 + $0x230] sm:$0xff] %v319_v6  ;;  %322 = vst [vmem:[%s2811_s29 + $0x238] sm:$0xff] %v321_v7  ;;  %v323_v8 = vld [vmem:[%s2803_s28 + $0x480] sm:$0xff]  ;;  %v325_v9 = vld [vmem:[%s2803_s28 + $0x488] sm:$0xff] }
  0x36   : > { %v327_v10 = vld [vmem:[%s2803_s28 + $0x4a0] sm:$0xff]  ;;  %324 = vst [vmem:[%s2811_s29 + $0x240] sm:$0xff] %v323_v8  ;;  %326 = vst [vmem:[%s2811_s29 + $0x248] sm:$0xff] %v325_v9  ;;  %v329_v11 = vld [vmem:[%s2803_s28 + $0x4a8] sm:$0xff] }
  0x37   : > { %328 = vst [vmem:[%s2811_s29 + $0x250] sm:$0xff] %v327_v10  ;;  %v331_v12 = vld [vmem:[%s2803_s28 + $0x4c0] sm:$0xff]  ;;  %v333_v13 = vld [vmem:[%s2803_s28 + $0x4c8] sm:$0xff]  ;;  %330 = vst [vmem:[%s2811_s29 + $0x258] sm:$0xff] %v329_v11 }
  0x38   : > { %332 = vst [vmem:[%s2811_s29 + $0x260] sm:$0xff] %v331_v12  ;;  %334 = vst [vmem:[%s2811_s29 + $0x268] sm:$0xff] %v333_v13  ;;  %v335_v14 = vld [vmem:[%s2803_s28 + $0x4e0] sm:$0xff]  ;;  %v337_v15 = vld [vmem:[%s2803_s28 + $0x4e8] sm:$0xff] }
  0x39   : > { %v339_v16 = vld [vmem:[%s2803_s28 + $0x500] sm:$0xff]  ;;  %336 = vst [vmem:[%s2811_s29 + $0x270] sm:$0xff] %v335_v14  ;;  %338 = vst [vmem:[%s2811_s29 + $0x278] sm:$0xff] %v337_v15  ;;  %v341_v17 = vld [vmem:[%s2803_s28 + $0x508] sm:$0xff] }
  0x3a   : > { %340 = vst [vmem:[%s2811_s29 + $0x280] sm:$0xff] %v339_v16  ;;  %v343_v18 = vld [vmem:[%s2803_s28 + $0x520] sm:$0xff]  ;;  %v345_v19 = vld [vmem:[%s2803_s28 + $0x528] sm:$0xff]  ;;  %342 = vst [vmem:[%s2811_s29 + $0x288] sm:$0xff] %v341_v17 }
  0x3b   : > { %344 = vst [vmem:[%s2811_s29 + $0x290] sm:$0xff] %v343_v18  ;;  %346 = vst [vmem:[%s2811_s29 + $0x298] sm:$0xff] %v345_v19  ;;  %v347_v20 = vld [vmem:[%s2803_s28 + $0x540] sm:$0xff]  ;;  %v349_v21 = vld [vmem:[%s2803_s28 + $0x548] sm:$0xff] }
  0x3c   : > { %v351_v22 = vld [vmem:[%s2803_s28 + $0x560] sm:$0xff]  ;;  %348 = vst [vmem:[%s2811_s29 + $0x2a0] sm:$0xff] %v347_v20  ;;  %350 = vst [vmem:[%s2811_s29 + $0x2a8] sm:$0xff] %v349_v21  ;;  %v353_v23 = vld [vmem:[%s2803_s28 + $0x568] sm:$0xff] }
  0x3d   : > { %352 = vst [vmem:[%s2811_s29 + $0x2b0] sm:$0xff] %v351_v22  ;;  %v355_v24 = vld [vmem:[%s2803_s28 + $0x580] sm:$0xff]  ;;  %v357_v25 = vld [vmem:[%s2803_s28 + $0x588] sm:$0xff]  ;;  %354 = vst [vmem:[%s2811_s29 + $0x2b8] sm:$0xff] %v353_v23 }
  0x3e   : > { %356 = vst [vmem:[%s2811_s29 + $0x2c0] sm:$0xff] %v355_v24  ;;  %358 = vst [vmem:[%s2811_s29 + $0x2c8] sm:$0xff] %v357_v25  ;;  %v359_v26 = vld [vmem:[%s2803_s28 + $0x5a0] sm:$0xff]  ;;  %v361_v27 = vld [vmem:[%s2803_s28 + $0x5a8] sm:$0xff] }
  0x3f   : > { %v363_v28 = vld [vmem:[%s2803_s28 + $0x5c0] sm:$0xff]  ;;  %360 = vst [vmem:[%s2811_s29 + $0x2d0] sm:$0xff] %v359_v26  ;;  %362 = vst [vmem:[%s2811_s29 + $0x2d8] sm:$0xff] %v361_v27  ;;  %v365_v29 = vld [vmem:[%s2803_s28 + $0x5c8] sm:$0xff] }
  0x40   : > { %364 = vst [vmem:[%s2811_s29 + $0x2e0] sm:$0xff] %v363_v28  ;;  %v367_v30 = vld [vmem:[%s2803_s28 + $0x5e0] sm:$0xff]  ;;  %v369_v31 = vld [vmem:[%s2803_s28 + $0x5e8] sm:$0xff]  ;;  %366 = vst [vmem:[%s2811_s29 + $0x2e8] sm:$0xff] %v365_v29 }
  0x41   : > { %368 = vst [vmem:[%s2811_s29 + $0x2f0] sm:$0xff] %v367_v30  ;;  %370 = vst [vmem:[%s2811_s29 + $0x2f8] sm:$0xff] %v369_v31  ;;  %v371_v32 = vld [vmem:[%s2803_s28 + $0x600] sm:$0xff]  ;;  %v373_v33 = vld [vmem:[%s2803_s28 + $0x608] sm:$0xff] }
  0x42   : > { %v375_v34 = vld [vmem:[%s2803_s28 + $0x620] sm:$0xff]  ;;  %372 = vst [vmem:[%s2811_s29 + $0x300] sm:$0xff] %v371_v32  ;;  %374 = vst [vmem:[%s2811_s29 + $0x308] sm:$0xff] %v373_v33  ;;  %v377_v35 = vld [vmem:[%s2803_s28 + $0x628] sm:$0xff] }
  0x43   : > { %376 = vst [vmem:[%s2811_s29 + $0x310] sm:$0xff] %v375_v34  ;;  %v379_v36 = vld [vmem:[%s2803_s28 + $0x640] sm:$0xff]  ;;  %v381_v37 = vld [vmem:[%s2803_s28 + $0x648] sm:$0xff]  ;;  %378 = vst [vmem:[%s2811_s29 + $0x318] sm:$0xff] %v377_v35 }
  0x44   : > { %380 = vst [vmem:[%s2811_s29 + $0x320] sm:$0xff] %v379_v36  ;;  %382 = vst [vmem:[%s2811_s29 + $0x328] sm:$0xff] %v381_v37  ;;  %v383_v38 = vld [vmem:[%s2803_s28 + $0x660] sm:$0xff]  ;;  %v385_v39 = vld [vmem:[%s2803_s28 + $0x668] sm:$0xff] }
  0x45   : > { %v387_v40 = vld [vmem:[%s2803_s28 + $0x680] sm:$0xff]  ;;  %384 = vst [vmem:[%s2811_s29 + $0x330] sm:$0xff] %v383_v38  ;;  %386 = vst [vmem:[%s2811_s29 + $0x338] sm:$0xff] %v385_v39  ;;  %v389_v41 = vld [vmem:[%s2803_s28 + $0x688] sm:$0xff] }
  0x46   : > { %388 = vst [vmem:[%s2811_s29 + $0x340] sm:$0xff] %v387_v40  ;;  %v391_v42 = vld [vmem:[%s2803_s28 + $0x6a0] sm:$0xff]  ;;  %v393_v43 = vld [vmem:[%s2803_s28 + $0x6a8] sm:$0xff]  ;;  %390 = vst [vmem:[%s2811_s29 + $0x348] sm:$0xff] %v389_v41 }
  0x47   : > { %392 = vst [vmem:[%s2811_s29 + $0x350] sm:$0xff] %v391_v42  ;;  %394 = vst [vmem:[%s2811_s29 + $0x358] sm:$0xff] %v393_v43  ;;  %v395_v44 = vld [vmem:[%s2803_s28 + $0x6c0] sm:$0xff]  ;;  %v397_v45 = vld [vmem:[%s2803_s28 + $0x6c8] sm:$0xff] }
  0x48   : > { %v399_v46 = vld [vmem:[%s2803_s28 + $0x6e0] sm:$0xff]  ;;  %396 = vst [vmem:[%s2811_s29 + $0x360] sm:$0xff] %v395_v44  ;;  %398 = vst [vmem:[%s2811_s29 + $0x368] sm:$0xff] %v397_v45  ;;  %v401_v47 = vld [vmem:[%s2803_s28 + $0x6e8] sm:$0xff] }
  0x49   : > { %400 = vst [vmem:[%s2811_s29 + $0x370] sm:$0xff] %v399_v46  ;;  %v403_v48 = vld [vmem:[%s2803_s28 + $0x700] sm:$0xff]  ;;  %v405_v49 = vld [vmem:[%s2803_s28 + $0x708] sm:$0xff]  ;;  %402 = vst [vmem:[%s2811_s29 + $0x378] sm:$0xff] %v401_v47 }
  0x4a   : > { %404 = vst [vmem:[%s2811_s29 + $0x380] sm:$0xff] %v403_v48  ;;  %406 = vst [vmem:[%s2811_s29 + $0x388] sm:$0xff] %v405_v49  ;;  %v407_v50 = vld [vmem:[%s2803_s28 + $0x720] sm:$0xff]  ;;  %v409_v51 = vld [vmem:[%s2803_s28 + $0x728] sm:$0xff] }
  0x4b   : > { %v411_v52 = vld [vmem:[%s2803_s28 + $0x740] sm:$0xff]  ;;  %408 = vst [vmem:[%s2811_s29 + $0x390] sm:$0xff] %v407_v50  ;;  %410 = vst [vmem:[%s2811_s29 + $0x398] sm:$0xff] %v409_v51  ;;  %v413_v53 = vld [vmem:[%s2803_s28 + $0x748] sm:$0xff] }
  0x4c   : > { %412 = vst [vmem:[%s2811_s29 + $0x3a0] sm:$0xff] %v411_v52  ;;  %v415_v54 = vld [vmem:[%s2803_s28 + $0x760] sm:$0xff]  ;;  %v417_v55 = vld [vmem:[%s2803_s28 + $0x768] sm:$0xff]  ;;  %414 = vst [vmem:[%s2811_s29 + $0x3a8] sm:$0xff] %v413_v53 }
  0x4d   : > { %416 = vst [vmem:[%s2811_s29 + $0x3b0] sm:$0xff] %v415_v54  ;;  %418 = vst [vmem:[%s2811_s29 + $0x3b8] sm:$0xff] %v417_v55  ;;  %v419_v56 = vld [vmem:[%s2803_s28 + $0x780] sm:$0xff]  ;;  %v421_v57 = vld [vmem:[%s2803_s28 + $0x788] sm:$0xff] }
  0x4e   : > { %v423_v58 = vld [vmem:[%s2803_s28 + $0x7a0] sm:$0xff]  ;;  %420 = vst [vmem:[%s2811_s29 + $0x3c0] sm:$0xff] %v419_v56  ;;  %422 = vst [vmem:[%s2811_s29 + $0x3c8] sm:$0xff] %v421_v57  ;;  %v425_v59 = vld [vmem:[%s2803_s28 + $0x7a8] sm:$0xff] }
  0x4f   : > { %424 = vst [vmem:[%s2811_s29 + $0x3d0] sm:$0xff] %v423_v58  ;;  %v427_v60 = vld [vmem:[%s2803_s28 + $0x7c0] sm:$0xff]  ;;  %v429_v61 = vld [vmem:[%s2803_s28 + $0x7c8] sm:$0xff]  ;;  %426 = vst [vmem:[%s2811_s29 + $0x3d8] sm:$0xff] %v425_v59 }
  0x50   : > { %428 = vst [vmem:[%s2811_s29 + $0x3e0] sm:$0xff] %v427_v60  ;;  %430 = vst [vmem:[%s2811_s29 + $0x3e8] sm:$0xff] %v429_v61  ;;  %v431_v62 = vld [vmem:[%s2803_s28 + $0x7e0] sm:$0xff]  ;;  %v433_v63 = vld [vmem:[%s2803_s28 + $0x7e8] sm:$0xff] }
  0x51   : > { %v435_v0 = vld [vmem:[%s2803_s28 + $0x800] sm:$0xff]  ;;  %432 = vst [vmem:[%s2811_s29 + $0x3f0] sm:$0xff] %v431_v62  ;;  %434 = vst [vmem:[%s2811_s29 + $0x3f8] sm:$0xff] %v433_v63  ;;  %v437_v1 = vld [vmem:[%s2803_s28 + $0x808] sm:$0xff] }
  0x52   : > { %436 = vst [vmem:[%s2811_s29 + $0x400] sm:$0xff] %v435_v0  ;;  %v439_v2 = vld [vmem:[%s2803_s28 + $0x820] sm:$0xff]  ;;  %v441_v3 = vld [vmem:[%s2803_s28 + $0x828] sm:$0xff]  ;;  %438 = vst [vmem:[%s2811_s29 + $0x408] sm:$0xff] %v437_v1 }
  0x53   : > { %440 = vst [vmem:[%s2811_s29 + $0x410] sm:$0xff] %v439_v2  ;;  %442 = vst [vmem:[%s2811_s29 + $0x418] sm:$0xff] %v441_v3  ;;  %v443_v4 = vld [vmem:[%s2803_s28 + $0x840] sm:$0xff]  ;;  %v445_v5 = vld [vmem:[%s2803_s28 + $0x848] sm:$0xff] }
  0x54   : > { %v447_v6 = vld [vmem:[%s2803_s28 + $0x860] sm:$0xff]  ;;  %444 = vst [vmem:[%s2811_s29 + $0x420] sm:$0xff] %v443_v4  ;;  %446 = vst [vmem:[%s2811_s29 + $0x428] sm:$0xff] %v445_v5  ;;  %v449_v7 = vld [vmem:[%s2803_s28 + $0x868] sm:$0xff] }
  0x55   : > { %448 = vst [vmem:[%s2811_s29 + $0x430] sm:$0xff] %v447_v6  ;;  %v451_v8 = vld [vmem:[%s2803_s28 + $0x880] sm:$0xff]  ;;  %v453_v9 = vld [vmem:[%s2803_s28 + $0x888] sm:$0xff]  ;;  %450 = vst [vmem:[%s2811_s29 + $0x438] sm:$0xff] %v449_v7 }
  0x56   : > { %452 = vst [vmem:[%s2811_s29 + $0x440] sm:$0xff] %v451_v8  ;;  %454 = vst [vmem:[%s2811_s29 + $0x448] sm:$0xff] %v453_v9  ;;  %v455_v10 = vld [vmem:[%s2803_s28 + $0x8a0] sm:$0xff]  ;;  %v457_v11 = vld [vmem:[%s2803_s28 + $0x8a8] sm:$0xff] }
  0x57   : > { %v459_v12 = vld [vmem:[%s2803_s28 + $0x8c0] sm:$0xff]  ;;  %456 = vst [vmem:[%s2811_s29 + $0x450] sm:$0xff] %v455_v10  ;;  %458 = vst [vmem:[%s2811_s29 + $0x458] sm:$0xff] %v457_v11  ;;  %v461_v13 = vld [vmem:[%s2803_s28 + $0x8c8] sm:$0xff] }
  0x58   : > { %460 = vst [vmem:[%s2811_s29 + $0x460] sm:$0xff] %v459_v12  ;;  %v463_v14 = vld [vmem:[%s2803_s28 + $0x8e0] sm:$0xff]  ;;  %v465_v15 = vld [vmem:[%s2803_s28 + $0x8e8] sm:$0xff]  ;;  %462 = vst [vmem:[%s2811_s29 + $0x468] sm:$0xff] %v461_v13 }
  0x59   : > { %464 = vst [vmem:[%s2811_s29 + $0x470] sm:$0xff] %v463_v14  ;;  %466 = vst [vmem:[%s2811_s29 + $0x478] sm:$0xff] %v465_v15  ;;  %v467_v16 = vld [vmem:[%s2803_s28 + $0x900] sm:$0xff]  ;;  %v469_v17 = vld [vmem:[%s2803_s28 + $0x908] sm:$0xff] }
  0x5a   : > { %v471_v18 = vld [vmem:[%s2803_s28 + $0x920] sm:$0xff]  ;;  %468 = vst [vmem:[%s2811_s29 + $0x480] sm:$0xff] %v467_v16  ;;  %470 = vst [vmem:[%s2811_s29 + $0x488] sm:$0xff] %v469_v17  ;;  %v473_v19 = vld [vmem:[%s2803_s28 + $0x928] sm:$0xff] }
  0x5b   : > { %472 = vst [vmem:[%s2811_s29 + $0x490] sm:$0xff] %v471_v18  ;;  %v475_v20 = vld [vmem:[%s2803_s28 + $0x940] sm:$0xff]  ;;  %v477_v21 = vld [vmem:[%s2803_s28 + $0x948] sm:$0xff]  ;;  %474 = vst [vmem:[%s2811_s29 + $0x498] sm:$0xff] %v473_v19 }
  0x5c   : > { %476 = vst [vmem:[%s2811_s29 + $0x4a0] sm:$0xff] %v475_v20  ;;  %478 = vst [vmem:[%s2811_s29 + $0x4a8] sm:$0xff] %v477_v21  ;;  %v479_v22 = vld [vmem:[%s2803_s28 + $0x960] sm:$0xff]  ;;  %v481_v23 = vld [vmem:[%s2803_s28 + $0x968] sm:$0xff] }
  0x5d   : > { %v483_v24 = vld [vmem:[%s2803_s28 + $0x980] sm:$0xff]  ;;  %480 = vst [vmem:[%s2811_s29 + $0x4b0] sm:$0xff] %v479_v22  ;;  %482 = vst [vmem:[%s2811_s29 + $0x4b8] sm:$0xff] %v481_v23  ;;  %v485_v25 = vld [vmem:[%s2803_s28 + $0x988] sm:$0xff] }
  0x5e   : > { %484 = vst [vmem:[%s2811_s29 + $0x4c0] sm:$0xff] %v483_v24  ;;  %v487_v26 = vld [vmem:[%s2803_s28 + $0x9a0] sm:$0xff]  ;;  %v489_v27 = vld [vmem:[%s2803_s28 + $0x9a8] sm:$0xff]  ;;  %486 = vst [vmem:[%s2811_s29 + $0x4c8] sm:$0xff] %v485_v25 }
  0x5f   : > { %488 = vst [vmem:[%s2811_s29 + $0x4d0] sm:$0xff] %v487_v26  ;;  %490 = vst [vmem:[%s2811_s29 + $0x4d8] sm:$0xff] %v489_v27  ;;  %v491_v28 = vld [vmem:[%s2803_s28 + $0x9c0] sm:$0xff]  ;;  %v493_v29 = vld [vmem:[%s2803_s28 + $0x9c8] sm:$0xff] }
  0x60   : > { %v495_v30 = vld [vmem:[%s2803_s28 + $0x9e0] sm:$0xff]  ;;  %492 = vst [vmem:[%s2811_s29 + $0x4e0] sm:$0xff] %v491_v28  ;;  %494 = vst [vmem:[%s2811_s29 + $0x4e8] sm:$0xff] %v493_v29  ;;  %v497_v31 = vld [vmem:[%s2803_s28 + $0x9e8] sm:$0xff] }
  0x61   : > { %496 = vst [vmem:[%s2811_s29 + $0x4f0] sm:$0xff] %v495_v30  ;;  %v499_v32 = vld [vmem:[%s2803_s28 + $0xa00] sm:$0xff]  ;;  %v501_v33 = vld [vmem:[%s2803_s28 + $0xa08] sm:$0xff]  ;;  %498 = vst [vmem:[%s2811_s29 + $0x4f8] sm:$0xff] %v497_v31 }
  0x62   : > { %500 = vst [vmem:[%s2811_s29 + $0x500] sm:$0xff] %v499_v32  ;;  %502 = vst [vmem:[%s2811_s29 + $0x508] sm:$0xff] %v501_v33  ;;  %v503_v34 = vld [vmem:[%s2803_s28 + $0xa20] sm:$0xff]  ;;  %v505_v35 = vld [vmem:[%s2803_s28 + $0xa28] sm:$0xff] }
  0x63   : > { %v507_v36 = vld [vmem:[%s2803_s28 + $0xa40] sm:$0xff]  ;;  %504 = vst [vmem:[%s2811_s29 + $0x510] sm:$0xff] %v503_v34  ;;  %506 = vst [vmem:[%s2811_s29 + $0x518] sm:$0xff] %v505_v35  ;;  %v509_v37 = vld [vmem:[%s2803_s28 + $0xa48] sm:$0xff] }
  0x64   : > { %508 = vst [vmem:[%s2811_s29 + $0x520] sm:$0xff] %v507_v36  ;;  %v511_v38 = vld [vmem:[%s2803_s28 + $0xa60] sm:$0xff]  ;;  %v513_v39 = vld [vmem:[%s2803_s28 + $0xa68] sm:$0xff]  ;;  %510 = vst [vmem:[%s2811_s29 + $0x528] sm:$0xff] %v509_v37 }
  0x65   : > { %512 = vst [vmem:[%s2811_s29 + $0x530] sm:$0xff] %v511_v38  ;;  %514 = vst [vmem:[%s2811_s29 + $0x538] sm:$0xff] %v513_v39  ;;  %v515_v40 = vld [vmem:[%s2803_s28 + $0xa80] sm:$0xff]  ;;  %v517_v41 = vld [vmem:[%s2803_s28 + $0xa88] sm:$0xff] }
  0x66   : > { %v519_v42 = vld [vmem:[%s2803_s28 + $0xaa0] sm:$0xff]  ;;  %516 = vst [vmem:[%s2811_s29 + $0x540] sm:$0xff] %v515_v40  ;;  %518 = vst [vmem:[%s2811_s29 + $0x548] sm:$0xff] %v517_v41  ;;  %v521_v43 = vld [vmem:[%s2803_s28 + $0xaa8] sm:$0xff] }
  0x67   : > { %520 = vst [vmem:[%s2811_s29 + $0x550] sm:$0xff] %v519_v42  ;;  %v523_v44 = vld [vmem:[%s2803_s28 + $0xac0] sm:$0xff]  ;;  %v525_v45 = vld [vmem:[%s2803_s28 + $0xac8] sm:$0xff]  ;;  %522 = vst [vmem:[%s2811_s29 + $0x558] sm:$0xff] %v521_v43 }
  0x68   : > { %524 = vst [vmem:[%s2811_s29 + $0x560] sm:$0xff] %v523_v44  ;;  %526 = vst [vmem:[%s2811_s29 + $0x568] sm:$0xff] %v525_v45  ;;  %v527_v46 = vld [vmem:[%s2803_s28 + $0xae0] sm:$0xff]  ;;  %v529_v47 = vld [vmem:[%s2803_s28 + $0xae8] sm:$0xff] }
  0x69   : > { %v531_v48 = vld [vmem:[%s2803_s28 + $0xb00] sm:$0xff]  ;;  %528 = vst [vmem:[%s2811_s29 + $0x570] sm:$0xff] %v527_v46  ;;  %530 = vst [vmem:[%s2811_s29 + $0x578] sm:$0xff] %v529_v47  ;;  %v533_v49 = vld [vmem:[%s2803_s28 + $0xb08] sm:$0xff] }
  0x6a   : > { %532 = vst [vmem:[%s2811_s29 + $0x580] sm:$0xff] %v531_v48  ;;  %v535_v50 = vld [vmem:[%s2803_s28 + $0xb20] sm:$0xff]  ;;  %v537_v51 = vld [vmem:[%s2803_s28 + $0xb28] sm:$0xff]  ;;  %534 = vst [vmem:[%s2811_s29 + $0x588] sm:$0xff] %v533_v49 }
  0x6b   : > { %536 = vst [vmem:[%s2811_s29 + $0x590] sm:$0xff] %v535_v50  ;;  %538 = vst [vmem:[%s2811_s29 + $0x598] sm:$0xff] %v537_v51  ;;  %v539_v52 = vld [vmem:[%s2803_s28 + $0xb40] sm:$0xff]  ;;  %v541_v53 = vld [vmem:[%s2803_s28 + $0xb48] sm:$0xff] }
  0x6c   : > { %v543_v54 = vld [vmem:[%s2803_s28 + $0xb60] sm:$0xff]  ;;  %540 = vst [vmem:[%s2811_s29 + $0x5a0] sm:$0xff] %v539_v52  ;;  %542 = vst [vmem:[%s2811_s29 + $0x5a8] sm:$0xff] %v541_v53  ;;  %v545_v55 = vld [vmem:[%s2803_s28 + $0xb68] sm:$0xff] }
  0x6d   : > { %544 = vst [vmem:[%s2811_s29 + $0x5b0] sm:$0xff] %v543_v54  ;;  %v547_v56 = vld [vmem:[%s2803_s28 + $0xb80] sm:$0xff]  ;;  %v549_v57 = vld [vmem:[%s2803_s28 + $0xb88] sm:$0xff]  ;;  %546 = vst [vmem:[%s2811_s29 + $0x5b8] sm:$0xff] %v545_v55 }
  0x6e   : > { %548 = vst [vmem:[%s2811_s29 + $0x5c0] sm:$0xff] %v547_v56  ;;  %550 = vst [vmem:[%s2811_s29 + $0x5c8] sm:$0xff] %v549_v57  ;;  %v551_v58 = vld [vmem:[%s2803_s28 + $0xba0] sm:$0xff]  ;;  %v553_v59 = vld [vmem:[%s2803_s28 + $0xba8] sm:$0xff] }
  0x6f   : > { %v555_v60 = vld [vmem:[%s2803_s28 + $0xbc0] sm:$0xff]  ;;  %552 = vst [vmem:[%s2811_s29 + $0x5d0] sm:$0xff] %v551_v58  ;;  %554 = vst [vmem:[%s2811_s29 + $0x5d8] sm:$0xff] %v553_v59  ;;  %v557_v61 = vld [vmem:[%s2803_s28 + $0xbc8] sm:$0xff] }
  0x70   : > { %556 = vst [vmem:[%s2811_s29 + $0x5e0] sm:$0xff] %v555_v60  ;;  %v559_v62 = vld [vmem:[%s2803_s28 + $0xbe0] sm:$0xff]  ;;  %v561_v63 = vld [vmem:[%s2803_s28 + $0xbe8] sm:$0xff]  ;;  %558 = vst [vmem:[%s2811_s29 + $0x5e8] sm:$0xff] %v557_v61 }
  0x71   : > { %560 = vst [vmem:[%s2811_s29 + $0x5f0] sm:$0xff] %v559_v62  ;;  %562 = vst [vmem:[%s2811_s29 + $0x5f8] sm:$0xff] %v561_v63 }
  0x72 PF: > { %p2185_p5 = scmp.ge.s32.totalorder %s2742_s17, 1  ;;  %p584_p6 = scmp.lt.s32.totalorder %s2742_s17, 3 }
  0x74   : > { %p585_p7 = pnand %p2185_p5, %p584_p6 }
  0x75   : > { %s591_s30 = sand.u32 (!%p585_p7), 1, %s2734_s15   ;;  %v644_v0 = vld [vmem:[%s3443_s0 + $0x8] sm:$0xff] (!%p585_p7)  ;;  %s2186_s24 = sshll.u32 (!%p585_p7), %s2179_s18, 2 }
  0x76   : > { %588 = sbr.rel (%p585_p7) target bundleno = 534 (0x216), region = 55  ;;  %v650_v1 = vpack.c.bf16 (!%p585_p7), %v644_v0, %v644_v0  ;;  %v643_v0 = vld [vmem:[%s3443_s0] sm:$0xff] (!%p585_p7)  ;;  %p627_p8 = scmp.lt.s32.totalorder (!%p585_p7), %s2186_s24, 7 }
  0x77   : > { %s2407_s7 = smul.u32 (!%p585_p7), 1536, %s591_s30 }
  0x78   : > { %1861 = vmatprep.mubr.bf16.mxu0 (!%p585_p7), %v650_v1  ;;  %1984 = vmatprep.mubr.bf16.mxu1 (!%p585_p7), %v650_v1 }
  0x79   : > { %s3197_s8 = scalar_lea.vmem (!%p585_p7), [#allocation2], %s2407_s7 }
  0x7a   : > { %v2432_v2 = vld [vmem:[%s3197_s8 + $0x4] ss:$16 sps:$4 sm:$0xff] (!%p585_p7)   ;;  %v2434_v3 = vld [vmem:[%s3197_s8 + $0xc] ss:$16 sps:$4 sm:$0xff] (!%p585_p7)   ;;  %v2436_v4 = vld [vmem:[%s3197_s8] ss:$16 sps:$4 sm:$0xff] (!%p585_p7)  }
  0x7b   : > { %1829 = vmatprep.subr.bf16.mxu0 (!%p585_p7), %v2432_v2  ;;  %v2437_v5 = vld [vmem:[%s3197_s8 + $0x8] ss:$16 sps:$4 sm:$0xff] (!%p585_p7)   ;;  %1952 = vmatprep.subr.bf16.mxu1 (!%p585_p7), %v2434_v3  ;;  %v2438_v6 = vld [vmem:[%s3197_s8 + $0x24] ss:$16 sps:$4 sm:$0xff] (!%p585_p7)   ;;  %v2440_v7 = vld [vmem:[%s3197_s8 + $0x2c] ss:$16 sps:$4 sm:$0xff] (!%p585_p7)  }
  0x7c   : > { %1830 = vmatpush1.bf16.msra.mxu0 (!%p585_p7), %v2436_v4  ;;  %1953 = vmatpush1.bf16.msra.mxu1 (!%p585_p7), %v2437_v5  ;;  %v2442_v8 = vld [vmem:[%s3197_s8 + $0x20] ss:$16 sps:$4 sm:$0xff] (!%p585_p7)   ;;  %v2443_v9 = vld [vmem:[%s3197_s8 + $0x28] ss:$16 sps:$4 sm:$0xff] (!%p585_p7)   ;;  %v2444_v10 = vld [vmem:[%s3197_s8 + $0x44] ss:$16 sps:$4 sm:$0xff] (!%p585_p7)  }
  0x7d   : > { %1831 = vmatprep.subr.bf16.mxu0 %v2438_v6  ;;  %1954 = vmatprep.subr.bf16.mxu1 %v2440_v7  ;;  %v2446_v11 = vld [vmem:[%s3197_s8 + $0x4c] ss:$16 sps:$4 sm:$0xff]   ;;  %v2448_v12 = vld [vmem:[%s3197_s8 + $0x40] ss:$16 sps:$4 sm:$0xff]   ;;  %v2449_v13 = vld [vmem:[%s3197_s8 + $0x48] ss:$16 sps:$4 sm:$0xff]   ;;  %v649_v7 = vpack.c.bf16 %v643_v0, %v643_v0 }
  0x7e   : > { %v2450_v14 = vld [vmem:[%s3197_s8 + $0x64] ss:$16 sps:$4 sm:$0xff]   ;;  %v2452_v15 = vld [vmem:[%s3197_s8 + $0x6c] ss:$16 sps:$4 sm:$0xff]   ;;  %v2454_v16 = vld [vmem:[%s3197_s8 + $0x60] ss:$16 sps:$4 sm:$0xff]  }
  0x7f   : > { %v2455_v17 = vld [vmem:[%s3197_s8 + $0x68] ss:$16 sps:$4 sm:$0xff]   ;;  %v2456_v18 = vld [vmem:[%s3197_s8 + $0x84] ss:$16 sps:$4 sm:$0xff]   ;;  %v2458_v19 = vld [vmem:[%s3197_s8 + $0x8c] ss:$16 sps:$4 sm:$0xff]  }
  0x80   : > { %1832 = vmatpush1.bf16.msra.mxu0 %v2442_v8  ;;  %1955 = vmatpush1.bf16.msra.mxu1 %v2443_v9  ;;  %v2460_v20 = vld [vmem:[%s3197_s8 + $0x80] ss:$16 sps:$4 sm:$0xff]   ;;  %v2461_v21 = vld [vmem:[%s3197_s8 + $0x88] ss:$16 sps:$4 sm:$0xff]   ;;  %v2462_v22 = vld [vmem:[%s3197_s8 + $0xa4] ss:$16 sps:$4 sm:$0xff]  }
  0x81   : > { %1833 = vmatprep.subr.bf16.mxu0 %v2444_v10  ;;  %1956 = vmatprep.subr.bf16.mxu1 %v2446_v11  ;;  %v2464_v23 = vld [vmem:[%s3197_s8 + $0xac] ss:$16 sps:$4 sm:$0xff]   ;;  %v2466_v24 = vld [vmem:[%s3197_s8 + $0xa0] ss:$16 sps:$4 sm:$0xff]   ;;  %v2467_v25 = vld [vmem:[%s3197_s8 + $0xa8] ss:$16 sps:$4 sm:$0xff]  }
  0x82   : > { %v2468_v26 = vld [vmem:[%s3197_s8 + $0xc4] ss:$16 sps:$4 sm:$0xff]   ;;  %v2470_v27 = vld [vmem:[%s3197_s8 + $0xcc] ss:$16 sps:$4 sm:$0xff]   ;;  %v2472_v28 = vld [vmem:[%s3197_s8 + $0xc0] ss:$16 sps:$4 sm:$0xff]  }
  0x83   : > { %v2473_v29 = vld [vmem:[%s3197_s8 + $0xc8] ss:$16 sps:$4 sm:$0xff]   ;;  %v2474_v30 = vld [vmem:[%s3197_s8 + $0xe4] ss:$16 sps:$4 sm:$0xff]   ;;  %v2476_v31 = vld [vmem:[%s3197_s8 + $0xec] ss:$16 sps:$4 sm:$0xff]  }
  0x84   : > { %1834 = vmatpush1.bf16.msra.mxu0 %v2448_v12  ;;  %1957 = vmatpush1.bf16.msra.mxu1 %v2449_v13  ;;  %v2478_v32 = vld [vmem:[%s3197_s8 + $0xe0] ss:$16 sps:$4 sm:$0xff]   ;;  %v2479_v33 = vld [vmem:[%s3197_s8 + $0xe8] ss:$16 sps:$4 sm:$0xff]   ;;  %v2480_v34 = vld [vmem:[%s3197_s8 + $0x104] ss:$16 sps:$4 sm:$0xff]  }
  0x85   : > { %1835 = vmatprep.subr.bf16.mxu0 %v2450_v14  ;;  %1958 = vmatprep.subr.bf16.mxu1 %v2452_v15  ;;  %v2482_v35 = vld [vmem:[%s3197_s8 + $0x10c] ss:$16 sps:$4 sm:$0xff]   ;;  %v2484_v36 = vld [vmem:[%s3197_s8 + $0x100] ss:$16 sps:$4 sm:$0xff]   ;;  %v2485_v37 = vld [vmem:[%s3197_s8 + $0x108] ss:$16 sps:$4 sm:$0xff]  }
  0x86   : > { %v2486_v38 = vld [vmem:[%s3197_s8 + $0x124] ss:$16 sps:$4 sm:$0xff]   ;;  %v2488_v39 = vld [vmem:[%s3197_s8 + $0x12c] ss:$16 sps:$4 sm:$0xff]   ;;  %v2490_v40 = vld [vmem:[%s3197_s8 + $0x120] ss:$16 sps:$4 sm:$0xff]  }
  0x87   : > { %v2491_v41 = vld [vmem:[%s3197_s8 + $0x128] ss:$16 sps:$4 sm:$0xff]   ;;  %v2492_v42 = vld [vmem:[%s3197_s8 + $0x144] ss:$16 sps:$4 sm:$0xff]   ;;  %v2494_v43 = vld [vmem:[%s3197_s8 + $0x14c] ss:$16 sps:$4 sm:$0xff]  }
  0x88   : > { %1836 = vmatpush1.bf16.msra.mxu0 %v2454_v16  ;;  %1959 = vmatpush1.bf16.msra.mxu1 %v2455_v17  ;;  %v2496_v44 = vld [vmem:[%s3197_s8 + $0x140] ss:$16 sps:$4 sm:$0xff]   ;;  %v2497_v45 = vld [vmem:[%s3197_s8 + $0x148] ss:$16 sps:$4 sm:$0xff]   ;;  %v2498_v46 = vld [vmem:[%s3197_s8 + $0x164] ss:$16 sps:$4 sm:$0xff]  }
  0x89   : > { %1837 = vmatprep.subr.bf16.mxu0 %v2456_v18  ;;  %1960 = vmatprep.subr.bf16.mxu1 %v2458_v19  ;;  %v2500_v47 = vld [vmem:[%s3197_s8 + $0x16c] ss:$16 sps:$4 sm:$0xff]   ;;  %v2502_v48 = vld [vmem:[%s3197_s8 + $0x160] ss:$16 sps:$4 sm:$0xff]   ;;  %v2503_v49 = vld [vmem:[%s3197_s8 + $0x168] ss:$16 sps:$4 sm:$0xff]  }
  0x8a   : > { %v2504_v50 = vld [vmem:[%s3197_s8 + $0x184] ss:$16 sps:$4 sm:$0xff]   ;;  %v2506_v51 = vld [vmem:[%s3197_s8 + $0x18c] ss:$16 sps:$4 sm:$0xff]   ;;  %v2508_v52 = vld [vmem:[%s3197_s8 + $0x180] ss:$16 sps:$4 sm:$0xff]  }
  0x8b   : > { %v2509_v53 = vld [vmem:[%s3197_s8 + $0x188] ss:$16 sps:$4 sm:$0xff]   ;;  %v2510_v54 = vld [vmem:[%s3197_s8 + $0x1a4] ss:$16 sps:$4 sm:$0xff]   ;;  %v2512_v55 = vld [vmem:[%s3197_s8 + $0x1ac] ss:$16 sps:$4 sm:$0xff]  }
  0x8c   : > { %1838 = vmatpush1.bf16.msra.mxu0 %v2460_v20  ;;  %1961 = vmatpush1.bf16.msra.mxu1 %v2461_v21  ;;  %v2514_v56 = vld [vmem:[%s3197_s8 + $0x1a0] ss:$16 sps:$4 sm:$0xff]   ;;  %v2515_v57 = vld [vmem:[%s3197_s8 + $0x1a8] ss:$16 sps:$4 sm:$0xff]   ;;  %v2516_v58 = vld [vmem:[%s3197_s8 + $0x1c4] ss:$16 sps:$4 sm:$0xff]  }
  0x8d   : > { %1839 = vmatprep.subr.bf16.mxu0 %v2462_v22  ;;  %1962 = vmatprep.subr.bf16.mxu1 %v2464_v23  ;;  %v2518_v59 = vld [vmem:[%s3197_s8 + $0x1cc] ss:$16 sps:$4 sm:$0xff]   ;;  %v2520_v60 = vld [vmem:[%s3197_s8 + $0x1c0] ss:$16 sps:$4 sm:$0xff]   ;;  %v2521_v61 = vld [vmem:[%s3197_s8 + $0x1c8] ss:$16 sps:$4 sm:$0xff]  }
  0x8e   : > { %v2522_v62 = vld [vmem:[%s3197_s8 + $0x1e4] ss:$16 sps:$4 sm:$0xff]   ;;  %v2524_v63 = vld [vmem:[%s3197_s8 + $0x1ec] ss:$16 sps:$4 sm:$0xff]   ;;  %v2526_v1 = vld [vmem:[%s3197_s8 + $0x1e0] ss:$16 sps:$4 sm:$0xff]  }
  0x8f   : > { %v2527_v2 = vld [vmem:[%s3197_s8 + $0x1e8] ss:$16 sps:$4 sm:$0xff]   ;;  %v2530_v3 = vld [vmem:[%s3197_s8 + $0x204] ss:$16 sps:$4 sm:$0xff]   ;;  %v2533_v4 = vld [vmem:[%s3197_s8 + $0x20c] ss:$16 sps:$4 sm:$0xff]  }
  0x90   : > { %1840 = vmatpush1.bf16.msra.mxu0 %v2466_v24  ;;  %1963 = vmatpush1.bf16.msra.mxu1 %v2467_v25  ;;  %v2528_v5 = vld [vmem:[%s3197_s8 + $0x200] ss:$16 sps:$4 sm:$0xff]   ;;  %v2531_v6 = vld [vmem:[%s3197_s8 + $0x208] ss:$16 sps:$4 sm:$0xff]   ;;  %v2536_v8 = vld [vmem:[%s3197_s8 + $0x224] ss:$16 sps:$4 sm:$0xff]  }
  0x91   : > { %1841 = vmatprep.subr.bf16.mxu0 %v2468_v26  ;;  %1964 = vmatprep.subr.bf16.mxu1 %v2470_v27  ;;  %v2539_v9 = vld [vmem:[%s3197_s8 + $0x22c] ss:$16 sps:$4 sm:$0xff]   ;;  %v2534_v10 = vld [vmem:[%s3197_s8 + $0x220] ss:$16 sps:$4 sm:$0xff]   ;;  %v2537_v11 = vld [vmem:[%s3197_s8 + $0x228] ss:$16 sps:$4 sm:$0xff]  }
  0x92   : > { %v2542_v12 = vld [vmem:[%s3197_s8 + $0x244] ss:$16 sps:$4 sm:$0xff]   ;;  %v2545_v13 = vld [vmem:[%s3197_s8 + $0x24c] ss:$16 sps:$4 sm:$0xff]   ;;  %v2540_v14 = vld [vmem:[%s3197_s8 + $0x240] ss:$16 sps:$4 sm:$0xff]  }
  0x93   : > { %v2543_v15 = vld [vmem:[%s3197_s8 + $0x248] ss:$16 sps:$4 sm:$0xff]   ;;  %v2548_v16 = vld [vmem:[%s3197_s8 + $0x264] ss:$16 sps:$4 sm:$0xff]   ;;  %v2551_v17 = vld [vmem:[%s3197_s8 + $0x26c] ss:$16 sps:$4 sm:$0xff]  }
  0x94   : > { %1842 = vmatpush1.bf16.msra.mxu0 %v2472_v28  ;;  %1965 = vmatpush1.bf16.msra.mxu1 %v2473_v29  ;;  %v2546_v18 = vld [vmem:[%s3197_s8 + $0x260] ss:$16 sps:$4 sm:$0xff]   ;;  %v2549_v19 = vld [vmem:[%s3197_s8 + $0x268] ss:$16 sps:$4 sm:$0xff]   ;;  %v2554_v20 = vld [vmem:[%s3197_s8 + $0x284] ss:$16 sps:$4 sm:$0xff]  }
  0x95   : > { %1843 = vmatprep.subr.bf16.mxu0 %v2474_v30  ;;  %1966 = vmatprep.subr.bf16.mxu1 %v2476_v31  ;;  %v2557_v21 = vld [vmem:[%s3197_s8 + $0x28c] ss:$16 sps:$4 sm:$0xff]   ;;  %v2552_v22 = vld [vmem:[%s3197_s8 + $0x280] ss:$16 sps:$4 sm:$0xff]   ;;  %v2555_v23 = vld [vmem:[%s3197_s8 + $0x288] ss:$16 sps:$4 sm:$0xff]  }
  0x96   : > { %v2560_v24 = vld [vmem:[%s3197_s8 + $0x2a4] ss:$16 sps:$4 sm:$0xff]   ;;  %v2563_v25 = vld [vmem:[%s3197_s8 + $0x2ac] ss:$16 sps:$4 sm:$0xff]   ;;  %v2558_v26 = vld [vmem:[%s3197_s8 + $0x2a0] ss:$16 sps:$4 sm:$0xff]  }
  0x97   : > { %v2561_v27 = vld [vmem:[%s3197_s8 + $0x2a8] ss:$16 sps:$4 sm:$0xff]   ;;  %v2566_v28 = vld [vmem:[%s3197_s8 + $0x2c4] ss:$16 sps:$4 sm:$0xff]   ;;  %v2569_v29 = vld [vmem:[%s3197_s8 + $0x2cc] ss:$16 sps:$4 sm:$0xff]  }
  0x98   : > { %1844 = vmatpush1.bf16.msra.mxu0 %v2478_v32  ;;  %1967 = vmatpush1.bf16.msra.mxu1 %v2479_v33  ;;  %v646_v30 = vld [vmem:[%s3443_s0 + $0x18] sm:$0xff]  ;;  %v2564_v32 = vld [vmem:[%s3197_s8 + $0x2c0] ss:$16 sps:$4 sm:$0xff]   ;;  %s3454_s24 = smov (!%p627_p8, %s2186_s24), 7 }
  0x99   : > { %1845 = vmatprep.subr.bf16.mxu0 %v2480_v34  ;;  %1968 = vmatprep.subr.bf16.mxu1 %v2482_v35  ;;  %v652_v31 = vpack.c.bf16 %v646_v30, %v646_v30  ;;  %v2567_v33 = vld [vmem:[%s3197_s8 + $0x2c8] ss:$16 sps:$4 sm:$0xff]   ;;  %v2572_v34 = vld [vmem:[%s3197_s8 + $0x2e4] ss:$16 sps:$4 sm:$0xff]   ;;  %v2575_v35 = vld [vmem:[%s3197_s8 + $0x2ec] ss:$16 sps:$4 sm:$0xff]   ;;  %s629_s27 = scalar_lea.vmem %s3445_s2, %s3454_s24 }
  0x9a   : > { %v2612_v0 = vld [vmem:[%s3197_s8 + $0x3c0] ss:$16 sps:$4 sm:$0xff]   ;;  %v2656_v30 = vld [vmem:[%s3197_s8 + $0x4a4] ss:$16 sps:$4 sm:$0xff]   ;;  %s2188_s28 = sshll.u32 %s3454_s24, 3 }
  0x9b   : > { %s635_s29 = scalar_lea.vmem %s3446_s3, %s2188_s28  ;;  %s641_s6 = scalar_lea.vmem %s3447_s4, %s2188_s28 }
  0x9c   : > { %1846 = vmatpush1.bf16.msra.mxu0 %v2484_v36  ;;  %1969 = vmatpush1.bf16.msra.mxu1 %v2485_v37  ;;  %v2570_v36 = vld [vmem:[%s3197_s8 + $0x2e0] ss:$16 sps:$4 sm:$0xff]   ;;  %v2573_v37 = vld [vmem:[%s3197_s8 + $0x2e8] ss:$16 sps:$4 sm:$0xff]  }
  0x9d   : > { %1847 = vmatprep.subr.bf16.mxu0 %v2486_v38  ;;  %1970 = vmatprep.subr.bf16.mxu1 %v2488_v39  ;;  %v2578_v38 = vld [vmem:[%s3197_s8 + $0x304] ss:$16 sps:$4 sm:$0xff]   ;;  %v2581_v39 = vld [vmem:[%s3197_s8 + $0x30c] ss:$16 sps:$4 sm:$0xff]  }
  0xa0   : > { %1848 = vmatpush1.bf16.msra.mxu0 %v2490_v40  ;;  %1971 = vmatpush1.bf16.msra.mxu1 %v2491_v41  ;;  %v2576_v40 = vld [vmem:[%s3197_s8 + $0x300] ss:$16 sps:$4 sm:$0xff]   ;;  %v2579_v41 = vld [vmem:[%s3197_s8 + $0x308] ss:$16 sps:$4 sm:$0xff]  }
  0xa1   : > { %1849 = vmatprep.subr.bf16.mxu0 %v2492_v42  ;;  %1972 = vmatprep.subr.bf16.mxu1 %v2494_v43  ;;  %v2584_v42 = vld [vmem:[%s3197_s8 + $0x324] ss:$16 sps:$4 sm:$0xff]   ;;  %v2587_v43 = vld [vmem:[%s3197_s8 + $0x32c] ss:$16 sps:$4 sm:$0xff]  }
  0xa4   : > { %1850 = vmatpush1.bf16.msra.mxu0 %v2496_v44  ;;  %1973 = vmatpush1.bf16.msra.mxu1 %v2497_v45  ;;  %v2582_v44 = vld [vmem:[%s3197_s8 + $0x320] ss:$16 sps:$4 sm:$0xff]   ;;  %v2585_v45 = vld [vmem:[%s3197_s8 + $0x328] ss:$16 sps:$4 sm:$0xff]  }
  0xa5   : > { %1851 = vmatprep.subr.bf16.mxu0 %v2498_v46  ;;  %1974 = vmatprep.subr.bf16.mxu1 %v2500_v47  ;;  %v2590_v46 = vld [vmem:[%s3197_s8 + $0x344] ss:$16 sps:$4 sm:$0xff]   ;;  %v2593_v47 = vld [vmem:[%s3197_s8 + $0x34c] ss:$16 sps:$4 sm:$0xff]  }
  0xa8   : > { %1852 = vmatpush1.bf16.msra.mxu0 %v2502_v48  ;;  %1975 = vmatpush1.bf16.msra.mxu1 %v2503_v49  ;;  %v2588_v48 = vld [vmem:[%s3197_s8 + $0x340] ss:$16 sps:$4 sm:$0xff]   ;;  %v2591_v49 = vld [vmem:[%s3197_s8 + $0x348] ss:$16 sps:$4 sm:$0xff]  }
  0xa9   : > { %1853 = vmatprep.subr.bf16.mxu0 %v2504_v50  ;;  %1976 = vmatprep.subr.bf16.mxu1 %v2506_v51  ;;  %v2596_v50 = vld [vmem:[%s3197_s8 + $0x364] ss:$16 sps:$4 sm:$0xff]   ;;  %v2599_v51 = vld [vmem:[%s3197_s8 + $0x36c] ss:$16 sps:$4 sm:$0xff]  }
  0xac   : > { %1854 = vmatpush1.bf16.msra.mxu0 %v2508_v52  ;;  %1977 = vmatpush1.bf16.msra.mxu1 %v2509_v53  ;;  %v2594_v52 = vld [vmem:[%s3197_s8 + $0x360] ss:$16 sps:$4 sm:$0xff]   ;;  %v2597_v53 = vld [vmem:[%s3197_s8 + $0x368] ss:$16 sps:$4 sm:$0xff]  }
  0xad   : > { %1855 = vmatprep.subr.bf16.mxu0 %v2510_v54  ;;  %1978 = vmatprep.subr.bf16.mxu1 %v2512_v55  ;;  %v2602_v54 = vld [vmem:[%s3197_s8 + $0x384] ss:$16 sps:$4 sm:$0xff]   ;;  %v2605_v55 = vld [vmem:[%s3197_s8 + $0x38c] ss:$16 sps:$4 sm:$0xff]  }
  0xb0   : > { %1856 = vmatpush1.bf16.msra.mxu0 %v2514_v56  ;;  %1979 = vmatpush1.bf16.msra.mxu1 %v2515_v57  ;;  %v2600_v56 = vld [vmem:[%s3197_s8 + $0x380] ss:$16 sps:$4 sm:$0xff]   ;;  %v2603_v57 = vld [vmem:[%s3197_s8 + $0x388] ss:$16 sps:$4 sm:$0xff]  }
  0xb1   : > { %1857 = vmatprep.subr.bf16.mxu0 %v2516_v58  ;;  %1980 = vmatprep.subr.bf16.mxu1 %v2518_v59  ;;  %v2608_v58 = vld [vmem:[%s3197_s8 + $0x3a4] ss:$16 sps:$4 sm:$0xff]   ;;  %v2611_v59 = vld [vmem:[%s3197_s8 + $0x3ac] ss:$16 sps:$4 sm:$0xff]  }
  0xb4   : > { %1858 = vmatpush1.bf16.msra.mxu0 %v2520_v60  ;;  %1981 = vmatpush1.bf16.msra.mxu1 %v2521_v61  ;;  %v2606_v60 = vld [vmem:[%s3197_s8 + $0x3a0] ss:$16 sps:$4 sm:$0xff]   ;;  %v2609_v61 = vld [vmem:[%s3197_s8 + $0x3a8] ss:$16 sps:$4 sm:$0xff]  }
  0xb5   : > { %1859 = vmatprep.subr.bf16.mxu0 %v2522_v62  ;;  %1982 = vmatprep.subr.bf16.mxu1 %v2524_v63  ;;  %v2614_v62 = vld [vmem:[%s3197_s8 + $0x3c4] ss:$16 sps:$4 sm:$0xff]   ;;  %v2617_v63 = vld [vmem:[%s3197_s8 + $0x3cc] ss:$16 sps:$4 sm:$0xff]  }
  0xb8   : > { %1860 = vmatpush1.bf16.msra.mxu0 %v2526_v1  ;;  %1983 = vmatpush1.bf16.msra.mxu1 %v2527_v2  ;;  %v2615_v1 = vld [vmem:[%s3197_s8 + $0x3c8] ss:$16 sps:$4 sm:$0xff]   ;;  %v2620_v2 = vld [vmem:[%s3197_s8 + $0x3e4] ss:$16 sps:$4 sm:$0xff]  }
  0xb9   : > { %1870 = vmatprep.subr.bf16.mxu0 %v2530_v3  ;;  %1993 = vmatprep.subr.bf16.mxu1 %v2533_v4  ;;  %v2623_v3 = vld [vmem:[%s3197_s8 + $0x3ec] ss:$16 sps:$4 sm:$0xff]   ;;  %v2618_v4 = vld [vmem:[%s3197_s8 + $0x3e0] ss:$16 sps:$4 sm:$0xff]  }
  0xbb   : > { %1862 = vmatmul.mubr.bf16.vlgmr.msra.gmra.mrb[0].mxu0 %v649_v7  ;;  %1985 = vmatmul.mubr.bf16.vlgmr.msra.gmra.mrb[0].mxu1 %v649_v7  ;;  %v2626_v7 = vld [vmem:[%s3197_s8 + $0x404] ss:$16 sps:$4 sm:$0xff]  }
  0xbc   : > { %1871 = vmatpush1.bf16.msra.mxu0 %v2528_v5  ;;  %1994 = vmatpush1.bf16.msra.mxu1 %v2531_v6  ;;  %v2621_v5 = vld [vmem:[%s3197_s8 + $0x3e8] ss:$16 sps:$4 sm:$0xff]   ;;  %v645_v6 = vld [vmem:[%s3443_s0 + $0x10] sm:$0xff] }
  0xbd   : > { %1872 = vmatprep.subr.bf16.mxu0 %v2536_v8  ;;  %1995 = vmatprep.subr.bf16.mxu1 %v2539_v9  ;;  %v2629_v8 = vld [vmem:[%s3197_s8 + $0x40c] ss:$16 sps:$4 sm:$0xff]   ;;  %v651_v9 = vpack.c.bf16 %v645_v6, %v645_v6  ;;  %v2716_v6 = vld [vmem:[%s3197_s8 + $0x5e4] ss:$16 sps:$4 sm:$0xff]  }
  0xbe   : > { %1902 = vmatprep.mubr.bf16.mxu0 %v652_v31  ;;  %2025 = vmatprep.mubr.bf16.mxu1 %v652_v31  ;;  %v2659_v31 = vld [vmem:[%s3197_s8 + $0x4ac] ss:$16 sps:$4 sm:$0xff]  }
  0xc0   : > { %1873 = vmatpush1.bf16.msra.mxu0 %v2534_v10  ;;  %1996 = vmatpush1.bf16.msra.mxu1 %v2537_v11  ;;  %v2624_v10 = vld [vmem:[%s3197_s8 + $0x400] ss:$16 sps:$4 sm:$0xff]   ;;  %v2627_v11 = vld [vmem:[%s3197_s8 + $0x408] ss:$16 sps:$4 sm:$0xff]  }
  0xc1   : > { %1874 = vmatprep.subr.bf16.mxu0 %v2542_v12  ;;  %1997 = vmatprep.subr.bf16.mxu1 %v2545_v13  ;;  %v648_v12 = vld [vmem:[%s3443_s0 + $0x28] sm:$0xff]  ;;  %v2632_v13 = vld [vmem:[%s3197_s8 + $0x424] ss:$16 sps:$4 sm:$0xff]  }
  0xc4   : > { %1875 = vmatpush1.bf16.msra.mxu0 %v2540_v14  ;;  %1998 = vmatpush1.bf16.msra.mxu1 %v2543_v15  ;;  %v2635_v14 = vld [vmem:[%s3197_s8 + $0x42c] ss:$16 sps:$4 sm:$0xff]   ;;  %v654_v15 = vpack.c.bf16 %v648_v12, %v648_v12  ;;  %v849_v12 = vlaneseq }
  0xc5   : > { %1876 = vmatprep.subr.bf16.mxu0 %v2548_v16  ;;  %1999 = vmatprep.subr.bf16.mxu1 %v2551_v17  ;;  %v2630_v16 = vld [vmem:[%s3197_s8 + $0x420] ss:$16 sps:$4 sm:$0xff]   ;;  %v2633_v17 = vld [vmem:[%s3197_s8 + $0x428] ss:$16 sps:$4 sm:$0xff]  }
  0xc8   : > { %1877 = vmatpush1.bf16.msra.mxu0 %v2546_v18  ;;  %2000 = vmatpush1.bf16.msra.mxu1 %v2549_v19  ;;  %v2638_v18 = vld [vmem:[%s3197_s8 + $0x444] ss:$16 sps:$4 sm:$0xff]   ;;  %v2641_v19 = vld [vmem:[%s3197_s8 + $0x44c] ss:$16 sps:$4 sm:$0xff]  }
  0xc9   : > { %1878 = vmatprep.subr.bf16.mxu0 %v2554_v20  ;;  %2001 = vmatprep.subr.bf16.mxu1 %v2557_v21  ;;  %v2636_v20 = vld [vmem:[%s3197_s8 + $0x440] ss:$16 sps:$4 sm:$0xff]   ;;  %v2639_v21 = vld [vmem:[%s3197_s8 + $0x448] ss:$16 sps:$4 sm:$0xff]  }
  0xcc   : > { %1879 = vmatpush1.bf16.msra.mxu0 %v2552_v22  ;;  %2002 = vmatpush1.bf16.msra.mxu1 %v2555_v23  ;;  %v2644_v22 = vld [vmem:[%s3197_s8 + $0x464] ss:$16 sps:$4 sm:$0xff]   ;;  %v2647_v23 = vld [vmem:[%s3197_s8 + $0x46c] ss:$16 sps:$4 sm:$0xff]  }
  0xcd   : > { %1880 = vmatprep.subr.bf16.mxu0 %v2560_v24  ;;  %2003 = vmatprep.subr.bf16.mxu1 %v2563_v25  ;;  %v2642_v24 = vld [vmem:[%s3197_s8 + $0x460] ss:$16 sps:$4 sm:$0xff]   ;;  %v2645_v25 = vld [vmem:[%s3197_s8 + $0x468] ss:$16 sps:$4 sm:$0xff]  }
  0xd0   : > { %1881 = vmatpush1.bf16.msra.mxu0 %v2558_v26  ;;  %2004 = vmatpush1.bf16.msra.mxu1 %v2561_v27  ;;  %v2650_v26 = vld [vmem:[%s3197_s8 + $0x484] ss:$16 sps:$4 sm:$0xff]   ;;  %v2653_v27 = vld [vmem:[%s3197_s8 + $0x48c] ss:$16 sps:$4 sm:$0xff]  }
  0xd1   : > { %1882 = vmatprep.subr.bf16.mxu0 %v2566_v28  ;;  %2005 = vmatprep.subr.bf16.mxu1 %v2569_v29  ;;  %v2648_v28 = vld [vmem:[%s3197_s8 + $0x480] ss:$16 sps:$4 sm:$0xff]   ;;  %v2651_v29 = vld [vmem:[%s3197_s8 + $0x488] ss:$16 sps:$4 sm:$0xff]  }
  0xd4   : > { %1883 = vmatpush1.bf16.msra.mxu0 %v2564_v32  ;;  %2006 = vmatpush1.bf16.msra.mxu1 %v2567_v33  ;;  %v2654_v32 = vld [vmem:[%s3197_s8 + $0x4a0] ss:$16 sps:$4 sm:$0xff]   ;;  %v2657_v33 = vld [vmem:[%s3197_s8 + $0x4a8] ss:$16 sps:$4 sm:$0xff]  }
  0xd5   : > { %1884 = vmatprep.subr.bf16.mxu0 %v2572_v34  ;;  %2007 = vmatprep.subr.bf16.mxu1 %v2575_v35  ;;  %v2662_v34 = vld [vmem:[%s3197_s8 + $0x4c4] ss:$16 sps:$4 sm:$0xff]   ;;  %v2665_v35 = vld [vmem:[%s3197_s8 + $0x4cc] ss:$16 sps:$4 sm:$0xff]  }
  0xd8   : > { %1885 = vmatpush1.bf16.msra.mxu0 %v2570_v36  ;;  %2008 = vmatpush1.bf16.msra.mxu1 %v2573_v37  ;;  %v2660_v36 = vld [vmem:[%s3197_s8 + $0x4c0] ss:$16 sps:$4 sm:$0xff]   ;;  %v2663_v37 = vld [vmem:[%s3197_s8 + $0x4c8] ss:$16 sps:$4 sm:$0xff]  }
  0xd9   : > { %1886 = vmatprep.subr.bf16.mxu0 %v2578_v38  ;;  %2009 = vmatprep.subr.bf16.mxu1 %v2581_v39  ;;  %v2668_v38 = vld [vmem:[%s3197_s8 + $0x4e4] ss:$16 sps:$4 sm:$0xff]   ;;  %v2671_v39 = vld [vmem:[%s3197_s8 + $0x4ec] ss:$16 sps:$4 sm:$0xff]  }
  0xdc   : > { %1887 = vmatpush1.bf16.msra.mxu0 %v2576_v40  ;;  %2010 = vmatpush1.bf16.msra.mxu1 %v2579_v41  ;;  %v2666_v40 = vld [vmem:[%s3197_s8 + $0x4e0] ss:$16 sps:$4 sm:$0xff]   ;;  %v2669_v41 = vld [vmem:[%s3197_s8 + $0x4e8] ss:$16 sps:$4 sm:$0xff]  }
  0xdd   : > { %1888 = vmatprep.subr.bf16.mxu0 %v2584_v42  ;;  %2011 = vmatprep.subr.bf16.mxu1 %v2587_v43  ;;  %v2674_v42 = vld [vmem:[%s3197_s8 + $0x504] ss:$16 sps:$4 sm:$0xff]   ;;  %v2677_v43 = vld [vmem:[%s3197_s8 + $0x50c] ss:$16 sps:$4 sm:$0xff]  }
  0xe0   : > { %1889 = vmatpush1.bf16.msra.mxu0 %v2582_v44  ;;  %2012 = vmatpush1.bf16.msra.mxu1 %v2585_v45  ;;  %v2672_v44 = vld [vmem:[%s3197_s8 + $0x500] ss:$16 sps:$4 sm:$0xff]   ;;  %v2675_v45 = vld [vmem:[%s3197_s8 + $0x508] ss:$16 sps:$4 sm:$0xff]  }
  0xe1   : > { %1890 = vmatprep.subr.bf16.mxu0 %v2590_v46  ;;  %2013 = vmatprep.subr.bf16.mxu1 %v2593_v47  ;;  %v2680_v46 = vld [vmem:[%s3197_s8 + $0x524] ss:$16 sps:$4 sm:$0xff]   ;;  %v2683_v47 = vld [vmem:[%s3197_s8 + $0x52c] ss:$16 sps:$4 sm:$0xff]  }
  0xe4   : > { %1891 = vmatpush1.bf16.msra.mxu0 %v2588_v48  ;;  %2014 = vmatpush1.bf16.msra.mxu1 %v2591_v49  ;;  %v2678_v48 = vld [vmem:[%s3197_s8 + $0x520] ss:$16 sps:$4 sm:$0xff]   ;;  %v2681_v49 = vld [vmem:[%s3197_s8 + $0x528] ss:$16 sps:$4 sm:$0xff]  }
  0xe5   : > { %1892 = vmatprep.subr.bf16.mxu0 %v2596_v50  ;;  %2015 = vmatprep.subr.bf16.mxu1 %v2599_v51  ;;  %v2686_v50 = vld [vmem:[%s3197_s8 + $0x544] ss:$16 sps:$4 sm:$0xff]   ;;  %v2689_v51 = vld [vmem:[%s3197_s8 + $0x54c] ss:$16 sps:$4 sm:$0xff]  }
  0xe8   : > { %1893 = vmatpush1.bf16.msra.mxu0 %v2594_v52  ;;  %2016 = vmatpush1.bf16.msra.mxu1 %v2597_v53  ;;  %v2684_v52 = vld [vmem:[%s3197_s8 + $0x540] ss:$16 sps:$4 sm:$0xff]   ;;  %v2687_v53 = vld [vmem:[%s3197_s8 + $0x548] ss:$16 sps:$4 sm:$0xff]  }
  0xe9   : > { %1894 = vmatprep.subr.bf16.mxu0 %v2602_v54  ;;  %2017 = vmatprep.subr.bf16.mxu1 %v2605_v55  ;;  %v2692_v54 = vld [vmem:[%s3197_s8 + $0x564] ss:$16 sps:$4 sm:$0xff]   ;;  %v2695_v55 = vld [vmem:[%s3197_s8 + $0x56c] ss:$16 sps:$4 sm:$0xff]  }
  0xec   : > { %1895 = vmatpush1.bf16.msra.mxu0 %v2600_v56  ;;  %2018 = vmatpush1.bf16.msra.mxu1 %v2603_v57  ;;  %v2690_v56 = vld [vmem:[%s3197_s8 + $0x560] ss:$16 sps:$4 sm:$0xff]   ;;  %v2693_v57 = vld [vmem:[%s3197_s8 + $0x568] ss:$16 sps:$4 sm:$0xff]  }
  0xed   : > { %1896 = vmatprep.subr.bf16.mxu0 %v2608_v58  ;;  %2019 = vmatprep.subr.bf16.mxu1 %v2611_v59  ;;  %v2698_v58 = vld [vmem:[%s3197_s8 + $0x584] ss:$16 sps:$4 sm:$0xff]   ;;  %v2701_v59 = vld [vmem:[%s3197_s8 + $0x58c] ss:$16 sps:$4 sm:$0xff]  }
  0xf0   : > { %1897 = vmatpush1.bf16.msra.mxu0 %v2606_v60  ;;  %2020 = vmatpush1.bf16.msra.mxu1 %v2609_v61  ;;  %v2696_v60 = vld [vmem:[%s3197_s8 + $0x580] ss:$16 sps:$4 sm:$0xff]   ;;  %v2699_v61 = vld [vmem:[%s3197_s8 + $0x588] ss:$16 sps:$4 sm:$0xff]  }
  0xf1   : > { %1898 = vmatprep.subr.bf16.mxu0 %v2614_v62  ;;  %2021 = vmatprep.subr.bf16.mxu1 %v2617_v63  ;;  %v2704_v62 = vld [vmem:[%s3197_s8 + $0x5a4] ss:$16 sps:$4 sm:$0xff]   ;;  %v2707_v63 = vld [vmem:[%s3197_s8 + $0x5ac] ss:$16 sps:$4 sm:$0xff]  }
  0xf4   : > { %1899 = vmatpush1.bf16.msra.mxu0 %v2612_v0  ;;  %2022 = vmatpush1.bf16.msra.mxu1 %v2615_v1  ;;  %v2702_v0 = vld [vmem:[%s3197_s8 + $0x5a0] ss:$16 sps:$4 sm:$0xff]   ;;  %v2705_v1 = vld [vmem:[%s3197_s8 + $0x5a8] ss:$16 sps:$4 sm:$0xff]  }
  0xf5   : > { %1900 = vmatprep.subr.bf16.mxu0 %v2620_v2  ;;  %2023 = vmatprep.subr.bf16.mxu1 %v2623_v3  ;;  %v2710_v2 = vld [vmem:[%s3197_s8 + $0x5c4] ss:$16 sps:$4 sm:$0xff]   ;;  %v2713_v3 = vld [vmem:[%s3197_s8 + $0x5cc] ss:$16 sps:$4 sm:$0xff]  }
  0xf8   : > { %1901 = vmatpush1.bf16.msra.mxu0 %v2618_v4  ;;  %2024 = vmatpush1.bf16.msra.mxu1 %v2621_v5  ;;  %v2708_v4 = vld [vmem:[%s3197_s8 + $0x5c0] ss:$16 sps:$4 sm:$0xff]   ;;  %v2711_v5 = vld [vmem:[%s3197_s8 + $0x5c8] ss:$16 sps:$4 sm:$0xff]  }
  0xf9   : > { %1911 = vmatprep.subr.bf16.mxu0 %v2626_v7  ;;  %2034 = vmatprep.subr.bf16.mxu1 %v2629_v8  ;;  %v2719_v7 = vld [vmem:[%s3197_s8 + $0x5ec] ss:$16 sps:$4 sm:$0xff]   ;;  %v2714_v8 = vld [vmem:[%s3197_s8 + $0x5e0] ss:$16 sps:$4 sm:$0xff]  }
  0xfb   : > { %1903 = vmatmul.mubr.bf16.vlgmr.msra.gmra.mrb[0].mxu0 %v651_v9  ;;  %2026 = vmatmul.mubr.bf16.vlgmr.msra.gmra.mrb[0].mxu1 %v651_v9  ;;  %v2717_v9 = vld [vmem:[%s3197_s8 + $0x5e8] ss:$16 sps:$4 sm:$0xff]  }
  0xfc   : > { %1912 = vmatpush1.bf16.msra.mxu0 %v2624_v10  ;;  %2035 = vmatpush1.bf16.msra.mxu1 %v2627_v11  ;;  %v647_v10 = vld [vmem:[%s3443_s0 + $0x20] sm:$0xff] }
  0xfd   : > { %1913 = vmatprep.subr.bf16.mxu0 %v2632_v13  ;;  %2036 = vmatprep.subr.bf16.mxu1 %v2635_v14  ;;  %v653_v11 = vpack.c.bf16 %v647_v10, %v647_v10  ;;  %v850_v13 = vshrl.u32 %v849_v12, 7 }
  0xfe   : > { %1943 = vmatprep.mubr.bf16.mxu0 %v654_v15  ;;  %2066 = vmatprep.mubr.bf16.mxu1 %v654_v15 }
  0xff   : > { %v851_v14 = vsub.s32 0, %v850_v13  ;;  %v859_v15 = vsub.s32 2, %v850_v13  ;;  %vm2077_vm0 = vcmp.ge.s32.totalorder %v850_v13, 1  ;;  %vm2078_vm1 = vcmp.lt.s32.totalorder %v850_v13, 5 }
 0x100   : > { %1914 = vmatpush1.bf16.msra.mxu0 %v2630_v16  ;;  %2037 = vmatpush1.bf16.msra.mxu1 %v2633_v17  ;;  %v847_v16 = vld [vmem:[%s629_s27] sm:$0xf]  ;;  %v855_v17 = vsub.s32 1, %v850_v13  ;;  %vm3418_vm2 = vmand %vm2077_vm0, %vm2078_vm1 }
 0x101   : > { %1915 = vmatprep.subr.bf16.mxu0 %v2638_v18  ;;  %2038 = vmatprep.subr.bf16.mxu1 %v2641_v19  ;;  %v863_v18 = vsub.s32 3, %v850_v13  ;;  %v852_v19 = vrot.slane %v847_v16, %v851_v14 }
 0x104   : > { %1916 = vmatpush1.bf16.msra.mxu0 %v2636_v20  ;;  %2039 = vmatpush1.bf16.msra.mxu1 %v2639_v21  ;;  %v860_v20 = vrot.slane %v847_v16, %v859_v15  ;;  %v856_v21 = vrot.slane %v847_v16, %v855_v17 }
 0x105   : > { %1917 = vmatprep.subr.bf16.mxu0 %v2644_v22  ;;  %2040 = vmatprep.subr.bf16.mxu1 %v2647_v23  ;;  %v864_v22 = vrot.slane %v847_v16, %v863_v18 }
 0x108   : > { %1918 = vmatpush1.bf16.msra.mxu0 %v2642_v24  ;;  %2041 = vmatpush1.bf16.msra.mxu1 %v2645_v25 }
 0x109   : > { %1919 = vmatprep.subr.bf16.mxu0 %v2650_v26  ;;  %2042 = vmatprep.subr.bf16.mxu1 %v2653_v27  ;;  %v2084_v27 = vld [vmem:[%s635_s29] sm:$0xff] }
 0x10c   : > { %1920 = vmatpush1.bf16.msra.mxu0 %v2648_v28  ;;  %2043 = vmatpush1.bf16.msra.mxu1 %v2651_v29 }
 0x10d   : > { %1921 = vmatprep.subr.bf16.mxu0 %v2656_v30  ;;  %2044 = vmatprep.subr.bf16.mxu1 %v2659_v31 }
 0x110   : > { %1922 = vmatpush1.bf16.msra.mxu0 %v2654_v32  ;;  %2045 = vmatpush1.bf16.msra.mxu1 %v2657_v33  ;;  %v2085_v32 = vld [vmem:[%s635_s29 + $0x8] sm:$0xff] }
 0x111   : > { %1923 = vmatprep.subr.bf16.mxu0 %v2662_v34  ;;  %2046 = vmatprep.subr.bf16.mxu1 %v2665_v35 }
 0x114   : > { %1924 = vmatpush1.bf16.msra.mxu0 %v2660_v36  ;;  %2047 = vmatpush1.bf16.msra.mxu1 %v2663_v37 }
 0x115   : > { %1925 = vmatprep.subr.bf16.mxu0 %v2668_v38  ;;  %2048 = vmatprep.subr.bf16.mxu1 %v2671_v39  ;;  %v2086_v38 = vld [vmem:[%s635_s29 + $0x10] sm:$0xff] }
 0x118   : > { %1926 = vmatpush1.bf16.msra.mxu0 %v2666_v40  ;;  %2049 = vmatpush1.bf16.msra.mxu1 %v2669_v41 }
 0x119   : > { %1927 = vmatprep.subr.bf16.mxu0 %v2674_v42  ;;  %2050 = vmatprep.subr.bf16.mxu1 %v2677_v43 }
 0x11c   : > { %1928 = vmatpush1.bf16.msra.mxu0 %v2672_v44  ;;  %2051 = vmatpush1.bf16.msra.mxu1 %v2675_v45  ;;  %v2087_v44 = vld [vmem:[%s635_s29 + $0x18] sm:$0xff] }
 0x11d   : > { %1929 = vmatprep.subr.bf16.mxu0 %v2680_v46  ;;  %2052 = vmatprep.subr.bf16.mxu1 %v2683_v47 }
 0x120   : > { %1930 = vmatpush1.bf16.msra.mxu0 %v2678_v48  ;;  %2053 = vmatpush1.bf16.msra.mxu1 %v2681_v49 }
 0x121   : > { %1931 = vmatprep.subr.bf16.mxu0 %v2686_v50  ;;  %2054 = vmatprep.subr.bf16.mxu1 %v2689_v51 }
 0x124   : > { %1932 = vmatpush1.bf16.msra.mxu0 %v2684_v52  ;;  %2055 = vmatpush1.bf16.msra.mxu1 %v2687_v53 }
 0x125   : > { %1933 = vmatprep.subr.bf16.mxu0 %v2692_v54  ;;  %2056 = vmatprep.subr.bf16.mxu1 %v2695_v55 }
 0x128   : > { %1934 = vmatpush1.bf16.msra.mxu0 %v2690_v56  ;;  %2057 = vmatpush1.bf16.msra.mxu1 %v2693_v57 }
 0x129   : > { %1935 = vmatprep.subr.bf16.mxu0 %v2698_v58  ;;  %2058 = vmatprep.subr.bf16.mxu1 %v2701_v59 }
 0x12c   : > { %1936 = vmatpush1.bf16.msra.mxu0 %v2696_v60  ;;  %2059 = vmatpush1.bf16.msra.mxu1 %v2699_v61 }
 0x12d   : > { %1937 = vmatprep.subr.bf16.mxu0 %v2704_v62  ;;  %2060 = vmatprep.subr.bf16.mxu1 %v2707_v63 }
 0x130   : > { %1938 = vmatpush1.bf16.msra.mxu0 %v2702_v0  ;;  %2061 = vmatpush1.bf16.msra.mxu1 %v2705_v1 }
 0x131   : > { %1939 = vmatprep.subr.bf16.mxu0 %v2710_v2  ;;  %2062 = vmatprep.subr.bf16.mxu1 %v2713_v3 }
 0x134   : > { %1940 = vmatpush1.bf16.msra.mxu0 %v2708_v4  ;;  %2063 = vmatpush1.bf16.msra.mxu1 %v2711_v5 }
 0x135   : > { %1941 = vmatprep.subr.bf16.mxu0 %v2716_v6  ;;  %2064 = vmatprep.subr.bf16.mxu1 %v2719_v7 }
 0x138   : > { %1942 = vmatpush1.bf16.msra.mxu0 %v2714_v8  ;;  %2065 = vmatpush1.bf16.msra.mxu1 %v2717_v9 }
 0x13b   : > { %1944 = vmatmul.mubr.bf16.vlgmr.msra.gmra.mrb[0].mxu0 %v653_v11  ;;  %2067 = vmatmul.mubr.bf16.vlgmr.msra.gmra.mrb[0].mxu1 %v653_v11 }
 0x20e   : > { %v1945_v23 = vpop.f32.mrb[0].mxu0  ;;  %v2068_v25 = vpop.f32.mrb[0].mxu1 }
 0x20f   : > { %v2386_v26 = vadd.f32 %v1945_v23, %v852_v19  ;;  %v2388_v28 = vadd.f32 %v2068_v25, %v860_v20  ;;  %v1947_v29 = vpop.f32.mrb[1].mxu0  ;;  %v2070_v30 = vpop.f32.mrb[1].mxu1 }
 0x210   : > { %v2387_v31 = vadd.f32 %v1947_v29, %v856_v21  ;;  %v2389_v33 = vadd.f32 %v2070_v30, %v864_v22  ;;  %v1949_v34 = vpop.f32.mrb[2].mxu0  ;;  %v2072_v35 = vpop.f32.mrb[2].mxu1 }
 0x211   : > { %v2080_v36 = vsel %vm3418_vm2, %v2386_v26, 0.0  ;;  %v2082_v37 = vsel %vm3418_vm2, %v2388_v28, 0.0  ;;  %v1950_v39 = vpop.f32.mrb[3].mxu0  ;;  %v2073_v40 = vpop.f32.mrb[3].mxu1 }
 0x212   : > { %v2088_v41 = vadd.f32 %v2084_v27, %v2080_v36  ;;  %v2081_v42 = vsel %vm3418_vm2, %v2387_v31, 0.0  ;;  %v2083_v43 = vsel %vm3418_vm2, %v2389_v33, 0.0  ;;  %v2090_v46 = vadd.f32 %v2086_v38, %v2082_v37 }
 0x213   : > { %v2089_v45 = vadd.f32 %v2085_v32, %v2081_v42  ;;  %v2091_v47 = vadd.f32 %v2087_v44, %v2083_v43 }
 0x214   : > { %2092 = vst [vmem:[%s641_s6] sm:$0xff] %v2088_v41  ;;  %2094 = vst [vmem:[%s641_s6 + $0x10] sm:$0xff] %v2090_v46 }
 0x215   : > { %2093 = vst [vmem:[%s641_s6 + $0x8] sm:$0xff] %v2089_v45  ;;  %2095 = vst [vmem:[%s641_s6 + $0x18] sm:$0xff] %v2091_v47 }
 0x216 PF: > { %p11_p9 = scmp.ge.s32.totalorder %s2786_s19, 4   ;;  %s3450_s15 = smov %s2738_s16 }
 0x217   : > { %s3451_s16 = smov %s2795_s22  ;;  %s3452_s17 = smov %s2786_s19 }
 0x218   :  { %13 = sbr.rel (!%p11_p9) target bundleno = 2 (0x2), region = 100 }

// kernel: _lambda_.4
= control target key start
LH: loop header
LB: loop body
LE: loop exit
PB: predicated region body
PF: predicated region fallthrough
CT: control target
= control target key end

     0   :  { %s9597_s24 = smov 0   ;;  %s9599_s25 = smov 0   ;;  %s12287_s0 = inlined_call_operand.vmem [shape: f32[8,1024], index: 0, kind: input, shape index: {}]   ;;  %s12288_s1 = inlined_call_operand.vmem [shape: f32[1,1024], index: 1, kind: input, shape index: {}]   ;;  %s12289_s2 = inlined_call_operand.vmem [shape: f32[1,1024], index: 2, kind: input, shape index: {}, may-alias: {2,6}]   ;;  %s12290_s3 = inlined_call_operand.vmem [shape: bf16[1024,3072], index: 3, kind: input, shape index: {}]   ;;  %s12291_s4 = inlined_call_operand.vmem [shape: f32[1,3072], index: 4, kind: input, shape index: {}]   ;;  %s12292_s5 = inlined_call_operand.vmem [shape: bf16[1024,1024], index: 5, kind: input, shape index: {}]   ;;  %s12293_s6 = inlined_call_operand.vmem [shape: f32[1,1024], index: 6, kind: input, shape index: {}, may-alias: {2,6}]   ;;  %s12294_s7 = inlined_call_operand.vmem [shape: f32[8,1024], index: 7, kind: output, shape index: {}]  }
   0x1   :  { %s9601_s26 = smov 0  }
   0x2 LB: > { %s9613_s27 = sadd.s32 4294967295, %s9552_s26   ;;  %s9616_s28 = sadd.s32 1, %s9552_s26   ;;  %s9552_s26 = sphi %s9601_s26, %s12297_s26   ;;  %s9548_s25 = sphi %s9599_s25, %s12296_s25   ;;  %s9544_s24 = sphi %s9597_s24, %s12295_s24  }
   0x3   : > { %s84_s29 = ssub.s32 %s9552_s26, %s9616_s28  ;;  %s87_s30 = sadd.s32 1, %s9548_s25 }
   0x4   : > { %p85_p0 = scmp.eq.s32.totalorder %s84_s29, 0  ;;  %p94_p1 = scmp.ne.s32.totalorder %s9548_s25, %s9544_s24 }
   0x5   : > { %p95_p2 = scmp.eq.s32.totalorder %s9552_s26, 0  ;;  %p8114_p4 = scmp.ge.s32.totalorder %s9552_s26, 6 }
   0x6   : > { %s9625_s8 = scalar_select %p85_p0, %s9548_s25, %s87_s30  }
   0x7   : > { %p96_p3 = por %p95_p2, %p94_p1  ;;  %224 = sbr.rel (%p8114_p4) target bundleno = 146 (0x92), region = 36 }
   0xe   : > { %227 = sbr.rel (!%p96_p3) target bundleno = 146 (0x92), region = 40  ;;  %s229_s9 = sand.u32 (%p96_p3), 1, %s9548_s25  }
   0xf   : > { %s8923_s10 = sshll.u32 (%p96_p3), %s9552_s26, 4  ;;  %s8115_s11 = sshll.u32 (%p96_p3), %s229_s9, 11 }
  0x10   : > { %s9633_s14 = scalar_lea.vmem (%p96_p3), %s12290_s3, %s8923_s10  ;;  %s9638_s15 = scalar_lea.vmem (%p96_p3), [#allocation5], %s8115_s11 }
  0x11   : > { %v247_v0 = vld [vmem:[%s9633_s14] sm:$0xff] (%p96_p3)  ;;  %v249_v1 = vld [vmem:[%s9633_s14 + $0x8] sm:$0xff] (%p96_p3) }
  0x12   : > { %v251_v2 = vld [vmem:[%s9633_s14 + $0x60] sm:$0xff] (%p96_p3)  ;;  %248 = vst [vmem:[%s9638_s15] sm:$0xff] (%p96_p3), %v247_v0  ;;  %250 = vst [vmem:[%s9638_s15 + $0x8] sm:$0xff] (%p96_p3), %v249_v1  ;;  %v253_v3 = vld [vmem:[%s9633_s14 + $0x68] sm:$0xff] (%p96_p3) }
  0x13   : > { %252 = vst [vmem:[%s9638_s15 + $0x10] sm:$0xff] (%p96_p3), %v251_v2  ;;  %v255_v4 = vld [vmem:[%s9633_s14 + $0xc0] sm:$0xff] (%p96_p3)  ;;  %v257_v5 = vld [vmem:[%s9633_s14 + $0xc8] sm:$0xff] (%p96_p3)  ;;  %254 = vst [vmem:[%s9638_s15 + $0x18] sm:$0xff] (%p96_p3), %v253_v3 }
  0x14   : > { %256 = vst [vmem:[%s9638_s15 + $0x20] sm:$0xff] (%p96_p3), %v255_v4  ;;  %258 = vst [vmem:[%s9638_s15 + $0x28] sm:$0xff] (%p96_p3), %v257_v5  ;;  %v259_v6 = vld [vmem:[%s9633_s14 + $0x120] sm:$0xff] (%p96_p3)  ;;  %v261_v7 = vld [vmem:[%s9633_s14 + $0x128] sm:$0xff] (%p96_p3) }
  0x15   : > { %v263_v8 = vld [vmem:[%s9633_s14 + $0x180] sm:$0xff]  ;;  %260 = vst [vmem:[%s9638_s15 + $0x30] sm:$0xff] %v259_v6  ;;  %262 = vst [vmem:[%s9638_s15 + $0x38] sm:$0xff] %v261_v7  ;;  %v265_v9 = vld [vmem:[%s9633_s14 + $0x188] sm:$0xff] }
  0x16   : > { %264 = vst [vmem:[%s9638_s15 + $0x40] sm:$0xff] %v263_v8  ;;  %v267_v10 = vld [vmem:[%s9633_s14 + $0x1e0] sm:$0xff]  ;;  %v269_v11 = vld [vmem:[%s9633_s14 + $0x1e8] sm:$0xff]  ;;  %266 = vst [vmem:[%s9638_s15 + $0x48] sm:$0xff] %v265_v9 }
  0x17   : > { %268 = vst [vmem:[%s9638_s15 + $0x50] sm:$0xff] %v267_v10  ;;  %270 = vst [vmem:[%s9638_s15 + $0x58] sm:$0xff] %v269_v11  ;;  %v271_v12 = vld [vmem:[%s9633_s14 + $0x240] sm:$0xff]  ;;  %v273_v13 = vld [vmem:[%s9633_s14 + $0x248] sm:$0xff] }
  0x18   : > { %v275_v14 = vld [vmem:[%s9633_s14 + $0x2a0] sm:$0xff]  ;;  %272 = vst [vmem:[%s9638_s15 + $0x60] sm:$0xff] %v271_v12  ;;  %274 = vst [vmem:[%s9638_s15 + $0x68] sm:$0xff] %v273_v13  ;;  %v277_v15 = vld [vmem:[%s9633_s14 + $0x2a8] sm:$0xff] }
  0x19   : > { %276 = vst [vmem:[%s9638_s15 + $0x70] sm:$0xff] %v275_v14  ;;  %v279_v16 = vld [vmem:[%s9633_s14 + $0x300] sm:$0xff]  ;;  %v281_v17 = vld [vmem:[%s9633_s14 + $0x308] sm:$0xff]  ;;  %278 = vst [vmem:[%s9638_s15 + $0x78] sm:$0xff] %v277_v15 }
  0x1a   : > { %280 = vst [vmem:[%s9638_s15 + $0x80] sm:$0xff] %v279_v16  ;;  %282 = vst [vmem:[%s9638_s15 + $0x88] sm:$0xff] %v281_v17  ;;  %v283_v18 = vld [vmem:[%s9633_s14 + $0x360] sm:$0xff]  ;;  %v285_v19 = vld [vmem:[%s9633_s14 + $0x368] sm:$0xff] }
  0x1b   : > { %v287_v20 = vld [vmem:[%s9633_s14 + $0x3c0] sm:$0xff]  ;;  %284 = vst [vmem:[%s9638_s15 + $0x90] sm:$0xff] %v283_v18  ;;  %286 = vst [vmem:[%s9638_s15 + $0x98] sm:$0xff] %v285_v19  ;;  %v289_v21 = vld [vmem:[%s9633_s14 + $0x3c8] sm:$0xff] }
  0x1c   : > { %288 = vst [vmem:[%s9638_s15 + $0xa0] sm:$0xff] %v287_v20  ;;  %v291_v22 = vld [vmem:[%s9633_s14 + $0x420] sm:$0xff]  ;;  %v293_v23 = vld [vmem:[%s9633_s14 + $0x428] sm:$0xff]  ;;  %290 = vst [vmem:[%s9638_s15 + $0xa8] sm:$0xff] %v289_v21 }
  0x1d   : > { %292 = vst [vmem:[%s9638_s15 + $0xb0] sm:$0xff] %v291_v22  ;;  %294 = vst [vmem:[%s9638_s15 + $0xb8] sm:$0xff] %v293_v23  ;;  %v295_v24 = vld [vmem:[%s9633_s14 + $0x480] sm:$0xff]  ;;  %v297_v25 = vld [vmem:[%s9633_s14 + $0x488] sm:$0xff] }
  0x1e   : > { %v299_v26 = vld [vmem:[%s9633_s14 + $0x4e0] sm:$0xff]  ;;  %296 = vst [vmem:[%s9638_s15 + $0xc0] sm:$0xff] %v295_v24  ;;  %298 = vst [vmem:[%s9638_s15 + $0xc8] sm:$0xff] %v297_v25  ;;  %v301_v27 = vld [vmem:[%s9633_s14 + $0x4e8] sm:$0xff] }
  0x1f   : > { %300 = vst [vmem:[%s9638_s15 + $0xd0] sm:$0xff] %v299_v26  ;;  %v303_v28 = vld [vmem:[%s9633_s14 + $0x540] sm:$0xff]  ;;  %v305_v29 = vld [vmem:[%s9633_s14 + $0x548] sm:$0xff]  ;;  %302 = vst [vmem:[%s9638_s15 + $0xd8] sm:$0xff] %v301_v27 }
  0x20   : > { %304 = vst [vmem:[%s9638_s15 + $0xe0] sm:$0xff] %v303_v28  ;;  %306 = vst [vmem:[%s9638_s15 + $0xe8] sm:$0xff] %v305_v29  ;;  %v307_v30 = vld [vmem:[%s9633_s14 + $0x5a0] sm:$0xff]  ;;  %v309_v31 = vld [vmem:[%s9633_s14 + $0x5a8] sm:$0xff] }
  0x21   : > { %v311_v32 = vld [vmem:[%s9633_s14 + $0x600] sm:$0xff]  ;;  %308 = vst [vmem:[%s9638_s15 + $0xf0] sm:$0xff] %v307_v30  ;;  %310 = vst [vmem:[%s9638_s15 + $0xf8] sm:$0xff] %v309_v31  ;;  %v313_v33 = vld [vmem:[%s9633_s14 + $0x608] sm:$0xff] }
  0x22   : > { %312 = vst [vmem:[%s9638_s15 + $0x100] sm:$0xff] %v311_v32  ;;  %v315_v34 = vld [vmem:[%s9633_s14 + $0x660] sm:$0xff]  ;;  %v317_v35 = vld [vmem:[%s9633_s14 + $0x668] sm:$0xff]  ;;  %314 = vst [vmem:[%s9638_s15 + $0x108] sm:$0xff] %v313_v33 }
  0x23   : > { %316 = vst [vmem:[%s9638_s15 + $0x110] sm:$0xff] %v315_v34  ;;  %318 = vst [vmem:[%s9638_s15 + $0x118] sm:$0xff] %v317_v35  ;;  %v319_v36 = vld [vmem:[%s9633_s14 + $0x6c0] sm:$0xff]  ;;  %v321_v37 = vld [vmem:[%s9633_s14 + $0x6c8] sm:$0xff] }
  0x24   : > { %v323_v38 = vld [vmem:[%s9633_s14 + $0x720] sm:$0xff]  ;;  %320 = vst [vmem:[%s9638_s15 + $0x120] sm:$0xff] %v319_v36  ;;  %322 = vst [vmem:[%s9638_s15 + $0x128] sm:$0xff] %v321_v37  ;;  %v325_v39 = vld [vmem:[%s9633_s14 + $0x728] sm:$0xff] }
  0x25   : > { %324 = vst [vmem:[%s9638_s15 + $0x130] sm:$0xff] %v323_v38  ;;  %v327_v40 = vld [vmem:[%s9633_s14 + $0x780] sm:$0xff]  ;;  %v329_v41 = vld [vmem:[%s9633_s14 + $0x788] sm:$0xff]  ;;  %326 = vst [vmem:[%s9638_s15 + $0x138] sm:$0xff] %v325_v39 }
  0x26   : > { %328 = vst [vmem:[%s9638_s15 + $0x140] sm:$0xff] %v327_v40  ;;  %330 = vst [vmem:[%s9638_s15 + $0x148] sm:$0xff] %v329_v41  ;;  %v331_v42 = vld [vmem:[%s9633_s14 + $0x7e0] sm:$0xff]  ;;  %v333_v43 = vld [vmem:[%s9633_s14 + $0x7e8] sm:$0xff] }
  0x27   : > { %v335_v44 = vld [vmem:[%s9633_s14 + $0x840] sm:$0xff]  ;;  %332 = vst [vmem:[%s9638_s15 + $0x150] sm:$0xff] %v331_v42  ;;  %334 = vst [vmem:[%s9638_s15 + $0x158] sm:$0xff] %v333_v43  ;;  %v337_v45 = vld [vmem:[%s9633_s14 + $0x848] sm:$0xff] }
  0x28   : > { %336 = vst [vmem:[%s9638_s15 + $0x160] sm:$0xff] %v335_v44  ;;  %v339_v46 = vld [vmem:[%s9633_s14 + $0x8a0] sm:$0xff]  ;;  %v341_v47 = vld [vmem:[%s9633_s14 + $0x8a8] sm:$0xff]  ;;  %338 = vst [vmem:[%s9638_s15 + $0x168] sm:$0xff] %v337_v45 }
  0x29   : > { %340 = vst [vmem:[%s9638_s15 + $0x170] sm:$0xff] %v339_v46  ;;  %342 = vst [vmem:[%s9638_s15 + $0x178] sm:$0xff] %v341_v47  ;;  %v343_v48 = vld [vmem:[%s9633_s14 + $0x900] sm:$0xff]  ;;  %v345_v49 = vld [vmem:[%s9633_s14 + $0x908] sm:$0xff] }
  0x2a   : > { %v347_v50 = vld [vmem:[%s9633_s14 + $0x960] sm:$0xff]  ;;  %344 = vst [vmem:[%s9638_s15 + $0x180] sm:$0xff] %v343_v48  ;;  %346 = vst [vmem:[%s9638_s15 + $0x188] sm:$0xff] %v345_v49  ;;  %v349_v51 = vld [vmem:[%s9633_s14 + $0x968] sm:$0xff] }
  0x2b   : > { %348 = vst [vmem:[%s9638_s15 + $0x190] sm:$0xff] %v347_v50  ;;  %v351_v52 = vld [vmem:[%s9633_s14 + $0x9c0] sm:$0xff]  ;;  %v353_v53 = vld [vmem:[%s9633_s14 + $0x9c8] sm:$0xff]  ;;  %350 = vst [vmem:[%s9638_s15 + $0x198] sm:$0xff] %v349_v51 }
  0x2c   : > { %352 = vst [vmem:[%s9638_s15 + $0x1a0] sm:$0xff] %v351_v52  ;;  %354 = vst [vmem:[%s9638_s15 + $0x1a8] sm:$0xff] %v353_v53  ;;  %v355_v54 = vld [vmem:[%s9633_s14 + $0xa20] sm:$0xff]  ;;  %v357_v55 = vld [vmem:[%s9633_s14 + $0xa28] sm:$0xff] }
  0x2d   : > { %v359_v56 = vld [vmem:[%s9633_s14 + $0xa80] sm:$0xff]  ;;  %356 = vst [vmem:[%s9638_s15 + $0x1b0] sm:$0xff] %v355_v54  ;;  %358 = vst [vmem:[%s9638_s15 + $0x1b8] sm:$0xff] %v357_v55  ;;  %v361_v57 = vld [vmem:[%s9633_s14 + $0xa88] sm:$0xff] }
  0x2e   : > { %360 = vst [vmem:[%s9638_s15 + $0x1c0] sm:$0xff] %v359_v56  ;;  %v363_v58 = vld [vmem:[%s9633_s14 + $0xae0] sm:$0xff]  ;;  %v365_v59 = vld [vmem:[%s9633_s14 + $0xae8] sm:$0xff]  ;;  %362 = vst [vmem:[%s9638_s15 + $0x1c8] sm:$0xff] %v361_v57 }
  0x2f   : > { %364 = vst [vmem:[%s9638_s15 + $0x1d0] sm:$0xff] %v363_v58  ;;  %366 = vst [vmem:[%s9638_s15 + $0x1d8] sm:$0xff] %v365_v59  ;;  %v367_v60 = vld [vmem:[%s9633_s14 + $0xb40] sm:$0xff]  ;;  %v369_v61 = vld [vmem:[%s9633_s14 + $0xb48] sm:$0xff] }
  0x30   : > { %v371_v62 = vld [vmem:[%s9633_s14 + $0xba0] sm:$0xff]  ;;  %368 = vst [vmem:[%s9638_s15 + $0x1e0] sm:$0xff] %v367_v60  ;;  %370 = vst [vmem:[%s9638_s15 + $0x1e8] sm:$0xff] %v369_v61  ;;  %v373_v63 = vld [vmem:[%s9633_s14 + $0xba8] sm:$0xff] }
  0x31   : > { %372 = vst [vmem:[%s9638_s15 + $0x1f0] sm:$0xff] %v371_v62  ;;  %v375_v0 = vld [vmem:[%s9633_s14 + $0xc00] sm:$0xff]  ;;  %v377_v1 = vld [vmem:[%s9633_s14 + $0xc08] sm:$0xff]  ;;  %374 = vst [vmem:[%s9638_s15 + $0x1f8] sm:$0xff] %v373_v63 }
  0x32   : > { %376 = vst [vmem:[%s9638_s15 + $0x200] sm:$0xff] %v375_v0  ;;  %378 = vst [vmem:[%s9638_s15 + $0x208] sm:$0xff] %v377_v1  ;;  %v379_v2 = vld [vmem:[%s9633_s14 + $0xc60] sm:$0xff]  ;;  %v381_v3 = vld [vmem:[%s9633_s14 + $0xc68] sm:$0xff] }
  0x33   : > { %v383_v4 = vld [vmem:[%s9633_s14 + $0xcc0] sm:$0xff]  ;;  %380 = vst [vmem:[%s9638_s15 + $0x210] sm:$0xff] %v379_v2  ;;  %382 = vst [vmem:[%s9638_s15 + $0x218] sm:$0xff] %v381_v3  ;;  %v385_v5 = vld [vmem:[%s9633_s14 + $0xcc8] sm:$0xff] }
  0x34   : > { %384 = vst [vmem:[%s9638_s15 + $0x220] sm:$0xff] %v383_v4  ;;  %v387_v6 = vld [vmem:[%s9633_s14 + $0xd20] sm:$0xff]  ;;  %v389_v7 = vld [vmem:[%s9633_s14 + $0xd28] sm:$0xff]  ;;  %386 = vst [vmem:[%s9638_s15 + $0x228] sm:$0xff] %v385_v5 }
  0x35   : > { %388 = vst [vmem:[%s9638_s15 + $0x230] sm:$0xff] %v387_v6  ;;  %390 = vst [vmem:[%s9638_s15 + $0x238] sm:$0xff] %v389_v7  ;;  %v391_v8 = vld [vmem:[%s9633_s14 + $0xd80] sm:$0xff]  ;;  %v393_v9 = vld [vmem:[%s9633_s14 + $0xd88] sm:$0xff] }
  0x36   : > { %v395_v10 = vld [vmem:[%s9633_s14 + $0xde0] sm:$0xff]  ;;  %392 = vst [vmem:[%s9638_s15 + $0x240] sm:$0xff] %v391_v8  ;;  %394 = vst [vmem:[%s9638_s15 + $0x248] sm:$0xff] %v393_v9  ;;  %v397_v11 = vld [vmem:[%s9633_s14 + $0xde8] sm:$0xff] }
  0x37   : > { %396 = vst [vmem:[%s9638_s15 + $0x250] sm:$0xff] %v395_v10  ;;  %v399_v12 = vld [vmem:[%s9633_s14 + $0xe40] sm:$0xff]  ;;  %v401_v13 = vld [vmem:[%s9633_s14 + $0xe48] sm:$0xff]  ;;  %398 = vst [vmem:[%s9638_s15 + $0x258] sm:$0xff] %v397_v11 }
  0x38   : > { %400 = vst [vmem:[%s9638_s15 + $0x260] sm:$0xff] %v399_v12  ;;  %402 = vst [vmem:[%s9638_s15 + $0x268] sm:$0xff] %v401_v13  ;;  %v403_v14 = vld [vmem:[%s9633_s14 + $0xea0] sm:$0xff]  ;;  %v405_v15 = vld [vmem:[%s9633_s14 + $0xea8] sm:$0xff] }
  0x39   : > { %v407_v16 = vld [vmem:[%s9633_s14 + $0xf00] sm:$0xff]  ;;  %404 = vst [vmem:[%s9638_s15 + $0x270] sm:$0xff] %v403_v14  ;;  %406 = vst [vmem:[%s9638_s15 + $0x278] sm:$0xff] %v405_v15  ;;  %v409_v17 = vld [vmem:[%s9633_s14 + $0xf08] sm:$0xff] }
  0x3a   : > { %408 = vst [vmem:[%s9638_s15 + $0x280] sm:$0xff] %v407_v16  ;;  %v411_v18 = vld [vmem:[%s9633_s14 + $0xf60] sm:$0xff]  ;;  %v413_v19 = vld [vmem:[%s9633_s14 + $0xf68] sm:$0xff]  ;;  %410 = vst [vmem:[%s9638_s15 + $0x288] sm:$0xff] %v409_v17 }
  0x3b   : > { %412 = vst [vmem:[%s9638_s15 + $0x290] sm:$0xff] %v411_v18  ;;  %414 = vst [vmem:[%s9638_s15 + $0x298] sm:$0xff] %v413_v19  ;;  %v415_v20 = vld [vmem:[%s9633_s14 + $0xfc0] sm:$0xff]  ;;  %v417_v21 = vld [vmem:[%s9633_s14 + $0xfc8] sm:$0xff] }
  0x3c   : > { %v419_v22 = vld [vmem:[%s9633_s14 + $0x1020] sm:$0xff]  ;;  %416 = vst [vmem:[%s9638_s15 + $0x2a0] sm:$0xff] %v415_v20  ;;  %418 = vst [vmem:[%s9638_s15 + $0x2a8] sm:$0xff] %v417_v21  ;;  %v421_v23 = vld [vmem:[%s9633_s14 + $0x1028] sm:$0xff] }
  0x3d   : > { %420 = vst [vmem:[%s9638_s15 + $0x2b0] sm:$0xff] %v419_v22  ;;  %v423_v24 = vld [vmem:[%s9633_s14 + $0x1080] sm:$0xff]  ;;  %v425_v25 = vld [vmem:[%s9633_s14 + $0x1088] sm:$0xff]  ;;  %422 = vst [vmem:[%s9638_s15 + $0x2b8] sm:$0xff] %v421_v23 }
  0x3e   : > { %424 = vst [vmem:[%s9638_s15 + $0x2c0] sm:$0xff] %v423_v24  ;;  %426 = vst [vmem:[%s9638_s15 + $0x2c8] sm:$0xff] %v425_v25  ;;  %v427_v26 = vld [vmem:[%s9633_s14 + $0x10e0] sm:$0xff]  ;;  %v429_v27 = vld [vmem:[%s9633_s14 + $0x10e8] sm:$0xff] }
  0x3f   : > { %v431_v28 = vld [vmem:[%s9633_s14 + $0x1140] sm:$0xff]  ;;  %428 = vst [vmem:[%s9638_s15 + $0x2d0] sm:$0xff] %v427_v26  ;;  %430 = vst [vmem:[%s9638_s15 + $0x2d8] sm:$0xff] %v429_v27  ;;  %v433_v29 = vld [vmem:[%s9633_s14 + $0x1148] sm:$0xff] }
  0x40   : > { %432 = vst [vmem:[%s9638_s15 + $0x2e0] sm:$0xff] %v431_v28  ;;  %v435_v30 = vld [vmem:[%s9633_s14 + $0x11a0] sm:$0xff]  ;;  %v437_v31 = vld [vmem:[%s9633_s14 + $0x11a8] sm:$0xff]  ;;  %434 = vst [vmem:[%s9638_s15 + $0x2e8] sm:$0xff] %v433_v29 }
  0x41   : > { %436 = vst [vmem:[%s9638_s15 + $0x2f0] sm:$0xff] %v435_v30  ;;  %438 = vst [vmem:[%s9638_s15 + $0x2f8] sm:$0xff] %v437_v31  ;;  %v439_v32 = vld [vmem:[%s9633_s14 + $0x1200] sm:$0xff]  ;;  %v441_v33 = vld [vmem:[%s9633_s14 + $0x1208] sm:$0xff] }
  0x42   : > { %v443_v34 = vld [vmem:[%s9633_s14 + $0x1260] sm:$0xff]  ;;  %440 = vst [vmem:[%s9638_s15 + $0x300] sm:$0xff] %v439_v32  ;;  %442 = vst [vmem:[%s9638_s15 + $0x308] sm:$0xff] %v441_v33  ;;  %v445_v35 = vld [vmem:[%s9633_s14 + $0x1268] sm:$0xff] }
  0x43   : > { %444 = vst [vmem:[%s9638_s15 + $0x310] sm:$0xff] %v443_v34  ;;  %v447_v36 = vld [vmem:[%s9633_s14 + $0x12c0] sm:$0xff]  ;;  %v449_v37 = vld [vmem:[%s9633_s14 + $0x12c8] sm:$0xff]  ;;  %446 = vst [vmem:[%s9638_s15 + $0x318] sm:$0xff] %v445_v35 }
  0x44   : > { %448 = vst [vmem:[%s9638_s15 + $0x320] sm:$0xff] %v447_v36  ;;  %450 = vst [vmem:[%s9638_s15 + $0x328] sm:$0xff] %v449_v37  ;;  %v451_v38 = vld [vmem:[%s9633_s14 + $0x1320] sm:$0xff]  ;;  %v453_v39 = vld [vmem:[%s9633_s14 + $0x1328] sm:$0xff] }
  0x45   : > { %v455_v40 = vld [vmem:[%s9633_s14 + $0x1380] sm:$0xff]  ;;  %452 = vst [vmem:[%s9638_s15 + $0x330] sm:$0xff] %v451_v38  ;;  %454 = vst [vmem:[%s9638_s15 + $0x338] sm:$0xff] %v453_v39  ;;  %v457_v41 = vld [vmem:[%s9633_s14 + $0x1388] sm:$0xff] }
  0x46   : > { %456 = vst [vmem:[%s9638_s15 + $0x340] sm:$0xff] %v455_v40  ;;  %v459_v42 = vld [vmem:[%s9633_s14 + $0x13e0] sm:$0xff]  ;;  %v461_v43 = vld [vmem:[%s9633_s14 + $0x13e8] sm:$0xff]  ;;  %458 = vst [vmem:[%s9638_s15 + $0x348] sm:$0xff] %v457_v41 }
  0x47   : > { %460 = vst [vmem:[%s9638_s15 + $0x350] sm:$0xff] %v459_v42  ;;  %462 = vst [vmem:[%s9638_s15 + $0x358] sm:$0xff] %v461_v43  ;;  %v463_v44 = vld [vmem:[%s9633_s14 + $0x1440] sm:$0xff]  ;;  %v465_v45 = vld [vmem:[%s9633_s14 + $0x1448] sm:$0xff] }
  0x48   : > { %v467_v46 = vld [vmem:[%s9633_s14 + $0x14a0] sm:$0xff]  ;;  %464 = vst [vmem:[%s9638_s15 + $0x360] sm:$0xff] %v463_v44  ;;  %466 = vst [vmem:[%s9638_s15 + $0x368] sm:$0xff] %v465_v45  ;;  %v469_v47 = vld [vmem:[%s9633_s14 + $0x14a8] sm:$0xff] }
  0x49   : > { %468 = vst [vmem:[%s9638_s15 + $0x370] sm:$0xff] %v467_v46  ;;  %v471_v48 = vld [vmem:[%s9633_s14 + $0x1500] sm:$0xff]  ;;  %v473_v49 = vld [vmem:[%s9633_s14 + $0x1508] sm:$0xff]  ;;  %470 = vst [vmem:[%s9638_s15 + $0x378] sm:$0xff] %v469_v47 }
  0x4a   : > { %472 = vst [vmem:[%s9638_s15 + $0x380] sm:$0xff] %v471_v48  ;;  %474 = vst [vmem:[%s9638_s15 + $0x388] sm:$0xff] %v473_v49  ;;  %v475_v50 = vld [vmem:[%s9633_s14 + $0x1560] sm:$0xff]  ;;  %v477_v51 = vld [vmem:[%s9633_s14 + $0x1568] sm:$0xff] }
  0x4b   : > { %v479_v52 = vld [vmem:[%s9633_s14 + $0x15c0] sm:$0xff]  ;;  %476 = vst [vmem:[%s9638_s15 + $0x390] sm:$0xff] %v475_v50  ;;  %478 = vst [vmem:[%s9638_s15 + $0x398] sm:$0xff] %v477_v51  ;;  %v481_v53 = vld [vmem:[%s9633_s14 + $0x15c8] sm:$0xff] }
  0x4c   : > { %480 = vst [vmem:[%s9638_s15 + $0x3a0] sm:$0xff] %v479_v52  ;;  %v483_v54 = vld [vmem:[%s9633_s14 + $0x1620] sm:$0xff]  ;;  %v485_v55 = vld [vmem:[%s9633_s14 + $0x1628] sm:$0xff]  ;;  %482 = vst [vmem:[%s9638_s15 + $0x3a8] sm:$0xff] %v481_v53 }
  0x4d   : > { %484 = vst [vmem:[%s9638_s15 + $0x3b0] sm:$0xff] %v483_v54  ;;  %486 = vst [vmem:[%s9638_s15 + $0x3b8] sm:$0xff] %v485_v55  ;;  %v487_v56 = vld [vmem:[%s9633_s14 + $0x1680] sm:$0xff]  ;;  %v489_v57 = vld [vmem:[%s9633_s14 + $0x1688] sm:$0xff] }
  0x4e   : > { %v491_v58 = vld [vmem:[%s9633_s14 + $0x16e0] sm:$0xff]  ;;  %488 = vst [vmem:[%s9638_s15 + $0x3c0] sm:$0xff] %v487_v56  ;;  %490 = vst [vmem:[%s9638_s15 + $0x3c8] sm:$0xff] %v489_v57  ;;  %v493_v59 = vld [vmem:[%s9633_s14 + $0x16e8] sm:$0xff] }
  0x4f   : > { %492 = vst [vmem:[%s9638_s15 + $0x3d0] sm:$0xff] %v491_v58  ;;  %v495_v60 = vld [vmem:[%s9633_s14 + $0x1740] sm:$0xff]  ;;  %v497_v61 = vld [vmem:[%s9633_s14 + $0x1748] sm:$0xff]  ;;  %494 = vst [vmem:[%s9638_s15 + $0x3d8] sm:$0xff] %v493_v59 }
  0x50   : > { %496 = vst [vmem:[%s9638_s15 + $0x3e0] sm:$0xff] %v495_v60  ;;  %498 = vst [vmem:[%s9638_s15 + $0x3e8] sm:$0xff] %v497_v61  ;;  %v499_v62 = vld [vmem:[%s9633_s14 + $0x17a0] sm:$0xff]  ;;  %v501_v63 = vld [vmem:[%s9633_s14 + $0x17a8] sm:$0xff] }
  0x51   : > { %v503_v0 = vld [vmem:[%s9633_s14 + $0x1800] sm:$0xff]  ;;  %500 = vst [vmem:[%s9638_s15 + $0x3f0] sm:$0xff] %v499_v62  ;;  %502 = vst [vmem:[%s9638_s15 + $0x3f8] sm:$0xff] %v501_v63  ;;  %v505_v1 = vld [vmem:[%s9633_s14 + $0x1808] sm:$0xff] }
  0x52   : > { %504 = vst [vmem:[%s9638_s15 + $0x400] sm:$0xff] %v503_v0  ;;  %v507_v2 = vld [vmem:[%s9633_s14 + $0x1860] sm:$0xff]  ;;  %v509_v3 = vld [vmem:[%s9633_s14 + $0x1868] sm:$0xff]  ;;  %506 = vst [vmem:[%s9638_s15 + $0x408] sm:$0xff] %v505_v1 }
  0x53   : > { %508 = vst [vmem:[%s9638_s15 + $0x410] sm:$0xff] %v507_v2  ;;  %510 = vst [vmem:[%s9638_s15 + $0x418] sm:$0xff] %v509_v3  ;;  %v511_v4 = vld [vmem:[%s9633_s14 + $0x18c0] sm:$0xff]  ;;  %v513_v5 = vld [vmem:[%s9633_s14 + $0x18c8] sm:$0xff] }
  0x54   : > { %v515_v6 = vld [vmem:[%s9633_s14 + $0x1920] sm:$0xff]  ;;  %512 = vst [vmem:[%s9638_s15 + $0x420] sm:$0xff] %v511_v4  ;;  %514 = vst [vmem:[%s9638_s15 + $0x428] sm:$0xff] %v513_v5  ;;  %v517_v7 = vld [vmem:[%s9633_s14 + $0x1928] sm:$0xff] }
  0x55   : > { %516 = vst [vmem:[%s9638_s15 + $0x430] sm:$0xff] %v515_v6  ;;  %v519_v8 = vld [vmem:[%s9633_s14 + $0x1980] sm:$0xff]  ;;  %v521_v9 = vld [vmem:[%s9633_s14 + $0x1988] sm:$0xff]  ;;  %518 = vst [vmem:[%s9638_s15 + $0x438] sm:$0xff] %v517_v7 }
  0x56   : > { %520 = vst [vmem:[%s9638_s15 + $0x440] sm:$0xff] %v519_v8  ;;  %522 = vst [vmem:[%s9638_s15 + $0x448] sm:$0xff] %v521_v9  ;;  %v523_v10 = vld [vmem:[%s9633_s14 + $0x19e0] sm:$0xff]  ;;  %v525_v11 = vld [vmem:[%s9633_s14 + $0x19e8] sm:$0xff] }
  0x57   : > { %v527_v12 = vld [vmem:[%s9633_s14 + $0x1a40] sm:$0xff]  ;;  %524 = vst [vmem:[%s9638_s15 + $0x450] sm:$0xff] %v523_v10  ;;  %526 = vst [vmem:[%s9638_s15 + $0x458] sm:$0xff] %v525_v11  ;;  %v529_v13 = vld [vmem:[%s9633_s14 + $0x1a48] sm:$0xff] }
  0x58   : > { %528 = vst [vmem:[%s9638_s15 + $0x460] sm:$0xff] %v527_v12  ;;  %v531_v14 = vld [vmem:[%s9633_s14 + $0x1aa0] sm:$0xff]  ;;  %v533_v15 = vld [vmem:[%s9633_s14 + $0x1aa8] sm:$0xff]  ;;  %530 = vst [vmem:[%s9638_s15 + $0x468] sm:$0xff] %v529_v13 }
  0x59   : > { %532 = vst [vmem:[%s9638_s15 + $0x470] sm:$0xff] %v531_v14  ;;  %534 = vst [vmem:[%s9638_s15 + $0x478] sm:$0xff] %v533_v15  ;;  %v535_v16 = vld [vmem:[%s9633_s14 + $0x1b00] sm:$0xff]  ;;  %v537_v17 = vld [vmem:[%s9633_s14 + $0x1b08] sm:$0xff] }
  0x5a   : > { %v539_v18 = vld [vmem:[%s9633_s14 + $0x1b60] sm:$0xff]  ;;  %536 = vst [vmem:[%s9638_s15 + $0x480] sm:$0xff] %v535_v16  ;;  %538 = vst [vmem:[%s9638_s15 + $0x488] sm:$0xff] %v537_v17  ;;  %v541_v19 = vld [vmem:[%s9633_s14 + $0x1b68] sm:$0xff] }
  0x5b   : > { %540 = vst [vmem:[%s9638_s15 + $0x490] sm:$0xff] %v539_v18  ;;  %v543_v20 = vld [vmem:[%s9633_s14 + $0x1bc0] sm:$0xff]  ;;  %v545_v21 = vld [vmem:[%s9633_s14 + $0x1bc8] sm:$0xff]  ;;  %542 = vst [vmem:[%s9638_s15 + $0x498] sm:$0xff] %v541_v19 }
  0x5c   : > { %544 = vst [vmem:[%s9638_s15 + $0x4a0] sm:$0xff] %v543_v20  ;;  %546 = vst [vmem:[%s9638_s15 + $0x4a8] sm:$0xff] %v545_v21  ;;  %v547_v22 = vld [vmem:[%s9633_s14 + $0x1c20] sm:$0xff]  ;;  %v549_v23 = vld [vmem:[%s9633_s14 + $0x1c28] sm:$0xff] }
  0x5d   : > { %v551_v24 = vld [vmem:[%s9633_s14 + $0x1c80] sm:$0xff]  ;;  %548 = vst [vmem:[%s9638_s15 + $0x4b0] sm:$0xff] %v547_v22  ;;  %550 = vst [vmem:[%s9638_s15 + $0x4b8] sm:$0xff] %v549_v23  ;;  %v553_v25 = vld [vmem:[%s9633_s14 + $0x1c88] sm:$0xff] }
  0x5e   : > { %552 = vst [vmem:[%s9638_s15 + $0x4c0] sm:$0xff] %v551_v24  ;;  %v555_v26 = vld [vmem:[%s9633_s14 + $0x1ce0] sm:$0xff]  ;;  %v557_v27 = vld [vmem:[%s9633_s14 + $0x1ce8] sm:$0xff]  ;;  %554 = vst [vmem:[%s9638_s15 + $0x4c8] sm:$0xff] %v553_v25 }
  0x5f   : > { %556 = vst [vmem:[%s9638_s15 + $0x4d0] sm:$0xff] %v555_v26  ;;  %558 = vst [vmem:[%s9638_s15 + $0x4d8] sm:$0xff] %v557_v27  ;;  %v559_v28 = vld [vmem:[%s9633_s14 + $0x1d40] sm:$0xff]  ;;  %v561_v29 = vld [vmem:[%s9633_s14 + $0x1d48] sm:$0xff] }
  0x60   : > { %v563_v30 = vld [vmem:[%s9633_s14 + $0x1da0] sm:$0xff]  ;;  %560 = vst [vmem:[%s9638_s15 + $0x4e0] sm:$0xff] %v559_v28  ;;  %562 = vst [vmem:[%s9638_s15 + $0x4e8] sm:$0xff] %v561_v29  ;;  %v565_v31 = vld [vmem:[%s9633_s14 + $0x1da8] sm:$0xff] }
  0x61   : > { %564 = vst [vmem:[%s9638_s15 + $0x4f0] sm:$0xff] %v563_v30  ;;  %v567_v32 = vld [vmem:[%s9633_s14 + $0x1e00] sm:$0xff]  ;;  %v569_v33 = vld [vmem:[%s9633_s14 + $0x1e08] sm:$0xff]  ;;  %566 = vst [vmem:[%s9638_s15 + $0x4f8] sm:$0xff] %v565_v31 }
  0x62   : > { %568 = vst [vmem:[%s9638_s15 + $0x500] sm:$0xff] %v567_v32  ;;  %570 = vst [vmem:[%s9638_s15 + $0x508] sm:$0xff] %v569_v33  ;;  %v571_v34 = vld [vmem:[%s9633_s14 + $0x1e60] sm:$0xff]  ;;  %v573_v35 = vld [vmem:[%s9633_s14 + $0x1e68] sm:$0xff] }
  0x63   : > { %v575_v36 = vld [vmem:[%s9633_s14 + $0x1ec0] sm:$0xff]  ;;  %572 = vst [vmem:[%s9638_s15 + $0x510] sm:$0xff] %v571_v34  ;;  %574 = vst [vmem:[%s9638_s15 + $0x518] sm:$0xff] %v573_v35  ;;  %v577_v37 = vld [vmem:[%s9633_s14 + $0x1ec8] sm:$0xff] }
  0x64   : > { %576 = vst [vmem:[%s9638_s15 + $0x520] sm:$0xff] %v575_v36  ;;  %v579_v38 = vld [vmem:[%s9633_s14 + $0x1f20] sm:$0xff]  ;;  %v581_v39 = vld [vmem:[%s9633_s14 + $0x1f28] sm:$0xff]  ;;  %578 = vst [vmem:[%s9638_s15 + $0x528] sm:$0xff] %v577_v37 }
  0x65   : > { %580 = vst [vmem:[%s9638_s15 + $0x530] sm:$0xff] %v579_v38  ;;  %582 = vst [vmem:[%s9638_s15 + $0x538] sm:$0xff] %v581_v39  ;;  %v583_v40 = vld [vmem:[%s9633_s14 + $0x1f80] sm:$0xff]  ;;  %v585_v41 = vld [vmem:[%s9633_s14 + $0x1f88] sm:$0xff] }
  0x66   : > { %v587_v42 = vld [vmem:[%s9633_s14 + $0x1fe0] sm:$0xff]  ;;  %584 = vst [vmem:[%s9638_s15 + $0x540] sm:$0xff] %v583_v40  ;;  %586 = vst [vmem:[%s9638_s15 + $0x548] sm:$0xff] %v585_v41  ;;  %v589_v43 = vld [vmem:[%s9633_s14 + $0x1fe8] sm:$0xff] }
  0x67   : > { %588 = vst [vmem:[%s9638_s15 + $0x550] sm:$0xff] %v587_v42  ;;  %v591_v44 = vld [vmem:[%s9633_s14 + $0x2040] sm:$0xff]  ;;  %v593_v45 = vld [vmem:[%s9633_s14 + $0x2048] sm:$0xff]  ;;  %590 = vst [vmem:[%s9638_s15 + $0x558] sm:$0xff] %v589_v43 }
  0x68   : > { %592 = vst [vmem:[%s9638_s15 + $0x560] sm:$0xff] %v591_v44  ;;  %594 = vst [vmem:[%s9638_s15 + $0x568] sm:$0xff] %v593_v45  ;;  %v595_v46 = vld [vmem:[%s9633_s14 + $0x20a0] sm:$0xff]  ;;  %v597_v47 = vld [vmem:[%s9633_s14 + $0x20a8] sm:$0xff] }
  0x69   : > { %v599_v48 = vld [vmem:[%s9633_s14 + $0x2100] sm:$0xff]  ;;  %596 = vst [vmem:[%s9638_s15 + $0x570] sm:$0xff] %v595_v46  ;;  %598 = vst [vmem:[%s9638_s15 + $0x578] sm:$0xff] %v597_v47  ;;  %v601_v49 = vld [vmem:[%s9633_s14 + $0x2108] sm:$0xff] }
  0x6a   : > { %600 = vst [vmem:[%s9638_s15 + $0x580] sm:$0xff] %v599_v48  ;;  %v603_v50 = vld [vmem:[%s9633_s14 + $0x2160] sm:$0xff]  ;;  %v605_v51 = vld [vmem:[%s9633_s14 + $0x2168] sm:$0xff]  ;;  %602 = vst [vmem:[%s9638_s15 + $0x588] sm:$0xff] %v601_v49 }
  0x6b   : > { %604 = vst [vmem:[%s9638_s15 + $0x590] sm:$0xff] %v603_v50  ;;  %606 = vst [vmem:[%s9638_s15 + $0x598] sm:$0xff] %v605_v51  ;;  %v607_v52 = vld [vmem:[%s9633_s14 + $0x21c0] sm:$0xff]  ;;  %v609_v53 = vld [vmem:[%s9633_s14 + $0x21c8] sm:$0xff] }
  0x6c   : > { %v611_v54 = vld [vmem:[%s9633_s14 + $0x2220] sm:$0xff]  ;;  %608 = vst [vmem:[%s9638_s15 + $0x5a0] sm:$0xff] %v607_v52  ;;  %610 = vst [vmem:[%s9638_s15 + $0x5a8] sm:$0xff] %v609_v53  ;;  %v613_v55 = vld [vmem:[%s9633_s14 + $0x2228] sm:$0xff] }
  0x6d   : > { %612 = vst [vmem:[%s9638_s15 + $0x5b0] sm:$0xff] %v611_v54  ;;  %v615_v56 = vld [vmem:[%s9633_s14 + $0x2280] sm:$0xff]  ;;  %v617_v57 = vld [vmem:[%s9633_s14 + $0x2288] sm:$0xff]  ;;  %614 = vst [vmem:[%s9638_s15 + $0x5b8] sm:$0xff] %v613_v55 }
  0x6e   : > { %616 = vst [vmem:[%s9638_s15 + $0x5c0] sm:$0xff] %v615_v56  ;;  %618 = vst [vmem:[%s9638_s15 + $0x5c8] sm:$0xff] %v617_v57  ;;  %v619_v58 = vld [vmem:[%s9633_s14 + $0x22e0] sm:$0xff]  ;;  %v621_v59 = vld [vmem:[%s9633_s14 + $0x22e8] sm:$0xff] }
  0x6f   : > { %v623_v60 = vld [vmem:[%s9633_s14 + $0x2340] sm:$0xff]  ;;  %620 = vst [vmem:[%s9638_s15 + $0x5d0] sm:$0xff] %v619_v58  ;;  %622 = vst [vmem:[%s9638_s15 + $0x5d8] sm:$0xff] %v621_v59  ;;  %v625_v61 = vld [vmem:[%s9633_s14 + $0x2348] sm:$0xff] }
  0x70   : > { %624 = vst [vmem:[%s9638_s15 + $0x5e0] sm:$0xff] %v623_v60  ;;  %v627_v62 = vld [vmem:[%s9633_s14 + $0x23a0] sm:$0xff]  ;;  %v629_v63 = vld [vmem:[%s9633_s14 + $0x23a8] sm:$0xff]  ;;  %626 = vst [vmem:[%s9638_s15 + $0x5e8] sm:$0xff] %v625_v61 }
  0x71   : > { %628 = vst [vmem:[%s9638_s15 + $0x5f0] sm:$0xff] %v627_v62  ;;  %630 = vst [vmem:[%s9638_s15 + $0x5f8] sm:$0xff] %v629_v63  ;;  %v631_v0 = vld [vmem:[%s9633_s14 + $0x2400] sm:$0xff]  ;;  %v633_v1 = vld [vmem:[%s9633_s14 + $0x2408] sm:$0xff] }
  0x72   : > { %v635_v2 = vld [vmem:[%s9633_s14 + $0x2460] sm:$0xff]  ;;  %632 = vst [vmem:[%s9638_s15 + $0x600] sm:$0xff] %v631_v0  ;;  %634 = vst [vmem:[%s9638_s15 + $0x608] sm:$0xff] %v633_v1  ;;  %v637_v3 = vld [vmem:[%s9633_s14 + $0x2468] sm:$0xff] }
  0x73   : > { %636 = vst [vmem:[%s9638_s15 + $0x610] sm:$0xff] %v635_v2  ;;  %v639_v4 = vld [vmem:[%s9633_s14 + $0x24c0] sm:$0xff]  ;;  %v641_v5 = vld [vmem:[%s9633_s14 + $0x24c8] sm:$0xff]  ;;  %638 = vst [vmem:[%s9638_s15 + $0x618] sm:$0xff] %v637_v3 }
  0x74   : > { %640 = vst [vmem:[%s9638_s15 + $0x620] sm:$0xff] %v639_v4  ;;  %642 = vst [vmem:[%s9638_s15 + $0x628] sm:$0xff] %v641_v5  ;;  %v643_v6 = vld [vmem:[%s9633_s14 + $0x2520] sm:$0xff]  ;;  %v645_v7 = vld [vmem:[%s9633_s14 + $0x2528] sm:$0xff] }
  0x75   : > { %v647_v8 = vld [vmem:[%s9633_s14 + $0x2580] sm:$0xff]  ;;  %644 = vst [vmem:[%s9638_s15 + $0x630] sm:$0xff] %v643_v6  ;;  %646 = vst [vmem:[%s9638_s15 + $0x638] sm:$0xff] %v645_v7  ;;  %v649_v9 = vld [vmem:[%s9633_s14 + $0x2588] sm:$0xff] }
  0x76   : > { %648 = vst [vmem:[%s9638_s15 + $0x640] sm:$0xff] %v647_v8  ;;  %v651_v10 = vld [vmem:[%s9633_s14 + $0x25e0] sm:$0xff]  ;;  %v653_v11 = vld [vmem:[%s9633_s14 + $0x25e8] sm:$0xff]  ;;  %650 = vst [vmem:[%s9638_s15 + $0x648] sm:$0xff] %v649_v9 }
  0x77   : > { %652 = vst [vmem:[%s9638_s15 + $0x650] sm:$0xff] %v651_v10  ;;  %654 = vst [vmem:[%s9638_s15 + $0x658] sm:$0xff] %v653_v11  ;;  %v655_v12 = vld [vmem:[%s9633_s14 + $0x2640] sm:$0xff]  ;;  %v657_v13 = vld [vmem:[%s9633_s14 + $0x2648] sm:$0xff] }
  0x78   : > { %v659_v14 = vld [vmem:[%s9633_s14 + $0x26a0] sm:$0xff]  ;;  %656 = vst [vmem:[%s9638_s15 + $0x660] sm:$0xff] %v655_v12  ;;  %658 = vst [vmem:[%s9638_s15 + $0x668] sm:$0xff] %v657_v13  ;;  %v661_v15 = vld [vmem:[%s9633_s14 + $0x26a8] sm:$0xff] }
  0x79   : > { %660 = vst [vmem:[%s9638_s15 + $0x670] sm:$0xff] %v659_v14  ;;  %v663_v16 = vld [vmem:[%s9633_s14 + $0x2700] sm:$0xff]  ;;  %v665_v17 = vld [vmem:[%s9633_s14 + $0x2708] sm:$0xff]  ;;  %662 = vst [vmem:[%s9638_s15 + $0x678] sm:$0xff] %v661_v15 }
  0x7a   : > { %664 = vst [vmem:[%s9638_s15 + $0x680] sm:$0xff] %v663_v16  ;;  %666 = vst [vmem:[%s9638_s15 + $0x688] sm:$0xff] %v665_v17  ;;  %v667_v18 = vld [vmem:[%s9633_s14 + $0x2760] sm:$0xff]  ;;  %v669_v19 = vld [vmem:[%s9633_s14 + $0x2768] sm:$0xff] }
  0x7b   : > { %v671_v20 = vld [vmem:[%s9633_s14 + $0x27c0] sm:$0xff]  ;;  %668 = vst [vmem:[%s9638_s15 + $0x690] sm:$0xff] %v667_v18  ;;  %670 = vst [vmem:[%s9638_s15 + $0x698] sm:$0xff] %v669_v19  ;;  %v673_v21 = vld [vmem:[%s9633_s14 + $0x27c8] sm:$0xff] }
  0x7c   : > { %672 = vst [vmem:[%s9638_s15 + $0x6a0] sm:$0xff] %v671_v20  ;;  %v675_v22 = vld [vmem:[%s9633_s14 + $0x2820] sm:$0xff]  ;;  %v677_v23 = vld [vmem:[%s9633_s14 + $0x2828] sm:$0xff]  ;;  %674 = vst [vmem:[%s9638_s15 + $0x6a8] sm:$0xff] %v673_v21 }
  0x7d   : > { %676 = vst [vmem:[%s9638_s15 + $0x6b0] sm:$0xff] %v675_v22  ;;  %678 = vst [vmem:[%s9638_s15 + $0x6b8] sm:$0xff] %v677_v23  ;;  %v679_v24 = vld [vmem:[%s9633_s14 + $0x2880] sm:$0xff]  ;;  %v681_v25 = vld [vmem:[%s9633_s14 + $0x2888] sm:$0xff] }
  0x7e   : > { %v683_v26 = vld [vmem:[%s9633_s14 + $0x28e0] sm:$0xff]  ;;  %680 = vst [vmem:[%s9638_s15 + $0x6c0] sm:$0xff] %v679_v24  ;;  %682 = vst [vmem:[%s9638_s15 + $0x6c8] sm:$0xff] %v681_v25  ;;  %v685_v27 = vld [vmem:[%s9633_s14 + $0x28e8] sm:$0xff] }
  0x7f   : > { %684 = vst [vmem:[%s9638_s15 + $0x6d0] sm:$0xff] %v683_v26  ;;  %v687_v28 = vld [vmem:[%s9633_s14 + $0x2940] sm:$0xff]  ;;  %v689_v29 = vld [vmem:[%s9633_s14 + $0x2948] sm:$0xff]  ;;  %686 = vst [vmem:[%s9638_s15 + $0x6d8] sm:$0xff] %v685_v27 }
  0x80   : > { %688 = vst [vmem:[%s9638_s15 + $0x6e0] sm:$0xff] %v687_v28  ;;  %690 = vst [vmem:[%s9638_s15 + $0x6e8] sm:$0xff] %v689_v29  ;;  %v691_v30 = vld [vmem:[%s9633_s14 + $0x29a0] sm:$0xff]  ;;  %v693_v31 = vld [vmem:[%s9633_s14 + $0x29a8] sm:$0xff] }
  0x81   : > { %v695_v32 = vld [vmem:[%s9633_s14 + $0x2a00] sm:$0xff]  ;;  %692 = vst [vmem:[%s9638_s15 + $0x6f0] sm:$0xff] %v691_v30  ;;  %694 = vst [vmem:[%s9638_s15 + $0x6f8] sm:$0xff] %v693_v31  ;;  %v697_v33 = vld [vmem:[%s9633_s14 + $0x2a08] sm:$0xff] }
  0x82   : > { %696 = vst [vmem:[%s9638_s15 + $0x700] sm:$0xff] %v695_v32  ;;  %v699_v34 = vld [vmem:[%s9633_s14 + $0x2a60] sm:$0xff]  ;;  %v701_v35 = vld [vmem:[%s9633_s14 + $0x2a68] sm:$0xff]  ;;  %698 = vst [vmem:[%s9638_s15 + $0x708] sm:$0xff] %v697_v33 }
  0x83   : > { %700 = vst [vmem:[%s9638_s15 + $0x710] sm:$0xff] %v699_v34  ;;  %702 = vst [vmem:[%s9638_s15 + $0x718] sm:$0xff] %v701_v35  ;;  %v703_v36 = vld [vmem:[%s9633_s14 + $0x2ac0] sm:$0xff]  ;;  %v705_v37 = vld [vmem:[%s9633_s14 + $0x2ac8] sm:$0xff] }
  0x84   : > { %v707_v38 = vld [vmem:[%s9633_s14 + $0x2b20] sm:$0xff]  ;;  %704 = vst [vmem:[%s9638_s15 + $0x720] sm:$0xff] %v703_v36  ;;  %706 = vst [vmem:[%s9638_s15 + $0x728] sm:$0xff] %v705_v37  ;;  %v709_v39 = vld [vmem:[%s9633_s14 + $0x2b28] sm:$0xff] }
  0x85   : > { %708 = vst [vmem:[%s9638_s15 + $0x730] sm:$0xff] %v707_v38  ;;  %v711_v40 = vld [vmem:[%s9633_s14 + $0x2b80] sm:$0xff]  ;;  %v713_v41 = vld [vmem:[%s9633_s14 + $0x2b88] sm:$0xff]  ;;  %710 = vst [vmem:[%s9638_s15 + $0x738] sm:$0xff] %v709_v39 }
  0x86   : > { %712 = vst [vmem:[%s9638_s15 + $0x740] sm:$0xff] %v711_v40  ;;  %714 = vst [vmem:[%s9638_s15 + $0x748] sm:$0xff] %v713_v41  ;;  %v715_v42 = vld [vmem:[%s9633_s14 + $0x2be0] sm:$0xff]  ;;  %v717_v43 = vld [vmem:[%s9633_s14 + $0x2be8] sm:$0xff] }
  0x87   : > { %v719_v44 = vld [vmem:[%s9633_s14 + $0x2c40] sm:$0xff]  ;;  %716 = vst [vmem:[%s9638_s15 + $0x750] sm:$0xff] %v715_v42  ;;  %718 = vst [vmem:[%s9638_s15 + $0x758] sm:$0xff] %v717_v43  ;;  %v721_v45 = vld [vmem:[%s9633_s14 + $0x2c48] sm:$0xff] }
  0x88   : > { %720 = vst [vmem:[%s9638_s15 + $0x760] sm:$0xff] %v719_v44  ;;  %v723_v46 = vld [vmem:[%s9633_s14 + $0x2ca0] sm:$0xff]  ;;  %v725_v47 = vld [vmem:[%s9633_s14 + $0x2ca8] sm:$0xff]  ;;  %722 = vst [vmem:[%s9638_s15 + $0x768] sm:$0xff] %v721_v45 }
  0x89   : > { %724 = vst [vmem:[%s9638_s15 + $0x770] sm:$0xff] %v723_v46  ;;  %726 = vst [vmem:[%s9638_s15 + $0x778] sm:$0xff] %v725_v47  ;;  %v727_v48 = vld [vmem:[%s9633_s14 + $0x2d00] sm:$0xff]  ;;  %v729_v49 = vld [vmem:[%s9633_s14 + $0x2d08] sm:$0xff] }
  0x8a   : > { %v731_v50 = vld [vmem:[%s9633_s14 + $0x2d60] sm:$0xff]  ;;  %728 = vst [vmem:[%s9638_s15 + $0x780] sm:$0xff] %v727_v48  ;;  %730 = vst [vmem:[%s9638_s15 + $0x788] sm:$0xff] %v729_v49  ;;  %v733_v51 = vld [vmem:[%s9633_s14 + $0x2d68] sm:$0xff] }
  0x8b   : > { %732 = vst [vmem:[%s9638_s15 + $0x790] sm:$0xff] %v731_v50  ;;  %v735_v52 = vld [vmem:[%s9633_s14 + $0x2dc0] sm:$0xff]  ;;  %v737_v53 = vld [vmem:[%s9633_s14 + $0x2dc8] sm:$0xff]  ;;  %734 = vst [vmem:[%s9638_s15 + $0x798] sm:$0xff] %v733_v51 }
  0x8c   : > { %736 = vst [vmem:[%s9638_s15 + $0x7a0] sm:$0xff] %v735_v52  ;;  %738 = vst [vmem:[%s9638_s15 + $0x7a8] sm:$0xff] %v737_v53  ;;  %v739_v54 = vld [vmem:[%s9633_s14 + $0x2e20] sm:$0xff]  ;;  %v741_v55 = vld [vmem:[%s9633_s14 + $0x2e28] sm:$0xff] }
  0x8d   : > { %v743_v56 = vld [vmem:[%s9633_s14 + $0x2e80] sm:$0xff]  ;;  %740 = vst [vmem:[%s9638_s15 + $0x7b0] sm:$0xff] %v739_v54  ;;  %742 = vst [vmem:[%s9638_s15 + $0x7b8] sm:$0xff] %v741_v55  ;;  %v745_v57 = vld [vmem:[%s9633_s14 + $0x2e88] sm:$0xff] }
  0x8e   : > { %744 = vst [vmem:[%s9638_s15 + $0x7c0] sm:$0xff] %v743_v56  ;;  %v747_v58 = vld [vmem:[%s9633_s14 + $0x2ee0] sm:$0xff]  ;;  %v749_v59 = vld [vmem:[%s9633_s14 + $0x2ee8] sm:$0xff]  ;;  %746 = vst [vmem:[%s9638_s15 + $0x7c8] sm:$0xff] %v745_v57 }
  0x8f   : > { %748 = vst [vmem:[%s9638_s15 + $0x7d0] sm:$0xff] %v747_v58  ;;  %750 = vst [vmem:[%s9638_s15 + $0x7d8] sm:$0xff] %v749_v59  ;;  %v751_v60 = vld [vmem:[%s9633_s14 + $0x2f40] sm:$0xff]  ;;  %v753_v61 = vld [vmem:[%s9633_s14 + $0x2f48] sm:$0xff] }
  0x90   : > { %v755_v62 = vld [vmem:[%s9633_s14 + $0x2fa0] sm:$0xff]  ;;  %752 = vst [vmem:[%s9638_s15 + $0x7e0] sm:$0xff] %v751_v60  ;;  %754 = vst [vmem:[%s9638_s15 + $0x7e8] sm:$0xff] %v753_v61  ;;  %v757_v63 = vld [vmem:[%s9633_s14 + $0x2fa8] sm:$0xff] }
  0x91   : > { %756 = vst [vmem:[%s9638_s15 + $0x7f0] sm:$0xff] %v755_v62  ;;  %758 = vst [vmem:[%s9638_s15 + $0x7f8] sm:$0xff] %v757_v63 }
  0x92 PF: > { %p8118_p5 = scmp.ge.s32.totalorder %s9552_s26, 1  ;;  %p771_p6 = scmp.lt.s32.totalorder %s9552_s26, 7 }
  0x94   : > { %p772_p7 = pnand %p8118_p5, %p771_p6 }
  0x95   : > { %s778_s16 = sand.u32 (!%p772_p7), 1, %s9544_s24   ;;  %s8120_s17 = sshll.u32 (!%p772_p7), %s9613_s27, 2 }
  0x96   : > { %775 = sbr.rel (%p772_p7) target bundleno = 2948 (0xb84), region = 67  ;;  %s8119_s18 = sshll.u32 (!%p772_p7), %s778_s16, 11 }
  0x97   : > { %p810_p8 = scmp.lt.s32.totalorder (!%p772_p7), %s8120_s17, 23  ;;  %s10159_s22 = scalar_lea.vmem (!%p772_p7), [#allocation5], %s8119_s18 }
  0x98   : > { %p8121_p9 = scmp.ne.s32.totalorder (!%p772_p7), %s9613_s27, 0 }
  0x9d   : > { %s12299_s17 = smov (!%p810_p8, %s8120_s17), 23  ;;  %817 = sbr.rel (%p8121_p9) target bundleno = 502 (0x1f6), region = 75 }
  0x9e   : > { %s812_s21 = scalar_lea.vmem %s12291_s4, %s12299_s17  ;;  %v818_v0 = vld [vmem:[%s12287_s0] sm:$0xff] (!%p8121_p9)  ;;  %v819_v1 = vld [vmem:[%s12287_s0 + $0x8] sm:$0xff] (!%p8121_p9)  ;;  %v820_v2 = vld [vmem:[%s12287_s0 + $0x10] sm:$0xff] (!%p8121_p9)  ;;  %v876_v40 = vlaneseq (!%p8121_p9) }
  0x9f   : > { %v828_v3 = vadd.f32 (!%p8121_p9), %v819_v1, %v818_v0  ;;  %v821_v4 = vld [vmem:[%s12287_s0 + $0x18] sm:$0xff] (!%p8121_p9)  ;;  %v822_v6 = vld [vmem:[%s12287_s0 + $0x20] sm:$0xff] (!%p8121_p9)  ;;  %v823_v8 = vld [vmem:[%s12287_s0 + $0x28] sm:$0xff] (!%p8121_p9) }
  0xa0   : > { %v824_v10 = vld [vmem:[%s12287_s0 + $0x30] sm:$0xff] (!%p8121_p9)  ;;  %v825_v12 = vld [vmem:[%s12287_s0 + $0x38] sm:$0xff] (!%p8121_p9)  ;;  %v877_v44 = vshrl.u32 (!%p8121_p9), %v876_v40, 7  ;;  %v826_v49 = vld [vmem:[%s12288_s1] sm:$0xff] (!%p8121_p9) }
  0xa1   : > { %v829_v5 = vadd.f32 (!%p8121_p9), %v828_v3, %v820_v2  ;;  %v827_v54 = vld [vmem:[%s12289_s2] sm:$0xff] (!%p8121_p9) }
  0xa2   : > { %v878_v45 = vsub.s32 (!%p8121_p9), 0, %v877_v44  ;;  %v882_v46 = vsub.s32 (!%p8121_p9), 1, %v877_v44  ;;  %v886_v47 = vsub.s32 (!%p8121_p9), 2, %v877_v44  ;;  %v890_v48 = vsub.s32 (!%p8121_p9), 3, %v877_v44 }
  0xa3   : > { %v830_v7 = vadd.f32 (!%p8121_p9), %v829_v5, %v821_v4  ;;  %v894_v50 = vsub.s32 (!%p8121_p9), 4, %v877_v44  ;;  %v898_v51 = vsub.s32 (!%p8121_p9), 5, %v877_v44  ;;  %v902_v52 = vsub.s32 (!%p8121_p9), 6, %v877_v44 }
  0xa4   : > { %v906_v53 = vsub.s32 7, %v877_v44  ;;  %v879_v55 = vrot.slane %v826_v49, %v878_v45  ;;  %v883_v56 = vrot.slane %v826_v49, %v882_v46  ;;  %v887_v57 = vrot.slane %v826_v49, %v886_v47 }
  0xa5   : > { %v831_v9 = vadd.f32 %v830_v7, %v822_v6  ;;  %v891_v58 = vrot.slane %v826_v49, %v890_v48  ;;  %v895_v59 = vrot.slane %v826_v49, %v894_v50  ;;  %v899_v60 = vrot.slane %v826_v49, %v898_v51 }
  0xa6   : > { %v903_v61 = vrot.slane %v826_v49, %v902_v52  ;;  %v907_v62 = vrot.slane %v826_v49, %v906_v53  ;;  %v928_v63 = vrot.slane %v827_v54, %v878_v45  ;;  %v948_v5 = vrot.slane %v827_v54, %v898_v51 }
  0xa7   : > { %v832_v11 = vadd.f32 %v831_v9, %v823_v8  ;;  %v956_v7 = vrot.slane %v827_v54, %v906_v53 }
  0xa9   : > { %v833_v13 = vadd.f32 %v832_v11, %v824_v10 }
  0xab   : > { %v834_v14 = vadd.f32 %v833_v13, %v825_v12 }
  0xad   : > { %835 = vadd.xlane.f32.xlu0 %v834_v14 }
 0x13a   : > { %v836_v15 = vpop.xlane.xlu0 %835 }
 0x13b   : > { %v838_v16 = vmul.f32 0.0009765625, %v836_v15 }
 0x13d   : > { %v839_v17 = vsub.f32 %v818_v0, %v838_v16  ;;  %v840_v18 = vsub.f32 %v819_v1, %v838_v16  ;;  %v841_v19 = vsub.f32 %v820_v2, %v838_v16  ;;  %v842_v20 = vsub.f32 %v821_v4, %v838_v16 }
 0x13e   : > { %v843_v23 = vsub.f32 %v822_v6, %v838_v16  ;;  %v844_v26 = vsub.f32 %v823_v8, %v838_v16  ;;  %v845_v29 = vsub.f32 %v824_v10, %v838_v16  ;;  %v846_v32 = vsub.f32 %v825_v12, %v838_v16 }
 0x13f   : > { %v847_v21 = vmul.f32 %v839_v17, %v839_v17  ;;  %v848_v22 = vmul.f32 %v840_v18, %v840_v18  ;;  %v849_v24 = vmul.f32 %v841_v19, %v841_v19  ;;  %v850_v27 = vmul.f32 %v842_v20, %v842_v20 }
 0x140   : > { %v851_v30 = vmul.f32 %v843_v23, %v843_v23  ;;  %v852_v33 = vmul.f32 %v844_v26, %v844_v26  ;;  %v853_v35 = vmul.f32 %v845_v29, %v845_v29  ;;  %v854_v37 = vmul.f32 %v846_v32, %v846_v32 }
 0x141   : > { %v855_v25 = vadd.f32 %v848_v22, %v847_v21  ;;  %v932_v0 = vrot.slane %v827_v54, %v882_v46  ;;  %v936_v1 = vrot.slane %v827_v54, %v886_v47  ;;  %v940_v2 = vrot.slane %v827_v54, %v890_v48 }
 0x142   : > { %v944_v4 = vrot.slane %v827_v54, %v894_v50  ;;  %v952_v6 = vrot.slane %v827_v54, %v902_v52 }
 0x143   : > { %v856_v28 = vadd.f32 %v855_v25, %v849_v24 }
 0x145   : > { %v857_v31 = vadd.f32 %v856_v28, %v850_v27 }
 0x147   : > { %v858_v34 = vadd.f32 %v857_v31, %v851_v30 }
 0x149   : > { %v859_v36 = vadd.f32 %v858_v34, %v852_v33 }
 0x14b   : > { %v860_v38 = vadd.f32 %v859_v36, %v853_v35 }
 0x14d   : > { %v861_v39 = vadd.f32 %v860_v38, %v854_v37 }
 0x14f   : > { %862 = vadd.xlane.f32.xlu0 %v861_v39 }
 0x1dc   : > { %v863_v41 = vpop.xlane.xlu0 %862 }
 0x1dd   : > { %v864_v42 = vmul.f32 0.0009765625, %v863_v41 }
 0x1df   : > { %v865_v43 = vadd.f32 1e-06, %v864_v42 }
 0x1e1   : > { %9095 = vrsqrt.f32 %v865_v43 }
 0x1eb   : > { %v9096_v3 = vpop.eup %9095 }
 0x1ec   : > { %v867_v8 = vmul.f32 %v9096_v3, %v839_v17  ;;  %v868_v9 = vmul.f32 %v9096_v3, %v840_v18  ;;  %v869_v10 = vmul.f32 %v9096_v3, %v841_v19  ;;  %v870_v11 = vmul.f32 %v9096_v3, %v842_v20 }
 0x1ed   : > { %v871_v12 = vmul.f32 %v9096_v3, %v843_v23  ;;  %v872_v13 = vmul.f32 %v9096_v3, %v844_v26  ;;  %v873_v14 = vmul.f32 %v9096_v3, %v845_v29  ;;  %v874_v15 = vmul.f32 %v9096_v3, %v846_v32 }
 0x1ee   : > { %v916_v16 = vmul.f32 %v879_v55, %v867_v8  ;;  %v917_v21 = vmul.f32 %v883_v56, %v868_v9  ;;  %v918_v22 = vmul.f32 %v887_v57, %v869_v10  ;;  %v919_v24 = vmul.f32 %v891_v58, %v870_v11 }
 0x1ef   : > { %v920_v25 = vmul.f32 %v895_v59, %v871_v12  ;;  %v921_v27 = vmul.f32 %v899_v60, %v872_v13  ;;  %v922_v28 = vmul.f32 %v903_v61, %v873_v14  ;;  %v923_v30 = vmul.f32 %v907_v62, %v874_v15 }
 0x1f0   : > { %v965_v31 = vadd.f32 %v928_v63, %v916_v16  ;;  %v966_v33 = vadd.f32 %v932_v0, %v917_v21  ;;  %v967_v34 = vadd.f32 %v936_v1, %v918_v22  ;;  %v968_v35 = vadd.f32 %v940_v2, %v919_v24 }
 0x1f1   : > { %v969_v17 = vadd.f32 %v944_v4, %v920_v25  ;;  %v970_v18 = vadd.f32 %v948_v5, %v921_v27  ;;  %v971_v19 = vadd.f32 %v952_v6, %v922_v28  ;;  %v972_v20 = vadd.f32 %v956_v7, %v923_v30 }
 0x1f2   : > { %v8924_v23 = vpack.c.bf16 %v966_v33, %v965_v31  ;;  %v8925_v26 = vpack.c.bf16 %v968_v35, %v967_v34 }
 0x1f3   : > { %v8926_v29 = vpack.c.bf16 %v970_v18, %v969_v17  ;;  %v8927_v32 = vpack.c.bf16 %v972_v20, %v971_v19 }
 0x1f4   : > { %1005 = vst [vmem:[#allocation2] sm:$0xff] %v8924_v23  ;;  %1006 = vst [vmem:[#allocation2 + $0x8] sm:$0xff] %v8925_v26 }
 0x1f5   : > { %1007 = vst [vmem:[#allocation2 + $0x10] sm:$0xff] %v8926_v29  ;;  %1008 = vst [vmem:[#allocation2 + $0x18] sm:$0xff] %v8927_v32 }
 0x1f6 PF: > { %v9097_v36 = vld [vmem:[%s10159_s22 + $0x4] ss:$16 sps:$4 sm:$0xff]   ;;  %v9099_v37 = vld [vmem:[%s10159_s22 + $0xc] ss:$16 sps:$4 sm:$0xff]   ;;  %v9101_v38 = vld [vmem:[%s10159_s22] ss:$16 sps:$4 sm:$0xff]  }
 0x1f7   : > { %2600 = vmatprep.subr.bf16.mxu0 %v9097_v36  ;;  %v9102_v39 = vld [vmem:[%s10159_s22 + $0x8] ss:$16 sps:$4 sm:$0xff]   ;;  %2764 = vmatprep.subr.bf16.mxu1 %v9099_v37  ;;  %v9103_v40 = vld [vmem:[%s10159_s22 + $0x24] ss:$16 sps:$4 sm:$0xff]   ;;  %v9105_v41 = vld [vmem:[%s10159_s22 + $0x2c] ss:$16 sps:$4 sm:$0xff]  }
 0x1f8   : > { %2601 = vmatpush1.bf16.msra.mxu0 %v9101_v38  ;;  %2765 = vmatpush1.bf16.msra.mxu1 %v9102_v39  ;;  %v9107_v42 = vld [vmem:[%s10159_s22 + $0x20] ss:$16 sps:$4 sm:$0xff]   ;;  %v9108_v43 = vld [vmem:[%s10159_s22 + $0x28] ss:$16 sps:$4 sm:$0xff]   ;;  %v9109_v44 = vld [vmem:[%s10159_s22 + $0x44] ss:$16 sps:$4 sm:$0xff]  }
 0x1f9   : > { %2602 = vmatprep.subr.bf16.mxu0 %v9103_v40  ;;  %2766 = vmatprep.subr.bf16.mxu1 %v9105_v41  ;;  %v9111_v45 = vld [vmem:[%s10159_s22 + $0x4c] ss:$16 sps:$4 sm:$0xff]   ;;  %v9113_v46 = vld [vmem:[%s10159_s22 + $0x40] ss:$16 sps:$4 sm:$0xff]   ;;  %v9114_v47 = vld [vmem:[%s10159_s22 + $0x48] ss:$16 sps:$4 sm:$0xff]  }
 0x1fa   : > { %v9115_v48 = vld [vmem:[%s10159_s22 + $0x64] ss:$16 sps:$4 sm:$0xff]   ;;  %v9117_v49 = vld [vmem:[%s10159_s22 + $0x6c] ss:$16 sps:$4 sm:$0xff]   ;;  %v9119_v50 = vld [vmem:[%s10159_s22 + $0x60] ss:$16 sps:$4 sm:$0xff]  }
 0x1fb   : > { %v9120_v51 = vld [vmem:[%s10159_s22 + $0x68] ss:$16 sps:$4 sm:$0xff]   ;;  %v9121_v52 = vld [vmem:[%s10159_s22 + $0x84] ss:$16 sps:$4 sm:$0xff]   ;;  %v9123_v53 = vld [vmem:[%s10159_s22 + $0x8c] ss:$16 sps:$4 sm:$0xff]  }
 0x1fc   : > { %2603 = vmatpush1.bf16.msra.mxu0 %v9107_v42  ;;  %2767 = vmatpush1.bf16.msra.mxu1 %v9108_v43  ;;  %v9125_v54 = vld [vmem:[%s10159_s22 + $0x80] ss:$16 sps:$4 sm:$0xff]   ;;  %v9126_v55 = vld [vmem:[%s10159_s22 + $0x88] ss:$16 sps:$4 sm:$0xff]   ;;  %v9127_v56 = vld [vmem:[%s10159_s22 + $0xa4] ss:$16 sps:$4 sm:$0xff]  }
 0x1fd   : > { %2604 = vmatprep.subr.bf16.mxu0 %v9109_v44  ;;  %2768 = vmatprep.subr.bf16.mxu1 %v9111_v45  ;;  %v9129_v57 = vld [vmem:[%s10159_s22 + $0xac] ss:$16 sps:$4 sm:$0xff]   ;;  %v9131_v58 = vld [vmem:[%s10159_s22 + $0xa0] ss:$16 sps:$4 sm:$0xff]   ;;  %v9132_v59 = vld [vmem:[%s10159_s22 + $0xa8] ss:$16 sps:$4 sm:$0xff]  }
 0x1fe   : > { %v9133_v60 = vld [vmem:[%s10159_s22 + $0xc4] ss:$16 sps:$4 sm:$0xff]   ;;  %v9135_v61 = vld [vmem:[%s10159_s22 + $0xcc] ss:$16 sps:$4 sm:$0xff]   ;;  %v9137_v62 = vld [vmem:[%s10159_s22 + $0xc0] ss:$16 sps:$4 sm:$0xff]  }
 0x1ff   : > { %v9138_v63 = vld [vmem:[%s10159_s22 + $0xc8] ss:$16 sps:$4 sm:$0xff]   ;;  %v9139_v0 = vld [vmem:[%s10159_s22 + $0xe4] ss:$16 sps:$4 sm:$0xff]   ;;  %v9141_v1 = vld [vmem:[%s10159_s22 + $0xec] ss:$16 sps:$4 sm:$0xff]  }
 0x200   : > { %2605 = vmatpush1.bf16.msra.mxu0 %v9113_v46  ;;  %2769 = vmatpush1.bf16.msra.mxu1 %v9114_v47  ;;  %v9143_v2 = vld [vmem:[%s10159_s22 + $0xe0] ss:$16 sps:$4 sm:$0xff]   ;;  %v9144_v3 = vld [vmem:[%s10159_s22 + $0xe8] ss:$16 sps:$4 sm:$0xff]   ;;  %v9145_v4 = vld [vmem:[%s10159_s22 + $0x104] ss:$16 sps:$4 sm:$0xff]  }
 0x201   : > { %2606 = vmatprep.subr.bf16.mxu0 %v9115_v48  ;;  %2770 = vmatprep.subr.bf16.mxu1 %v9117_v49  ;;  %v9147_v5 = vld [vmem:[%s10159_s22 + $0x10c] ss:$16 sps:$4 sm:$0xff]   ;;  %v9149_v6 = vld [vmem:[%s10159_s22 + $0x100] ss:$16 sps:$4 sm:$0xff]   ;;  %v9150_v7 = vld [vmem:[%s10159_s22 + $0x108] ss:$16 sps:$4 sm:$0xff]  }
 0x202   : > { %v9151_v8 = vld [vmem:[%s10159_s22 + $0x124] ss:$16 sps:$4 sm:$0xff]   ;;  %v9153_v9 = vld [vmem:[%s10159_s22 + $0x12c] ss:$16 sps:$4 sm:$0xff]   ;;  %v9155_v10 = vld [vmem:[%s10159_s22 + $0x120] ss:$16 sps:$4 sm:$0xff]  }
 0x203   : > { %v9156_v11 = vld [vmem:[%s10159_s22 + $0x128] ss:$16 sps:$4 sm:$0xff]   ;;  %v9157_v12 = vld [vmem:[%s10159_s22 + $0x144] ss:$16 sps:$4 sm:$0xff]   ;;  %v9159_v13 = vld [vmem:[%s10159_s22 + $0x14c] ss:$16 sps:$4 sm:$0xff]  }
 0x204   : > { %2607 = vmatpush1.bf16.msra.mxu0 %v9119_v50  ;;  %2771 = vmatpush1.bf16.msra.mxu1 %v9120_v51  ;;  %v9161_v14 = vld [vmem:[%s10159_s22 + $0x140] ss:$16 sps:$4 sm:$0xff]   ;;  %v9162_v15 = vld [vmem:[%s10159_s22 + $0x148] ss:$16 sps:$4 sm:$0xff]   ;;  %v9163_v16 = vld [vmem:[%s10159_s22 + $0x164] ss:$16 sps:$4 sm:$0xff]  }
 0x205   : > { %2608 = vmatprep.subr.bf16.mxu0 %v9121_v52  ;;  %2772 = vmatprep.subr.bf16.mxu1 %v9123_v53  ;;  %v9165_v21 = vld [vmem:[%s10159_s22 + $0x16c] ss:$16 sps:$4 sm:$0xff]   ;;  %v1010_v22 = vld [vmem:[#allocation2] sm:$0xff]  ;;  %v9168_v27 = vld [vmem:[%s10159_s22 + $0x168] ss:$16 sps:$4 sm:$0xff]   ;;  %s8126_s30 = sshll.u32 %s9613_s27, 9 }
 0x206   : > { %v9167_v24 = vld [vmem:[%s10159_s22 + $0x160] ss:$16 sps:$4 sm:$0xff]   ;;  %v8128_v25 = vcombine.high %v1010_v22, %v1010_v22  ;;  %v9169_v28 = vld [vmem:[%s10159_s22 + $0x184] ss:$16 sps:$4 sm:$0xff]   ;;  %v9171_v30 = vld [vmem:[%s10159_s22 + $0x18c] ss:$16 sps:$4 sm:$0xff]   ;;  %v8127_v40 = vcombine.low %v1010_v22, %v1010_v22 }
 0x207   : > { %v9173_v31 = vld [vmem:[%s10159_s22 + $0x180] ss:$16 sps:$4 sm:$0xff]   ;;  %v9174_v33 = vld [vmem:[%s10159_s22 + $0x188] ss:$16 sps:$4 sm:$0xff]   ;;  %v9175_v34 = vld [vmem:[%s10159_s22 + $0x1a4] ss:$16 sps:$4 sm:$0xff]  }
 0x208   : > { %2609 = vmatpush1.bf16.msra.mxu0 %v9125_v54  ;;  %2773 = vmatpush1.bf16.msra.mxu1 %v9126_v55  ;;  %v9177_v35 = vld [vmem:[%s10159_s22 + $0x1ac] ss:$16 sps:$4 sm:$0xff]   ;;  %v9179_v17 = vld [vmem:[%s10159_s22 + $0x1a0] ss:$16 sps:$4 sm:$0xff]   ;;  %v9180_v18 = vld [vmem:[%s10159_s22 + $0x1a8] ss:$16 sps:$4 sm:$0xff]  }
 0x209   : > { %2610 = vmatprep.subr.bf16.mxu0 %v9127_v56  ;;  %2774 = vmatprep.subr.bf16.mxu1 %v9129_v57  ;;  %v9181_v19 = vld [vmem:[%s10159_s22 + $0x1c4] ss:$16 sps:$4 sm:$0xff]   ;;  %v9183_v20 = vld [vmem:[%s10159_s22 + $0x1cc] ss:$16 sps:$4 sm:$0xff]   ;;  %v9185_v23 = vld [vmem:[%s10159_s22 + $0x1c0] ss:$16 sps:$4 sm:$0xff]  }
 0x20a   : > { %2632 = vmatprep.mubr.bf16.mxu0 %v8128_v25  ;;  %2796 = vmatprep.mubr.bf16.mxu1 %v8128_v25  ;;  %v9186_v26 = vld [vmem:[%s10159_s22 + $0x1c8] ss:$16 sps:$4 sm:$0xff]   ;;  %v9187_v29 = vld [vmem:[%s10159_s22 + $0x1e4] ss:$16 sps:$4 sm:$0xff]   ;;  %v9189_v32 = vld [vmem:[%s10159_s22 + $0x1ec] ss:$16 sps:$4 sm:$0xff]  }
 0x20b   : > { %v9191_v36 = vld [vmem:[%s10159_s22 + $0x1e0] ss:$16 sps:$4 sm:$0xff]   ;;  %v9192_v37 = vld [vmem:[%s10159_s22 + $0x1e8] ss:$16 sps:$4 sm:$0xff]   ;;  %v9197_v38 = vld [vmem:[%s10159_s22 + $0x204] ss:$16 sps:$4 sm:$0xff]  }
 0x20c   : > { %2611 = vmatpush1.bf16.msra.mxu0 %v9131_v58  ;;  %2775 = vmatpush1.bf16.msra.mxu1 %v9132_v59  ;;  %v9200_v39 = vld [vmem:[%s10159_s22 + $0x20c] ss:$16 sps:$4 sm:$0xff]   ;;  %v9195_v41 = vld [vmem:[%s10159_s22 + $0x200] ss:$16 sps:$4 sm:$0xff]   ;;  %v9198_v42 = vld [vmem:[%s10159_s22 + $0x208] ss:$16 sps:$4 sm:$0xff]  }
 0x20d   : > { %2612 = vmatprep.subr.bf16.mxu0 %v9133_v60  ;;  %2776 = vmatprep.subr.bf16.mxu1 %v9135_v61  ;;  %v9203_v43 = vld [vmem:[%s10159_s22 + $0x224] ss:$16 sps:$4 sm:$0xff]   ;;  %v9206_v44 = vld [vmem:[%s10159_s22 + $0x22c] ss:$16 sps:$4 sm:$0xff]   ;;  %v9201_v45 = vld [vmem:[%s10159_s22 + $0x220] ss:$16 sps:$4 sm:$0xff]  }
 0x20e   : > { %v9204_v46 = vld [vmem:[%s10159_s22 + $0x228] ss:$16 sps:$4 sm:$0xff]   ;;  %v9209_v47 = vld [vmem:[%s10159_s22 + $0x244] ss:$16 sps:$4 sm:$0xff]   ;;  %v9212_v48 = vld [vmem:[%s10159_s22 + $0x24c] ss:$16 sps:$4 sm:$0xff]  }
 0x20f   : > { %v9207_v49 = vld [vmem:[%s10159_s22 + $0x240] ss:$16 sps:$4 sm:$0xff]   ;;  %v9210_v50 = vld [vmem:[%s10159_s22 + $0x248] ss:$16 sps:$4 sm:$0xff]   ;;  %v9215_v51 = vld [vmem:[%s10159_s22 + $0x264] ss:$16 sps:$4 sm:$0xff]  }
 0x210   : > { %2613 = vmatpush1.bf16.msra.mxu0 %v9137_v62  ;;  %2777 = vmatpush1.bf16.msra.mxu1 %v9138_v63  ;;  %v9218_v52 = vld [vmem:[%s10159_s22 + $0x26c] ss:$16 sps:$4 sm:$0xff]   ;;  %v9213_v53 = vld [vmem:[%s10159_s22 + $0x260] ss:$16 sps:$4 sm:$0xff]   ;;  %v9216_v54 = vld [vmem:[%s10159_s22 + $0x268] ss:$16 sps:$4 sm:$0xff]  }
 0x211   : > { %2614 = vmatprep.subr.bf16.mxu0 %v9139_v0  ;;  %2778 = vmatprep.subr.bf16.mxu1 %v9141_v1  ;;  %v9221_v55 = vld [vmem:[%s10159_s22 + $0x284] ss:$16 sps:$4 sm:$0xff]   ;;  %v9224_v56 = vld [vmem:[%s10159_s22 + $0x28c] ss:$16 sps:$4 sm:$0xff]   ;;  %v9219_v57 = vld [vmem:[%s10159_s22 + $0x280] ss:$16 sps:$4 sm:$0xff]  }
 0x212   : > { %v9222_v58 = vld [vmem:[%s10159_s22 + $0x288] ss:$16 sps:$4 sm:$0xff]   ;;  %v9227_v59 = vld [vmem:[%s10159_s22 + $0x2a4] ss:$16 sps:$4 sm:$0xff]   ;;  %v9230_v60 = vld [vmem:[%s10159_s22 + $0x2ac] ss:$16 sps:$4 sm:$0xff]  }
 0x213   : > { %v9225_v61 = vld [vmem:[%s10159_s22 + $0x2a0] ss:$16 sps:$4 sm:$0xff]   ;;  %v9228_v62 = vld [vmem:[%s10159_s22 + $0x2a8] ss:$16 sps:$4 sm:$0xff]   ;;  %v9233_v63 = vld [vmem:[%s10159_s22 + $0x2c4] ss:$16 sps:$4 sm:$0xff]  }
 0x214   : > { %2615 = vmatpush1.bf16.msra.mxu0 %v9143_v2  ;;  %2779 = vmatpush1.bf16.msra.mxu1 %v9144_v3  ;;  %v9236_v0 = vld [vmem:[%s10159_s22 + $0x2cc] ss:$16 sps:$4 sm:$0xff]   ;;  %v9231_v3 = vld [vmem:[%s10159_s22 + $0x2c0] ss:$16 sps:$4 sm:$0xff]   ;;  %v9258_v25 = vld [vmem:[%s10159_s22 + $0x348] ss:$16 sps:$4 sm:$0xff]  }
 0x215   : > { %2616 = vmatprep.subr.bf16.mxu0 %v9145_v4  ;;  %2780 = vmatprep.subr.bf16.mxu1 %v9147_v5  ;;  %v10282_v1 = vld [vmem:[#allocation2 + $0x8] sm:$0xff]  ;;  %v9239_v5 = vld [vmem:[%s10159_s22 + $0x2e4] ss:$16 sps:$4 sm:$0xff]   ;;  %p8392_p10 = scmp.ne.s32.totalorder %s9613_s27, 5 }
 0x216   : > { %v8130_v2 = vcombine.high %v10282_v1, %v10282_v1  ;;  %v9234_v4 = vld [vmem:[%s10159_s22 + $0x2c8] ss:$16 sps:$4 sm:$0xff]   ;;  %v9260_v22 = vld [vmem:[%s10159_s22 + $0x34c] ss:$16 sps:$4 sm:$0xff]   ;;  %vm9555_vm0 = vmmov (!%p8392_p10), 0   ;;  %vm3019_vm2 = vcmask (!%p8392_p10), 64512  }
 0x218   : > { %2617 = vmatpush1.bf16.msra.mxu0 %v9149_v6  ;;  %2781 = vmatpush1.bf16.msra.mxu1 %v9150_v7  ;;  %v9242_v6 = vld [vmem:[%s10159_s22 + $0x2ec] ss:$16 sps:$4 sm:$0xff]   ;;  %v9237_v7 = vld [vmem:[%s10159_s22 + $0x2e0] ss:$16 sps:$4 sm:$0xff]  }
 0x219   : > { %2618 = vmatprep.subr.bf16.mxu0 %v9151_v8  ;;  %2782 = vmatprep.subr.bf16.mxu1 %v9153_v9  ;;  %v9240_v8 = vld [vmem:[%s10159_s22 + $0x2e8] ss:$16 sps:$4 sm:$0xff]   ;;  %v9245_v9 = vld [vmem:[%s10159_s22 + $0x304] ss:$16 sps:$4 sm:$0xff]  }
 0x21c   : > { %2619 = vmatpush1.bf16.msra.mxu0 %v9155_v10  ;;  %2783 = vmatpush1.bf16.msra.mxu1 %v9156_v11  ;;  %v9248_v10 = vld [vmem:[%s10159_s22 + $0x30c] ss:$16 sps:$4 sm:$0xff]   ;;  %v9243_v11 = vld [vmem:[%s10159_s22 + $0x300] ss:$16 sps:$4 sm:$0xff]  }
 0x21d   : > { %2620 = vmatprep.subr.bf16.mxu0 %v9157_v12  ;;  %2784 = vmatprep.subr.bf16.mxu1 %v9159_v13  ;;  %v9246_v12 = vld [vmem:[%s10159_s22 + $0x308] ss:$16 sps:$4 sm:$0xff]   ;;  %v9251_v13 = vld [vmem:[%s10159_s22 + $0x324] ss:$16 sps:$4 sm:$0xff]  }
 0x220   : > { %2621 = vmatpush1.bf16.msra.mxu0 %v9161_v14  ;;  %2785 = vmatpush1.bf16.msra.mxu1 %v9162_v15  ;;  %v9254_v14 = vld [vmem:[%s10159_s22 + $0x32c] ss:$16 sps:$4 sm:$0xff]   ;;  %v9249_v15 = vld [vmem:[%s10159_s22 + $0x320] ss:$16 sps:$4 sm:$0xff]  }
 0x221   : > { %2622 = vmatprep.subr.bf16.mxu0 %v9163_v16  ;;  %2786 = vmatprep.subr.bf16.mxu1 %v9165_v21  ;;  %v9252_v16 = vld [vmem:[%s10159_s22 + $0x328] ss:$16 sps:$4 sm:$0xff]   ;;  %v9257_v21 = vld [vmem:[%s10159_s22 + $0x344] ss:$16 sps:$4 sm:$0xff]  }
 0x224   : > { %2623 = vmatpush1.bf16.msra.mxu0 %v9167_v24  ;;  %2787 = vmatpush1.bf16.msra.mxu1 %v9168_v27  ;;  %v9255_v24 = vld [vmem:[%s10159_s22 + $0x340] ss:$16 sps:$4 sm:$0xff]   ;;  %v9263_v27 = vld [vmem:[%s10159_s22 + $0x364] ss:$16 sps:$4 sm:$0xff]  }
 0x225   : > { %2624 = vmatprep.subr.bf16.mxu0 %v9169_v28  ;;  %2788 = vmatprep.subr.bf16.mxu1 %v9171_v30  ;;  %v9266_v28 = vld [vmem:[%s10159_s22 + $0x36c] ss:$16 sps:$4 sm:$0xff]   ;;  %v9261_v30 = vld [vmem:[%s10159_s22 + $0x360] ss:$16 sps:$4 sm:$0xff]  }
 0x228   : > { %2625 = vmatpush1.bf16.msra.mxu0 %v9173_v31  ;;  %2789 = vmatpush1.bf16.msra.mxu1 %v9174_v33  ;;  %v9264_v31 = vld [vmem:[%s10159_s22 + $0x368] ss:$16 sps:$4 sm:$0xff]   ;;  %v9269_v33 = vld [vmem:[%s10159_s22 + $0x384] ss:$16 sps:$4 sm:$0xff]  }
 0x229   : > { %2626 = vmatprep.subr.bf16.mxu0 %v9175_v34  ;;  %2790 = vmatprep.subr.bf16.mxu1 %v9177_v35  ;;  %v9272_v34 = vld [vmem:[%s10159_s22 + $0x38c] ss:$16 sps:$4 sm:$0xff]   ;;  %v9267_v35 = vld [vmem:[%s10159_s22 + $0x380] ss:$16 sps:$4 sm:$0xff]  }
 0x22c   : > { %2627 = vmatpush1.bf16.msra.mxu0 %v9179_v17  ;;  %2791 = vmatpush1.bf16.msra.mxu1 %v9180_v18  ;;  %v9270_v17 = vld [vmem:[%s10159_s22 + $0x388] ss:$16 sps:$4 sm:$0xff]   ;;  %v9275_v18 = vld [vmem:[%s10159_s22 + $0x3a4] ss:$16 sps:$4 sm:$0xff]  }
 0x22d   : > { %2628 = vmatprep.subr.bf16.mxu0 %v9181_v19  ;;  %2792 = vmatprep.subr.bf16.mxu1 %v9183_v20  ;;  %v9278_v19 = vld [vmem:[%s10159_s22 + $0x3ac] ss:$16 sps:$4 sm:$0xff]   ;;  %v9273_v20 = vld [vmem:[%s10159_s22 + $0x3a0] ss:$16 sps:$4 sm:$0xff]  }
 0x230   : > { %2629 = vmatpush1.bf16.msra.mxu0 %v9185_v23  ;;  %2793 = vmatpush1.bf16.msra.mxu1 %v9186_v26  ;;  %v9276_v23 = vld [vmem:[%s10159_s22 + $0x3a8] ss:$16 sps:$4 sm:$0xff]   ;;  %v9281_v26 = vld [vmem:[%s10159_s22 + $0x3c4] ss:$16 sps:$4 sm:$0xff]  }
 0x231   : > { %2630 = vmatprep.subr.bf16.mxu0 %v9187_v29  ;;  %2794 = vmatprep.subr.bf16.mxu1 %v9189_v32  ;;  %v9284_v29 = vld [vmem:[%s10159_s22 + $0x3cc] ss:$16 sps:$4 sm:$0xff]   ;;  %v9279_v32 = vld [vmem:[%s10159_s22 + $0x3c0] ss:$16 sps:$4 sm:$0xff]  }
 0x234   : > { %2631 = vmatpush1.bf16.msra.mxu0 %v9191_v36  ;;  %2795 = vmatpush1.bf16.msra.mxu1 %v9192_v37  ;;  %v9282_v36 = vld [vmem:[%s10159_s22 + $0x3c8] ss:$16 sps:$4 sm:$0xff]   ;;  %v9287_v37 = vld [vmem:[%s10159_s22 + $0x3e4] ss:$16 sps:$4 sm:$0xff]  }
 0x235   : > { %2641 = vmatprep.subr.bf16.mxu0 %v9197_v38  ;;  %2805 = vmatprep.subr.bf16.mxu1 %v9200_v39  ;;  %v9290_v38 = vld [vmem:[%s10159_s22 + $0x3ec] ss:$16 sps:$4 sm:$0xff]   ;;  %v9285_v39 = vld [vmem:[%s10159_s22 + $0x3e0] ss:$16 sps:$4 sm:$0xff]  }
 0x237   : > { %2633 = vmatmul.mubr.bf16.vlgmr.msra.gmra.mrb[0].mxu0 %v8127_v40  ;;  %2797 = vmatmul.mubr.bf16.vlgmr.msra.gmra.mrb[0].mxu1 %v8127_v40  ;;  %v9288_v40 = vld [vmem:[%s10159_s22 + $0x3e8] ss:$16 sps:$4 sm:$0xff]  }
 0x238   : > { %2642 = vmatpush1.bf16.msra.mxu0 %v9195_v41  ;;  %2806 = vmatpush1.bf16.msra.mxu1 %v9198_v42  ;;  %v9295_v41 = vld [vmem:[%s10159_s22 + $0x404] ss:$16 sps:$4 sm:$0xff]   ;;  %v9298_v42 = vld [vmem:[%s10159_s22 + $0x40c] ss:$16 sps:$4 sm:$0xff]  }
 0x239   : > { %2643 = vmatprep.subr.bf16.mxu0 %v9203_v43  ;;  %2807 = vmatprep.subr.bf16.mxu1 %v9206_v44  ;;  %v8129_v43 = vcombine.low %v10282_v1, %v10282_v1  ;;  %v9293_v44 = vld [vmem:[%s10159_s22 + $0x400] ss:$16 sps:$4 sm:$0xff]   ;;  %v9328_v1 = vld [vmem:[%s10159_s22 + $0x4ac] ss:$16 sps:$4 sm:$0xff]  }
 0x23a   : > { %2673 = vmatprep.mubr.bf16.mxu0 %v8130_v2  ;;  %2837 = vmatprep.mubr.bf16.mxu1 %v8130_v2  ;;  %v9323_v2 = vld [vmem:[%s10159_s22 + $0x4a0] ss:$16 sps:$4 sm:$0xff]  }
 0x23c   : > { %2644 = vmatpush1.bf16.msra.mxu0 %v9201_v45  ;;  %2808 = vmatpush1.bf16.msra.mxu1 %v9204_v46  ;;  %v9296_v45 = vld [vmem:[%s10159_s22 + $0x408] ss:$16 sps:$4 sm:$0xff]   ;;  %v9301_v46 = vld [vmem:[%s10159_s22 + $0x424] ss:$16 sps:$4 sm:$0xff]  }
 0x23d   : > { %2645 = vmatprep.subr.bf16.mxu0 %v9209_v47  ;;  %2809 = vmatprep.subr.bf16.mxu1 %v9212_v48  ;;  %v10331_v47 = vld [vmem:[#allocation2 + $0x10] sm:$0xff]  ;;  %v9304_v48 = vld [vmem:[%s10159_s22 + $0x42c] ss:$16 sps:$4 sm:$0xff]  }
 0x240   : > { %2646 = vmatpush1.bf16.msra.mxu0 %v9207_v49  ;;  %2810 = vmatpush1.bf16.msra.mxu1 %v9210_v50  ;;  %v8132_v49 = vcombine.high %v10331_v47, %v10331_v47  ;;  %v9299_v50 = vld [vmem:[%s10159_s22 + $0x420] ss:$16 sps:$4 sm:$0xff]  }
 0x241   : > { %2647 = vmatprep.subr.bf16.mxu0 %v9215_v51  ;;  %2811 = vmatprep.subr.bf16.mxu1 %v9218_v52  ;;  %v9302_v51 = vld [vmem:[%s10159_s22 + $0x428] ss:$16 sps:$4 sm:$0xff]   ;;  %v9307_v52 = vld [vmem:[%s10159_s22 + $0x444] ss:$16 sps:$4 sm:$0xff]  }
 0x244   : > { %2648 = vmatpush1.bf16.msra.mxu0 %v9213_v53  ;;  %2812 = vmatpush1.bf16.msra.mxu1 %v9216_v54  ;;  %v9310_v53 = vld [vmem:[%s10159_s22 + $0x44c] ss:$16 sps:$4 sm:$0xff]   ;;  %v9305_v54 = vld [vmem:[%s10159_s22 + $0x440] ss:$16 sps:$4 sm:$0xff]  }
 0x245   : > { %2649 = vmatprep.subr.bf16.mxu0 %v9221_v55  ;;  %2813 = vmatprep.subr.bf16.mxu1 %v9224_v56  ;;  %v9308_v55 = vld [vmem:[%s10159_s22 + $0x448] ss:$16 sps:$4 sm:$0xff]   ;;  %v9313_v56 = vld [vmem:[%s10159_s22 + $0x464] ss:$16 sps:$4 sm:$0xff]  }
 0x248   : > { %2650 = vmatpush1.bf16.msra.mxu0 %v9219_v57  ;;  %2814 = vmatpush1.bf16.msra.mxu1 %v9222_v58  ;;  %v9316_v57 = vld [vmem:[%s10159_s22 + $0x46c] ss:$16 sps:$4 sm:$0xff]   ;;  %v9311_v58 = vld [vmem:[%s10159_s22 + $0x460] ss:$16 sps:$4 sm:$0xff]  }
 0x249   : > { %2651 = vmatprep.subr.bf16.mxu0 %v9227_v59  ;;  %2815 = vmatprep.subr.bf16.mxu1 %v9230_v60  ;;  %v9314_v59 = vld [vmem:[%s10159_s22 + $0x468] ss:$16 sps:$4 sm:$0xff]   ;;  %v9319_v60 = vld [vmem:[%s10159_s22 + $0x484] ss:$16 sps:$4 sm:$0xff]  }
 0x24c   : > { %2652 = vmatpush1.bf16.msra.mxu0 %v9225_v61  ;;  %2816 = vmatpush1.bf16.msra.mxu1 %v9228_v62  ;;  %v9322_v61 = vld [vmem:[%s10159_s22 + $0x48c] ss:$16 sps:$4 sm:$0xff]   ;;  %v9317_v62 = vld [vmem:[%s10159_s22 + $0x480] ss:$16 sps:$4 sm:$0xff]  }
 0x24d   : > { %2653 = vmatprep.subr.bf16.mxu0 %v9233_v63  ;;  %2817 = vmatprep.subr.bf16.mxu1 %v9236_v0  ;;  %v9320_v63 = vld [vmem:[%s10159_s22 + $0x488] ss:$16 sps:$4 sm:$0xff]   ;;  %v9325_v0 = vld [vmem:[%s10159_s22 + $0x4a4] ss:$16 sps:$4 sm:$0xff]  }
 0x250   : > { %2654 = vmatpush1.bf16.msra.mxu0 %v9231_v3  ;;  %2818 = vmatpush1.bf16.msra.mxu1 %v9234_v4  ;;  %v9326_v3 = vld [vmem:[%s10159_s22 + $0x4a8] ss:$16 sps:$4 sm:$0xff]   ;;  %v9331_v4 = vld [vmem:[%s10159_s22 + $0x4c4] ss:$16 sps:$4 sm:$0xff]  }
 0x251   : > { %2655 = vmatprep.subr.bf16.mxu0 %v9239_v5  ;;  %2819 = vmatprep.subr.bf16.mxu1 %v9242_v6  ;;  %v9334_v5 = vld [vmem:[%s10159_s22 + $0x4cc] ss:$16 sps:$4 sm:$0xff]   ;;  %v9329_v6 = vld [vmem:[%s10159_s22 + $0x4c0] ss:$16 sps:$4 sm:$0xff]  }
 0x254   : > { %2656 = vmatpush1.bf16.msra.mxu0 %v9237_v7  ;;  %2820 = vmatpush1.bf16.msra.mxu1 %v9240_v8  ;;  %v9332_v7 = vld [vmem:[%s10159_s22 + $0x4c8] ss:$16 sps:$4 sm:$0xff]   ;;  %v9337_v8 = vld [vmem:[%s10159_s22 + $0x4e4] ss:$16 sps:$4 sm:$0xff]  }
 0x255   : > { %2657 = vmatprep.subr.bf16.mxu0 %v9245_v9  ;;  %2821 = vmatprep.subr.bf16.mxu1 %v9248_v10  ;;  %v9340_v9 = vld [vmem:[%s10159_s22 + $0x4ec] ss:$16 sps:$4 sm:$0xff]   ;;  %v9335_v10 = vld [vmem:[%s10159_s22 + $0x4e0] ss:$16 sps:$4 sm:$0xff]  }
 0x258   : > { %2658 = vmatpush1.bf16.msra.mxu0 %v9243_v11  ;;  %2822 = vmatpush1.bf16.msra.mxu1 %v9246_v12  ;;  %v9338_v11 = vld [vmem:[%s10159_s22 + $0x4e8] ss:$16 sps:$4 sm:$0xff]   ;;  %v9343_v12 = vld [vmem:[%s10159_s22 + $0x504] ss:$16 sps:$4 sm:$0xff]  }
 0x259   : > { %2659 = vmatprep.subr.bf16.mxu0 %v9251_v13  ;;  %2823 = vmatprep.subr.bf16.mxu1 %v9254_v14  ;;  %v9346_v13 = vld [vmem:[%s10159_s22 + $0x50c] ss:$16 sps:$4 sm:$0xff]   ;;  %v9341_v14 = vld [vmem:[%s10159_s22 + $0x500] ss:$16 sps:$4 sm:$0xff]  }
 0x25c   : > { %2660 = vmatpush1.bf16.msra.mxu0 %v9249_v15  ;;  %2824 = vmatpush1.bf16.msra.mxu1 %v9252_v16  ;;  %v9344_v15 = vld [vmem:[%s10159_s22 + $0x508] ss:$16 sps:$4 sm:$0xff]   ;;  %v9349_v16 = vld [vmem:[%s10159_s22 + $0x524] ss:$16 sps:$4 sm:$0xff]  }
 0x25d   : > { %2661 = vmatprep.subr.bf16.mxu0 %v9257_v21  ;;  %2825 = vmatprep.subr.bf16.mxu1 %v9260_v22  ;;  %v9352_v21 = vld [vmem:[%s10159_s22 + $0x52c] ss:$16 sps:$4 sm:$0xff]   ;;  %v9347_v22 = vld [vmem:[%s10159_s22 + $0x520] ss:$16 sps:$4 sm:$0xff]  }
 0x260   : > { %2662 = vmatpush1.bf16.msra.mxu0 %v9255_v24  ;;  %2826 = vmatpush1.bf16.msra.mxu1 %v9258_v25  ;;  %v9350_v24 = vld [vmem:[%s10159_s22 + $0x528] ss:$16 sps:$4 sm:$0xff]   ;;  %v9355_v25 = vld [vmem:[%s10159_s22 + $0x544] ss:$16 sps:$4 sm:$0xff]  }
 0x261   : > { %2663 = vmatprep.subr.bf16.mxu0 %v9263_v27  ;;  %2827 = vmatprep.subr.bf16.mxu1 %v9266_v28  ;;  %v9358_v27 = vld [vmem:[%s10159_s22 + $0x54c] ss:$16 sps:$4 sm:$0xff]   ;;  %v9353_v28 = vld [vmem:[%s10159_s22 + $0x540] ss:$16 sps:$4 sm:$0xff]  }
 0x264   : > { %2664 = vmatpush1.bf16.msra.mxu0 %v9261_v30  ;;  %2828 = vmatpush1.bf16.msra.mxu1 %v9264_v31  ;;  %v9356_v30 = vld [vmem:[%s10159_s22 + $0x548] ss:$16 sps:$4 sm:$0xff]   ;;  %v9361_v31 = vld [vmem:[%s10159_s22 + $0x564] ss:$16 sps:$4 sm:$0xff]  }
 0x265   : > { %2665 = vmatprep.subr.bf16.mxu0 %v9269_v33  ;;  %2829 = vmatprep.subr.bf16.mxu1 %v9272_v34  ;;  %v9364_v33 = vld [vmem:[%s10159_s22 + $0x56c] ss:$16 sps:$4 sm:$0xff]   ;;  %v9359_v34 = vld [vmem:[%s10159_s22 + $0x560] ss:$16 sps:$4 sm:$0xff]  }
 0x268   : > { %2666 = vmatpush1.bf16.msra.mxu0 %v9267_v35  ;;  %2830 = vmatpush1.bf16.msra.mxu1 %v9270_v17  ;;  %v9362_v35 = vld [vmem:[%s10159_s22 + $0x568] ss:$16 sps:$4 sm:$0xff]   ;;  %v9367_v17 = vld [vmem:[%s10159_s22 + $0x584] ss:$16 sps:$4 sm:$0xff]  }
 0x269   : > { %2667 = vmatprep.subr.bf16.mxu0 %v9275_v18  ;;  %2831 = vmatprep.subr.bf16.mxu1 %v9278_v19  ;;  %v9370_v18 = vld [vmem:[%s10159_s22 + $0x58c] ss:$16 sps:$4 sm:$0xff]   ;;  %v9365_v19 = vld [vmem:[%s10159_s22 + $0x580] ss:$16 sps:$4 sm:$0xff]  }
 0x26c   : > { %2668 = vmatpush1.bf16.msra.mxu0 %v9273_v20  ;;  %2832 = vmatpush1.bf16.msra.mxu1 %v9276_v23  ;;  %v9368_v20 = vld [vmem:[%s10159_s22 + $0x588] ss:$16 sps:$4 sm:$0xff]   ;;  %v9373_v23 = vld [vmem:[%s10159_s22 + $0x5a4] ss:$16 sps:$4 sm:$0xff]  }
 0x26d   : > { %2669 = vmatprep.subr.bf16.mxu0 %v9281_v26  ;;  %2833 = vmatprep.subr.bf16.mxu1 %v9284_v29  ;;  %v9376_v26 = vld [vmem:[%s10159_s22 + $0x5ac] ss:$16 sps:$4 sm:$0xff]   ;;  %v9371_v29 = vld [vmem:[%s10159_s22 + $0x5a0] ss:$16 sps:$4 sm:$0xff]  }
 0x270   : > { %2670 = vmatpush1.bf16.msra.mxu0 %v9279_v32  ;;  %2834 = vmatpush1.bf16.msra.mxu1 %v9282_v36  ;;  %v9374_v32 = vld [vmem:[%s10159_s22 + $0x5a8] ss:$16 sps:$4 sm:$0xff]   ;;  %v9379_v36 = vld [vmem:[%s10159_s22 + $0x5c4] ss:$16 sps:$4 sm:$0xff]  }
 0x271   : > { %2671 = vmatprep.subr.bf16.mxu0 %v9287_v37  ;;  %2835 = vmatprep.subr.bf16.mxu1 %v9290_v38  ;;  %v9382_v37 = vld [vmem:[%s10159_s22 + $0x5cc] ss:$16 sps:$4 sm:$0xff]   ;;  %v9377_v38 = vld [vmem:[%s10159_s22 + $0x5c0] ss:$16 sps:$4 sm:$0xff]  }
 0x274   : > { %2672 = vmatpush1.bf16.msra.mxu0 %v9285_v39  ;;  %2836 = vmatpush1.bf16.msra.mxu1 %v9288_v40  ;;  %v9380_v39 = vld [vmem:[%s10159_s22 + $0x5c8] ss:$16 sps:$4 sm:$0xff]   ;;  %v9385_v40 = vld [vmem:[%s10159_s22 + $0x5e4] ss:$16 sps:$4 sm:$0xff]  }
 0x275   : > { %2682 = vmatprep.subr.bf16.mxu0 %v9295_v41  ;;  %2846 = vmatprep.subr.bf16.mxu1 %v9298_v42  ;;  %v9388_v41 = vld [vmem:[%s10159_s22 + $0x5ec] ss:$16 sps:$4 sm:$0xff]   ;;  %v9383_v42 = vld [vmem:[%s10159_s22 + $0x5e0] ss:$16 sps:$4 sm:$0xff]  }
 0x277   : > { %2674 = vmatmul.mubr.bf16.vlgmr.msra.gmra.mrb[0].mxu0 %v8129_v43  ;;  %2838 = vmatmul.mubr.bf16.vlgmr.msra.gmra.mrb[0].mxu1 %v8129_v43  ;;  %v9386_v43 = vld [vmem:[%s10159_s22 + $0x5e8] ss:$16 sps:$4 sm:$0xff]  }
 0x278   : > { %2683 = vmatpush1.bf16.msra.mxu0 %v9293_v44  ;;  %2847 = vmatpush1.bf16.msra.mxu1 %v9296_v45  ;;  %v9393_v44 = vld [vmem:[%s10159_s22 + $0x604] ss:$16 sps:$4 sm:$0xff]   ;;  %v9396_v45 = vld [vmem:[%s10159_s22 + $0x60c] ss:$16 sps:$4 sm:$0xff]  }
 0x279   : > { %2684 = vmatprep.subr.bf16.mxu0 %v9301_v46  ;;  %2848 = vmatprep.subr.bf16.mxu1 %v9304_v48  ;;  %v8131_v46 = vcombine.low %v10331_v47, %v10331_v47  ;;  %v10398_v48 = vld [vmem:[#allocation2 + $0x18] sm:$0xff]  ;;  %v9397_v47 = vld [vmem:[%s10159_s22 + $0x620] ss:$16 sps:$4 sm:$0xff]  }
 0x27a   : > { %2714 = vmatprep.mubr.bf16.mxu0 %v8132_v49  ;;  %2878 = vmatprep.mubr.bf16.mxu1 %v8132_v49  ;;  %v9391_v49 = vld [vmem:[%s10159_s22 + $0x600] ss:$16 sps:$4 sm:$0xff]  }
 0x27c   : > { %2685 = vmatpush1.bf16.msra.mxu0 %v9299_v50  ;;  %2849 = vmatpush1.bf16.msra.mxu1 %v9302_v51  ;;  %v9394_v50 = vld [vmem:[%s10159_s22 + $0x608] ss:$16 sps:$4 sm:$0xff]   ;;  %v9399_v51 = vld [vmem:[%s10159_s22 + $0x624] ss:$16 sps:$4 sm:$0xff]  }
 0x27d   : > { %2686 = vmatprep.subr.bf16.mxu0 %v9307_v52  ;;  %2850 = vmatprep.subr.bf16.mxu1 %v9310_v53  ;;  %v9402_v52 = vld [vmem:[%s10159_s22 + $0x62c] ss:$16 sps:$4 sm:$0xff]   ;;  %v8134_v53 = vcombine.high %v10398_v48, %v10398_v48 }
 0x280   : > { %2687 = vmatpush1.bf16.msra.mxu0 %v9305_v54  ;;  %2851 = vmatpush1.bf16.msra.mxu1 %v9308_v55  ;;  %v9400_v54 = vld [vmem:[%s10159_s22 + $0x628] ss:$16 sps:$4 sm:$0xff]   ;;  %v9405_v55 = vld [vmem:[%s10159_s22 + $0x644] ss:$16 sps:$4 sm:$0xff]  }
 0x281   : > { %2688 = vmatprep.subr.bf16.mxu0 %v9313_v56  ;;  %2852 = vmatprep.subr.bf16.mxu1 %v9316_v57  ;;  %v9408_v56 = vld [vmem:[%s10159_s22 + $0x64c] ss:$16 sps:$4 sm:$0xff]   ;;  %v9403_v57 = vld [vmem:[%s10159_s22 + $0x640] ss:$16 sps:$4 sm:$0xff]  }
 0x284   : > { %2689 = vmatpush1.bf16.msra.mxu0 %v9311_v58  ;;  %2853 = vmatpush1.bf16.msra.mxu1 %v9314_v59  ;;  %v9406_v58 = vld [vmem:[%s10159_s22 + $0x648] ss:$16 sps:$4 sm:$0xff]   ;;  %v9411_v59 = vld [vmem:[%s10159_s22 + $0x664] ss:$16 sps:$4 sm:$0xff]  }
 0x285   : > { %2690 = vmatprep.subr.bf16.mxu0 %v9319_v60  ;;  %2854 = vmatprep.subr.bf16.mxu1 %v9322_v61  ;;  %v9414_v60 = vld [vmem:[%s10159_s22 + $0x66c] ss:$16 sps:$4 sm:$0xff]   ;;  %v9409_v61 = vld [vmem:[%s10159_s22 + $0x660] ss:$16 sps:$4 sm:$0xff]  }
 0x288   : > { %2691 = vmatpush1.bf16.msra.mxu0 %v9317_v62  ;;  %2855 = vmatpush1.bf16.msra.mxu1 %v9320_v63  ;;  %v9412_v62 = vld [vmem:[%s10159_s22 + $0x668] ss:$16 sps:$4 sm:$0xff]   ;;  %v9417_v63 = vld [vmem:[%s10159_s22 + $0x684] ss:$16 sps:$4 sm:$0xff]  }
 0x289   : > { %2692 = vmatprep.subr.bf16.mxu0 %v9325_v0  ;;  %2856 = vmatprep.subr.bf16.mxu1 %v9328_v1  ;;  %v9420_v0 = vld [vmem:[%s10159_s22 + $0x68c] ss:$16 sps:$4 sm:$0xff]   ;;  %v9415_v1 = vld [vmem:[%s10159_s22 + $0x680] ss:$16 sps:$4 sm:$0xff]  }
 0x28c   : > { %2693 = vmatpush1.bf16.msra.mxu0 %v9323_v2  ;;  %2857 = vmatpush1.bf16.msra.mxu1 %v9326_v3  ;;  %v9418_v2 = vld [vmem:[%s10159_s22 + $0x688] ss:$16 sps:$4 sm:$0xff]   ;;  %v9423_v3 = vld [vmem:[%s10159_s22 + $0x6a4] ss:$16 sps:$4 sm:$0xff]  }
 0x28d   : > { %2694 = vmatprep.subr.bf16.mxu0 %v9331_v4  ;;  %2858 = vmatprep.subr.bf16.mxu1 %v9334_v5  ;;  %v9426_v4 = vld [vmem:[%s10159_s22 + $0x6ac] ss:$16 sps:$4 sm:$0xff]   ;;  %v9421_v5 = vld [vmem:[%s10159_s22 + $0x6a0] ss:$16 sps:$4 sm:$0xff]  }
 0x290   : > { %2695 = vmatpush1.bf16.msra.mxu0 %v9329_v6  ;;  %2859 = vmatpush1.bf16.msra.mxu1 %v9332_v7  ;;  %v9424_v6 = vld [vmem:[%s10159_s22 + $0x6a8] ss:$16 sps:$4 sm:$0xff]   ;;  %v9429_v7 = vld [vmem:[%s10159_s22 + $0x6c4] ss:$16 sps:$4 sm:$0xff]  }
 0x291   : > { %2696 = vmatprep.subr.bf16.mxu0 %v9337_v8  ;;  %2860 = vmatprep.subr.bf16.mxu1 %v9340_v9  ;;  %v9432_v8 = vld [vmem:[%s10159_s22 + $0x6cc] ss:$16 sps:$4 sm:$0xff]   ;;  %v9427_v9 = vld [vmem:[%s10159_s22 + $0x6c0] ss:$16 sps:$4 sm:$0xff]  }
 0x294   : > { %2697 = vmatpush1.bf16.msra.mxu0 %v9335_v10  ;;  %2861 = vmatpush1.bf16.msra.mxu1 %v9338_v11  ;;  %v9430_v10 = vld [vmem:[%s10159_s22 + $0x6c8] ss:$16 sps:$4 sm:$0xff]   ;;  %v9435_v11 = vld [vmem:[%s10159_s22 + $0x6e4] ss:$16 sps:$4 sm:$0xff]  }
 0x295   : > { %2698 = vmatprep.subr.bf16.mxu0 %v9343_v12  ;;  %2862 = vmatprep.subr.bf16.mxu1 %v9346_v13  ;;  %v9438_v12 = vld [vmem:[%s10159_s22 + $0x6ec] ss:$16 sps:$4 sm:$0xff]   ;;  %v9433_v13 = vld [vmem:[%s10159_s22 + $0x6e0] ss:$16 sps:$4 sm:$0xff]  }
 0x298   : > { %2699 = vmatpush1.bf16.msra.mxu0 %v9341_v14  ;;  %2863 = vmatpush1.bf16.msra.mxu1 %v9344_v15  ;;  %v9436_v14 = vld [vmem:[%s10159_s22 + $0x6e8] ss:$16 sps:$4 sm:$0xff]   ;;  %v9441_v15 = vld [vmem:[%s10159_s22 + $0x704] ss:$16 sps:$4 sm:$0xff]  }
 0x299   : > { %2700 = vmatprep.subr.bf16.mxu0 %v9349_v16  ;;  %2864 = vmatprep.subr.bf16.mxu1 %v9352_v21  ;;  %v9444_v16 = vld [vmem:[%s10159_s22 + $0x70c] ss:$16 sps:$4 sm:$0xff]   ;;  %v9439_v21 = vld [vmem:[%s10159_s22 + $0x700] ss:$16 sps:$4 sm:$0xff]  }
 0x29c   : > { %2701 = vmatpush1.bf16.msra.mxu0 %v9347_v22  ;;  %2865 = vmatpush1.bf16.msra.mxu1 %v9350_v24  ;;  %v9442_v22 = vld [vmem:[%s10159_s22 + $0x708] ss:$16 sps:$4 sm:$0xff]   ;;  %v9447_v24 = vld [vmem:[%s10159_s22 + $0x724] ss:$16 sps:$4 sm:$0xff]  }
 0x29d   : > { %2702 = vmatprep.subr.bf16.mxu0 %v9355_v25  ;;  %2866 = vmatprep.subr.bf16.mxu1 %v9358_v27  ;;  %v9450_v25 = vld [vmem:[%s10159_s22 + $0x72c] ss:$16 sps:$4 sm:$0xff]   ;;  %v9445_v27 = vld [vmem:[%s10159_s22 + $0x720] ss:$16 sps:$4 sm:$0xff]  }
 0x2a0   : > { %2703 = vmatpush1.bf16.msra.mxu0 %v9353_v28  ;;  %2867 = vmatpush1.bf16.msra.mxu1 %v9356_v30  ;;  %v9448_v28 = vld [vmem:[%s10159_s22 + $0x728] ss:$16 sps:$4 sm:$0xff]   ;;  %v9453_v30 = vld [vmem:[%s10159_s22 + $0x744] ss:$16 sps:$4 sm:$0xff]  }
 0x2a1   : > { %2704 = vmatprep.subr.bf16.mxu0 %v9361_v31  ;;  %2868 = vmatprep.subr.bf16.mxu1 %v9364_v33  ;;  %v9456_v31 = vld [vmem:[%s10159_s22 + $0x74c] ss:$16 sps:$4 sm:$0xff]   ;;  %v9451_v33 = vld [vmem:[%s10159_s22 + $0x740] ss:$16 sps:$4 sm:$0xff]  }
 0x2a4   : > { %2705 = vmatpush1.bf16.msra.mxu0 %v9359_v34  ;;  %2869 = vmatpush1.bf16.msra.mxu1 %v9362_v35  ;;  %v9454_v34 = vld [vmem:[%s10159_s22 + $0x748] ss:$16 sps:$4 sm:$0xff]   ;;  %v9459_v35 = vld [vmem:[%s10159_s22 + $0x764] ss:$16 sps:$4 sm:$0xff]  }
 0x2a5   : > { %2706 = vmatprep.subr.bf16.mxu0 %v9367_v17  ;;  %2870 = vmatprep.subr.bf16.mxu1 %v9370_v18  ;;  %v9462_v17 = vld [vmem:[%s10159_s22 + $0x76c] ss:$16 sps:$4 sm:$0xff]   ;;  %v9457_v18 = vld [vmem:[%s10159_s22 + $0x760] ss:$16 sps:$4 sm:$0xff]  }
 0x2a8   : > { %2707 = vmatpush1.bf16.msra.mxu0 %v9365_v19  ;;  %2871 = vmatpush1.bf16.msra.mxu1 %v9368_v20  ;;  %v9460_v19 = vld [vmem:[%s10159_s22 + $0x768] ss:$16 sps:$4 sm:$0xff]   ;;  %v9465_v20 = vld [vmem:[%s10159_s22 + $0x784] ss:$16 sps:$4 sm:$0xff]  }
 0x2a9   : > { %2708 = vmatprep.subr.bf16.mxu0 %v9373_v23  ;;  %2872 = vmatprep.subr.bf16.mxu1 %v9376_v26  ;;  %v9468_v23 = vld [vmem:[%s10159_s22 + $0x78c] ss:$16 sps:$4 sm:$0xff]   ;;  %v9463_v26 = vld [vmem:[%s10159_s22 + $0x780] ss:$16 sps:$4 sm:$0xff]  }
 0x2ac   : > { %2709 = vmatpush1.bf16.msra.mxu0 %v9371_v29  ;;  %2873 = vmatpush1.bf16.msra.mxu1 %v9374_v32  ;;  %v9466_v29 = vld [vmem:[%s10159_s22 + $0x788] ss:$16 sps:$4 sm:$0xff]   ;;  %v9471_v32 = vld [vmem:[%s10159_s22 + $0x7a4] ss:$16 sps:$4 sm:$0xff]  }
 0x2ad   : > { %2710 = vmatprep.subr.bf16.mxu0 %v9379_v36  ;;  %2874 = vmatprep.subr.bf16.mxu1 %v9382_v37  ;;  %v9474_v36 = vld [vmem:[%s10159_s22 + $0x7ac] ss:$16 sps:$4 sm:$0xff]   ;;  %v9469_v37 = vld [vmem:[%s10159_s22 + $0x7a0] ss:$16 sps:$4 sm:$0xff]  }
 0x2b0   : > { %2711 = vmatpush1.bf16.msra.mxu0 %v9377_v38  ;;  %2875 = vmatpush1.bf16.msra.mxu1 %v9380_v39  ;;  %v9472_v38 = vld [vmem:[%s10159_s22 + $0x7a8] ss:$16 sps:$4 sm:$0xff]   ;;  %v9477_v39 = vld [vmem:[%s10159_s22 + $0x7c4] ss:$16 sps:$4 sm:$0xff]  }
 0x2b1   : > { %2712 = vmatprep.subr.bf16.mxu0 %v9385_v40  ;;  %2876 = vmatprep.subr.bf16.mxu1 %v9388_v41  ;;  %v9480_v40 = vld [vmem:[%s10159_s22 + $0x7cc] ss:$16 sps:$4 sm:$0xff]   ;;  %v9475_v41 = vld [vmem:[%s10159_s22 + $0x7c0] ss:$16 sps:$4 sm:$0xff]  }
 0x2b4   : > { %2713 = vmatpush1.bf16.msra.mxu0 %v9383_v42  ;;  %2877 = vmatpush1.bf16.msra.mxu1 %v9386_v43  ;;  %v9478_v42 = vld [vmem:[%s10159_s22 + $0x7c8] ss:$16 sps:$4 sm:$0xff]   ;;  %v9483_v43 = vld [vmem:[%s10159_s22 + $0x7e4] ss:$16 sps:$4 sm:$0xff]  }
 0x2b5   : > { %2723 = vmatprep.subr.bf16.mxu0 %v9393_v44  ;;  %2887 = vmatprep.subr.bf16.mxu1 %v9396_v45  ;;  %v9486_v44 = vld [vmem:[%s10159_s22 + $0x7ec] ss:$16 sps:$4 sm:$0xff]   ;;  %v9481_v45 = vld [vmem:[%s10159_s22 + $0x7e0] ss:$16 sps:$4 sm:$0xff]  }
 0x2b7   : > { %2715 = vmatmul.mubr.bf16.vlgmr.msra.gmra.mrb[0].mxu0 %v8131_v46  ;;  %2879 = vmatmul.mubr.bf16.vlgmr.msra.gmra.mrb[0].mxu1 %v8131_v46  ;;  %v9484_v46 = vld [vmem:[%s10159_s22 + $0x7e8] ss:$16 sps:$4 sm:$0xff]   ;;  %s2928_s22 = sshra.s32 %s8126_s30, 7 }
 0x2b8   : > { %2724 = vmatpush1.bf16.msra.mxu0 %v9391_v49  ;;  %2888 = vmatpush1.bf16.msra.mxu1 %v9394_v50  ;;  %v8133_v49 = vcombine.low %v10398_v48, %v10398_v48  ;;  %v1272_v50 = vlaneseq  ;;  %s8391_s11 = sshll.u32 %s2928_s22, 3 }
 0x2b9   : > { %2725 = vmatprep.subr.bf16.mxu0 %v9399_v51  ;;  %2889 = vmatprep.subr.bf16.mxu1 %v9402_v52  ;;  %s2931_s17 = scalar_lea.vmem [#allocation3], %s8391_s11 }
 0x2ba   : > { %2755 = vmatprep.mubr.bf16.mxu0 %v8134_v53  ;;  %2919 = vmatprep.mubr.bf16.mxu1 %v8134_v53  ;;  %v10466_v51 = vshrl.u32 %v1272_v50, 7 }
 0x2bc   : > { %2726 = vmatpush1.bf16.msra.mxu0 %v9397_v47  ;;  %2890 = vmatpush1.bf16.msra.mxu1 %v9400_v54  ;;  %v1274_v52 = vsub.s32 0, %v10466_v51  ;;  %v1282_v53 = vsub.s32 2, %v10466_v51  ;;  %v1270_v47 = vld [vmem:[%s812_s21] sm:$0xf]  ;;  %v1278_v48 = vsub.s32 1, %v10466_v51  ;;  %v1286_v54 = vsub.s32 3, %v10466_v51 }
 0x2bd   : > { %2727 = vmatprep.subr.bf16.mxu0 %v9405_v55  ;;  %2891 = vmatprep.subr.bf16.mxu1 %v9408_v56 }
 0x2be   : > { %v1275_v55 = vrot.slane %v1270_v47, %v1274_v52  ;;  %v1283_v56 = vrot.slane %v1270_v47, %v1282_v53 }
 0x2c0   : > { %2728 = vmatpush1.bf16.msra.mxu0 %v9403_v57  ;;  %2892 = vmatpush1.bf16.msra.mxu1 %v9406_v58  ;;  %v1279_v57 = vrot.slane %v1270_v47, %v1278_v48  ;;  %v1287_v58 = vrot.slane %v1270_v47, %v1286_v54 }
 0x2c1   : > { %2729 = vmatprep.subr.bf16.mxu0 %v9411_v59  ;;  %2893 = vmatprep.subr.bf16.mxu1 %v9414_v60 }
 0x2c4   : > { %2730 = vmatpush1.bf16.msra.mxu0 %v9409_v61  ;;  %2894 = vmatpush1.bf16.msra.mxu1 %v9412_v62 }
 0x2c5   : > { %2731 = vmatprep.subr.bf16.mxu0 %v9417_v63  ;;  %2895 = vmatprep.subr.bf16.mxu1 %v9420_v0 }
 0x2c8   : > { %2732 = vmatpush1.bf16.msra.mxu0 %v9415_v1  ;;  %2896 = vmatpush1.bf16.msra.mxu1 %v9418_v2 }
 0x2c9   : > { %2733 = vmatprep.subr.bf16.mxu0 %v9423_v3  ;;  %2897 = vmatprep.subr.bf16.mxu1 %v9426_v4 }
 0x2cc   : > { %2734 = vmatpush1.bf16.msra.mxu0 %v9421_v5  ;;  %2898 = vmatpush1.bf16.msra.mxu1 %v9424_v6 }
 0x2cd   : > { %2735 = vmatprep.subr.bf16.mxu0 %v9429_v7  ;;  %2899 = vmatprep.subr.bf16.mxu1 %v9432_v8  ;;  %v9554_v8 = vmov (!%p8392_p10), 0.0  }
 0x2d0   : > { %2736 = vmatpush1.bf16.msra.mxu0 %v9427_v9  ;;  %2900 = vmatpush1.bf16.msra.mxu1 %v9430_v10  ;;  %v2941_v10 = vand.u32 (!%p8392_p10), 127, %v1272_v50 }
 0x2d1   : > { %2737 = vmatprep.subr.bf16.mxu0 %v9435_v11  ;;  %2901 = vmatprep.subr.bf16.mxu1 %v9438_v12  ;;  %v9556_v12 = vmov (!%p8392_p10), -1e+30  }
 0x2d2   : > { %vm2942_vm1 = vcmp.lt.s32.totalorder (!%p8392_p10), %v2941_v10, 5 }
 0x2d4   : > { %2738 = vmatpush1.bf16.msra.mxu0 %v9433_v13  ;;  %2902 = vmatpush1.bf16.msra.mxu1 %v9436_v14  ;;  %v10496_v13 = vsel (!%p8392_p10), %vm2942_vm1, 0.0, %v9556_v12 }
 0x2d5   : > { %2739 = vmatprep.subr.bf16.mxu0 %v9441_v15  ;;  %2903 = vmatprep.subr.bf16.mxu1 %v9444_v16 }
 0x2d8   : > { %2740 = vmatpush1.bf16.msra.mxu0 %v9439_v21  ;;  %2904 = vmatpush1.bf16.msra.mxu1 %v9442_v22 }
 0x2d9   : > { %2741 = vmatprep.subr.bf16.mxu0 %v9447_v24  ;;  %2905 = vmatprep.subr.bf16.mxu1 %v9450_v25 }
 0x2dc   : > { %2742 = vmatpush1.bf16.msra.mxu0 %v9445_v27  ;;  %2906 = vmatpush1.bf16.msra.mxu1 %v9448_v28 }
 0x2dd   : > { %2743 = vmatprep.subr.bf16.mxu0 %v9453_v30  ;;  %2907 = vmatprep.subr.bf16.mxu1 %v9456_v31 }
 0x2e0   : > { %2744 = vmatpush1.bf16.msra.mxu0 %v9451_v33  ;;  %2908 = vmatpush1.bf16.msra.mxu1 %v9454_v34 }
 0x2e1   : > { %2745 = vmatprep.subr.bf16.mxu0 %v9459_v35  ;;  %2909 = vmatprep.subr.bf16.mxu1 %v9462_v17 }
 0x2e4   : > { %2746 = vmatpush1.bf16.msra.mxu0 %v9457_v18  ;;  %2910 = vmatpush1.bf16.msra.mxu1 %v9460_v19 }
 0x2e5   : > { %2747 = vmatprep.subr.bf16.mxu0 %v9465_v20  ;;  %2911 = vmatprep.subr.bf16.mxu1 %v9468_v23 }
 0x2e8   : > { %2748 = vmatpush1.bf16.msra.mxu0 %v9463_v26  ;;  %2912 = vmatpush1.bf16.msra.mxu1 %v9466_v29 }
 0x2e9   : > { %2749 = vmatprep.subr.bf16.mxu0 %v9471_v32  ;;  %2913 = vmatprep.subr.bf16.mxu1 %v9474_v36 }
 0x2ec   : > { %2750 = vmatpush1.bf16.msra.mxu0 %v9469_v37  ;;  %2914 = vmatpush1.bf16.msra.mxu1 %v9472_v38 }
 0x2ed   : > { %2751 = vmatprep.subr.bf16.mxu0 %v9477_v39  ;;  %2915 = vmatprep.subr.bf16.mxu1 %v9480_v40 }
 0x2f0   : > { %2752 = vmatpush1.bf16.msra.mxu0 %v9475_v41  ;;  %2916 = vmatpush1.bf16.msra.mxu1 %v9478_v42 }
 0x2f1   : > { %2753 = vmatprep.subr.bf16.mxu0 %v9483_v43  ;;  %2917 = vmatprep.subr.bf16.mxu1 %v9486_v44 }
 0x2f4   : > { %2754 = vmatpush1.bf16.msra.mxu0 %v9481_v45  ;;  %2918 = vmatpush1.bf16.msra.mxu1 %v9484_v46 }
 0x2f5   : > { %8960 = vmatprep.subr.mxu0 (!%p8392_p10), %v9554_v8  ;;  %8965 = vmatprep.subr.mxu1 (!%p8392_p10), %v9554_v8 }
 0x2f7   : > { %2756 = vmatmul.mubr.bf16.vlgmr.msra.gmra.mrb[0].mxu0 %v8133_v49  ;;  %2920 = vmatmul.mubr.bf16.vlgmr.msra.gmra.mrb[0].mxu1 %v8133_v49 }
 0x2f8   : > { %8962 = vmatprep.mubr.msk.f32.mxu0 (!%p8392_p10), %vm9555_vm0, %v9554_v8  ;;  %8967 = vmatprep.mubr.msk.f32.mxu1 (!%p8392_p10), %vm9555_vm0, %v9554_v8 }
 0x3c8   : > { %2939 = sbr.rel (%p8392_p10) target bundleno = 2948 (0xb84), region = 79 }
 0x3ca   : > { %v2757_v59 = vpop.f32.mrb[0].mxu0  ;;  %v2921_v60 = vpop.f32.mrb[0].mxu1 }
 0x3cb   : > { %v9040_v61 = vadd.f32 %v2757_v59, %v1275_v55  ;;  %v9042_v62 = vadd.f32 %v2921_v60, %v1283_v56  ;;  %v2759_v63 = vpop.f32.mrb[1].mxu0  ;;  %v2923_v0 = vpop.f32.mrb[1].mxu1 }
 0x3cc   : > { %v9041_v1 = vadd.f32 %v2759_v63, %v1279_v57  ;;  %v9043_v2 = vadd.f32 %v2923_v0, %v1287_v58  ;;  %v2761_v3 = vpop.f32.mrb[2].mxu0  ;;  %v2925_v4 = vpop.f32.mrb[2].mxu1 }
 0x3cd   : > { %2932 = vst [vmem:[%s2931_s17] sm:$0xff] %v9040_v61  ;;  %2934 = vst [vmem:[%s2931_s17 + $0x10] sm:$0xff] %v9042_v62  ;;  %v2762_v5 = vpop.f32.mrb[3].mxu0  ;;  %v2926_v6 = vpop.f32.mrb[3].mxu1 }
 0x3ce   : > { %2933 = vst [vmem:[%s2931_s17 + $0x8] sm:$0xff] %v9041_v1  ;;  %2935 = vst [vmem:[%s2931_s17 + $0x18] sm:$0xff] %v9043_v2 }
 0x3d5   : > { %v2945_v7 = vld [vmem:[#allocation3 + $0x40] sm:$0xff]  ;;  %v3107_v35 = vld [vmem:[#allocation3 + $0x48] sm:$0xff]  ;;  %v3268_v18 = vld [vmem:[#allocation3 + $0x50] sm:$0xff] }
 0x3d6   : > { %8961 = vmatpush3.xpose.msra.mxu0 %v2945_v7  ;;  %v2944_v9 = vld [vmem:[#allocation3] sm:$0xff]  ;;  %v3106_v17 = vld [vmem:[#allocation3 + $0x8] sm:$0xff]  ;;  %v3267_v19 = vld [vmem:[#allocation3 + $0x10] sm:$0xff] }
 0x3d7   : > { %8975 = vmatprep.subr.mxu0 %v9554_v8  ;;  %v2946_v30 = vld [vmem:[#allocation3 + $0x80] sm:$0xff]  ;;  %v3429_v20 = vld [vmem:[#allocation3 + $0x58] sm:$0xff]  ;;  %v3751_v32 = vld [vmem:[#allocation3 + $0x68] sm:$0xff] }
 0x3d8   : > { %8966 = vmatpush3.msra.mxu1 %v2946_v30  ;;  %v3428_v23 = vld [vmem:[#allocation3 + $0x18] sm:$0xff]  ;;  %v3590_v26 = vld [vmem:[#allocation3 + $0x60] sm:$0xff]  ;;  %v3750_v36 = vld [vmem:[#allocation3 + $0x28] sm:$0xff] }
 0x3d9   : > { %8963 = vmatmul.mubr.f32.vlgmr.msra.gmra.mrb[0].mxu0 %v2944_v9  ;;  %8970 = vmatprep.subr.mxu1 %v9554_v8  ;;  %v3589_v29 = vld [vmem:[#allocation3 + $0x20] sm:$0xff]  ;;  %v3912_v37 = vld [vmem:[#allocation3 + $0x70] sm:$0xff]  ;;  %v4073_v39 = vld [vmem:[#allocation3 + $0x78] sm:$0xff] }
 0x3da   : > { %8977 = vmatprep.mubr.msk.f32.mxu0 %vm9555_vm0, %v9554_v8  ;;  %v3911_v38 = vld [vmem:[#allocation3 + $0x30] sm:$0xff]  ;;  %v4072_v40 = vld [vmem:[#allocation3 + $0x38] sm:$0xff] }
 0x4ac   : > { %v3013_v11 = vpop.f32.mrb[0].mxu0 }
 0x4ad   : > { %v3017_v14 = vmul.f32 0.088388346, %v3013_v11  ;;  %v8964_v15 = vpop.f32.mrb[1].mxu0 }
 0x4af   : > { %v3018_v16 = vadd.f32 %v3017_v14, %v10496_v13 }
 0x4b1   : > { %v3020_v21 = vsel %vm3019_vm2, %v3018_v16, -inf }
 0x4b2   : > { %3021 = vmax.xlane.f32.xlu0 %v3020_v21 }
 0x53f   : > { %v3022_v22 = vpop.xlane.xlu0 %3021 }
 0x540   : > { %v3023_v24 = vsub.f32 %v3018_v16, %v3022_v22 }
 0x542   : > { %v3024_v25 = vmul.f32 1.442695, %v3023_v24 }
 0x544   : > { %9497 = vpow2.f32 %v3024_v25 }
 0x54e   : > { %v9498_v27 = vpop.eup %9497 }
 0x54f   : > { %v3026_v28 = vsel %vm3019_vm2, %v9498_v27, 0.0 }
 0x550   : > { %3027 = vadd.xlane.f32.xlu0 %v3026_v28 }
 0x5dd   : > { %v3028_v31 = vpop.xlane.xlu0 %3027 }
 0x5de   : > { %9499 = vrcp.f32 %v3028_v31 }
 0x5e8   : > { %v9500_v33 = vpop.eup %9499 }
 0x5e9   : > { %v3030_v34 = vmul.f32 %v9500_v33, %v9498_v27 }
 0x5eb   : > { %8968 = vmatmul.mubr.msk.f32.vlgmr.msra.gmra.mrb[0].mxu1 %vm3019_vm2, %v3030_v34 }
 0x5ec   : > { %8971 = vmatpush3.xpose.msra.mxu1 %v3107_v35  ;;  %8972 = vmatprep.mubr.msk.f32.mxu1 %vm9555_vm0, %v9554_v8 }
 0x5ed   : > { %8980 = vmatprep.subr.mxu1 %v9554_v8 }
 0x5ef   : > { %8973 = vmatmul.mubr.f32.vlgmr.msra.gmra.mrb[2].mxu1 %v3106_v17 }
 0x5f0   : > { %8981 = vmatpush3.xpose.msra.mxu1 %v3268_v18  ;;  %8982 = vmatprep.mubr.msk.f32.mxu1 %vm9555_vm0, %v9554_v8 }
 0x5f1   : > { %8990 = vmatprep.subr.mxu1 %v9554_v8 }
 0x5f3   : > { %8983 = vmatmul.mubr.f32.vlgmr.msra.gmra.mrb[4].mxu1 %v3267_v19 }
 0x5f4   : > { %8991 = vmatpush3.xpose.msra.mxu1 %v3429_v20  ;;  %8992 = vmatprep.mubr.msk.f32.mxu1 %vm9555_vm0, %v9554_v8 }
 0x5f5   : > { %9000 = vmatprep.subr.mxu1 %v9554_v8 }
 0x5f7   : > { %8993 = vmatmul.mubr.f32.vlgmr.msra.gmra.mrb[6].mxu1 %v3428_v23 }
 0x5f8   : > { %9001 = vmatpush3.xpose.msra.mxu1 %v3590_v26  ;;  %9002 = vmatprep.mubr.msk.f32.mxu1 %vm9555_vm0, %v9554_v8 }
 0x5f9   : > { %9010 = vmatprep.subr.mxu1 %v9554_v8 }
 0x5fb   : > { %9003 = vmatmul.mubr.f32.vlgmr.msra.gmra.mrb[8].mxu1 %v3589_v29 }
 0x5fc   : > { %9011 = vmatpush3.xpose.msra.mxu1 %v3751_v32  ;;  %9012 = vmatprep.mubr.msk.f32.mxu1 %vm9555_vm0, %v9554_v8 }
 0x5fd   : > { %9020 = vmatprep.subr.mxu1 %v9554_v8 }
 0x5ff   : > { %9013 = vmatmul.mubr.f32.vlgmr.msra.gmra.mrb[10].mxu1 %v3750_v36 }
 0x600   : > { %9021 = vmatpush3.xpose.msra.mxu1 %v3912_v37  ;;  %9022 = vmatprep.mubr.msk.f32.mxu1 %vm9555_vm0, %v9554_v8 }
 0x601   : > { %9030 = vmatprep.subr.mxu1 %v9554_v8 }
 0x603   : > { %9023 = vmatmul.mubr.f32.vlgmr.msra.gmra.mrb[12].mxu1 %v3911_v38 }
 0x604   : > { %9031 = vmatpush3.xpose.msra.mxu1 %v4073_v39  ;;  %9032 = vmatprep.mubr.msk.f32.mxu1 %vm9555_vm0, %v9554_v8 }
 0x607   : > { %9033 = vmatmul.mubr.f32.vlgmr.msra.gmra.mrb[14].mxu1 %v4072_v40 }
 0x6be   : > { %v3100_v41 = vpop.f32.mrb[0].mxu1 }
 0x6bf   : > { %v3104_v42 = vpack.c.bf16 %v3100_v41, %v3100_v41  ;;  %v8969_v43 = vpop.f32.mrb[1].mxu1 }
 0x6c1   : > { %3105 = vst [vmem:[#allocation4] sm:$0xf] %v3104_v42 }
 0x6c2   : > { %v3175_v44 = vpop.f32.mrb[2].mxu1 }
 0x6c3   : > { %v3179_v45 = vmul.f32 0.088388346, %v3175_v44  ;;  %v8974_v46 = vpop.f32.mrb[3].mxu1 }
 0x6c5   : > { %v3180_v49 = vadd.f32 %v3179_v45, %v10496_v13 }
 0x6c6   : > { %v3336_v50 = vpop.f32.mrb[4].mxu1 }
 0x6c7   : > { %v3340_v47 = vmul.f32 0.088388346, %v3336_v50  ;;  %v8984_v55 = vpop.f32.mrb[5].mxu1  ;;  %v3181_v56 = vsel %vm3019_vm2, %v3180_v49, -inf }
 0x6c8   : > { %3182 = vmax.xlane.f32.xlu1 %v3181_v56 }
 0x6c9   : > { %v3341_v57 = vadd.f32 %v3340_v47, %v10496_v13 }
 0x6ca   : > { %v3497_v58 = vpop.f32.mrb[6].mxu1 }
 0x6cb   : > { %v3501_v59 = vmul.f32 0.088388346, %v3497_v58  ;;  %v8994_v60 = vpop.f32.mrb[7].mxu1  ;;  %v3342_v61 = vsel %vm3019_vm2, %v3341_v57, -inf }
 0x6cc   : > { %3343 = vmax.xlane.f32.xlu1 %v3342_v61  ;;  %v3108_v61 = vld [vmem:[#allocation3 + $0x88] sm:$0xff] }
 0x6cd   : > { %v3502_v62 = vadd.f32 %v3501_v59, %v10496_v13  ;;  %8976 = vmatpush3.msra.mxu0 %v3108_v61 }
 0x6ce   : > { %v3658_v63 = vpop.f32.mrb[8].mxu1  ;;  %8985 = vmatprep.subr.mxu0 %v9554_v8 }
 0x6cf   : > { %v3662_v0 = vmul.f32 0.088388346, %v3658_v63  ;;  %v3503_v1 = vsel %vm3019_vm2, %v3502_v62, -inf  ;;  %v9004_v2 = vpop.f32.mrb[9].mxu1  ;;  %v4299_v63 = vld [vmem:[%s12292_s5 + $0x20] sm:$0xff] }
 0x6d0   : > { %3504 = vmax.xlane.f32.xlu0 %v3503_v1 }
 0x6d1   : > { %v3663_v3 = vadd.f32 %v3662_v0, %v10496_v13  ;;  %v4303_v0 = vld [vmem:[%s12292_s5 + $0x40] sm:$0xff] }
 0x6d2   : > { %v3819_v4 = vpop.f32.mrb[10].mxu1 }
 0x6d3   : > { %v3823_v5 = vmul.f32 0.088388346, %v3819_v4  ;;  %v3664_v6 = vsel %vm3019_vm2, %v3663_v3, -inf  ;;  %v9014_v7 = vpop.f32.mrb[11].mxu1 }
 0x6d4   : > { %3665 = vmax.xlane.f32.xlu1 %v3664_v6  ;;  %v4315_v6 = vld [vmem:[%s12292_s5 + $0xa0] sm:$0xff] }
 0x6d5   : > { %v3824_v9 = vadd.f32 %v3823_v5, %v10496_v13  ;;  %v4311_v5 = vld [vmem:[%s12292_s5 + $0x80] sm:$0xff] }
 0x6d6   : > { %v3980_v10 = vpop.f32.mrb[12].mxu1 }
 0x6d7   : > { %v3984_v11 = vmul.f32 0.088388346, %v3980_v10  ;;  %v3825_v12 = vsel %vm3019_vm2, %v3824_v9, -inf  ;;  %v9024_v14 = vpop.f32.mrb[13].mxu1  ;;  %v4319_v10 = vld [vmem:[%s12292_s5 + $0xc0] sm:$0xff] }
 0x6d8   : > { %3826 = vmax.xlane.f32.xlu0 %v3825_v12  ;;  %v8425_v12 = vcombine.low %v4311_v5, %v4315_v6 }
 0x6d9   : > { %v3985_v15 = vadd.f32 %v3984_v11, %v10496_v13  ;;  %v4323_v11 = vld [vmem:[%s12292_s5 + $0xe0] sm:$0xff] }
 0x6da   : > { %v4141_v16 = vpop.f32.mrb[14].mxu1  ;;  %v8434_v14 = vcombine.high %v4319_v10, %v4323_v11 }
 0x6db   : > { %v4145_v21 = vmul.f32 0.088388346, %v4141_v16  ;;  %v3986_v22 = vsel %vm3019_vm2, %v3985_v15, -inf  ;;  %v9034_v24 = vpop.f32.mrb[15].mxu1  ;;  %v4331_v16 = vld [vmem:[%s12292_s5 + $0x120] sm:$0xff] }
 0x6dc   : > { %3987 = vmax.xlane.f32.xlu1 %v3986_v22  ;;  %v4335_v24 = vld [vmem:[%s12292_s5 + $0x140] sm:$0xff] }
 0x6dd   : > { %v4146_v25 = vadd.f32 %v4145_v21, %v10496_v13  ;;  %v8433_v21 = vcombine.low %v4319_v10, %v4323_v11  ;;  %v3430_v10 = vld [vmem:[#allocation3 + $0x98] sm:$0xff] }
 0x6df   : > { %v4147_v27 = vsel %vm3019_vm2, %v4146_v25, -inf }
 0x6e0   : > { %4148 = vmax.xlane.f32.xlu0 %v4147_v27 }
 0x755   : > { %v3183_v28 = vpop.xlane.xlu1 %3182 }
 0x756   : > { %v3184_v30 = vsub.f32 %v3180_v49, %v3183_v28 }
 0x758   : > { %v3185_v31 = vmul.f32 1.442695, %v3184_v30  ;;  %v4343_v30 = vld [vmem:[%s12292_s5 + $0x180] sm:$0xff] }
 0x759   : > { %v3344_v33 = vpop.xlane.xlu1 %3343 }
 0x75a   : > { %9501 = vpow2.f32 %v3185_v31  ;;  %v3345_v34 = vsub.f32 %v3341_v57, %v3344_v33  ;;  %v4347_v31 = vld [vmem:[%s12292_s5 + $0x1a0] sm:$0xff] }
 0x75c   : > { %v3346_v35 = vmul.f32 1.442695, %v3345_v34  ;;  %v8458_v34 = vcombine.high %v4343_v30, %v4347_v31 }
 0x75d   : > { %v3505_v17 = vpop.xlane.xlu0 %3504 }
 0x75e   : > { %9503 = vpow2.f32 %v3346_v35  ;;  %v3506_v18 = vsub.f32 %v3502_v62, %v3505_v17  ;;  %v4295_v62 = vld [vmem:[%s12292_s5] sm:$0xff] }
 0x75f   : > { %v8409_v1 = vcombine.low %v4295_v62, %v4299_v63  ;;  %v8410_v2 = vcombine.high %v4295_v62, %v4299_v63  ;;  %v4351_v35 = vld [vmem:[%s12292_s5 + $0x1c0] sm:$0xff] }
 0x760   : > { %v3507_v19 = vmul.f32 1.442695, %v3506_v18  ;;  %v4355_v17 = vld [vmem:[%s12292_s5 + $0x1e0] sm:$0xff]  ;;  %v8457_v18 = vcombine.low %v4343_v30, %v4347_v31 }
 0x761   : > { %v3666_v20 = vpop.xlane.xlu1 %3665  ;;  %7395 = vmatprep.subr.bf16.mxu1 %v8410_v2  ;;  %v4431_v31 = vld [vmem:[%s12292_s5 + $0x440] sm:$0xff] }
 0x762   : > { %9505 = vpow2.f32 %v3507_v19  ;;  %v3667_v23 = vsub.f32 %v3663_v3, %v3666_v20  ;;  %v4307_v3 = vld [vmem:[%s12292_s5 + $0x60] sm:$0xff]  ;;  %7396 = vmatpush1.bf16.msra.mxu1 %v8409_v1  ;;  %v8466_v19 = vcombine.high %v4351_v35, %v4355_v17 }
 0x763   : > { %v8418_v4 = vcombine.high %v4303_v0, %v4307_v3  ;;  %v8417_v7 = vcombine.low %v4303_v0, %v4307_v3  ;;  %v4359_v20 = vld [vmem:[%s12292_s5 + $0x200] sm:$0xff] }
 0x764   : > { %v10537_v26 = vpop.eup %9501  ;;  %v3668_v13 = vmul.f32 1.442695, %v3667_v23  ;;  %v4363_v23 = vld [vmem:[%s12292_s5 + $0x220] sm:$0xff] }
 0x765   : > { %v3827_v29 = vpop.xlane.xlu0 %3826  ;;  %v3187_v32 = vsel %vm3019_vm2, %v10537_v26, 0.0  ;;  %7397 = vmatprep.subr.bf16.mxu1 %v8418_v4 }
 0x766   : > { %9507 = vpow2.f32 %v3668_v13  ;;  %v3828_v36 = vsub.f32 %v3824_v9, %v3827_v29  ;;  %3188 = vadd.xlane.f32.xlu1 %v3187_v32  ;;  %v8426_v9 = vcombine.high %v4311_v5, %v4315_v6  ;;  %7398 = vmatpush1.bf16.msra.mxu1 %v8417_v7  ;;  %v8465_v13 = vcombine.low %v4351_v35, %v4355_v17  ;;  %v4367_v32 = vld [vmem:[%s12292_s5 + $0x240] sm:$0xff]  ;;  %v3269_v5 = vld [vmem:[#allocation3 + $0x90] sm:$0xff] }
 0x767   : > { %v8474_v29 = vcombine.high %v4359_v20, %v4363_v23 }
 0x768   : > { %v10541_v37 = vpop.eup %9503  ;;  %v3829_v38 = vmul.f32 1.442695, %v3828_v36  ;;  %7399 = vmatprep.subr.bf16.mxu1 %v8426_v9  ;;  %v4371_v36 = vld [vmem:[%s12292_s5 + $0x260] sm:$0xff] }
 0x769   : > { %v3988_v39 = vpop.xlane.xlu1 %3987  ;;  %v3348_v40 = vsel %vm3019_vm2, %v10541_v37, 0.0 }
 0x76a   : > { %9509 = vpow2.f32 %v3829_v38  ;;  %v3989_v41 = vsub.f32 %v3985_v15, %v3988_v39  ;;  %3349 = vadd.xlane.f32.xlu0 %v3348_v40  ;;  %v4327_v15 = vld [vmem:[%s12292_s5 + $0x100] sm:$0xff]  ;;  %7400 = vmatpush1.bf16.msra.mxu1 %v8425_v12  ;;  %v8473_v38 = vcombine.low %v4359_v20, %v4363_v23  ;;  %v8482_v39 = vcombine.high %v4367_v32, %v4371_v36 }
 0x76b   : > { %7401 = vmatprep.subr.bf16.mxu1 %v8434_v14  ;;  %v8442_v22 = vcombine.high %v4327_v15, %v4331_v16  ;;  %v8441_v27 = vcombine.low %v4327_v15, %v4331_v16  ;;  %v4375_v40 = vld [vmem:[%s12292_s5 + $0x280] sm:$0xff] }
 0x76c   : > { %v10545_v42 = vpop.eup %9505  ;;  %v3990_v43 = vmul.f32 1.442695, %v3989_v41  ;;  %v4379_v41 = vld [vmem:[%s12292_s5 + $0x2a0] sm:$0xff] }
 0x76d   : > { %v4149_v44 = vpop.xlane.xlu0 %4148  ;;  %v3509_v45 = vsel %vm3019_vm2, %v10545_v42, 0.0  ;;  %v3591_v14 = vld [vmem:[#allocation3 + $0xa0] sm:$0xff] }
 0x76e   : > { %9511 = vpow2.f32 %v3990_v43  ;;  %v4150_v46 = vsub.f32 %v4146_v25, %v4149_v44  ;;  %3510 = vadd.xlane.f32.xlu1 %v3509_v45  ;;  %v4339_v25 = vld [vmem:[%s12292_s5 + $0x160] sm:$0xff]  ;;  %7402 = vmatpush1.bf16.msra.mxu1 %v8433_v21  ;;  %v8481_v43 = vcombine.low %v4367_v32, %v4371_v36  ;;  %v8490_v44 = vcombine.high %v4375_v40, %v4379_v41  ;;  %v3752_v21 = vld [vmem:[#allocation3 + $0xa8] sm:$0xff] }
 0x76f   : > { %7403 = vmatprep.subr.bf16.mxu1 %v8442_v22  ;;  %v8450_v28 = vcombine.high %v4335_v24, %v4339_v25  ;;  %v8449_v33 = vcombine.low %v4335_v24, %v4339_v25  ;;  %v4383_v45 = vld [vmem:[%s12292_s5 + $0x2c0] sm:$0xff]  ;;  %v3913_v24 = vld [vmem:[#allocation3 + $0xb0] sm:$0xff] }
 0x770   : > { %v10549_v49 = vpop.eup %9507  ;;  %v4151_v50 = vmul.f32 1.442695, %v4150_v46  ;;  %v4387_v46 = vld [vmem:[%s12292_s5 + $0x2e0] sm:$0xff] }
 0x771   : > { %v3670_v47 = vsel %vm3019_vm2, %v10549_v49, 0.0  ;;  %v4427_v25 = vld [vmem:[%s12292_s5 + $0x420] sm:$0xff] }
 0x772   : > { %9513 = vpow2.f32 %v4151_v50  ;;  %3671 = vadd.xlane.f32.xlu0 %v3670_v47  ;;  %7404 = vmatpush1.bf16.msra.mxu1 %v8441_v27  ;;  %v8489_v50 = vcombine.low %v4375_v40, %v4379_v41  ;;  %v8498_v47 = vcombine.high %v4383_v45, %v4387_v46  ;;  %v4455_v32 = vld [vmem:[%s12292_s5 + $0x500] sm:$0xff] }
 0x773   : > { %7405 = vmatprep.subr.bf16.mxu1 %v8450_v28  ;;  %v4074_v28 = vld [vmem:[#allocation3 + $0xb8] sm:$0xff]  ;;  %v4459_v36 = vld [vmem:[%s12292_s5 + $0x520] sm:$0xff] }
 0x774   : > { %v10553_v55 = vpop.eup %9509  ;;  %v4463_v40 = vld [vmem:[%s12292_s5 + $0x540] sm:$0xff] }
 0x775   : > { %v3831_v56 = vsel %vm3019_vm2, %v10553_v55, 0.0  ;;  %v4467_v41 = vld [vmem:[%s12292_s5 + $0x560] sm:$0xff] }
 0x776   : > { %3832 = vadd.xlane.f32.xlu1 %v3831_v56  ;;  %7406 = vmatpush1.bf16.msra.mxu1 %v8449_v33  ;;  %v4391_v56 = vld [vmem:[%s12292_s5 + $0x300] sm:$0xff] }
 0x777   : > { %7407 = vmatprep.subr.bf16.mxu1 %v8458_v34  ;;  %v4435_v33 = vld [vmem:[%s12292_s5 + $0x460] sm:$0xff] }
 0x778   : > { %v10557_v57 = vpop.eup %9511  ;;  %v8546_v17 = vcombine.high %v4431_v31, %v4435_v33  ;;  %v8545_v20 = vcombine.low %v4431_v31, %v4435_v33  ;;  %v4415_v31 = vld [vmem:[%s12292_s5 + $0x3c0] sm:$0xff] }
 0x779   : > { %v3992_v58 = vsel %vm3019_vm2, %v10557_v57, 0.0  ;;  %v4419_v33 = vld [vmem:[%s12292_s5 + $0x3e0] sm:$0xff] }
 0x77a   : > { %3993 = vadd.xlane.f32.xlu0 %v3992_v58  ;;  %7408 = vmatpush1.bf16.msra.mxu1 %v8457_v18  ;;  %v4395_v58 = vld [vmem:[%s12292_s5 + $0x320] sm:$0xff] }
 0x77b   : > { %7409 = vmatprep.subr.bf16.mxu1 %v8466_v19  ;;  %v8506_v61 = vcombine.high %v4391_v56, %v4395_v58  ;;  %v8505_v62 = vcombine.low %v4391_v56, %v4395_v58  ;;  %v4439_v18 = vld [vmem:[%s12292_s5 + $0x480] sm:$0xff] }
 0x77c   : > { %v10561_v59 = vpop.eup %9513  ;;  %v4443_v19 = vld [vmem:[%s12292_s5 + $0x4a0] sm:$0xff] }
 0x77d   : > { %v4153_v60 = vsel %vm3019_vm2, %v10561_v59, 0.0  ;;  %v8554_v23 = vcombine.high %v4439_v18, %v4443_v19  ;;  %v4479_v56 = vld [vmem:[%s12292_s5 + $0x5c0] sm:$0xff] }
 0x77e   : > { %4154 = vadd.xlane.f32.xlu1 %v4153_v60  ;;  %7410 = vmatpush1.bf16.msra.mxu1 %v8465_v13  ;;  %v8497_v60 = vcombine.low %v4383_v45, %v4387_v46  ;;  %v8553_v13 = vcombine.low %v4439_v18, %v4443_v19  ;;  %v4471_v45 = vld [vmem:[%s12292_s5 + $0x580] sm:$0xff] }
 0x77f   : > { %7411 = vmatprep.subr.bf16.mxu1 %v8474_v29  ;;  %v4475_v46 = vld [vmem:[%s12292_s5 + $0x5a0] sm:$0xff] }
 0x780   : > { %v4483_v58 = vld [vmem:[%s12292_s5 + $0x5e0] sm:$0xff] }
 0x782   : > { %7412 = vmatpush1.bf16.msra.mxu1 %v8473_v38 }
 0x783   : > { %7413 = vmatprep.subr.bf16.mxu1 %v8482_v39  ;;  %v8570_v39 = vcombine.high %v4455_v32, %v4459_v36 }
 0x786   : > { %7414 = vmatpush1.bf16.msra.mxu1 %v8481_v43  ;;  %v8569_v43 = vcombine.low %v4455_v32, %v4459_v36 }
 0x787   : > { %7415 = vmatprep.subr.bf16.mxu1 %v8490_v44  ;;  %v8578_v44 = vcombine.high %v4463_v40, %v4467_v41 }
 0x78a   : > { %7416 = vmatpush1.bf16.msra.mxu1 %v8489_v50  ;;  %v8577_v50 = vcombine.low %v4463_v40, %v4467_v41 }
 0x78b   : > { %7417 = vmatprep.subr.bf16.mxu1 %v8498_v47  ;;  %v8586_v47 = vcombine.high %v4471_v45, %v4475_v46 }
 0x78e   : > { %7418 = vmatpush1.bf16.msra.mxu1 %v8497_v60  ;;  %v8585_v60 = vcombine.low %v4471_v45, %v4475_v46 }
 0x78f   : > { %7419 = vmatprep.subr.bf16.mxu1 %v8506_v61  ;;  %v8594_v61 = vcombine.high %v4479_v56, %v4483_v58 }
 0x792   : > { %7420 = vmatpush1.bf16.msra.mxu1 %v8505_v62  ;;  %v4487_v62 = vld [vmem:[%s12292_s5 + $0x600] sm:$0xff] }
 0x7f3   : > { %v3189_v63 = vpop.xlane.xlu1 %3188 }
 0x7f4   : > { %9515 = vrcp.f32 %v3189_v63  ;;  %v4491_v63 = vld [vmem:[%s12292_s5 + $0x620] sm:$0xff] }
 0x7f7   : > { %v3350_v0 = vpop.xlane.xlu0 %3349 }
 0x7f8   : > { %9517 = vrcp.f32 %v3350_v0  ;;  %v8593_v0 = vcombine.low %v4479_v56, %v4483_v58 }
 0x7fb   : > { %v3511_v1 = vpop.xlane.xlu1 %3510 }
 0x7fc   : > { %9519 = vrcp.f32 %v3511_v1  ;;  %v8602_v1 = vcombine.high %v4487_v62, %v4491_v63 }
 0x7fe   : > { %v9516_v2 = vpop.eup %9515 }
 0x7ff   : > { %v3191_v3 = vmul.f32 %v9516_v2, %v10537_v26  ;;  %v3672_v4 = vpop.xlane.xlu0 %3671  ;;  %v4495_v2 = vld [vmem:[%s12292_s5 + $0x640] sm:$0xff] }
 0x800   : > { %9521 = vrcp.f32 %v3672_v4  ;;  %v8601_v4 = vcombine.low %v4487_v62, %v4491_v63 }
 0x801   : > { %8978 = vmatmul.mubr.msk.f32.vlgmr.msra.gmra.mrb[2].mxu0 %vm3019_vm2, %v3191_v3  ;;  %v4499_v3 = vld [vmem:[%s12292_s5 + $0x660] sm:$0xff] }
 0x802   : > { %v9518_v6 = vpop.eup %9517  ;;  %8986 = vmatpush3.msra.mxu0 %v3269_v5  ;;  %8987 = vmatprep.mubr.msk.f32.mxu0 %vm9555_vm0, %v9554_v8  ;;  %v8610_v5 = vcombine.high %v4495_v2, %v4499_v3 }
 0x803   : > { %v3352_v7 = vmul.f32 %v9518_v6, %v10541_v37  ;;  %v3833_v9 = vpop.xlane.xlu1 %3832  ;;  %8995 = vmatprep.subr.mxu0 %v9554_v8  ;;  %v4503_v6 = vld [vmem:[%s12292_s5 + $0x680] sm:$0xff] }
 0x804   : > { %9523 = vrcp.f32 %v3833_v9  ;;  %v8609_v9 = vcombine.low %v4495_v2, %v4499_v3  ;;  %v4563_v2 = vld [vmem:[%s12292_s5 + $0x860] sm:$0xff] }
 0x805   : > { %8988 = vmatmul.mubr.msk.f32.vlgmr.msra.gmra.mrb[4].mxu0 %vm3019_vm2, %v3352_v7  ;;  %v4507_v7 = vld [vmem:[%s12292_s5 + $0x6a0] sm:$0xff] }
 0x806   : > { %v9520_v26 = vpop.eup %9519  ;;  %8996 = vmatpush3.msra.mxu0 %v3430_v10  ;;  %8997 = vmatprep.mubr.msk.f32.mxu0 %vm9555_vm0, %v9554_v8  ;;  %v8618_v10 = vcombine.high %v4503_v6, %v4507_v7 }
 0x807   : > { %v3513_v11 = vmul.f32 %v9520_v26, %v10545_v42  ;;  %v3994_v12 = vpop.xlane.xlu0 %3993  ;;  %9005 = vmatprep.subr.mxu0 %v9554_v8  ;;  %v8617_v26 = vcombine.low %v4503_v6, %v4507_v7 }
 0x808   : > { %9525 = vrcp.f32 %v3994_v12  ;;  %v4403_v12 = vld [vmem:[%s12292_s5 + $0x360] sm:$0xff] }
 0x809   : > { %8998 = vmatmul.mubr.msk.f32.vlgmr.msra.gmra.mrb[6].mxu0 %vm3019_vm2, %v3513_v11  ;;  %v4399_v11 = vld [vmem:[%s12292_s5 + $0x340] sm:$0xff] }
 0x80a   : > { %v9522_v37 = vpop.eup %9521  ;;  %9006 = vmatpush3.msra.mxu0 %v3591_v14  ;;  %9007 = vmatprep.mubr.msk.f32.mxu0 %vm9555_vm0, %v9554_v8  ;;  %v4511_v14 = vld [vmem:[%s12292_s5 + $0x6c0] sm:$0xff] }
 0x80b   : > { %v3674_v15 = vmul.f32 %v9522_v37, %v10549_v49  ;;  %v4155_v16 = vpop.xlane.xlu1 %4154  ;;  %9015 = vmatprep.subr.mxu0 %v9554_v8  ;;  %v4423_v49 = vld [vmem:[%s12292_s5 + $0x400] sm:$0xff]  ;;  %v8514_v37 = vcombine.high %v4399_v11, %v4403_v12 }
 0x80c   : > { %9527 = vrcp.f32 %v4155_v16  ;;  %v8538_v30 = vcombine.high %v4423_v49, %v4427_v25  ;;  %v8513_v16 = vcombine.low %v4399_v11, %v4403_v12  ;;  %v4571_v11 = vld [vmem:[%s12292_s5 + $0x8a0] sm:$0xff] }
 0x80d   : > { %9008 = vmatmul.mubr.msk.f32.vlgmr.msra.gmra.mrb[8].mxu0 %vm3019_vm2, %v3674_v15  ;;  %v4515_v15 = vld [vmem:[%s12292_s5 + $0x6e0] sm:$0xff]  ;;  %7421 = vmatprep.subr.bf16.mxu1 %v8514_v37 }
 0x80e   : > { %v9524_v42 = vpop.eup %9523  ;;  %9016 = vmatpush3.msra.mxu0 %v3752_v21  ;;  %9017 = vmatprep.mubr.msk.f32.mxu0 %vm9555_vm0, %v9554_v8  ;;  %v8625_v21 = vcombine.low %v4511_v14, %v4515_v15 }
 0x80f   : > { %v3835_v22 = vmul.f32 %v9524_v42, %v10553_v55  ;;  %9025 = vmatprep.subr.mxu0 %v9554_v8  ;;  %v8626_v42 = vcombine.high %v4511_v14, %v4515_v15  ;;  %7422 = vmatpush1.bf16.msra.mxu1 %v8513_v16  ;;  %v4575_v15 = vld [vmem:[%s12292_s5 + $0x8c0] sm:$0xff] }
 0x811   : > { %9018 = vmatmul.mubr.msk.f32.vlgmr.msra.gmra.mrb[10].mxu0 %vm3019_vm2, %v3835_v22  ;;  %v4407_v22 = vld [vmem:[%s12292_s5 + $0x380] sm:$0xff] }
 0x812   : > { %v9526_v27 = vpop.eup %9525  ;;  %9026 = vmatpush3.msra.mxu0 %v3913_v24  ;;  %9027 = vmatprep.mubr.msk.f32.mxu0 %vm9555_vm0, %v9554_v8  ;;  %v4411_v24 = vld [vmem:[%s12292_s5 + $0x3a0] sm:$0xff] }
 0x813   : > { %v3996_v55 = vmul.f32 %v9526_v27, %v10557_v57  ;;  %9035 = vmatprep.subr.mxu0 %v9554_v8  ;;  %v8537_v57 = vcombine.low %v4423_v49, %v4427_v25  ;;  %v4519_v49 = vld [vmem:[%s12292_s5 + $0x700] sm:$0xff]  ;;  %v8522_v25 = vcombine.high %v4407_v22, %v4411_v24 }
 0x814   : > { %v4523_v27 = vld [vmem:[%s12292_s5 + $0x720] sm:$0xff] }
 0x815   : > { %9028 = vmatmul.mubr.msk.f32.vlgmr.msra.gmra.mrb[12].mxu0 %vm3019_vm2, %v3996_v55  ;;  %v8521_v55 = vcombine.low %v4407_v22, %v4411_v24  ;;  %7423 = vmatprep.subr.bf16.mxu1 %v8522_v25  ;;  %v4687_v22 = vld [vmem:[%s12292_s5 + $0xc40] sm:$0xff] }
 0x816   : > { %v9528_v34 = vpop.eup %9527  ;;  %9036 = vmatpush3.msra.mxu0 %v4074_v28  ;;  %9037 = vmatprep.mubr.msk.f32.mxu0 %vm9555_vm0, %v9554_v8  ;;  %v4447_v8 = vld [vmem:[%s12292_s5 + $0x4c0] sm:$0xff]  ;;  %v8633_v28 = vcombine.low %v4519_v49, %v4523_v27 }
 0x817   : > { %v4157_v35 = vmul.f32 %v9528_v34, %v10561_v59  ;;  %7436 = vmatprep.subr.bf16.mxu0 %v8538_v30  ;;  %v4451_v59 = vld [vmem:[%s12292_s5 + $0x4e0] sm:$0xff]  ;;  %v8634_v30 = vcombine.high %v4519_v49, %v4523_v27  ;;  %7424 = vmatpush1.bf16.msra.mxu1 %v8521_v55 }
 0x818   : > { %v8562_v29 = vcombine.high %v4447_v8, %v4451_v59  ;;  %v8561_v38 = vcombine.low %v4447_v8, %v4451_v59  ;;  %v4527_v34 = vld [vmem:[%s12292_s5 + $0x740] sm:$0xff] }
 0x819   : > { %9038 = vmatmul.mubr.msk.f32.vlgmr.msra.gmra.mrb[14].mxu0 %vm3019_vm2, %v4157_v35  ;;  %v4531_v35 = vld [vmem:[%s12292_s5 + $0x760] sm:$0xff] }
 0x81a   : > { %7437 = vmatpush1.bf16.msra.mxu0 %v8537_v57  ;;  %v8530_v57 = vcombine.high %v4415_v31, %v4419_v33  ;;  %v8641_v18 = vcombine.low %v4527_v34, %v4531_v35  ;;  %v8642_v19 = vcombine.high %v4527_v34, %v4531_v35  ;;  %v4551_v8 = vld [vmem:[%s12292_s5 + $0x800] sm:$0xff] }
 0x81b   : > { %7438 = vmatprep.subr.bf16.mxu0 %v8546_v17  ;;  %v8529_v17 = vcombine.low %v4415_v31, %v4419_v33  ;;  %v4691_v24 = vld [vmem:[%s12292_s5 + $0xc60] sm:$0xff] }
 0x81c   : > { %7425 = vmatprep.subr.bf16.mxu1 %v8530_v57  ;;  %v8802_v31 = vcombine.high %v4687_v22, %v4691_v24  ;;  %v4583_v33 = vld [vmem:[%s12292_s5 + $0x900] sm:$0xff] }
 0x81d   : > { %7426 = vmatpush1.bf16.msra.mxu1 %v8529_v17  ;;  %v4587_v35 = vld [vmem:[%s12292_s5 + $0x920] sm:$0xff] }
 0x81e   : > { %7439 = vmatpush1.bf16.msra.mxu0 %v8545_v20  ;;  %v4535_v20 = vld [vmem:[%s12292_s5 + $0x780] sm:$0xff] }
 0x81f   : > { %7440 = vmatprep.subr.bf16.mxu0 %v8554_v23  ;;  %v4539_v23 = vld [vmem:[%s12292_s5 + $0x7a0] sm:$0xff] }
 0x820   : > { %v8650_v59 = vcombine.high %v4535_v20, %v4539_v23  ;;  %v4695_v17 = vld [vmem:[%s12292_s5 + $0xc80] sm:$0xff] }
 0x822   : > { %7441 = vmatpush1.bf16.msra.mxu0 %v8553_v13  ;;  %v4555_v13 = vld [vmem:[%s12292_s5 + $0x820] sm:$0xff] }
 0x823   : > { %7442 = vmatprep.subr.bf16.mxu0 %v8562_v29  ;;  %v8649_v29 = vcombine.low %v4535_v20, %v4539_v23  ;;  %v8665_v32 = vcombine.low %v4551_v8, %v4555_v13  ;;  %v8666_v36 = vcombine.high %v4551_v8, %v4555_v13  ;;  %v8801_v20 = vcombine.low %v4687_v22, %v4691_v24  ;;  %v4591_v13 = vld [vmem:[%s12292_s5 + $0x940] sm:$0xff] }
 0x824   : > { %v8698_v8 = vcombine.high %v4583_v33, %v4587_v35  ;;  %v4623_v24 = vld [vmem:[%s12292_s5 + $0xa40] sm:$0xff] }
 0x825   : > { %7477 = vmatprep.subr.bf16.mxu1 %v8666_v36  ;;  %v4595_v36 = vld [vmem:[%s12292_s5 + $0x960] sm:$0xff] }
 0x826   : > { %7443 = vmatpush1.bf16.msra.mxu0 %v8561_v38  ;;  %v4543_v38 = vld [vmem:[%s12292_s5 + $0x7c0] sm:$0xff] }
 0x827   : > { %7444 = vmatprep.subr.bf16.mxu0 %v8570_v39  ;;  %v4547_v39 = vld [vmem:[%s12292_s5 + $0x7e0] sm:$0xff] }
 0x828   : > { %v8658_v40 = vcombine.high %v4543_v38, %v4547_v39  ;;  %v8657_v41 = vcombine.low %v4543_v38, %v4547_v39  ;;  %v4703_v38 = vld [vmem:[%s12292_s5 + $0xcc0] sm:$0xff] }
 0x829   : > { %v4707_v39 = vld [vmem:[%s12292_s5 + $0xce0] sm:$0xff] }
 0x82a   : > { %7445 = vmatpush1.bf16.msra.mxu0 %v8569_v43  ;;  %v4679_v43 = vld [vmem:[%s12292_s5 + $0xc00] sm:$0xff] }
 0x82b   : > { %7446 = vmatprep.subr.bf16.mxu0 %v8578_v44  ;;  %v4683_v44 = vld [vmem:[%s12292_s5 + $0xc20] sm:$0xff] }
 0x82c   : > { %v8793_v45 = vcombine.low %v4679_v43, %v4683_v44  ;;  %v8794_v46 = vcombine.high %v4679_v43, %v4683_v44 }
 0x82e   : > { %7447 = vmatpush1.bf16.msra.mxu0 %v8577_v50 }
 0x82f   : > { %7448 = vmatprep.subr.bf16.mxu0 %v8586_v47 }
 0x832   : > { %7449 = vmatpush1.bf16.msra.mxu0 %v8585_v60 }
 0x833   : > { %7450 = vmatprep.subr.bf16.mxu0 %v8594_v61 }
 0x836   : > { %7451 = vmatpush1.bf16.msra.mxu0 %v8593_v0 }
 0x837   : > { %7452 = vmatprep.subr.bf16.mxu0 %v8602_v1  ;;  %v4559_v1 = vld [vmem:[%s12292_s5 + $0x840] sm:$0xff] }
 0x838   : > { %v8674_v7 = vcombine.high %v4559_v1, %v4563_v2  ;;  %v8673_v12 = vcombine.low %v4559_v1, %v4563_v2  ;;  %v4611_v1 = vld [vmem:[%s12292_s5 + $0x9e0] sm:$0xff] }
 0x839   : > { %v4719_v2 = vld [vmem:[%s12292_s5 + $0xd40] sm:$0xff] }
 0x83a   : > { %7453 = vmatpush1.bf16.msra.mxu0 %v8601_v4 }
 0x83b   : > { %7454 = vmatprep.subr.bf16.mxu0 %v8610_v5 }
 0x83e   : > { %7455 = vmatpush1.bf16.msra.mxu0 %v8609_v9 }
 0x83f   : > { %7456 = vmatprep.subr.bf16.mxu0 %v8618_v10 }
 0x842   : > { %7457 = vmatpush1.bf16.msra.mxu0 %v8617_v26  ;;  %v4567_v26 = vld [vmem:[%s12292_s5 + $0x880] sm:$0xff] }
 0x843   : > { %7458 = vmatprep.subr.bf16.mxu0 %v8626_v42  ;;  %v8682_v37 = vcombine.high %v4567_v26, %v4571_v11  ;;  %v4579_v42 = vld [vmem:[%s12292_s5 + $0x8e0] sm:$0xff]  ;;  %v8681_v27 = vcombine.low %v4567_v26, %v4571_v11 }
 0x846   : > { %7459 = vmatpush1.bf16.msra.mxu0 %v8625_v21 }
 0x847   : > { %7460 = vmatprep.subr.bf16.mxu0 %v8634_v30  ;;  %v8690_v30 = vcombine.high %v4575_v15, %v4579_v42 }
 0x84a   : > { %7461 = vmatpush1.bf16.msra.mxu0 %v8633_v28 }
 0x84b   : > { %7462 = vmatprep.subr.bf16.mxu0 %v8642_v19  ;;  %v8689_v19 = vcombine.low %v4575_v15, %v4579_v42  ;;  %v4731_v15 = vld [vmem:[%s12292_s5 + $0xda0] sm:$0xff] }
 0x84e   : > { %7463 = vmatpush1.bf16.msra.mxu0 %v8641_v18  ;;  %v4699_v18 = vld [vmem:[%s12292_s5 + $0xca0] sm:$0xff] }
 0x84f   : > { %7464 = vmatprep.subr.bf16.mxu0 %v8650_v59  ;;  %v8810_v59 = vcombine.high %v4695_v17, %v4699_v18  ;;  %v8809_v44 = vcombine.low %v4695_v17, %v4699_v18  ;;  %v4743_v17 = vld [vmem:[%s12292_s5 + $0xe00] sm:$0xff] }
 0x850   : > { %v4747_v18 = vld [vmem:[%s12292_s5 + $0xe20] sm:$0xff] }
 0x852   : > { %7465 = vmatpush1.bf16.msra.mxu0 %v8649_v29 }
 0x853   : > { %7466 = vmatprep.subr.bf16.mxu0 %v8658_v40 }
 0x856   : > { %7467 = vmatpush1.bf16.msra.mxu0 %v8657_v41  ;;  %v8697_v41 = vcombine.low %v4583_v33, %v4587_v35  ;;  %v4635_v35 = vld [vmem:[%s12292_s5 + $0xaa0] sm:$0xff] }
 0x857   : > { %7518 = vmatprep.subr.bf16.mxu0 %v8794_v46  ;;  %v8818_v46 = vcombine.high %v4703_v38, %v4707_v39 }
 0x8d4   : > { %v3261_v50 = vpop.f32.mrb[2].mxu0 }
 0x8d5   : > { %v3265_v47 = vpack.c.bf16 %v3261_v50, %v3261_v50  ;;  %v8979_v56 = vpop.f32.mrb[3].mxu0  ;;  %v4599_v50 = vld [vmem:[%s12292_s5 + $0x980] sm:$0xff] }
 0x8d6   : > { %v4711_v56 = vld [vmem:[%s12292_s5 + $0xd00] sm:$0xff] }
 0x8d7   : > { %3266 = vst [vmem:[#allocation4 + $0x4] sm:$0xf] %v3265_v47  ;;  %v4603_v47 = vld [vmem:[%s12292_s5 + $0x9a0] sm:$0xff] }
 0x8d8   : > { %v3422_v58 = vpop.f32.mrb[4].mxu0 }
 0x8d9   : > { %v3426_v60 = vpack.c.bf16 %v3422_v58, %v3422_v58  ;;  %v8989_v61 = vpop.f32.mrb[5].mxu0  ;;  %v4715_v58 = vld [vmem:[%s12292_s5 + $0xd20] sm:$0xff] }
 0x8da   : > { %v8817_v61 = vcombine.low %v4703_v38, %v4707_v39  ;;  %v8857_v38 = vcombine.low %v4743_v17, %v4747_v18 }
 0x8db   : > { %3427 = vst [vmem:[#allocation4 + $0x8] sm:$0xf] %v3426_v60  ;;  %v8705_v60 = vcombine.low %v4591_v13, %v4595_v36 }
 0x8dc   : > { %v3583_v62 = vpop.f32.mrb[6].mxu0 }
 0x8dd   : > { %v3587_v63 = vpack.c.bf16 %v3583_v62, %v3583_v62  ;;  %v8999_v0 = vpop.f32.mrb[7].mxu0  ;;  %v8714_v62 = vcombine.high %v4599_v50, %v4603_v47 }
 0x8de   : > { %v4291_v3 = vld [vmem:[#allocation4] sm:$0xff] }
 0x8df   : > { %3588 = vst [vmem:[#allocation4 + $0xc] sm:$0xf] %v3587_v63  ;;  %v10807_v4 = vcombine.high %v4291_v3, %v4291_v3  ;;  %v10809_v5 = vcombine.low %v4291_v3, %v4291_v3  ;;  %v8826_v63 = vcombine.high %v4711_v56, %v4715_v58  ;;  %v4607_v0 = vld [vmem:[%s12292_s5 + $0x9c0] sm:$0xff] }
 0x8e0   : > { %v3744_v6 = vpop.f32.mrb[8].mxu0  ;;  %v4723_v3 = vld [vmem:[%s12292_s5 + $0xd60] sm:$0xff]  ;;  %v8722_v26 = vcombine.high %v4607_v0, %v4611_v1 }
 0x8e1   : > { %v3748_v9 = vpack.c.bf16 %v3744_v6, %v3744_v6  ;;  %v9009_v10 = vpop.f32.mrb[9].mxu0  ;;  %7427 = vmatprep.mubr.bf16.mxu1 %v10807_v4  ;;  %v8834_v11 = vcombine.high %v4719_v2, %v4723_v3 }
 0x8e2   : > { %7428 = vmatmul.mubr.bf16.vlgmr.msra.gmra.mrb[16].mxu1 %v10809_v5 }
 0x8e3   : > { %3749 = vst [vmem:[#allocation4 + $0x10] sm:$0xf] %v3748_v9  ;;  %7478 = vmatpush1.bf16.msra.mxu1 %v8665_v32  ;;  %v8825_v9 = vcombine.low %v4711_v56, %v4715_v58 }
 0x8e4   : > { %v3905_v14 = vpop.f32.mrb[10].mxu0  ;;  %7479 = vmatprep.subr.bf16.mxu1 %v8674_v7  ;;  %v8713_v7 = vcombine.low %v4599_v50, %v4603_v47  ;;  %v4763_v50 = vld [vmem:[%s12292_s5 + $0xea0] sm:$0xff] }
 0x8e5   : > { %v3909_v16 = vpack.c.bf16 %v3905_v14, %v3905_v14  ;;  %v9019_v21 = vpop.f32.mrb[11].mxu0  ;;  %v4619_v14 = vld [vmem:[%s12292_s5 + $0xa20] sm:$0xff] }
 0x8e6   : > { %v4292_v49 = vld [vmem:[#allocation4 + $0x8] sm:$0xff]  ;;  %v8833_v21 = vcombine.low %v4719_v2, %v4723_v3 }
 0x8e7   : > { %3910 = vst [vmem:[#allocation4 + $0x14] sm:$0xf] %v3909_v16  ;;  %7480 = vmatpush1.bf16.msra.mxu1 %v8673_v12  ;;  %v10831_v25 = vcombine.high %v4292_v49, %v4292_v49  ;;  %v10833_v55 = vcombine.low %v4292_v49, %v4292_v49  ;;  %v4615_v12 = vld [vmem:[%s12292_s5 + $0xa00] sm:$0xff]  ;;  %v8721_v16 = vcombine.low %v4607_v0, %v4611_v1 }
 0x8e8   : > { %v4066_v28 = vpop.f32.mrb[12].mxu0  ;;  %7481 = vmatprep.subr.bf16.mxu1 %v8682_v37  ;;  %v4727_v37 = vld [vmem:[%s12292_s5 + $0xd80] sm:$0xff]  ;;  %v8730_v42 = vcombine.high %v4615_v12, %v4619_v14 }
 0x8e9   : > { %v4070_v34 = vpack.c.bf16 %v4066_v28, %v4066_v28  ;;  %v9029_v57 = vpop.f32.mrb[13].mxu0  ;;  %7468 = vmatprep.mubr.bf16.mxu0 %v10831_v25  ;;  %v8842_v22 = vcombine.high %v4727_v37, %v4731_v15  ;;  %v4627_v49 = vld [vmem:[%s12292_s5 + $0xa60] sm:$0xff] }
 0x8ea   : > { %7469 = vmatmul.mubr.bf16.vlgmr.msra.gmra.mrb[16].mxu0 %v10833_v55  ;;  %v4739_v28 = vld [vmem:[%s12292_s5 + $0xde0] sm:$0xff]  ;;  %v8738_v33 = vcombine.high %v4623_v24, %v4627_v49 }
 0x8eb   : > { %4071 = vst [vmem:[#allocation4 + $0x18] sm:$0xf] %v4070_v34  ;;  %7482 = vmatpush1.bf16.msra.mxu1 %v8681_v27  ;;  %7519 = vmatpush1.bf16.msra.mxu0 %v8793_v45  ;;  %v8706_v45 = vcombine.high %v4591_v13, %v4595_v36  ;;  %v4735_v27 = vld [vmem:[%s12292_s5 + $0xdc0] sm:$0xff] }
 0x8ec   : > { %v4227_v23 = vpop.f32.mrb[14].mxu0  ;;  %7483 = vmatprep.subr.bf16.mxu1 %v8690_v30  ;;  %7520 = vmatprep.subr.bf16.mxu0 %v8802_v31  ;;  %v8729_v30 = vcombine.low %v4615_v12, %v4619_v14  ;;  %v8841_v31 = vcombine.low %v4727_v37, %v4731_v15  ;;  %v8850_v34 = vcombine.high %v4735_v27, %v4739_v28  ;;  %v4631_v57 = vld [vmem:[%s12292_s5 + $0xa80] sm:$0xff] }
 0x8ed   : > { %v4231_v29 = vpack.c.bf16 %v4227_v23, %v4227_v23  ;;  %v9039_v32 = vpop.f32.mrb[15].mxu0  ;;  %v8746_v23 = vcombine.high %v4631_v57, %v4635_v35  ;;  %v4643_v13 = vld [vmem:[%s12292_s5 + $0xae0] sm:$0xff]  ;;  %v8745_v36 = vcombine.low %v4631_v57, %v4635_v35  ;;  %v4300_v57 = vld [vmem:[%s12292_s5 + $0x28] sm:$0xff] }
 0x8ee   : > { %v10861_v40 = vld [vmem:[#allocation4 + $0x10] sm:$0xff]  ;;  %v4755_v32 = vld [vmem:[%s12292_s5 + $0xe60] sm:$0xff] }
 0x8ef   : > { %4232 = vst [vmem:[#allocation4 + $0x1c] sm:$0xf] %v4231_v29  ;;  %7484 = vmatpush1.bf16.msra.mxu1 %v8689_v19  ;;  %7521 = vmatpush1.bf16.msra.mxu0 %v8801_v20  ;;  %v10865_v43 = vcombine.high %v10861_v40, %v10861_v40  ;;  %v8737_v19 = vcombine.low %v4623_v24, %v4627_v49  ;;  %v4751_v29 = vld [vmem:[%s12292_s5 + $0xe40] sm:$0xff] }
 0x8f0   : > { %7485 = vmatprep.subr.bf16.mxu1 %v8698_v8  ;;  %7522 = vmatprep.subr.bf16.mxu0 %v8810_v59  ;;  %v8849_v20 = vcombine.low %v4735_v27, %v4739_v28  ;;  %v8858_v8 = vcombine.high %v4743_v17, %v4747_v18  ;;  %v4639_v59 = vld [vmem:[%s12292_s5 + $0xac0] sm:$0xff]  ;;  %v8865_v56 = vcombine.low %v4751_v29, %v4755_v32 }
 0x8f1   : > { %7509 = vmatprep.mubr.bf16.mxu1 %v10865_v43  ;;  %v8754_v39 = vcombine.high %v4639_v59, %v4643_v13  ;;  %v8753_v47 = vcombine.low %v4639_v59, %v4643_v13  ;;  %v4771_v0 = vld [vmem:[%s12292_s5 + $0xee0] sm:$0xff]  ;;  %v4308_v59 = vld [vmem:[%s12292_s5 + $0x68] sm:$0xff] }
 0x8f2   : > { %v4779_v12 = vld [vmem:[%s12292_s5 + $0xf20] sm:$0xff] }
 0x8f3   : > { %7486 = vmatpush1.bf16.msra.mxu1 %v8697_v41  ;;  %7523 = vmatpush1.bf16.msra.mxu0 %v8809_v44  ;;  %v8866_v41 = vcombine.high %v4751_v29, %v4755_v32  ;;  %v4647_v44 = vld [vmem:[%s12292_s5 + $0xb00] sm:$0xff]  ;;  %v11021_v32 = vcombine.low %v10861_v40, %v10861_v40  ;;  %v4428_v40 = vld [vmem:[%s12292_s5 + $0x428] sm:$0xff] }
 0x8f4   : > { %7487 = vmatprep.subr.bf16.mxu1 %v8706_v45  ;;  %7524 = vmatprep.subr.bf16.mxu0 %v8818_v46  ;;  %v4651_v45 = vld [vmem:[%s12292_s5 + $0xb20] sm:$0xff] }
 0x8f5   : > { %v4759_v46 = vld [vmem:[%s12292_s5 + $0xe80] sm:$0xff]  ;;  %v8762_v58 = vcombine.high %v4647_v44, %v4651_v45  ;;  %v8761_v1 = vcombine.low %v4647_v44, %v4651_v45  ;;  %v4424_v44 = vld [vmem:[%s12292_s5 + $0x408] sm:$0xff] }
 0x8f6   : > { %v10892_v6 = vld [vmem:[#allocation4 + $0x18] sm:$0xff]  ;;  %v8873_v2 = vcombine.low %v4759_v46, %v4763_v50  ;;  %v4787_v24 = vld [vmem:[%s12292_s5 + $0xf60] sm:$0xff] }
 0x8f7   : > { %7488 = vmatpush1.bf16.msra.mxu1 %v8705_v60  ;;  %7525 = vmatpush1.bf16.msra.mxu0 %v8817_v61  ;;  %v10896_v10 = vcombine.high %v10892_v6, %v10892_v6  ;;  %v8874_v60 = vcombine.high %v4759_v46, %v4763_v50  ;;  %v4655_v61 = vld [vmem:[%s12292_s5 + $0xb40] sm:$0xff] }
 0x8f8   : > { %7489 = vmatprep.subr.bf16.mxu1 %v8714_v62  ;;  %7526 = vmatprep.subr.bf16.mxu0 %v8826_v63  ;;  %v4659_v62 = vld [vmem:[%s12292_s5 + $0xb60] sm:$0xff] }
 0x8f9   : > { %7550 = vmatprep.mubr.bf16.mxu0 %v10896_v10  ;;  %v4767_v63 = vld [vmem:[%s12292_s5 + $0xec0] sm:$0xff]  ;;  %v8770_v3 = vcombine.high %v4655_v61, %v4659_v62  ;;  %v8769_v14 = vcombine.low %v4655_v61, %v4659_v62  ;;  %v4436_v61 = vld [vmem:[%s12292_s5 + $0x468] sm:$0xff] }
 0x8fa   : > { %v8881_v37 = vcombine.low %v4767_v63, %v4771_v0 }
 0x8fb   : > { %7490 = vmatpush1.bf16.msra.mxu1 %v8713_v7  ;;  %7527 = vmatpush1.bf16.msra.mxu0 %v8825_v9  ;;  %v8882_v7 = vcombine.high %v4767_v63, %v4771_v0  ;;  %v4663_v9 = vld [vmem:[%s12292_s5 + $0xb80] sm:$0xff]  ;;  %v8539_v63 = vcombine.low %v4424_v44, %v4428_v40  ;;  %v11051_v0 = vcombine.low %v10892_v6, %v10892_v6  ;;  %v4444_v6 = vld [vmem:[%s12292_s5 + $0x4a8] sm:$0xff] }
 0x8fc   : > { %7491 = vmatprep.subr.bf16.mxu1 %v8722_v26  ;;  %7528 = vmatprep.subr.bf16.mxu0 %v8834_v11  ;;  %v4667_v26 = vld [vmem:[%s12292_s5 + $0xba0] sm:$0xff] }
 0x8fd   : > { %v4775_v11 = vld [vmem:[%s12292_s5 + $0xf00] sm:$0xff]  ;;  %v8778_v15 = vcombine.high %v4663_v9, %v4667_v26  ;;  %v8777_v49 = vcombine.low %v4663_v9, %v4667_v26  ;;  %v4440_v9 = vld [vmem:[%s12292_s5 + $0x488] sm:$0xff] }
 0x8fe   : > { %v8889_v27 = vcombine.low %v4775_v11, %v4779_v12 }
 0x8ff   : > { %7492 = vmatpush1.bf16.msra.mxu1 %v8721_v16  ;;  %7529 = vmatpush1.bf16.msra.mxu0 %v8833_v21  ;;  %v8890_v16 = vcombine.high %v4775_v11, %v4779_v12  ;;  %v4671_v21 = vld [vmem:[%s12292_s5 + $0xbc0] sm:$0xff] }
 0x900   : > { %7493 = vmatprep.subr.bf16.mxu1 %v8730_v42  ;;  %7530 = vmatprep.subr.bf16.mxu0 %v8842_v22  ;;  %v4675_v42 = vld [vmem:[%s12292_s5 + $0xbe0] sm:$0xff] }
 0x901   : > { %v4783_v22 = vld [vmem:[%s12292_s5 + $0xf40] sm:$0xff]  ;;  %v8786_v28 = vcombine.high %v4671_v21, %v4675_v42  ;;  %v8785_v35 = vcombine.low %v4671_v21, %v4675_v42  ;;  %v4452_v21 = vld [vmem:[%s12292_s5 + $0x4e8] sm:$0xff] }
 0x902   : > { %v8897_v17 = vcombine.low %v4783_v22, %v4787_v24 }
 0x903   : > { %7494 = vmatpush1.bf16.msra.mxu1 %v8729_v30  ;;  %7531 = vmatpush1.bf16.msra.mxu0 %v8841_v31  ;;  %v8898_v30 = vcombine.high %v4783_v22, %v4787_v24  ;;  %v4791_v31 = vld [vmem:[%s12292_s5 + $0xf80] sm:$0xff]  ;;  %v8555_v22 = vcombine.low %v4440_v9, %v4444_v6 }
 0x904   : > { %7495 = vmatprep.subr.bf16.mxu1 %v8738_v33  ;;  %7532 = vmatprep.subr.bf16.mxu0 %v8850_v34  ;;  %v4795_v33 = vld [vmem:[%s12292_s5 + $0xfa0] sm:$0xff]  ;;  %v4296_v34 = vld [vmem:[%s12292_s5 + $0x8] sm:$0xff] }
 0x905   : > { %v8906_v18 = vcombine.high %v4791_v31, %v4795_v33  ;;  %v8905_v13 = vcombine.low %v4791_v31, %v4795_v33  ;;  %v8411_v29 = vcombine.low %v4296_v34, %v4300_v57  ;;  %v4460_v31 = vld [vmem:[%s12292_s5 + $0x528] sm:$0xff] }
 0x907   : > { %7496 = vmatpush1.bf16.msra.mxu1 %v8737_v19  ;;  %7533 = vmatpush1.bf16.msra.mxu0 %v8849_v20  ;;  %v8412_v19 = vcombine.high %v4296_v34, %v4300_v57  ;;  %v4799_v20 = vld [vmem:[%s12292_s5 + $0xfc0] sm:$0xff] }
 0x908   : > { %7497 = vmatprep.subr.bf16.mxu1 %v8746_v23  ;;  %7534 = vmatprep.subr.bf16.mxu0 %v8858_v8  ;;  %v4803_v23 = vld [vmem:[%s12292_s5 + $0xfe0] sm:$0xff]  ;;  %v4304_v8 = vld [vmem:[%s12292_s5 + $0x48] sm:$0xff] }
 0x909   : > { %v8913_v45 = vcombine.low %v4799_v20, %v4803_v23  ;;  %v8419_v46 = vcombine.low %v4304_v8, %v4308_v59 }
 0x90b   : > { %7498 = vmatpush1.bf16.msra.mxu1 %v8745_v36  ;;  %7535 = vmatpush1.bf16.msra.mxu0 %v8857_v38  ;;  %v8914_v36 = vcombine.high %v4799_v20, %v4803_v23  ;;  %v4312_v38 = vld [vmem:[%s12292_s5 + $0x88] sm:$0xff] }
 0x90c   : > { %7499 = vmatprep.subr.bf16.mxu1 %v8754_v39  ;;  %7536 = vmatprep.subr.bf16.mxu0 %v8866_v41  ;;  %v8420_v39 = vcombine.high %v4304_v8, %v4308_v59  ;;  %v4316_v41 = vld [vmem:[%s12292_s5 + $0xa8] sm:$0xff] }
 0x90d   : > { %v8428_v50 = vcombine.high %v4312_v38, %v4316_v41  ;;  %v8427_v62 = vcombine.low %v4312_v38, %v4316_v41  ;;  %v4468_v20 = vld [vmem:[%s12292_s5 + $0x568] sm:$0xff] }
 0x90e   : > { %v4472_v38 = vld [vmem:[%s12292_s5 + $0x588] sm:$0xff] }
 0x90f   : > { %7500 = vmatpush1.bf16.msra.mxu1 %v8753_v47  ;;  %7537 = vmatpush1.bf16.msra.mxu0 %v8865_v56  ;;  %v8540_v47 = vcombine.high %v4424_v44, %v4428_v40  ;;  %v4320_v56 = vld [vmem:[%s12292_s5 + $0xc8] sm:$0xff] }
 0x910   : > { %7501 = vmatprep.subr.bf16.mxu1 %v8762_v58  ;;  %7538 = vmatprep.subr.bf16.mxu0 %v8874_v60  ;;  %v4324_v58 = vld [vmem:[%s12292_s5 + $0xe8] sm:$0xff] }
 0x911   : > { %v4432_v60 = vld [vmem:[%s12292_s5 + $0x448] sm:$0xff]  ;;  %v8435_v26 = vcombine.low %v4320_v56, %v4324_v58 }
 0x912   : > { %v8547_v11 = vcombine.low %v4432_v60, %v4436_v61 }
 0x913   : > { %7502 = vmatpush1.bf16.msra.mxu1 %v8761_v1  ;;  %7539 = vmatpush1.bf16.msra.mxu0 %v8873_v2  ;;  %v8436_v1 = vcombine.high %v4320_v56, %v4324_v58  ;;  %v4328_v2 = vld [vmem:[%s12292_s5 + $0x108] sm:$0xff] }
 0x914   : > { %7503 = vmatprep.subr.bf16.mxu1 %v8770_v3  ;;  %7540 = vmatprep.subr.bf16.mxu0 %v8882_v7  ;;  %v8548_v3 = vcombine.high %v4432_v60, %v4436_v61  ;;  %v4332_v7 = vld [vmem:[%s12292_s5 + $0x128] sm:$0xff] }
 0x915   : > { %v8444_v12 = vcombine.high %v4328_v2, %v4332_v7  ;;  %v8443_v42 = vcombine.low %v4328_v2, %v4332_v7  ;;  %v4484_v56 = vld [vmem:[%s12292_s5 + $0x5e8] sm:$0xff] }
 0x916   : > { %v4488_v2 = vld [vmem:[%s12292_s5 + $0x608] sm:$0xff] }
 0x917   : > { %7504 = vmatpush1.bf16.msra.mxu1 %v8769_v14  ;;  %7541 = vmatpush1.bf16.msra.mxu0 %v8881_v37  ;;  %v8556_v14 = vcombine.high %v4440_v9, %v4444_v6  ;;  %v4336_v37 = vld [vmem:[%s12292_s5 + $0x148] sm:$0xff] }
 0x918   : > { %7505 = vmatprep.subr.bf16.mxu1 %v8778_v15  ;;  %7542 = vmatprep.subr.bf16.mxu0 %v8890_v16  ;;  %v4340_v15 = vld [vmem:[%s12292_s5 + $0x168] sm:$0xff] }
 0x919   : > { %v4448_v16 = vld [vmem:[%s12292_s5 + $0x4c8] sm:$0xff]  ;;  %v8452_v24 = vcombine.high %v4336_v37, %v4340_v15  ;;  %v8451_v33 = vcombine.low %v4336_v37, %v4340_v15 }
 0x91a   : > { %v8563_v34 = vcombine.low %v4448_v16, %v4452_v21  ;;  %v4500_v37 = vld [vmem:[%s12292_s5 + $0x668] sm:$0xff] }
 0x91b   : > { %7506 = vmatpush1.bf16.msra.mxu1 %v8777_v49  ;;  %7543 = vmatpush1.bf16.msra.mxu0 %v8889_v27  ;;  %v8564_v49 = vcombine.high %v4448_v16, %v4452_v21  ;;  %v4344_v27 = vld [vmem:[%s12292_s5 + $0x188] sm:$0xff] }
 0x91c   : > { %7507 = vmatprep.subr.bf16.mxu1 %v8786_v28  ;;  %7544 = vmatprep.subr.bf16.mxu0 %v8898_v30  ;;  %v4348_v28 = vld [vmem:[%s12292_s5 + $0x1a8] sm:$0xff] }
 0x91d   : > { %v4456_v30 = vld [vmem:[%s12292_s5 + $0x508] sm:$0xff]  ;;  %v8460_v57 = vcombine.high %v4344_v27, %v4348_v28  ;;  %v8459_v23 = vcombine.low %v4344_v27, %v4348_v28 }
 0x91e   : > { %v8571_v8 = vcombine.low %v4456_v30, %v4460_v31  ;;  %v4508_v27 = vld [vmem:[%s12292_s5 + $0x6a8] sm:$0xff] }
 0x91f   : > { %7508 = vmatpush1.bf16.msra.mxu1 %v8785_v35  ;;  %7545 = vmatpush1.bf16.msra.mxu0 %v8897_v17  ;;  %v8572_v35 = vcombine.high %v4456_v30, %v4460_v31  ;;  %v4352_v17 = vld [vmem:[%s12292_s5 + $0x1c8] sm:$0xff] }
 0x920   : > { %7546 = vmatprep.subr.bf16.mxu0 %v8906_v18  ;;  %7559 = vmatprep.subr.bf16.mxu1 %v8412_v19  ;;  %v4356_v18 = vld [vmem:[%s12292_s5 + $0x1e8] sm:$0xff] }
 0x921   : > { %v4464_v19 = vld [vmem:[%s12292_s5 + $0x548] sm:$0xff]  ;;  %v8468_v59 = vcombine.high %v4352_v17, %v4356_v18  ;;  %v8467_v41 = vcombine.low %v4352_v17, %v4356_v18 }
 0x922   : > { %7510 = vmatmul.mubr.bf16.vlgmr.msra.gmra.mrb[20].mxu1 %v11021_v32  ;;  %v8579_v44 = vcombine.low %v4464_v19, %v4468_v20  ;;  %v4516_v17 = vld [vmem:[%s12292_s5 + $0x6e8] sm:$0xff] }
 0x923   : > { %7547 = vmatpush1.bf16.msra.mxu0 %v8905_v13  ;;  %7560 = vmatpush1.bf16.msra.mxu1 %v8411_v29  ;;  %v8580_v13 = vcombine.high %v4464_v19, %v4468_v20  ;;  %v4360_v29 = vld [vmem:[%s12292_s5 + $0x208] sm:$0xff] }
 0x924   : > { %7591 = vmatprep.mubr.bf16.mxu1 %v10807_v4  ;;  %7548 = vmatprep.subr.bf16.mxu0 %v8914_v36  ;;  %v4364_v36 = vld [vmem:[%s12292_s5 + $0x228] sm:$0xff] }
 0x925   : > { %7561 = vmatprep.subr.bf16.mxu1 %v8420_v39  ;;  %v4476_v39 = vld [vmem:[%s12292_s5 + $0x5a8] sm:$0xff]  ;;  %v8476_v40 = vcombine.high %v4360_v29, %v4364_v36  ;;  %v8475_v58 = vcombine.low %v4360_v29, %v4364_v36 }
 0x926   : > { %v8587_v60 = vcombine.low %v4472_v38, %v4476_v39  ;;  %v4524_v29 = vld [vmem:[%s12292_s5 + $0x728] sm:$0xff] }
 0x927   : > { %7549 = vmatpush1.bf16.msra.mxu0 %v8913_v45  ;;  %7562 = vmatpush1.bf16.msra.mxu1 %v8419_v46  ;;  %v8588_v45 = vcombine.high %v4472_v38, %v4476_v39  ;;  %v4368_v46 = vld [vmem:[%s12292_s5 + $0x248] sm:$0xff] }
 0x928   : > { %7563 = vmatprep.subr.bf16.mxu1 %v8428_v50  ;;  %7600 = vmatprep.subr.bf16.mxu0 %v8540_v47  ;;  %v4372_v50 = vld [vmem:[%s12292_s5 + $0x268] sm:$0xff] }
 0x929   : > { %v4480_v47 = vld [vmem:[%s12292_s5 + $0x5c8] sm:$0xff]  ;;  %v8484_v61 = vcombine.high %v4368_v46, %v4372_v50  ;;  %v8483_v7 = vcombine.low %v4368_v46, %v4372_v50 }
 0x92a   : > { %7551 = vmatmul.mubr.bf16.vlgmr.msra.gmra.mrb[20].mxu0 %v11051_v0  ;;  %v8595_v9 = vcombine.low %v4480_v47, %v4484_v56  ;;  %v4532_v46 = vld [vmem:[%s12292_s5 + $0x768] sm:$0xff] }
 0x92b   : > { %7564 = vmatpush1.bf16.msra.mxu1 %v8427_v62  ;;  %7601 = vmatpush1.bf16.msra.mxu0 %v8539_v63  ;;  %v8596_v62 = vcombine.high %v4480_v47, %v4484_v56  ;;  %v4376_v63 = vld [vmem:[%s12292_s5 + $0x288] sm:$0xff] }
 0x92c   : > { %7632 = vmatprep.mubr.bf16.mxu0 %v10831_v25  ;;  %7565 = vmatprep.subr.bf16.mxu1 %v8436_v1  ;;  %v4380_v1 = vld [vmem:[%s12292_s5 + $0x2a8] sm:$0xff] }
 0x92d   : > { %7602 = vmatprep.subr.bf16.mxu0 %v8548_v3  ;;  %v4492_v3 = vld [vmem:[%s12292_s5 + $0x628] sm:$0xff]  ;;  %v8492_v6 = vcombine.high %v4376_v63, %v4380_v1  ;;  %v8491_v15 = vcombine.low %v4376_v63, %v4380_v1 }
 0x92e   : > { %v8603_v16 = vcombine.low %v4488_v2, %v4492_v3  ;;  %v4556_v63 = vld [vmem:[%s12292_s5 + $0x828] sm:$0xff] }
 0x92f   : > { %7566 = vmatpush1.bf16.msra.mxu1 %v8435_v26  ;;  %7603 = vmatpush1.bf16.msra.mxu0 %v8547_v11  ;;  %v8604_v26 = vcombine.high %v4488_v2, %v4492_v3  ;;  %v4384_v11 = vld [vmem:[%s12292_s5 + $0x2c8] sm:$0xff] }
 0x930   : > { %7567 = vmatprep.subr.bf16.mxu1 %v8444_v12  ;;  %7604 = vmatprep.subr.bf16.mxu0 %v8556_v14  ;;  %v4388_v12 = vld [vmem:[%s12292_s5 + $0x2e8] sm:$0xff] }
 0x931   : > { %v4496_v14 = vld [vmem:[%s12292_s5 + $0x648] sm:$0xff]  ;;  %v8500_v21 = vcombine.high %v4384_v11, %v4388_v12  ;;  %v8499_v28 = vcombine.low %v4384_v11, %v4388_v12 }
 0x932   : > { %v8611_v30 = vcombine.low %v4496_v14, %v4500_v37  ;;  %v4564_v11 = vld [vmem:[%s12292_s5 + $0x868] sm:$0xff] }
 0x933   : > { %7568 = vmatpush1.bf16.msra.mxu1 %v8443_v42  ;;  %7605 = vmatpush1.bf16.msra.mxu0 %v8555_v22  ;;  %v8612_v42 = vcombine.high %v4496_v14, %v4500_v37  ;;  %v4392_v22 = vld [vmem:[%s12292_s5 + $0x308] sm:$0xff] }
 0x934   : > { %7569 = vmatprep.subr.bf16.mxu1 %v8452_v24  ;;  %7606 = vmatprep.subr.bf16.mxu0 %v8564_v49  ;;  %v4396_v24 = vld [vmem:[%s12292_s5 + $0x328] sm:$0xff] }
 0x935   : > { %v4504_v49 = vld [vmem:[%s12292_s5 + $0x688] sm:$0xff]  ;;  %v8508_v31 = vcombine.high %v4392_v22, %v4396_v24  ;;  %v8507_v18 = vcombine.low %v4392_v22, %v4396_v24 }
 0x936   : > { %v8619_v19 = vcombine.low %v4504_v49, %v4508_v27  ;;  %v4684_v22 = vld [vmem:[%s12292_s5 + $0xc28] sm:$0xff] }
 0x937   : > { %7570 = vmatpush1.bf16.msra.mxu1 %v8451_v33  ;;  %7607 = vmatpush1.bf16.msra.mxu0 %v8563_v34  ;;  %v8620_v33 = vcombine.high %v4504_v49, %v4508_v27  ;;  %v4400_v34 = vld [vmem:[%s12292_s5 + $0x348] sm:$0xff] }
 0x938   : > { %7571 = vmatprep.subr.bf16.mxu1 %v8460_v57  ;;  %7608 = vmatprep.subr.bf16.mxu0 %v8572_v35  ;;  %v4404_v57 = vld [vmem:[%s12292_s5 + $0x368] sm:$0xff] }
 0x939   : > { %v4512_v35 = vld [vmem:[%s12292_s5 + $0x6c8] sm:$0xff]  ;;  %v8516_v20 = vcombine.high %v4400_v34, %v4404_v57  ;;  %v8515_v36 = vcombine.low %v4400_v34, %v4404_v57 }
 0x93a   : > { %v8627_v38 = vcombine.low %v4512_v35, %v4516_v17  ;;  %v4692_v34 = vld [vmem:[%s12292_s5 + $0xc68] sm:$0xff] }
 0x93b   : > { %7572 = vmatpush1.bf16.msra.mxu1 %v8459_v23  ;;  %7609 = vmatpush1.bf16.msra.mxu0 %v8571_v8  ;;  %v8628_v23 = vcombine.high %v4512_v35, %v4516_v17  ;;  %v4408_v8 = vld [vmem:[%s12292_s5 + $0x388] sm:$0xff] }
 0x93c   : > { %7573 = vmatprep.subr.bf16.mxu1 %v8468_v59  ;;  %7610 = vmatprep.subr.bf16.mxu0 %v8580_v13  ;;  %v4412_v59 = vld [vmem:[%s12292_s5 + $0x3a8] sm:$0xff] }
 0x93d   : > { %v4520_v13 = vld [vmem:[%s12292_s5 + $0x708] sm:$0xff]  ;;  %v8524_v39 = vcombine.high %v4408_v8, %v4412_v59  ;;  %v8523_v50 = vcombine.low %v4408_v8, %v4412_v59 }
 0x93e   : > { %v8635_v47 = vcombine.low %v4520_v13, %v4524_v29  ;;  %v4700_v8 = vld [vmem:[%s12292_s5 + $0xca8] sm:$0xff] }
 0x93f   : > { %7574 = vmatpush1.bf16.msra.mxu1 %v8467_v41  ;;  %7611 = vmatpush1.bf16.msra.mxu0 %v8579_v44  ;;  %v8636_v41 = vcombine.high %v4520_v13, %v4524_v29  ;;  %v4416_v44 = vld [vmem:[%s12292_s5 + $0x3c8] sm:$0xff] }
 0x940   : > { %7575 = vmatprep.subr.bf16.mxu1 %v8476_v40  ;;  %7612 = vmatprep.subr.bf16.mxu0 %v8588_v45  ;;  %v4420_v40 = vld [vmem:[%s12292_s5 + $0x3e8] sm:$0xff] }
 0x941   : > { %v4528_v45 = vld [vmem:[%s12292_s5 + $0x748] sm:$0xff]  ;;  %v8532_v56 = vcombine.high %v4416_v44, %v4420_v40  ;;  %v8531_v1 = vcombine.low %v4416_v44, %v4420_v40 }
 0x942   : > { %v8643_v2 = vcombine.low %v4528_v45, %v4532_v46  ;;  %v4708_v44 = vld [vmem:[%s12292_s5 + $0xce8] sm:$0xff] }
 0x943   : > { %7576 = vmatpush1.bf16.msra.mxu1 %v8475_v58  ;;  %7613 = vmatpush1.bf16.msra.mxu0 %v8587_v60  ;;  %v8644_v58 = vcombine.high %v4528_v45, %v4532_v46  ;;  %v4536_v60 = vld [vmem:[%s12292_s5 + $0x788] sm:$0xff] }
 0x944   : > { %7577 = vmatprep.subr.bf16.mxu1 %v8484_v61  ;;  %7614 = vmatprep.subr.bf16.mxu0 %v8596_v62  ;;  %v4540_v61 = vld [vmem:[%s12292_s5 + $0x7a8] sm:$0xff] }
 0x945   : > { %v4552_v62 = vld [vmem:[%s12292_s5 + $0x808] sm:$0xff]  ;;  %v8652_v3 = vcombine.high %v4536_v60, %v4540_v61  ;;  %v8651_v12 = vcombine.low %v4536_v60, %v4540_v61 }
 0x946   : > { %v8667_v14 = vcombine.low %v4552_v62, %v4556_v63  ;;  %v4716_v60 = vld [vmem:[%s12292_s5 + $0xd28] sm:$0xff] }
 0x947   : > { %7578 = vmatpush1.bf16.msra.mxu1 %v8483_v7  ;;  %7615 = vmatpush1.bf16.msra.mxu0 %v8595_v9  ;;  %v8668_v7 = vcombine.high %v4552_v62, %v4556_v63  ;;  %v4544_v9 = vld [vmem:[%s12292_s5 + $0x7c8] sm:$0xff] }
 0x948   : > { %7579 = vmatprep.subr.bf16.mxu1 %v8492_v6  ;;  %7616 = vmatprep.subr.bf16.mxu0 %v8604_v26  ;;  %v4548_v6 = vld [vmem:[%s12292_s5 + $0x7e8] sm:$0xff] }
 0x949   : > { %v4560_v26 = vld [vmem:[%s12292_s5 + $0x848] sm:$0xff]  ;;  %v8660_v37 = vcombine.high %v4544_v9, %v4548_v6  ;;  %v8659_v24 = vcombine.low %v4544_v9, %v4548_v6 }
 0x94a   : > { %v8675_v49 = vcombine.low %v4560_v26, %v4564_v11  ;;  %v4724_v9 = vld [vmem:[%s12292_s5 + $0xd68] sm:$0xff] }
 0x94b   : > { %7580 = vmatpush1.bf16.msra.mxu1 %v8491_v15  ;;  %7617 = vmatpush1.bf16.msra.mxu0 %v8603_v16  ;;  %v4568_v15 = vld [vmem:[%s12292_s5 + $0x888] sm:$0xff]  ;;  %v8676_v16 = vcombine.high %v4560_v26, %v4564_v11 }
 0x94c   : > { %7581 = vmatprep.subr.bf16.mxu1 %v8500_v21  ;;  %7618 = vmatprep.subr.bf16.mxu0 %v8612_v42  ;;  %v4572_v21 = vld [vmem:[%s12292_s5 + $0x8a8] sm:$0xff] }
 0x94d   : > { %v4680_v42 = vld [vmem:[%s12292_s5 + $0xc08] sm:$0xff]  ;;  %v8684_v27 = vcombine.high %v4568_v15, %v4572_v21  ;;  %v8683_v57 = vcombine.low %v4568_v15, %v4572_v21 }
 0x94e   : > { %v8795_v35 = vcombine.low %v4680_v42, %v4684_v22  ;;  %v4728_v15 = vld [vmem:[%s12292_s5 + $0xd88] sm:$0xff] }
 0x94f   : > { %7582 = vmatpush1.bf16.msra.mxu1 %v8499_v28  ;;  %7619 = vmatpush1.bf16.msra.mxu0 %v8611_v30  ;;  %v8796_v28 = vcombine.high %v4680_v42, %v4684_v22  ;;  %v4576_v30 = vld [vmem:[%s12292_s5 + $0x8c8] sm:$0xff] }
 0x950   : > { %7583 = vmatprep.subr.bf16.mxu1 %v8508_v31  ;;  %7620 = vmatprep.subr.bf16.mxu0 %v8620_v33  ;;  %v4580_v31 = vld [vmem:[%s12292_s5 + $0x8e8] sm:$0xff] }
 0x951   : > { %v4688_v33 = vld [vmem:[%s12292_s5 + $0xc48] sm:$0xff]  ;;  %v8692_v17 = vcombine.high %v4576_v30, %v4580_v31  ;;  %v8691_v59 = vcombine.low %v4576_v30, %v4580_v31 }
 0x952   : > { %v8803_v13 = vcombine.low %v4688_v33, %v4692_v34  ;;  %v4740_v30 = vld [vmem:[%s12292_s5 + $0xde8] sm:$0xff] }
 0x953   : > { %7584 = vmatpush1.bf16.msra.mxu1 %v8507_v18  ;;  %7621 = vmatpush1.bf16.msra.mxu0 %v8619_v19  ;;  %v4584_v18 = vld [vmem:[%s12292_s5 + $0x908] sm:$0xff]  ;;  %v8804_v19 = vcombine.high %v4688_v33, %v4692_v34 }
 0x954   : > { %7585 = vmatprep.subr.bf16.mxu1 %v8516_v20  ;;  %7622 = vmatprep.subr.bf16.mxu0 %v8628_v23  ;;  %v4588_v20 = vld [vmem:[%s12292_s5 + $0x928] sm:$0xff] }
 0x955   : > { %v4696_v23 = vld [vmem:[%s12292_s5 + $0xc88] sm:$0xff]  ;;  %v8700_v29 = vcombine.high %v4584_v18, %v4588_v20  ;;  %v8699_v40 = vcombine.low %v4584_v18, %v4588_v20 }
 0x956   : > { %v8811_v45 = vcombine.low %v4696_v23, %v4700_v8  ;;  %v4744_v18 = vld [vmem:[%s12292_s5 + $0xe08] sm:$0xff] }
 0x957   : > { %7586 = vmatpush1.bf16.msra.mxu1 %v8515_v36  ;;  %7623 = vmatpush1.bf16.msra.mxu0 %v8627_v38  ;;  %v8812_v36 = vcombine.high %v4696_v23, %v4700_v8  ;;  %v4592_v38 = vld [vmem:[%s12292_s5 + $0x948] sm:$0xff] }
 0x958   : > { %7587 = vmatprep.subr.bf16.mxu1 %v8524_v39  ;;  %7624 = vmatprep.subr.bf16.mxu0 %v8636_v41  ;;  %v4596_v39 = vld [vmem:[%s12292_s5 + $0x968] sm:$0xff] }
 0x959   : > { %v4704_v41 = vld [vmem:[%s12292_s5 + $0xcc8] sm:$0xff]  ;;  %v8708_v46 = vcombine.high %v4592_v38, %v4596_v39  ;;  %v8707_v61 = vcombine.low %v4592_v38, %v4596_v39 }
 0x95a   : > { %v8819_v62 = vcombine.low %v4704_v41, %v4708_v44  ;;  %v4756_v38 = vld [vmem:[%s12292_s5 + $0xe68] sm:$0xff] }
 0x95b   : > { %7588 = vmatpush1.bf16.msra.mxu1 %v8523_v50  ;;  %7625 = vmatpush1.bf16.msra.mxu0 %v8635_v47  ;;  %v8820_v50 = vcombine.high %v4704_v41, %v4708_v44  ;;  %v4600_v47 = vld [vmem:[%s12292_s5 + $0x988] sm:$0xff] }
 0x95c   : > { %7589 = vmatprep.subr.bf16.mxu1 %v8532_v56  ;;  %7626 = vmatprep.subr.bf16.mxu0 %v8644_v58  ;;  %v4604_v56 = vld [vmem:[%s12292_s5 + $0x9a8] sm:$0xff] }
 0x95d   : > { %v4712_v58 = vld [vmem:[%s12292_s5 + $0xd08] sm:$0xff]  ;;  %v8716_v63 = vcombine.high %v4600_v47, %v4604_v56  ;;  %v8715_v6 = vcombine.low %v4600_v47, %v4604_v56 }
 0x95e   : > { %v8827_v26 = vcombine.low %v4712_v58, %v4716_v60  ;;  %v4764_v47 = vld [vmem:[%s12292_s5 + $0xea8] sm:$0xff] }
 0x95f   : > { %7590 = vmatpush1.bf16.msra.mxu1 %v8531_v1  ;;  %7627 = vmatpush1.bf16.msra.mxu0 %v8643_v2  ;;  %v8828_v1 = vcombine.high %v4712_v58, %v4716_v60  ;;  %v4608_v2 = vld [vmem:[%s12292_s5 + $0x9c8] sm:$0xff] }
 0x960   : > { %7628 = vmatprep.subr.bf16.mxu0 %v8652_v3  ;;  %7641 = vmatprep.subr.bf16.mxu1 %v8668_v7  ;;  %v4612_v3 = vld [vmem:[%s12292_s5 + $0x9e8] sm:$0xff] }
 0x961   : > { %v4720_v7 = vld [vmem:[%s12292_s5 + $0xd48] sm:$0xff]  ;;  %v8724_v11 = vcombine.high %v4608_v2, %v4612_v3  ;;  %v8723_v21 = vcombine.low %v4608_v2, %v4612_v3 }
 0x962   : > { %7592 = vmatmul.mubr.bf16.vlgmr.msra.gmra.mrb[24].mxu1 %v10809_v5  ;;  %v8835_v42 = vcombine.low %v4720_v7, %v4724_v9  ;;  %v4772_v2 = vld [vmem:[%s12292_s5 + $0xee8] sm:$0xff] }
 0x963   : > { %7629 = vmatpush1.bf16.msra.mxu0 %v8651_v12  ;;  %7642 = vmatpush1.bf16.msra.mxu1 %v8667_v14  ;;  %v8836_v12 = vcombine.high %v4720_v7, %v4724_v9  ;;  %v4616_v14 = vld [vmem:[%s12292_s5 + $0xa08] sm:$0xff] }
 0x964   : > { %7673 = vmatprep.mubr.bf16.mxu1 %v10865_v43  ;;  %7630 = vmatprep.subr.bf16.mxu0 %v8660_v37  ;;  %v4620_v37 = vld [vmem:[%s12292_s5 + $0xa28] sm:$0xff] }
 0x965   : > { %7643 = vmatprep.subr.bf16.mxu1 %v8676_v16  ;;  %v4732_v16 = vld [vmem:[%s12292_s5 + $0xda8] sm:$0xff]  ;;  %v8732_v22 = vcombine.high %v4616_v14, %v4620_v37  ;;  %v8731_v31 = vcombine.low %v4616_v14, %v4620_v37 }
 0x966   : > { %v8843_v33 = vcombine.low %v4728_v15, %v4732_v16  ;;  %v4780_v14 = vld [vmem:[%s12292_s5 + $0xf28] sm:$0xff] }
 0x967   : > { %7631 = vmatpush1.bf16.msra.mxu0 %v8659_v24  ;;  %7644 = vmatpush1.bf16.msra.mxu1 %v8675_v49  ;;  %v8844_v24 = vcombine.high %v4728_v15, %v4732_v16  ;;  %v4624_v49 = vld [vmem:[%s12292_s5 + $0xa48] sm:$0xff] }
 0x968   : > { %7645 = vmatprep.subr.bf16.mxu1 %v8684_v27  ;;  %7682 = vmatprep.subr.bf16.mxu0 %v8796_v28  ;;  %v4628_v27 = vld [vmem:[%s12292_s5 + $0xa68] sm:$0xff] }
 0x969   : > { %v4736_v28 = vld [vmem:[%s12292_s5 + $0xdc8] sm:$0xff]  ;;  %v8740_v34 = vcombine.high %v4624_v49, %v4628_v27  ;;  %v8739_v20 = vcombine.low %v4624_v49, %v4628_v27 }
 0x96a   : > { %7633 = vmatmul.mubr.bf16.vlgmr.msra.gmra.mrb[24].mxu0 %v10833_v55  ;;  %v8851_v23 = vcombine.low %v4736_v28, %v4740_v30  ;;  %v4788_v49 = vld [vmem:[%s12292_s5 + $0xf68] sm:$0xff] }
 0x96b   : > { %7646 = vmatpush1.bf16.msra.mxu1 %v8683_v57  ;;  %7683 = vmatpush1.bf16.msra.mxu0 %v8795_v35  ;;  %v8852_v57 = vcombine.high %v4736_v28, %v4740_v30  ;;  %v4632_v35 = vld [vmem:[%s12292_s5 + $0xa88] sm:$0xff] }
 0x96c   : > { %7714 = vmatprep.mubr.bf16.mxu0 %v10896_v10  ;;  %7647 = vmatprep.subr.bf16.mxu1 %v8692_v17  ;;  %v4636_v17 = vld [vmem:[%s12292_s5 + $0xaa8] sm:$0xff] }
 0x96d   : > { %7684 = vmatprep.subr.bf16.mxu0 %v8804_v19  ;;  %v4748_v19 = vld [vmem:[%s12292_s5 + $0xe28] sm:$0xff]  ;;  %v8748_v8 = vcombine.high %v4632_v35, %v4636_v17  ;;  %v8747_v39 = vcombine.low %v4632_v35, %v4636_v17  ;;  %v4301_v35 = vld [vmem:[%s12292_s5 + $0x30] sm:$0xff] }
 0x96e   : > { %v8859_v41 = vcombine.low %v4744_v18, %v4748_v19 }
 0x96f   : > { %7648 = vmatpush1.bf16.msra.mxu1 %v8691_v59  ;;  %7685 = vmatpush1.bf16.msra.mxu0 %v8803_v13  ;;  %v8860_v59 = vcombine.high %v4744_v18, %v4748_v19  ;;  %v4640_v13 = vld [vmem:[%s12292_s5 + $0xac8] sm:$0xff] }
 0x970   : > { %7649 = vmatprep.subr.bf16.mxu1 %v8700_v29  ;;  %7686 = vmatprep.subr.bf16.mxu0 %v8812_v36  ;;  %v4644_v29 = vld [vmem:[%s12292_s5 + $0xae8] sm:$0xff] }
 0x971   : > { %v4752_v36 = vld [vmem:[%s12292_s5 + $0xe48] sm:$0xff]  ;;  %v8756_v44 = vcombine.high %v4640_v13, %v4644_v29  ;;  %v8755_v56 = vcombine.low %v4640_v13, %v4644_v29  ;;  %v4309_v13 = vld [vmem:[%s12292_s5 + $0x70] sm:$0xff] }
 0x972   : > { %v8867_v58 = vcombine.low %v4752_v36, %v4756_v38 }
 0x973   : > { %7650 = vmatpush1.bf16.msra.mxu1 %v8699_v40  ;;  %7687 = vmatpush1.bf16.msra.mxu0 %v8811_v45  ;;  %v8868_v40 = vcombine.high %v4752_v36, %v4756_v38  ;;  %v4648_v45 = vld [vmem:[%s12292_s5 + $0xb08] sm:$0xff] }
 0x974   : > { %7651 = vmatprep.subr.bf16.mxu1 %v8708_v46  ;;  %7688 = vmatprep.subr.bf16.mxu0 %v8820_v50  ;;  %v4652_v46 = vld [vmem:[%s12292_s5 + $0xb28] sm:$0xff] }
 0x975   : > { %v4760_v50 = vld [vmem:[%s12292_s5 + $0xe88] sm:$0xff]  ;;  %v8764_v60 = vcombine.high %v4648_v45, %v4652_v46  ;;  %v8763_v3 = vcombine.low %v4648_v45, %v4652_v46  ;;  %v4429_v45 = vld [vmem:[%s12292_s5 + $0x430] sm:$0xff] }
 0x976   : > { %v8875_v7 = vcombine.low %v4760_v50, %v4764_v47 }
 0x977   : > { %7652 = vmatpush1.bf16.msra.mxu1 %v8707_v61  ;;  %7689 = vmatpush1.bf16.msra.mxu0 %v8819_v62  ;;  %v8876_v61 = vcombine.high %v4760_v50, %v4764_v47  ;;  %v4656_v62 = vld [vmem:[%s12292_s5 + $0xb48] sm:$0xff] }
 0x978   : > { %7653 = vmatprep.subr.bf16.mxu1 %v8716_v63  ;;  %7690 = vmatprep.subr.bf16.mxu0 %v8828_v1  ;;  %v4660_v63 = vld [vmem:[%s12292_s5 + $0xb68] sm:$0xff] }
 0x979   : > { %v4768_v1 = vld [vmem:[%s12292_s5 + $0xec8] sm:$0xff]  ;;  %v8772_v9 = vcombine.high %v4656_v62, %v4660_v63  ;;  %v8771_v37 = vcombine.low %v4656_v62, %v4660_v63  ;;  %v4437_v62 = vld [vmem:[%s12292_s5 + $0x470] sm:$0xff] }
 0x97a   : > { %v8883_v15 = vcombine.low %v4768_v1, %v4772_v2 }
 0x97b   : > { %7654 = vmatpush1.bf16.msra.mxu1 %v8715_v6  ;;  %7691 = vmatpush1.bf16.msra.mxu0 %v8827_v26  ;;  %v8884_v6 = vcombine.high %v4768_v1, %v4772_v2  ;;  %v4664_v26 = vld [vmem:[%s12292_s5 + $0xb88] sm:$0xff] }
 0x97c   : > { %7655 = vmatprep.subr.bf16.mxu1 %v8724_v11  ;;  %7692 = vmatprep.subr.bf16.mxu0 %v8836_v12  ;;  %v4668_v11 = vld [vmem:[%s12292_s5 + $0xba8] sm:$0xff] }
 0x97d   : > { %v4776_v12 = vld [vmem:[%s12292_s5 + $0xf08] sm:$0xff]  ;;  %v8780_v16 = vcombine.high %v4664_v26, %v4668_v11  ;;  %v8779_v27 = vcombine.low %v4664_v26, %v4668_v11  ;;  %v4445_v26 = vld [vmem:[%s12292_s5 + $0x4b0] sm:$0xff] }
 0x97e   : > { %v8891_v28 = vcombine.low %v4776_v12, %v4780_v14 }
 0x97f   : > { %7656 = vmatpush1.bf16.msra.mxu1 %v8723_v21  ;;  %7693 = vmatpush1.bf16.msra.mxu0 %v8835_v42  ;;  %v8892_v21 = vcombine.high %v4776_v12, %v4780_v14  ;;  %v4672_v42 = vld [vmem:[%s12292_s5 + $0xbc8] sm:$0xff] }
 0x980   : > { %7657 = vmatprep.subr.bf16.mxu1 %v8732_v22  ;;  %7694 = vmatprep.subr.bf16.mxu0 %v8844_v24  ;;  %v4676_v22 = vld [vmem:[%s12292_s5 + $0xbe8] sm:$0xff] }
 0x981   : > { %v4784_v24 = vld [vmem:[%s12292_s5 + $0xf48] sm:$0xff]  ;;  %v8788_v30 = vcombine.high %v4672_v42, %v4676_v22  ;;  %v8787_v17 = vcombine.low %v4672_v42, %v4676_v22  ;;  %v4453_v42 = vld [vmem:[%s12292_s5 + $0x4f0] sm:$0xff] }
 0x982   : > { %v8899_v18 = vcombine.low %v4784_v24, %v4788_v49 }
 0x983   : > { %7658 = vmatpush1.bf16.msra.mxu1 %v8731_v31  ;;  %7695 = vmatpush1.bf16.msra.mxu0 %v8843_v33  ;;  %v8900_v31 = vcombine.high %v4784_v24, %v4788_v49  ;;  %v4792_v33 = vld [vmem:[%s12292_s5 + $0xf88] sm:$0xff] }
 0x984   : > { %7659 = vmatprep.subr.bf16.mxu1 %v8740_v34  ;;  %7696 = vmatprep.subr.bf16.mxu0 %v8852_v57  ;;  %v4796_v34 = vld [vmem:[%s12292_s5 + $0xfa8] sm:$0xff]  ;;  %v4297_v57 = vld [vmem:[%s12292_s5 + $0x10] sm:$0xff] }
 0x985   : > { %v8908_v19 = vcombine.high %v4792_v33, %v4796_v34  ;;  %v8907_v29 = vcombine.low %v4792_v33, %v4796_v34  ;;  %v8413_v36 = vcombine.low %v4297_v57, %v4301_v35  ;;  %v4461_v33 = vld [vmem:[%s12292_s5 + $0x530] sm:$0xff] }
 0x987   : > { %7660 = vmatpush1.bf16.msra.mxu1 %v8739_v20  ;;  %7697 = vmatpush1.bf16.msra.mxu0 %v8851_v23  ;;  %v8414_v20 = vcombine.high %v4297_v57, %v4301_v35  ;;  %v4800_v23 = vld [vmem:[%s12292_s5 + $0xfc8] sm:$0xff] }
 0x988   : > { %7661 = vmatprep.subr.bf16.mxu1 %v8748_v8  ;;  %7698 = vmatprep.subr.bf16.mxu0 %v8860_v59  ;;  %v4804_v8 = vld [vmem:[%s12292_s5 + $0xfe8] sm:$0xff]  ;;  %v4305_v59 = vld [vmem:[%s12292_s5 + $0x50] sm:$0xff] }
 0x989   : > { %v8916_v38 = vcombine.high %v4800_v23, %v4804_v8  ;;  %v8915_v46 = vcombine.low %v4800_v23, %v4804_v8  ;;  %v8421_v50 = vcombine.low %v4305_v59, %v4309_v13  ;;  %v4465_v23 = vld [vmem:[%s12292_s5 + $0x550] sm:$0xff] }
 0x98a   : > { %v4469_v8 = vld [vmem:[%s12292_s5 + $0x570] sm:$0xff] }
 0x98b   : > { %7662 = vmatpush1.bf16.msra.mxu1 %v8747_v39  ;;  %7699 = vmatpush1.bf16.msra.mxu0 %v8859_v41  ;;  %v4313_v39 = vld [vmem:[%s12292_s5 + $0x90] sm:$0xff]  ;;  %v8422_v41 = vcombine.high %v4305_v59, %v4309_v13 }
 0x98c   : > { %7663 = vmatprep.subr.bf16.mxu1 %v8756_v44  ;;  %7700 = vmatprep.subr.bf16.mxu0 %v8868_v40  ;;  %v4317_v44 = vld [vmem:[%s12292_s5 + $0xb0] sm:$0xff] }
 0x98d   : > { %v4425_v40 = vld [vmem:[%s12292_s5 + $0x410] sm:$0xff]  ;;  %v8430_v47 = vcombine.high %v4313_v39, %v4317_v44  ;;  %v8429_v63 = vcombine.low %v4313_v39, %v4317_v44 }
 0x98e   : > { %v8541_v1 = vcombine.low %v4425_v40, %v4429_v45  ;;  %v4361_v44 = vld [vmem:[%s12292_s5 + $0x210] sm:$0xff] }
 0x98f   : > { %7664 = vmatpush1.bf16.msra.mxu1 %v8755_v56  ;;  %7701 = vmatpush1.bf16.msra.mxu0 %v8867_v58  ;;  %v8542_v56 = vcombine.high %v4425_v40, %v4429_v45  ;;  %v4321_v58 = vld [vmem:[%s12292_s5 + $0xd0] sm:$0xff] }
 0x990   : > { %7665 = vmatprep.subr.bf16.mxu1 %v8764_v60  ;;  %7702 = vmatprep.subr.bf16.mxu0 %v8876_v61  ;;  %v4325_v60 = vld [vmem:[%s12292_s5 + $0xf0] sm:$0xff] }
 0x991   : > { %v4433_v61 = vld [vmem:[%s12292_s5 + $0x450] sm:$0xff]  ;;  %v8438_v2 = vcombine.high %v4321_v58, %v4325_v60  ;;  %v8437_v11 = vcombine.low %v4321_v58, %v4325_v60 }
 0x992   : > { %v8549_v12 = vcombine.low %v4433_v61, %v4437_v62  ;;  %v4365_v40 = vld [vmem:[%s12292_s5 + $0x230] sm:$0xff] }
 0x993   : > { %7666 = vmatpush1.bf16.msra.mxu1 %v8763_v3  ;;  %7703 = vmatpush1.bf16.msra.mxu0 %v8875_v7  ;;  %v4329_v3 = vld [vmem:[%s12292_s5 + $0x110] sm:$0xff]  ;;  %v8550_v7 = vcombine.high %v4433_v61, %v4437_v62 }
 0x994   : > { %7667 = vmatprep.subr.bf16.mxu1 %v8772_v9  ;;  %7704 = vmatprep.subr.bf16.mxu0 %v8884_v6  ;;  %v4333_v9 = vld [vmem:[%s12292_s5 + $0x130] sm:$0xff] }
 0x995   : > { %v4441_v6 = vld [vmem:[%s12292_s5 + $0x490] sm:$0xff]  ;;  %v8446_v14 = vcombine.high %v4329_v3, %v4333_v9  ;;  %v8445_v22 = vcombine.low %v4329_v3, %v4333_v9 }
 0x996   : > { %v8557_v24 = vcombine.low %v4441_v6, %v4445_v26  ;;  %v4473_v45 = vld [vmem:[%s12292_s5 + $0x590] sm:$0xff] }
 0x997   : > { %7668 = vmatpush1.bf16.msra.mxu1 %v8771_v37  ;;  %7705 = vmatpush1.bf16.msra.mxu0 %v8883_v15  ;;  %v8558_v37 = vcombine.high %v4441_v6, %v4445_v26  ;;  %v4337_v15 = vld [vmem:[%s12292_s5 + $0x150] sm:$0xff]  ;;  %v8477_v6 = vcombine.low %v4361_v44, %v4365_v40 }
 0x998   : > { %7669 = vmatprep.subr.bf16.mxu1 %v8780_v16  ;;  %7706 = vmatprep.subr.bf16.mxu0 %v8892_v21  ;;  %v4341_v16 = vld [vmem:[%s12292_s5 + $0x170] sm:$0xff] }
 0x999   : > { %v4449_v21 = vld [vmem:[%s12292_s5 + $0x4d0] sm:$0xff]  ;;  %v8454_v49 = vcombine.high %v4337_v15, %v4341_v16  ;;  %v8453_v34 = vcombine.low %v4337_v15, %v4341_v16 }
 0x99a   : > { %v8565_v57 = vcombine.low %v4449_v21, %v4453_v42  ;;  %v4369_v60 = vld [vmem:[%s12292_s5 + $0x250] sm:$0xff] }
 0x99b   : > { %7670 = vmatpush1.bf16.msra.mxu1 %v8779_v27  ;;  %7707 = vmatpush1.bf16.msra.mxu0 %v8891_v28  ;;  %v8566_v27 = vcombine.high %v4449_v21, %v4453_v42  ;;  %v4345_v28 = vld [vmem:[%s12292_s5 + $0x190] sm:$0xff] }
 0x99c   : > { %7671 = vmatprep.subr.bf16.mxu1 %v8788_v30  ;;  %7708 = vmatprep.subr.bf16.mxu0 %v8900_v31  ;;  %v4349_v30 = vld [vmem:[%s12292_s5 + $0x1b0] sm:$0xff] }
 0x99d   : > { %v4457_v31 = vld [vmem:[%s12292_s5 + $0x510] sm:$0xff]  ;;  %v8462_v35 = vcombine.high %v4345_v28, %v4349_v30 }
 0x99e   : > { %v4373_v62 = vld [vmem:[%s12292_s5 + $0x270] sm:$0xff] }
 0x99f   : > { %7672 = vmatpush1.bf16.msra.mxu1 %v8787_v17  ;;  %7709 = vmatpush1.bf16.msra.mxu0 %v8899_v18  ;;  %v8574_v17 = vcombine.high %v4457_v31, %v4461_v33  ;;  %v4353_v18 = vld [vmem:[%s12292_s5 + $0x1d0] sm:$0xff]  ;;  %v8485_v42 = vcombine.low %v4369_v60, %v4373_v62 }
 0x9a0   : > { %7710 = vmatprep.subr.bf16.mxu0 %v8908_v19  ;;  %7723 = vmatprep.subr.bf16.mxu1 %v8414_v20  ;;  %v4357_v20 = vld [vmem:[%s12292_s5 + $0x1f0] sm:$0xff] }
 0x9a1   : > { %v8470_v39 = vcombine.high %v4353_v18, %v4357_v20  ;;  %v4381_v15 = vld [vmem:[%s12292_s5 + $0x2b0] sm:$0xff] }
 0x9a2   : > { %7674 = vmatmul.mubr.bf16.vlgmr.msra.gmra.mrb[28].mxu1 %v11021_v32  ;;  %v4489_v16 = vld [vmem:[%s12292_s5 + $0x610] sm:$0xff] }
 0x9a3   : > { %7711 = vmatpush1.bf16.msra.mxu0 %v8907_v29  ;;  %7724 = vmatpush1.bf16.msra.mxu1 %v8413_v36  ;;  %v8461_v29 = vcombine.low %v4345_v28, %v4349_v30  ;;  %v8573_v36 = vcombine.low %v4457_v31, %v4461_v33  ;;  %v4493_v21 = vld [vmem:[%s12292_s5 + $0x630] sm:$0xff] }
 0x9a4   : > { %7755 = vmatprep.mubr.bf16.mxu1 %v10807_v4  ;;  %7712 = vmatprep.subr.bf16.mxu0 %v8916_v38  ;;  %v4389_v28 = vld [vmem:[%s12292_s5 + $0x2f0] sm:$0xff] }
 0x9a5   : > { %7725 = vmatprep.subr.bf16.mxu1 %v8422_v41  ;;  %v8582_v41 = vcombine.high %v4465_v23, %v4469_v8  ;;  %v4497_v30 = vld [vmem:[%s12292_s5 + $0x650] sm:$0xff] }
 0x9a6   : > { %v4501_v31 = vld [vmem:[%s12292_s5 + $0x670] sm:$0xff] }
 0x9a7   : > { %7713 = vmatpush1.bf16.msra.mxu0 %v8915_v46  ;;  %7726 = vmatpush1.bf16.msra.mxu1 %v8421_v50  ;;  %v4477_v46 = vld [vmem:[%s12292_s5 + $0x5b0] sm:$0xff]  ;;  %v8469_v50 = vcombine.low %v4353_v18, %v4357_v20 }
 0x9a8   : > { %7727 = vmatprep.subr.bf16.mxu1 %v8430_v47  ;;  %7764 = vmatprep.subr.bf16.mxu0 %v8542_v56  ;;  %v8581_v47 = vcombine.low %v4465_v23, %v4469_v8  ;;  %v8478_v56 = vcombine.high %v4361_v44, %v4365_v40  ;;  %v8590_v58 = vcombine.high %v4473_v45, %v4477_v46  ;;  %v4397_v18 = vld [vmem:[%s12292_s5 + $0x330] sm:$0xff] }
 0x9a9   : > { %v8589_v26 = vcombine.low %v4473_v45, %v4477_v46  ;;  %v4509_v20 = vld [vmem:[%s12292_s5 + $0x6b0] sm:$0xff]  ;;  %v8613_v8 = vcombine.low %v4497_v30, %v4501_v31 }
 0x9aa   : > { %7715 = vmatmul.mubr.bf16.vlgmr.msra.gmra.mrb[28].mxu0 %v11051_v0  ;;  %v4409_v46 = vld [vmem:[%s12292_s5 + $0x390] sm:$0xff] }
 0x9ab   : > { %7728 = vmatpush1.bf16.msra.mxu1 %v8429_v63  ;;  %7765 = vmatpush1.bf16.msra.mxu0 %v8541_v1  ;;  %v4481_v63 = vld [vmem:[%s12292_s5 + $0x5d0] sm:$0xff] }
 0x9ac   : > { %7796 = vmatprep.mubr.bf16.mxu0 %v10831_v25  ;;  %7729 = vmatprep.subr.bf16.mxu1 %v8438_v2  ;;  %v4485_v1 = vld [vmem:[%s12292_s5 + $0x5f0] sm:$0xff] }
 0x9ad   : > { %7766 = vmatprep.subr.bf16.mxu0 %v8550_v7 }
 0x9af   : > { %7730 = vmatpush1.bf16.msra.mxu1 %v8437_v11  ;;  %7767 = vmatpush1.bf16.msra.mxu0 %v8549_v12  ;;  %v8486_v12 = vcombine.high %v4369_v60, %v4373_v62 }
 0x9b0   : > { %7731 = vmatprep.subr.bf16.mxu1 %v8446_v14  ;;  %7768 = vmatprep.subr.bf16.mxu0 %v8558_v37  ;;  %v8598_v14 = vcombine.high %v4481_v63, %v4485_v1  ;;  %v4377_v37 = vld [vmem:[%s12292_s5 + $0x290] sm:$0xff] }
 0x9b1   : > { %v8493_v33 = vcombine.low %v4377_v37, %v4381_v15 }
 0x9b3   : > { %7732 = vmatpush1.bf16.msra.mxu1 %v8445_v22  ;;  %7769 = vmatpush1.bf16.msra.mxu0 %v8557_v24  ;;  %v8597_v22 = vcombine.low %v4481_v63, %v4485_v1  ;;  %v8494_v24 = vcombine.high %v4377_v37, %v4381_v15  ;;  %v4417_v63 = vld [vmem:[%s12292_s5 + $0x3d0] sm:$0xff] }
 0x9b4   : > { %7733 = vmatprep.subr.bf16.mxu1 %v8454_v49  ;;  %7770 = vmatprep.subr.bf16.mxu0 %v8566_v27  ;;  %v8606_v49 = vcombine.high %v4489_v16, %v4493_v21  ;;  %v4385_v27 = vld [vmem:[%s12292_s5 + $0x2d0] sm:$0xff] }
 0x9b5   : > { %v7429_v19 = vpop.f32.mrb[16].mxu1  ;;  %v8501_v23 = vcombine.low %v4385_v27, %v4389_v28  ;;  %v4421_v1 = vld [vmem:[%s12292_s5 + $0x3f0] sm:$0xff] }
 0x9b6   : > { %v7431_v59 = vpop.f32.mrb[17].mxu1  ;;  %v4541_v37 = vld [vmem:[%s12292_s5 + $0x7b0] sm:$0xff] }
 0x9b7   : > { %7734 = vmatpush1.bf16.msra.mxu1 %v8453_v34  ;;  %7771 = vmatpush1.bf16.msra.mxu0 %v8565_v57  ;;  %v7433_v13 = vpop.f32.mrb[18].mxu1  ;;  %v8605_v34 = vcombine.low %v4489_v16, %v4493_v21  ;;  %v8502_v57 = vcombine.high %v4385_v27, %v4389_v28  ;;  %v4553_v15 = vld [vmem:[%s12292_s5 + $0x810] sm:$0xff]  ;;  %v8533_v21 = vcombine.low %v4417_v63, %v4421_v1 }
 0x9b8   : > { %v7434_v38 = vpop.f32.mrb[19].mxu1  ;;  %7735 = vmatprep.subr.bf16.mxu1 %v8462_v35  ;;  %7772 = vmatprep.subr.bf16.mxu0 %v8574_v17  ;;  %v8614_v35 = vcombine.high %v4497_v30, %v4501_v31  ;;  %v4393_v17 = vld [vmem:[%s12292_s5 + $0x310] sm:$0xff] }
 0x9b9   : > { %v4513_v38 = vld [vmem:[%s12292_s5 + $0x6d0] sm:$0xff] }
 0x9ba   : > { %v4557_v16 = vld [vmem:[%s12292_s5 + $0x830] sm:$0xff] }
 0x9bb   : > { %7736 = vmatpush1.bf16.msra.mxu1 %v8461_v29  ;;  %7773 = vmatpush1.bf16.msra.mxu0 %v8573_v36  ;;  %v4401_v29 = vld [vmem:[%s12292_s5 + $0x350] sm:$0xff] }
 0x9bc   : > { %7737 = vmatprep.subr.bf16.mxu1 %v8470_v39  ;;  %7774 = vmatprep.subr.bf16.mxu0 %v8582_v41  ;;  %v4405_v36 = vld [vmem:[%s12292_s5 + $0x370] sm:$0xff]  ;;  %v8509_v41 = vcombine.low %v4393_v17, %v4397_v18 }
 0x9bd   : > { %v7470_v61 = vpop.f32.mrb[16].mxu0  ;;  %v4517_v39 = vld [vmem:[%s12292_s5 + $0x6f0] sm:$0xff]  ;;  %v8518_v40 = vcombine.high %v4401_v29, %v4405_v36 }
 0x9be   : > { %v11519_v2 = vadd.f32 %v7470_v61, %v7429_v19  ;;  %v7472_v3 = vpop.f32.mrb[17].mxu0  ;;  %v4505_v19 = vld [vmem:[%s12292_s5 + $0x690] sm:$0xff]  ;;  %v8630_v45 = vcombine.high %v4513_v38, %v4517_v39  ;;  %v8629_v60 = vcombine.low %v4513_v38, %v4517_v39 }
 0x9bf   : > { %v11521_v7 = vadd.f32 %v7472_v3, %v7431_v59  ;;  %7738 = vmatpush1.bf16.msra.mxu1 %v8469_v50  ;;  %7775 = vmatpush1.bf16.msra.mxu0 %v8581_v47  ;;  %v7474_v9 = vpop.f32.mrb[18].mxu0  ;;  %v8510_v59 = vcombine.high %v4393_v17, %v4397_v18  ;;  %v8622_v13 = vcombine.high %v4505_v19, %v4509_v20  ;;  %v4413_v50 = vld [vmem:[%s12292_s5 + $0x3b0] sm:$0xff] }
 0x9c0   : > { %v7475_v11 = vpop.f32.mrb[19].mxu0  ;;  %7739 = vmatprep.subr.bf16.mxu1 %v8478_v56  ;;  %7776 = vmatprep.subr.bf16.mxu0 %v8590_v58  ;;  %v8621_v44 = vcombine.low %v4505_v19, %v4509_v20  ;;  %v4521_v47 = vld [vmem:[%s12292_s5 + $0x710] sm:$0xff]  ;;  %v8517_v58 = vcombine.low %v4401_v29, %v4405_v36  ;;  %v8526_v61 = vcombine.high %v4409_v46, %v4413_v50 }
 0x9c1   : > { %v4525_v56 = vld [vmem:[%s12292_s5 + $0x730] sm:$0xff]  ;;  %v8534_v11 = vcombine.high %v4417_v63, %v4421_v1 }
 0x9c2   : > { %v8638_v62 = vcombine.high %v4521_v47, %v4525_v56  ;;  %v4529_v3 = vld [vmem:[%s12292_s5 + $0x750] sm:$0xff] }
 0x9c3   : > { %7740 = vmatpush1.bf16.msra.mxu1 %v8477_v6  ;;  %7777 = vmatpush1.bf16.msra.mxu0 %v8589_v26  ;;  %v4533_v9 = vld [vmem:[%s12292_s5 + $0x770] sm:$0xff]  ;;  %v8525_v6 = vcombine.low %v4409_v46, %v4413_v50  ;;  %v8637_v26 = vcombine.low %v4521_v47, %v4525_v56 }
 0x9c4   : > { %7741 = vmatprep.subr.bf16.mxu1 %v8486_v12  ;;  %7778 = vmatprep.subr.bf16.mxu0 %v8598_v14  ;;  %v8646_v12 = vcombine.high %v4529_v3, %v4533_v9  ;;  %v4537_v14 = vld [vmem:[%s12292_s5 + $0x790] sm:$0xff] }
 0x9c5   : > { %v4549_v27 = vld [vmem:[%s12292_s5 + $0x7f0] sm:$0xff]  ;;  %v8653_v31 = vcombine.low %v4537_v14, %v4541_v37 }
 0x9c6   : > { %v4561_v28 = vld [vmem:[%s12292_s5 + $0x850] sm:$0xff] }
 0x9c7   : > { %7742 = vmatpush1.bf16.msra.mxu1 %v8485_v42  ;;  %7779 = vmatpush1.bf16.msra.mxu0 %v8597_v22  ;;  %v8645_v42 = vcombine.low %v4529_v3, %v4533_v9  ;;  %v8654_v22 = vcombine.high %v4537_v14, %v4541_v37  ;;  %v4565_v30 = vld [vmem:[%s12292_s5 + $0x870] sm:$0xff] }
 0x9c8   : > { %7743 = vmatprep.subr.bf16.mxu1 %v8494_v24  ;;  %7780 = vmatprep.subr.bf16.mxu0 %v8606_v49  ;;  %v8670_v24 = vcombine.high %v4553_v15, %v4557_v16  ;;  %v4545_v49 = vld [vmem:[%s12292_s5 + $0x7d0] sm:$0xff] }
 0x9c9   : > { %v4573_v17 = vld [vmem:[%s12292_s5 + $0x8b0] sm:$0xff]  ;;  %v8661_v20 = vcombine.low %v4545_v49, %v4549_v27 }
 0x9ca   : > { %v4681_v18 = vld [vmem:[%s12292_s5 + $0xc10] sm:$0xff] }
 0x9cb   : > { %7744 = vmatpush1.bf16.msra.mxu1 %v8493_v33  ;;  %7781 = vmatpush1.bf16.msra.mxu0 %v8605_v34  ;;  %v8669_v33 = vcombine.low %v4553_v15, %v4557_v16  ;;  %v8662_v34 = vcombine.high %v4545_v49, %v4549_v27  ;;  %v4685_v19 = vld [vmem:[%s12292_s5 + $0xc30] sm:$0xff] }
 0x9cc   : > { %7745 = vmatprep.subr.bf16.mxu1 %v8502_v57  ;;  %7782 = vmatprep.subr.bf16.mxu0 %v8614_v35  ;;  %v4569_v57 = vld [vmem:[%s12292_s5 + $0x890] sm:$0xff]  ;;  %v8678_v35 = vcombine.high %v4561_v28, %v4565_v30 }
 0x9cd   : > { %v4581_v29 = vld [vmem:[%s12292_s5 + $0x8f0] sm:$0xff]  ;;  %v8685_v39 = vcombine.low %v4569_v57, %v4573_v17 }
 0x9ce   : > { %v4689_v36 = vld [vmem:[%s12292_s5 + $0xc50] sm:$0xff] }
 0x9cf   : > { %7746 = vmatpush1.bf16.msra.mxu1 %v8501_v23  ;;  %7783 = vmatpush1.bf16.msra.mxu0 %v8613_v8  ;;  %v8677_v23 = vcombine.low %v4561_v28, %v4565_v30  ;;  %v8686_v8 = vcombine.high %v4569_v57, %v4573_v17  ;;  %v4693_v38 = vld [vmem:[%s12292_s5 + $0xc70] sm:$0xff] }
 0x9d0   : > { %7747 = vmatprep.subr.bf16.mxu1 %v8510_v59  ;;  %7784 = vmatprep.subr.bf16.mxu0 %v8622_v13  ;;  %v8798_v59 = vcombine.high %v4681_v18, %v4685_v19  ;;  %v4577_v13 = vld [vmem:[%s12292_s5 + $0x8d0] sm:$0xff] }
 0x9d1   : > { %v4589_v46 = vld [vmem:[%s12292_s5 + $0x930] sm:$0xff]  ;;  %v8693_v56 = vcombine.low %v4577_v13, %v4581_v29 }
 0x9d2   : > { %v4697_v50 = vld [vmem:[%s12292_s5 + $0xc90] sm:$0xff] }
 0x9d3   : > { %7748 = vmatpush1.bf16.msra.mxu1 %v8509_v41  ;;  %7785 = vmatpush1.bf16.msra.mxu0 %v8621_v44  ;;  %v8797_v41 = vcombine.low %v4681_v18, %v4685_v19  ;;  %v8694_v44 = vcombine.high %v4577_v13, %v4581_v29  ;;  %v4701_v47 = vld [vmem:[%s12292_s5 + $0xcb0] sm:$0xff] }
 0x9d4   : > { %7749 = vmatprep.subr.bf16.mxu1 %v8518_v40  ;;  %7786 = vmatprep.subr.bf16.mxu0 %v8630_v45  ;;  %v4585_v40 = vld [vmem:[%s12292_s5 + $0x910] sm:$0xff]  ;;  %v8806_v45 = vcombine.high %v4689_v36, %v4693_v38 }
 0x9d5   : > { %v4597_v63 = vld [vmem:[%s12292_s5 + $0x970] sm:$0xff]  ;;  %v8701_v9 = vcombine.low %v4585_v40, %v4589_v46 }
 0x9d6   : > { %v4705_v1 = vld [vmem:[%s12292_s5 + $0xcd0] sm:$0xff] }
 0x9d7   : > { %7750 = vmatpush1.bf16.msra.mxu1 %v8517_v58  ;;  %7787 = vmatpush1.bf16.msra.mxu0 %v8629_v60  ;;  %v8805_v58 = vcombine.low %v4689_v36, %v4693_v38  ;;  %v8702_v60 = vcombine.high %v4585_v40, %v4589_v46  ;;  %v4709_v3 = vld [vmem:[%s12292_s5 + $0xcf0] sm:$0xff]  ;;  %v4234_v36 = vld [vmem:[%s12287_s0 + $0x8] sm:$0xff] }
 0x9d8   : > { %7751 = vmatprep.subr.bf16.mxu1 %v8526_v61  ;;  %7788 = vmatprep.subr.bf16.mxu0 %v8638_v62  ;;  %v8814_v61 = vcombine.high %v4697_v50, %v4701_v47  ;;  %v4593_v62 = vld [vmem:[%s12292_s5 + $0x950] sm:$0xff] }
 0x9d9   : > { %v4605_v14 = vld [vmem:[%s12292_s5 + $0x9b0] sm:$0xff]  ;;  %v8709_v16 = vcombine.low %v4593_v62, %v4597_v63 }
 0x9da   : > { %v4713_v37 = vld [vmem:[%s12292_s5 + $0xd10] sm:$0xff] }
 0x9db   : > { %7752 = vmatpush1.bf16.msra.mxu1 %v8525_v6  ;;  %7789 = vmatpush1.bf16.msra.mxu0 %v8637_v26  ;;  %v8813_v6 = vcombine.low %v4697_v50, %v4701_v47  ;;  %v8710_v26 = vcombine.high %v4593_v62, %v4597_v63  ;;  %v4717_v15 = vld [vmem:[%s12292_s5 + $0xd30] sm:$0xff] }
 0x9dc   : > { %7753 = vmatprep.subr.bf16.mxu1 %v8534_v11  ;;  %7790 = vmatprep.subr.bf16.mxu0 %v8646_v12  ;;  %v8822_v11 = vcombine.high %v4705_v1, %v4709_v3  ;;  %v4601_v12 = vld [vmem:[%s12292_s5 + $0x990] sm:$0xff]  ;;  %v8829_v18 = vcombine.low %v4713_v37, %v4717_v15 }
 0x9dd   : > { %v4609_v49 = vld [vmem:[%s12292_s5 + $0x9d0] sm:$0xff]  ;;  %v8717_v17 = vcombine.low %v4601_v12, %v4605_v14 }
 0x9de   : > { %v4613_v28 = vld [vmem:[%s12292_s5 + $0x9f0] sm:$0xff] }
 0x9df   : > { %7754 = vmatpush1.bf16.msra.mxu1 %v8533_v21  ;;  %7791 = vmatpush1.bf16.msra.mxu0 %v8645_v42  ;;  %v8821_v21 = vcombine.low %v4705_v1, %v4709_v3  ;;  %v8718_v42 = vcombine.high %v4601_v12, %v4605_v14  ;;  %v4721_v30 = vld [vmem:[%s12292_s5 + $0xd50] sm:$0xff]  ;;  %v8725_v38 = vcombine.low %v4609_v49, %v4613_v28 }
 0x9e0   : > { %7792 = vmatprep.subr.bf16.mxu0 %v8654_v22  ;;  %7805 = vmatprep.subr.bf16.mxu1 %v8670_v24  ;;  %v8830_v22 = vcombine.high %v4713_v37, %v4717_v15  ;;  %v11686_v24 = vld [vmem:[%s12293_s6] sm:$0xff]  ;;  %v4621_v13 = vld [vmem:[%s12292_s5 + $0xa30] sm:$0xff] }
 0x9e1   : > { %v4729_v29 = vld [vmem:[%s12292_s5 + $0xd90] sm:$0xff] }
 0x9e2   : > { %7756 = vmatmul.mubr.bf16.vlgmr.msra.gmra.mrb[32].mxu1 %v10809_v5  ;;  %v4625_v40 = vld [vmem:[%s12292_s5 + $0xa50] sm:$0xff] }
 0x9e3   : > { %7793 = vmatpush1.bf16.msra.mxu0 %v8653_v31  ;;  %7806 = vmatpush1.bf16.msra.mxu1 %v8669_v33  ;;  %v4725_v31 = vld [vmem:[%s12292_s5 + $0xd70] sm:$0xff] }
 0x9e4   : > { %7837 = vmatprep.mubr.bf16.mxu1 %v10865_v43  ;;  %7794 = vmatprep.subr.bf16.mxu0 %v8662_v34  ;;  %v4629_v50 = vld [vmem:[%s12292_s5 + $0xa70] sm:$0xff] }
 0x9e5   : > { %7807 = vmatprep.subr.bf16.mxu1 %v8678_v35  ;;  %v4737_v47 = vld [vmem:[%s12292_s5 + $0xdd0] sm:$0xff] }
 0x9e6   : > { %v4637_v14 = vld [vmem:[%s12292_s5 + $0xab0] sm:$0xff] }
 0x9e7   : > { %7795 = vmatpush1.bf16.msra.mxu0 %v8661_v20  ;;  %7808 = vmatpush1.bf16.msra.mxu1 %v8677_v23  ;;  %v4233_v20 = vld [vmem:[%s12287_s0] sm:$0xff]  ;;  %v4246_v23 = vrot.slane %v11686_v24, %v1274_v52  ;;  %v4733_v52 = vld [vmem:[%s12292_s5 + $0xdb0] sm:$0xff] }
 0x9e8   : > { %7809 = vmatprep.subr.bf16.mxu1 %v8686_v8  ;;  %7846 = vmatprep.subr.bf16.mxu0 %v8798_v59  ;;  %v8838_v8 = vcombine.high %v4721_v30, %v4725_v31  ;;  %v4250_v59 = vrot.slane %v11686_v24, %v1278_v48  ;;  %v8837_v48 = vcombine.low %v4721_v30, %v4725_v31  ;;  %v4745_v37 = vld [vmem:[%s12292_s5 + $0xe10] sm:$0xff] }
 0x9e9   : > { %v8845_v1 = vcombine.low %v4729_v29, %v4733_v52  ;;  %v4749_v15 = vld [vmem:[%s12292_s5 + $0xe30] sm:$0xff] }
 0x9ea   : > { %7797 = vmatmul.mubr.bf16.vlgmr.msra.gmra.mrb[32].mxu0 %v10833_v55  ;;  %v4284_v46 = vadd.f32 %v4250_v59, %v4234_v36  ;;  %v4757_v30 = vld [vmem:[%s12292_s5 + $0xe70] sm:$0xff] }
 0x9eb   : > { %7810 = vmatpush1.bf16.msra.mxu1 %v8685_v39  ;;  %7847 = vmatpush1.bf16.msra.mxu0 %v8797_v41  ;;  %v4283_v39 = vadd.f32 %v4246_v23, %v4233_v20  ;;  %v4661_v59 = vld [vmem:[%s12292_s5 + $0xb70] sm:$0xff] }
 0x9ec   : > { %7878 = vmatprep.mubr.bf16.mxu0 %v10896_v10  ;;  %7811 = vmatprep.subr.bf16.mxu1 %v8694_v44  ;;  %v8846_v44 = vcombine.high %v4729_v29, %v4733_v52  ;;  %v4773_v29 = vld [vmem:[%s12292_s5 + $0xef0] sm:$0xff] }
 0x9ed   : > { %7848 = vmatprep.subr.bf16.mxu0 %v8806_v45 }
 0x9ef   : > { %7812 = vmatpush1.bf16.msra.mxu1 %v8693_v56  ;;  %7849 = vmatpush1.bf16.msra.mxu0 %v8805_v58  ;;  %v4741_v56 = vld [vmem:[%s12292_s5 + $0xdf0] sm:$0xff] }
 0x9f0   : > { %7813 = vmatprep.subr.bf16.mxu1 %v8702_v60  ;;  %7850 = vmatprep.subr.bf16.mxu0 %v8814_v61 }
 0x9f3   : > { %7814 = vmatpush1.bf16.msra.mxu1 %v8701_v9  ;;  %7851 = vmatpush1.bf16.msra.mxu0 %v8813_v6  ;;  %v8742_v6 = vcombine.high %v4625_v40, %v4629_v50 }
 0x9f4   : > { %7815 = vmatprep.subr.bf16.mxu1 %v8710_v26  ;;  %7852 = vmatprep.subr.bf16.mxu0 %v8822_v11  ;;  %v8854_v26 = vcombine.high %v4737_v47, %v4741_v56  ;;  %v4633_v11 = vld [vmem:[%s12292_s5 + $0xa90] sm:$0xff] }
 0x9f5   : > { %v7511_v27 = vpop.f32.mrb[20].mxu1  ;;  %v8749_v31 = vcombine.low %v4633_v11, %v4637_v14 }
 0x9f6   : > { %v7512_v33 = vadd.f32 %v7511_v27, %v11519_v2  ;;  %v7513_v34 = vpop.f32.mrb[21].mxu1  ;;  %v8726_v2 = vcombine.high %v4609_v49, %v4613_v28  ;;  %v4641_v49 = vld [vmem:[%s12292_s5 + $0xad0] sm:$0xff] }
 0x9f7   : > { %v7514_v57 = vadd.f32 %v7513_v34, %v11521_v7  ;;  %v7515_v35 = vpop.f32.mrb[22].mxu1  ;;  %7816 = vmatpush1.bf16.msra.mxu1 %v8709_v16  ;;  %7853 = vmatpush1.bf16.msra.mxu0 %v8821_v21  ;;  %v4617_v7 = vld [vmem:[%s12292_s5 + $0xa10] sm:$0xff]  ;;  %v8741_v16 = vcombine.low %v4625_v40, %v4629_v50  ;;  %v8853_v21 = vcombine.low %v4737_v47, %v4741_v56 }
 0x9f8   : > { %v7516_v19 = vpop.f32.mrb[23].mxu1  ;;  %7817 = vmatprep.subr.bf16.mxu1 %v8718_v42  ;;  %7854 = vmatprep.subr.bf16.mxu0 %v8830_v22  ;;  %v8734_v41 = vcombine.high %v4617_v7, %v4621_v13  ;;  %v8733_v63 = vcombine.low %v4617_v7, %v4621_v13  ;;  %v8750_v42 = vcombine.high %v4633_v11, %v4637_v14  ;;  %v4645_v27 = vld [vmem:[%s12292_s5 + $0xaf0] sm:$0xff]  ;;  %v4302_v11 = vld [vmem:[%s12292_s5 + $0x38] sm:$0xff] }
 0x9f9   : > { %v8862_v22 = vcombine.high %v4745_v37, %v4749_v15  ;;  %v4753_v28 = vld [vmem:[%s12292_s5 + $0xe50] sm:$0xff]  ;;  %v8758_v34 = vcombine.high %v4641_v49, %v4645_v27  ;;  %v8757_v20 = vcombine.low %v4641_v49, %v4645_v27 }
 0x9fa   : > { %v4649_v35 = vld [vmem:[%s12292_s5 + $0xb10] sm:$0xff]  ;;  %v8869_v23 = vcombine.low %v4753_v28, %v4757_v30 }
 0x9fb   : > { %7818 = vmatpush1.bf16.msra.mxu1 %v8717_v17  ;;  %7855 = vmatpush1.bf16.msra.mxu0 %v8829_v18  ;;  %v4653_v17 = vld [vmem:[%s12292_s5 + $0xb30] sm:$0xff] }
 0x9fc   : > { %7819 = vmatprep.subr.bf16.mxu1 %v8726_v2  ;;  %7856 = vmatprep.subr.bf16.mxu0 %v8838_v8  ;;  %v4761_v18 = vld [vmem:[%s12292_s5 + $0xe90] sm:$0xff]  ;;  %v8766_v2 = vcombine.high %v4649_v35, %v4653_v17  ;;  %v8765_v52 = vcombine.low %v4649_v35, %v4653_v17 }
 0x9fd   : > { %v7552_v45 = vpop.f32.mrb[20].mxu0  ;;  %v4765_v19 = vld [vmem:[%s12292_s5 + $0xeb0] sm:$0xff] }
 0x9fe   : > { %v7553_v58 = vadd.f32 %v7552_v45, %v7512_v33  ;;  %v7554_v60 = vpop.f32.mrb[21].mxu0  ;;  %v8861_v33 = vcombine.low %v4745_v37, %v4749_v15  ;;  %v8878_v8 = vcombine.high %v4761_v18, %v4765_v19  ;;  %v4657_v7 = vld [vmem:[%s12292_s5 + $0xb50] sm:$0xff]  ;;  %v8877_v36 = vcombine.low %v4761_v18, %v4765_v19 }
 0x9ff   : > { %v7555_v61 = vadd.f32 %v7554_v60, %v7514_v57  ;;  %v7556_v62 = vpop.f32.mrb[22].mxu0  ;;  %7820 = vmatpush1.bf16.msra.mxu1 %v8725_v38  ;;  %7857 = vmatpush1.bf16.msra.mxu0 %v8837_v48  ;;  %v8870_v57 = vcombine.high %v4753_v28, %v4757_v30  ;;  %v4769_v13 = vld [vmem:[%s12292_s5 + $0xed0] sm:$0xff]  ;;  %v8774_v38 = vcombine.high %v4657_v7, %v4661_v59  ;;  %v4314_v30 = vld [vmem:[%s12292_s5 + $0x98] sm:$0xff] }
 0xa00   : > { %v8051_v3 = vadd.f32 %v7553_v58, %v4283_v39  ;;  %v7557_v9 = vpop.f32.mrb[23].mxu0  ;;  %7821 = vmatprep.subr.bf16.mxu1 %v8734_v41  ;;  %7858 = vmatprep.subr.bf16.mxu0 %v8846_v44  ;;  %v8886_v48 = vcombine.high %v4769_v13, %v4773_v29  ;;  %v4665_v39 = vld [vmem:[%s12292_s5 + $0xb90] sm:$0xff]  ;;  %v8773_v45 = vcombine.low %v4657_v7, %v4661_v59 }
 0xa01   : > { %v8052_v12 = vadd.f32 %v7555_v61, %v4284_v46  ;;  %v4669_v41 = vld [vmem:[%s12292_s5 + $0xbb0] sm:$0xff]  ;;  %v8885_v46 = vcombine.low %v4769_v13, %v4773_v29  ;;  %v4330_v13 = vld [vmem:[%s12292_s5 + $0x118] sm:$0xff] }
 0xa02   : > { %8059 = vst [vmem:[%s12294_s7] sm:$0xff] %v8051_v3  ;;  %v4777_v44 = vld [vmem:[%s12292_s5 + $0xf10] sm:$0xff]  ;;  %v8782_v50 = vcombine.high %v4665_v39, %v4669_v41  ;;  %v8781_v62 = vcombine.low %v4665_v39, %v4669_v41 }
 0xa03   : > { %8060 = vst [vmem:[%s12294_s7 + $0x8] sm:$0xff] %v8052_v12  ;;  %7822 = vmatpush1.bf16.msra.mxu1 %v8733_v63  ;;  %7859 = vmatpush1.bf16.msra.mxu0 %v8845_v1  ;;  %v4781_v40 = vld [vmem:[%s12292_s5 + $0xf30] sm:$0xff] }
 0xa04   : > { %7823 = vmatprep.subr.bf16.mxu1 %v8742_v6  ;;  %7860 = vmatprep.subr.bf16.mxu0 %v8854_v26  ;;  %v8894_v47 = vcombine.high %v4777_v44, %v4781_v40  ;;  %v4673_v56 = vld [vmem:[%s12292_s5 + $0xbd0] sm:$0xff]  ;;  %v8893_v63 = vcombine.low %v4777_v44, %v4781_v40  ;;  %v4298_v26 = vld [vmem:[%s12292_s5 + $0x18] sm:$0xff] }
 0xa05   : > { %v4677_v58 = vld [vmem:[%s12292_s5 + $0xbf0] sm:$0xff]  ;;  %v8416_v15 = vcombine.high %v4298_v26, %v4302_v11  ;;  %v8415_v27 = vcombine.low %v4298_v26, %v4302_v11  ;;  %v4338_v40 = vld [vmem:[%s12292_s5 + $0x158] sm:$0xff] }
 0xa06   : > { %v4785_v60 = vld [vmem:[%s12292_s5 + $0xf50] sm:$0xff]  ;;  %v8790_v1 = vcombine.high %v4673_v56, %v4677_v58  ;;  %v8789_v12 = vcombine.low %v4673_v56, %v4677_v58  ;;  %v4354_v26 = vld [vmem:[%s12292_s5 + $0x1d8] sm:$0xff] }
 0xa07   : > { %7824 = vmatpush1.bf16.msra.mxu1 %v8741_v16  ;;  %7861 = vmatpush1.bf16.msra.mxu0 %v8853_v21  ;;  %v4789_v61 = vld [vmem:[%s12292_s5 + $0xf70] sm:$0xff] }
 0xa08   : > { %7825 = vmatprep.subr.bf16.mxu1 %v8750_v42  ;;  %7862 = vmatprep.subr.bf16.mxu0 %v8862_v22  ;;  %v8902_v3 = vcombine.high %v4785_v60, %v4789_v61  ;;  %v4793_v9 = vld [vmem:[%s12292_s5 + $0xf90] sm:$0xff]  ;;  %v8901_v14 = vcombine.low %v4785_v60, %v4789_v61  ;;  %v4306_v42 = vld [vmem:[%s12292_s5 + $0x58] sm:$0xff] }
 0xa09   : > { %v4797_v6 = vld [vmem:[%s12292_s5 + $0xfb0] sm:$0xff]  ;;  %v4310_v22 = vld [vmem:[%s12292_s5 + $0x78] sm:$0xff] }
 0xa0a   : > { %v8910_v37 = vcombine.high %v4793_v9, %v4797_v6  ;;  %v4801_v16 = vld [vmem:[%s12292_s5 + $0xfd0] sm:$0xff]  ;;  %v8909_v49 = vcombine.low %v4793_v9, %v4797_v6  ;;  %v8423_v17 = vcombine.low %v4306_v42, %v4310_v22  ;;  %v4346_v60 = vld [vmem:[%s12292_s5 + $0x198] sm:$0xff] }
 0xa0b   : > { %7826 = vmatpush1.bf16.msra.mxu1 %v8749_v31  ;;  %7863 = vmatpush1.bf16.msra.mxu0 %v8861_v33  ;;  %v4805_v21 = vld [vmem:[%s12292_s5 + $0xff0] sm:$0xff]  ;;  %v8424_v31 = vcombine.high %v4306_v42, %v4310_v22  ;;  %v4318_v33 = vld [vmem:[%s12292_s5 + $0xb8] sm:$0xff] }
 0xa0c   : > { %7827 = vmatprep.subr.bf16.mxu1 %v8758_v34  ;;  %7864 = vmatprep.subr.bf16.mxu0 %v8870_v57  ;;  %v8918_v28 = vcombine.high %v4801_v16, %v4805_v21  ;;  %v4426_v34 = vld [vmem:[%s12292_s5 + $0x418] sm:$0xff]  ;;  %v8917_v35 = vcombine.low %v4801_v16, %v4805_v21  ;;  %v8432_v18 = vcombine.high %v4314_v30, %v4318_v33 }
 0xa0d   : > { %v4430_v57 = vld [vmem:[%s12292_s5 + $0x438] sm:$0xff] }
 0xa0e   : > { %v8544_v19 = vcombine.high %v4426_v34, %v4430_v57  ;;  %v8543_v7 = vcombine.low %v4426_v34, %v4430_v57  ;;  %v4350_v61 = vld [vmem:[%s12292_s5 + $0x1b8] sm:$0xff] }
 0xa0f   : > { %7828 = vmatpush1.bf16.msra.mxu1 %v8757_v20  ;;  %7865 = vmatpush1.bf16.msra.mxu0 %v8869_v23  ;;  %v4322_v20 = vld [vmem:[%s12292_s5 + $0xd8] sm:$0xff]  ;;  %v8464_v9 = vcombine.high %v4346_v60, %v4350_v61  ;;  %v8463_v21 = vcombine.low %v4346_v60, %v4350_v61 }
 0xa10   : > { %7829 = vmatprep.subr.bf16.mxu1 %v8766_v2  ;;  %7866 = vmatprep.subr.bf16.mxu0 %v8878_v8  ;;  %v4326_v23 = vld [vmem:[%s12292_s5 + $0xf8] sm:$0xff]  ;;  %v8431_v8 = vcombine.low %v4314_v30, %v4318_v33 }
 0xa11   : > { %v4434_v2 = vld [vmem:[%s12292_s5 + $0x458] sm:$0xff]  ;;  %v8440_v59 = vcombine.high %v4322_v20, %v4326_v23 }
 0xa12   : > { %v4366_v30 = vld [vmem:[%s12292_s5 + $0x238] sm:$0xff] }
 0xa13   : > { %7830 = vmatpush1.bf16.msra.mxu1 %v8765_v52  ;;  %7867 = vmatpush1.bf16.msra.mxu0 %v8877_v36  ;;  %v4334_v52 = vld [vmem:[%s12292_s5 + $0x138] sm:$0xff] }
 0xa14   : > { %7831 = vmatprep.subr.bf16.mxu1 %v8774_v38  ;;  %7868 = vmatprep.subr.bf16.mxu0 %v8886_v48  ;;  %v4442_v36 = vld [vmem:[%s12292_s5 + $0x498] sm:$0xff]  ;;  %v8439_v48 = vcombine.low %v4322_v20, %v4326_v23  ;;  %v8448_v41 = vcombine.high %v4330_v13, %v4334_v52 }
 0xa15   : > { %v4446_v38 = vld [vmem:[%s12292_s5 + $0x4b8] sm:$0xff] }
 0xa16   : > { %v8560_v44 = vcombine.high %v4442_v36, %v4446_v38  ;;  %v4478_v33 = vld [vmem:[%s12292_s5 + $0x5b8] sm:$0xff] }
 0xa17   : > { %7832 = vmatpush1.bf16.msra.mxu1 %v8773_v45  ;;  %7869 = vmatpush1.bf16.msra.mxu0 %v8885_v46  ;;  %v4342_v45 = vld [vmem:[%s12292_s5 + $0x178] sm:$0xff] }
 0xa18   : > { %7833 = vmatprep.subr.bf16.mxu1 %v8782_v50  ;;  %7870 = vmatprep.subr.bf16.mxu0 %v8894_v47  ;;  %v4450_v46 = vld [vmem:[%s12292_s5 + $0x4d8] sm:$0xff]  ;;  %v8447_v50 = vcombine.low %v4330_v13, %v4334_v52  ;;  %v8559_v47 = vcombine.low %v4442_v36, %v4446_v38  ;;  %v8456_v56 = vcombine.high %v4338_v40, %v4342_v45 }
 0xa19   : > { %v4374_v20 = vld [vmem:[%s12292_s5 + $0x278] sm:$0xff] }
 0xa1a   : > { %v4482_v23 = vld [vmem:[%s12292_s5 + $0x5d8] sm:$0xff] }
 0xa1b   : > { %7834 = vmatpush1.bf16.msra.mxu1 %v8781_v62  ;;  %7871 = vmatpush1.bf16.msra.mxu0 %v8893_v63  ;;  %v4458_v62 = vld [vmem:[%s12292_s5 + $0x518] sm:$0xff] }
 0xa1c   : > { %7835 = vmatprep.subr.bf16.mxu1 %v8790_v1  ;;  %7872 = vmatprep.subr.bf16.mxu0 %v8902_v3  ;;  %v4462_v63 = vld [vmem:[%s12292_s5 + $0x538] sm:$0xff]  ;;  %v8455_v1 = vcombine.low %v4338_v40, %v4342_v45 }
 0xa1d   : > { %v8576_v6 = vcombine.high %v4458_v62, %v4462_v63  ;;  %v8575_v42 = vcombine.low %v4458_v62, %v4462_v63 }
 0xa1f   : > { %7836 = vmatpush1.bf16.msra.mxu1 %v8789_v12  ;;  %7873 = vmatpush1.bf16.msra.mxu0 %v8901_v14  ;;  %v4358_v12 = vld [vmem:[%s12292_s5 + $0x1f8] sm:$0xff] }
 0xa20   : > { %7874 = vmatprep.subr.bf16.mxu0 %v8910_v37  ;;  %7887 = vmatprep.subr.bf16.mxu1 %v8416_v15  ;;  %v4466_v14 = vld [vmem:[%s12292_s5 + $0x558] sm:$0xff]  ;;  %v8471_v34 = vcombine.low %v4354_v26, %v4358_v12 }
 0xa21   : > { %v4470_v37 = vld [vmem:[%s12292_s5 + $0x578] sm:$0xff] }
 0xa22   : > { %7838 = vmatmul.mubr.bf16.vlgmr.msra.gmra.mrb[36].mxu1 %v11021_v32  ;;  %v8583_v57 = vcombine.low %v4466_v14, %v4470_v37 }
 0xa23   : > { %7875 = vmatpush1.bf16.msra.mxu0 %v8909_v49  ;;  %7888 = vmatpush1.bf16.msra.mxu1 %v8415_v27  ;;  %v8472_v49 = vcombine.high %v4354_v26, %v4358_v12  ;;  %v8584_v27 = vcombine.high %v4466_v14, %v4470_v37  ;;  %v4402_v37 = vld [vmem:[%s12292_s5 + $0x358] sm:$0xff] }
 0xa24   : > { %7919 = vmatprep.mubr.bf16.mxu1 %v10807_v4  ;;  %7876 = vmatprep.subr.bf16.mxu0 %v8918_v28  ;;  %v4438_v4 = vld [vmem:[%s12292_s5 + $0x478] sm:$0xff] }
 0xa25   : > { %7889 = vmatprep.subr.bf16.mxu1 %v8424_v31  ;;  %v8552_v29 = vcombine.high %v4434_v2, %v4438_v4  ;;  %v8551_v39 = vcombine.low %v4434_v2, %v4438_v4  ;;  %v4362_v28 = vld [vmem:[%s12292_s5 + $0x218] sm:$0xff] }
 0xa26   : > { %v4474_v31 = vld [vmem:[%s12292_s5 + $0x598] sm:$0xff]  ;;  %v8479_v13 = vcombine.low %v4362_v28, %v4366_v30 }
 0xa27   : > { %7877 = vmatpush1.bf16.msra.mxu0 %v8917_v35  ;;  %7890 = vmatpush1.bf16.msra.mxu1 %v8423_v17  ;;  %v8480_v35 = vcombine.high %v4362_v28, %v4366_v30  ;;  %v8592_v17 = vcombine.high %v4474_v31, %v4478_v33  ;;  %v4486_v2 = vld [vmem:[%s12292_s5 + $0x5f8] sm:$0xff] }
 0xa28   : > { %7891 = vmatprep.subr.bf16.mxu1 %v8432_v18  ;;  %7928 = vmatprep.subr.bf16.mxu0 %v8544_v19  ;;  %v4370_v18 = vld [vmem:[%s12292_s5 + $0x258] sm:$0xff]  ;;  %v8600_v38 = vcombine.high %v4482_v23, %v4486_v2  ;;  %v8599_v45 = vcombine.low %v4482_v23, %v4486_v2 }
 0xa29   : > { %v8488_v36 = vcombine.high %v4370_v18, %v4374_v20  ;;  %v8487_v40 = vcombine.low %v4370_v18, %v4374_v20  ;;  %v4410_v28 = vld [vmem:[%s12292_s5 + $0x398] sm:$0xff] }
 0xa2a   : > { %7879 = vmatmul.mubr.bf16.vlgmr.msra.gmra.mrb[36].mxu0 %v11051_v0  ;;  %v4414_v30 = vld [vmem:[%s12292_s5 + $0x3b8] sm:$0xff] }
 0xa2b   : > { %7892 = vmatpush1.bf16.msra.mxu1 %v8431_v8  ;;  %7929 = vmatpush1.bf16.msra.mxu0 %v8543_v7  ;;  %v4418_v18 = vld [vmem:[%s12292_s5 + $0x3d8] sm:$0xff]  ;;  %v8527_v2 = vcombine.low %v4410_v28, %v4414_v30 }
 0xa2c   : > { %7960 = vmatprep.mubr.bf16.mxu0 %v10831_v25  ;;  %7893 = vmatprep.subr.bf16.mxu1 %v8440_v59  ;;  %v4454_v25 = vld [vmem:[%s12292_s5 + $0x4f8] sm:$0xff] }
 0xa2d   : > { %7930 = vmatprep.subr.bf16.mxu0 %v8552_v29  ;;  %v8568_v58 = vcombine.high %v4450_v46, %v4454_v25  ;;  %v8567_v3 = vcombine.low %v4450_v46, %v4454_v25  ;;  %v8591_v29 = vcombine.low %v4474_v31, %v4478_v33  ;;  %v4522_v31 = vld [vmem:[%s12292_s5 + $0x718] sm:$0xff] }
 0xa2e   : > { %v4526_v33 = vld [vmem:[%s12292_s5 + $0x738] sm:$0xff] }
 0xa2f   : > { %7894 = vmatpush1.bf16.msra.mxu1 %v8439_v48  ;;  %7931 = vmatpush1.bf16.msra.mxu0 %v8551_v39  ;;  %v4378_v48 = vld [vmem:[%s12292_s5 + $0x298] sm:$0xff] }
 0xa30   : > { %7895 = vmatprep.subr.bf16.mxu1 %v8448_v41  ;;  %7932 = vmatprep.subr.bf16.mxu0 %v8560_v44  ;;  %v4382_v39 = vld [vmem:[%s12292_s5 + $0x2b8] sm:$0xff] }
 0xa31   : > { %v4490_v41 = vld [vmem:[%s12292_s5 + $0x618] sm:$0xff]  ;;  %v8496_v46 = vcombine.high %v4378_v48, %v4382_v39  ;;  %v8495_v60 = vcombine.low %v4378_v48, %v4382_v39 }
 0xa32   : > { %v4494_v44 = vld [vmem:[%s12292_s5 + $0x638] sm:$0xff] }
 0xa33   : > { %7896 = vmatpush1.bf16.msra.mxu1 %v8447_v50  ;;  %7933 = vmatpush1.bf16.msra.mxu0 %v8559_v47  ;;  %v8608_v25 = vcombine.high %v4490_v41, %v4494_v44  ;;  %v4386_v50 = vld [vmem:[%s12292_s5 + $0x2d8] sm:$0xff]  ;;  %v8607_v61 = vcombine.low %v4490_v41, %v4494_v44 }
 0xa34   : > { %7897 = vmatprep.subr.bf16.mxu1 %v8456_v56  ;;  %7934 = vmatprep.subr.bf16.mxu0 %v8568_v58  ;;  %v4390_v47 = vld [vmem:[%s12292_s5 + $0x2f8] sm:$0xff] }
 0xa35   : > { %v7593_v11 = vpop.f32.mrb[24].mxu1  ;;  %v4498_v56 = vld [vmem:[%s12292_s5 + $0x658] sm:$0xff]  ;;  %v8504_v62 = vcombine.high %v4386_v50, %v4390_v47  ;;  %v8503_v26 = vcombine.low %v4386_v50, %v4390_v47 }
 0xa36   : > { %v7595_v15 = vpop.f32.mrb[25].mxu1  ;;  %v4502_v58 = vld [vmem:[%s12292_s5 + $0x678] sm:$0xff] }
 0xa37   : > { %v7597_v16 = vpop.f32.mrb[26].mxu1  ;;  %7898 = vmatpush1.bf16.msra.mxu1 %v8455_v1  ;;  %7935 = vmatpush1.bf16.msra.mxu0 %v8567_v3  ;;  %v8616_v63 = vcombine.high %v4498_v56, %v4502_v58  ;;  %v4394_v1 = vld [vmem:[%s12292_s5 + $0x318] sm:$0xff] }
 0xa38   : > { %v7598_v22 = vpop.f32.mrb[27].mxu1  ;;  %7899 = vmatprep.subr.bf16.mxu1 %v8464_v9  ;;  %7936 = vmatprep.subr.bf16.mxu0 %v8576_v6  ;;  %v4398_v3 = vld [vmem:[%s12292_s5 + $0x338] sm:$0xff] }
 0xa39   : > { %v4506_v9 = vld [vmem:[%s12292_s5 + $0x698] sm:$0xff]  ;;  %v8512_v12 = vcombine.high %v4394_v1, %v4398_v3 }
 0xa3a   : > { %v4510_v6 = vld [vmem:[%s12292_s5 + $0x6b8] sm:$0xff] }
 0xa3b   : > { %7900 = vmatpush1.bf16.msra.mxu1 %v8463_v21  ;;  %7937 = vmatpush1.bf16.msra.mxu0 %v8575_v42  ;;  %v8624_v14 = vcombine.high %v4506_v9, %v4510_v6  ;;  %v4514_v16 = vld [vmem:[%s12292_s5 + $0x6d8] sm:$0xff]  ;;  %v8511_v42 = vcombine.low %v4394_v1, %v4398_v3  ;;  %v8623_v22 = vcombine.low %v4506_v9, %v4510_v6 }
 0xa3c   : > { %7901 = vmatprep.subr.bf16.mxu1 %v8472_v49  ;;  %7938 = vmatprep.subr.bf16.mxu0 %v8584_v27  ;;  %v4518_v21 = vld [vmem:[%s12292_s5 + $0x6f8] sm:$0xff] }
 0xa3d   : > { %v7634_v19 = vpop.f32.mrb[24].mxu0  ;;  %v8632_v27 = vcombine.high %v4514_v16, %v4518_v21  ;;  %v4530_v20 = vld [vmem:[%s12292_s5 + $0x758] sm:$0xff] }
 0xa3e   : > { %v11940_v4 = vadd.f32 %v7634_v19, %v7593_v11  ;;  %v7636_v8 = vpop.f32.mrb[25].mxu0  ;;  %v8615_v11 = vcombine.low %v4498_v56, %v4502_v58  ;;  %v4422_v19 = vld [vmem:[%s12292_s5 + $0x3f8] sm:$0xff] }
 0xa3f   : > { %v11942_v7 = vadd.f32 %v7636_v8, %v7595_v15  ;;  %v7638_v59 = vpop.f32.mrb[26].mxu0  ;;  %7902 = vmatpush1.bf16.msra.mxu1 %v8471_v34  ;;  %7939 = vmatpush1.bf16.msra.mxu0 %v8583_v57  ;;  %v4406_v15 = vld [vmem:[%s12292_s5 + $0x378] sm:$0xff]  ;;  %v8631_v57 = vcombine.low %v4514_v16, %v4518_v21  ;;  %v8639_v8 = vcombine.low %v4522_v31, %v4526_v33 }
 0xa40   : > { %v7639_v52 = vpop.f32.mrb[27].mxu0  ;;  %7903 = vmatprep.subr.bf16.mxu1 %v8480_v35  ;;  %7940 = vmatprep.subr.bf16.mxu0 %v8592_v17  ;;  %v8520_v49 = vcombine.high %v4402_v37, %v4406_v15  ;;  %v8519_v34 = vcombine.low %v4402_v37, %v4406_v15  ;;  %v8528_v35 = vcombine.high %v4410_v28, %v4414_v30  ;;  %v4534_v23 = vld [vmem:[%s12292_s5 + $0x778] sm:$0xff] }
 0xa41   : > { %v8640_v17 = vcombine.high %v4522_v31, %v4526_v33  ;;  %v8536_v59 = vcombine.high %v4418_v18, %v4422_v19  ;;  %v4542_v52 = vld [vmem:[%s12292_s5 + $0x7b8] sm:$0xff]  ;;  %v8535_v48 = vcombine.low %v4418_v18, %v4422_v19  ;;  %v8647_v39 = vcombine.low %v4530_v20, %v4534_v23 }
 0xa42   : > { %v4570_v58 = vld [vmem:[%s12292_s5 + $0x898] sm:$0xff] }
 0xa43   : > { %7904 = vmatpush1.bf16.msra.mxu1 %v8479_v13  ;;  %7941 = vmatpush1.bf16.msra.mxu0 %v8591_v29  ;;  %v8648_v13 = vcombine.high %v4530_v20, %v4534_v23  ;;  %v4538_v29 = vld [vmem:[%s12292_s5 + $0x798] sm:$0xff] }
 0xa44   : > { %7905 = vmatprep.subr.bf16.mxu1 %v8488_v36  ;;  %7942 = vmatprep.subr.bf16.mxu0 %v8600_v38  ;;  %v4554_v36 = vld [vmem:[%s12292_s5 + $0x818] sm:$0xff]  ;;  %v8656_v41 = vcombine.high %v4538_v29, %v4542_v52  ;;  %v8655_v50 = vcombine.low %v4538_v29, %v4542_v52 }
 0xa45   : > { %v4558_v38 = vld [vmem:[%s12292_s5 + $0x838] sm:$0xff] }
 0xa46   : > { %v8672_v44 = vcombine.high %v4554_v36, %v4558_v38  ;;  %v8671_v47 = vcombine.low %v4554_v36, %v4558_v38  ;;  %v4586_v15 = vld [vmem:[%s12292_s5 + $0x918] sm:$0xff] }
 0xa47   : > { %7906 = vmatpush1.bf16.msra.mxu1 %v8487_v40  ;;  %7943 = vmatpush1.bf16.msra.mxu0 %v8599_v45  ;;  %v4546_v40 = vld [vmem:[%s12292_s5 + $0x7d8] sm:$0xff] }
 0xa48   : > { %7907 = vmatprep.subr.bf16.mxu1 %v8496_v46  ;;  %7944 = vmatprep.subr.bf16.mxu0 %v8608_v25  ;;  %v4550_v45 = vld [vmem:[%s12292_s5 + $0x7f8] sm:$0xff] }
 0xa49   : > { %v4562_v46 = vld [vmem:[%s12292_s5 + $0x858] sm:$0xff]  ;;  %v8664_v56 = vcombine.high %v4546_v40, %v4550_v45  ;;  %v8663_v1 = vcombine.low %v4546_v40, %v4550_v45 }
 0xa4a   : > { %v4566_v25 = vld [vmem:[%s12292_s5 + $0x878] sm:$0xff] }
 0xa4b   : > { %7908 = vmatpush1.bf16.msra.mxu1 %v8495_v60  ;;  %7945 = vmatpush1.bf16.msra.mxu0 %v8607_v61  ;;  %v8680_v60 = vcombine.high %v4562_v46, %v4566_v25  ;;  %v4574_v61 = vld [vmem:[%s12292_s5 + $0x8b8] sm:$0xff]  ;;  %v8679_v3 = vcombine.low %v4562_v46, %v4566_v25 }
 0xa4c   : > { %7909 = vmatprep.subr.bf16.mxu1 %v8504_v62  ;;  %7946 = vmatprep.subr.bf16.mxu0 %v8616_v63  ;;  %v4682_v62 = vld [vmem:[%s12292_s5 + $0xc18] sm:$0xff]  ;;  %v8688_v9 = vcombine.high %v4570_v58, %v4574_v61 }
 0xa4d   : > { %v4686_v63 = vld [vmem:[%s12292_s5 + $0xc38] sm:$0xff] }
 0xa4e   : > { %v8800_v6 = vcombine.high %v4682_v62, %v4686_v63  ;;  %v4590_v21 = vld [vmem:[%s12292_s5 + $0x938] sm:$0xff] }
 0xa4f   : > { %7910 = vmatpush1.bf16.msra.mxu1 %v8503_v26  ;;  %7947 = vmatpush1.bf16.msra.mxu0 %v8615_v11  ;;  %v4578_v26 = vld [vmem:[%s12292_s5 + $0x8d8] sm:$0xff]  ;;  %v8704_v28 = vcombine.high %v4586_v15, %v4590_v21 }
 0xa50   : > { %7911 = vmatprep.subr.bf16.mxu1 %v8512_v12  ;;  %7948 = vmatprep.subr.bf16.mxu0 %v8624_v14  ;;  %v4582_v11 = vld [vmem:[%s12292_s5 + $0x8f8] sm:$0xff]  ;;  %v8687_v12 = vcombine.low %v4570_v58, %v4574_v61  ;;  %v8799_v14 = vcombine.low %v4682_v62, %v4686_v63  ;;  %v4258_v58 = vrot.slane %v11686_v24, %v1286_v54 }
 0xa51   : > { %v8696_v37 = vcombine.high %v4578_v26, %v4582_v11  ;;  %v4594_v31 = vld [vmem:[%s12292_s5 + $0x958] sm:$0xff] }
 0xa52   : > { %v4598_v33 = vld [vmem:[%s12292_s5 + $0x978] sm:$0xff] }
 0xa53   : > { %7912 = vmatpush1.bf16.msra.mxu1 %v8511_v42  ;;  %7949 = vmatpush1.bf16.msra.mxu0 %v8623_v22  ;;  %v4698_v42 = vld [vmem:[%s12292_s5 + $0xc98] sm:$0xff] }
 0xa54   : > { %7913 = vmatprep.subr.bf16.mxu1 %v8520_v49  ;;  %7950 = vmatprep.subr.bf16.mxu0 %v8632_v27  ;;  %v4702_v22 = vld [vmem:[%s12292_s5 + $0xcb8] sm:$0xff]  ;;  %v8695_v49 = vcombine.low %v4578_v26, %v4582_v11 }
 0xa55   : > { %v8816_v30 = vcombine.high %v4698_v42, %v4702_v22  ;;  %v4602_v18 = vld [vmem:[%s12292_s5 + $0x998] sm:$0xff] }
 0xa56   : > { %v4606_v19 = vld [vmem:[%s12292_s5 + $0x9b8] sm:$0xff] }
 0xa57   : > { %7914 = vmatpush1.bf16.msra.mxu1 %v8519_v34  ;;  %7951 = vmatpush1.bf16.msra.mxu0 %v8631_v57  ;;  %v8703_v34 = vcombine.low %v4586_v15, %v4590_v21  ;;  %v8815_v57 = vcombine.low %v4698_v42, %v4702_v22  ;;  %v4714_v20 = vld [vmem:[%s12292_s5 + $0xd18] sm:$0xff]  ;;  %v8719_v45 = vcombine.low %v4602_v18, %v4606_v19 }
 0xa58   : > { %7915 = vmatprep.subr.bf16.mxu1 %v8528_v35  ;;  %7952 = vmatprep.subr.bf16.mxu0 %v8640_v17  ;;  %v8712_v35 = vcombine.high %v4594_v31, %v4598_v33  ;;  %v4718_v23 = vld [vmem:[%s12292_s5 + $0xd38] sm:$0xff] }
 0xa59   : > { %v4610_v29 = vld [vmem:[%s12292_s5 + $0x9d8] sm:$0xff]  ;;  %v8831_v46 = vcombine.low %v4714_v20, %v4718_v23 }
 0xa5a   : > { %v4614_v36 = vld [vmem:[%s12292_s5 + $0x9f8] sm:$0xff] }
 0xa5b   : > { %7916 = vmatpush1.bf16.msra.mxu1 %v8527_v2  ;;  %7953 = vmatpush1.bf16.msra.mxu0 %v8639_v8  ;;  %v8711_v2 = vcombine.low %v4594_v31, %v4598_v33  ;;  %v4722_v38 = vld [vmem:[%s12292_s5 + $0xd58] sm:$0xff]  ;;  %v8727_v63 = vcombine.low %v4610_v29, %v4614_v36 }
 0xa5c   : > { %7917 = vmatprep.subr.bf16.mxu1 %v8536_v59  ;;  %7954 = vmatprep.subr.bf16.mxu0 %v8648_v13  ;;  %v8720_v59 = vcombine.high %v4602_v18, %v4606_v19  ;;  %v8832_v13 = vcombine.high %v4714_v20, %v4718_v23  ;;  %v4730_v61 = vld [vmem:[%s12292_s5 + $0xd98] sm:$0xff] }
 0xa5d   : > { %v4236_v62 = vld [vmem:[%s12287_s0 + $0x18] sm:$0xff] }
 0xa5e   : > { %v4286_v26 = vadd.f32 %v4258_v58, %v4236_v62  ;;  %v4630_v11 = vld [vmem:[%s12292_s5 + $0xa78] sm:$0xff] }
 0xa5f   : > { %7918 = vmatpush1.bf16.msra.mxu1 %v8535_v48  ;;  %7955 = vmatpush1.bf16.msra.mxu0 %v8647_v39  ;;  %v4726_v48 = vld [vmem:[%s12292_s5 + $0xd78] sm:$0xff] }
 0xa60   : > { %7956 = vmatprep.subr.bf16.mxu0 %v8656_v41  ;;  %7969 = vmatprep.subr.bf16.mxu1 %v8672_v44  ;;  %v8839_v54 = vcombine.low %v4722_v38, %v4726_v48  ;;  %v4638_v31 = vld [vmem:[%s12292_s5 + $0xab8] sm:$0xff] }
 0xa61   : > { %v4746_v33 = vld [vmem:[%s12292_s5 + $0xe18] sm:$0xff] }
 0xa62   : > { %7920 = vmatmul.mubr.bf16.vlgmr.msra.gmra.mrb[40].mxu1 %v10809_v5  ;;  %v4690_v5 = vld [vmem:[%s12292_s5 + $0xc58] sm:$0xff] }
 0xa63   : > { %7957 = vmatpush1.bf16.msra.mxu0 %v8655_v50  ;;  %7970 = vmatpush1.bf16.msra.mxu1 %v8671_v47  ;;  %v4235_v50 = vld [vmem:[%s12287_s0 + $0x10] sm:$0xff]  ;;  %v4254_v47 = vrot.slane %v11686_v24, %v1282_v53  ;;  %v4734_v53 = vld [vmem:[%s12292_s5 + $0xdb8] sm:$0xff] }
 0xa64   : > { %8001 = vmatprep.mubr.bf16.mxu1 %v10865_v43  ;;  %7958 = vmatprep.subr.bf16.mxu0 %v8664_v56  ;;  %v4694_v43 = vld [vmem:[%s12292_s5 + $0xc78] sm:$0xff]  ;;  %v8840_v56 = vcombine.high %v4722_v38, %v4726_v48  ;;  %v8847_v21 = vcombine.low %v4730_v61, %v4734_v53 }
 0xa65   : > { %7971 = vmatprep.subr.bf16.mxu1 %v8680_v60  ;;  %v8808_v16 = vcombine.high %v4690_v5, %v4694_v43  ;;  %v8807_v27 = vcombine.low %v4690_v5, %v4694_v43  ;;  %v4622_v60 = vld [vmem:[%s12292_s5 + $0xa38] sm:$0xff]  ;;  %v4285_v24 = vadd.f32 %v4254_v47, %v4235_v50 }
 0xa66   : > { %v4738_v5 = vld [vmem:[%s12292_s5 + $0xdd8] sm:$0xff] }
 0xa67   : > { %7959 = vmatpush1.bf16.msra.mxu0 %v8663_v1  ;;  %7972 = vmatpush1.bf16.msra.mxu1 %v8679_v3  ;;  %v8848_v3 = vcombine.high %v4730_v61, %v4734_v53  ;;  %v4742_v43 = vld [vmem:[%s12292_s5 + $0xdf8] sm:$0xff] }
 0xa68   : > { %7973 = vmatprep.subr.bf16.mxu1 %v8688_v9  ;;  %8010 = vmatprep.subr.bf16.mxu0 %v8800_v6  ;;  %v4626_v9 = vld [vmem:[%s12292_s5 + $0xa58] sm:$0xff] }
 0xa69   : > { %v4646_v18 = vld [vmem:[%s12292_s5 + $0xaf8] sm:$0xff] }
 0xa6a   : > { %7961 = vmatmul.mubr.bf16.vlgmr.msra.gmra.mrb[40].mxu0 %v10833_v55  ;;  %v4706_v55 = vld [vmem:[%s12292_s5 + $0xcd8] sm:$0xff] }
 0xa6b   : > { %7974 = vmatpush1.bf16.msra.mxu1 %v8687_v12  ;;  %8011 = vmatpush1.bf16.msra.mxu0 %v8799_v14  ;;  %v4754_v19 = vld [vmem:[%s12292_s5 + $0xe58] sm:$0xff] }
 0xa6c   : > { %8042 = vmatprep.mubr.bf16.mxu0 %v10896_v10  ;;  %7975 = vmatprep.subr.bf16.mxu1 %v8696_v37  ;;  %v4710_v10 = vld [vmem:[%s12292_s5 + $0xcf8] sm:$0xff] }
 0xa6d   : > { %8012 = vmatprep.subr.bf16.mxu0 %v8808_v16  ;;  %v8824_v17 = vcombine.high %v4706_v55, %v4710_v10  ;;  %v8823_v8 = vcombine.low %v4706_v55, %v4710_v10  ;;  %v4750_v55 = vld [vmem:[%s12292_s5 + $0xe38] sm:$0xff]  ;;  %v8743_v10 = vcombine.low %v4626_v9, %v4630_v11 }
 0xa6e   : > { %v4758_v20 = vld [vmem:[%s12292_s5 + $0xe78] sm:$0xff] }
 0xa6f   : > { %7976 = vmatpush1.bf16.msra.mxu1 %v8695_v49  ;;  %8013 = vmatpush1.bf16.msra.mxu0 %v8807_v27  ;;  %v8744_v49 = vcombine.high %v4626_v9, %v4630_v11  ;;  %v8856_v27 = vcombine.high %v4738_v5, %v4742_v43  ;;  %v8871_v48 = vcombine.low %v4754_v19, %v4758_v20  ;;  %v4778_v58 = vld [vmem:[%s12292_s5 + $0xf18] sm:$0xff] }
 0xa70   : > { %7977 = vmatprep.subr.bf16.mxu1 %v8704_v28  ;;  %8014 = vmatprep.subr.bf16.mxu0 %v8816_v30  ;;  %v4634_v28 = vld [vmem:[%s12292_s5 + $0xa98] sm:$0xff] }
 0xa71   : > { %v8751_v23 = vcombine.low %v4634_v28, %v4638_v31 }
 0xa73   : > { %7978 = vmatpush1.bf16.msra.mxu1 %v8703_v34  ;;  %8015 = vmatpush1.bf16.msra.mxu0 %v8815_v57  ;;  %v8855_v34 = vcombine.low %v4738_v5, %v4742_v43  ;;  %v8752_v57 = vcombine.high %v4634_v28, %v4638_v31  ;;  %v4794_v5 = vld [vmem:[%s12292_s5 + $0xf98] sm:$0xff] }
 0xa74   : > { %7979 = vmatprep.subr.bf16.mxu1 %v8712_v35  ;;  %8016 = vmatprep.subr.bf16.mxu0 %v8824_v17  ;;  %v8864_v35 = vcombine.high %v4746_v33, %v4750_v55  ;;  %v4642_v17 = vld [vmem:[%s12292_s5 + $0xad8] sm:$0xff] }
 0xa75   : > { %v7675_v52 = vpop.f32.mrb[28].mxu1  ;;  %v8759_v38 = vcombine.low %v4642_v17, %v4646_v18  ;;  %v4798_v43 = vld [vmem:[%s12292_s5 + $0xfb8] sm:$0xff] }
 0xa76   : > { %v7676_v39 = vadd.f32 %v7675_v52, %v11940_v4  ;;  %v7677_v41 = vpop.f32.mrb[29].mxu1  ;;  %v8728_v4 = vcombine.high %v4610_v29, %v4614_v36  ;;  %v4654_v29 = vld [vmem:[%s12292_s5 + $0xb38] sm:$0xff] }
 0xa77   : > { %v7678_v44 = vadd.f32 %v7677_v41, %v11942_v7  ;;  %v7679_v40 = vpop.f32.mrb[30].mxu1  ;;  %7980 = vmatpush1.bf16.msra.mxu1 %v8711_v2  ;;  %8017 = vmatpush1.bf16.msra.mxu0 %v8823_v8  ;;  %v4618_v7 = vld [vmem:[%s12292_s5 + $0xa18] sm:$0xff]  ;;  %v8863_v2 = vcombine.low %v4746_v33, %v4750_v55  ;;  %v8760_v8 = vcombine.high %v4642_v17, %v4646_v18 }
 0xa78   : > { %v7680_v25 = vpop.f32.mrb[31].mxu1  ;;  %7981 = vmatprep.subr.bf16.mxu1 %v8720_v59  ;;  %8018 = vmatprep.subr.bf16.mxu0 %v8832_v13  ;;  %v8736_v1 = vcombine.high %v4618_v7, %v4622_v60  ;;  %v8735_v16 = vcombine.low %v4618_v7, %v4622_v60  ;;  %v8872_v59 = vcombine.high %v4754_v19, %v4758_v20  ;;  %v4650_v13 = vld [vmem:[%s12292_s5 + $0xb18] sm:$0xff] }
 0xa79   : > { %v4762_v52 = vld [vmem:[%s12292_s5 + $0xe98] sm:$0xff]  ;;  %v8767_v25 = vcombine.low %v4650_v13, %v4654_v29 }
 0xa7a   : > { %v4766_v36 = vld [vmem:[%s12292_s5 + $0xeb8] sm:$0xff] }
 0xa7b   : > { %7982 = vmatpush1.bf16.msra.mxu1 %v8719_v45  ;;  %8019 = vmatpush1.bf16.msra.mxu0 %v8831_v46  ;;  %v8880_v41 = vcombine.high %v4762_v52, %v4766_v36  ;;  %v4662_v40 = vld [vmem:[%s12292_s5 + $0xb78] sm:$0xff]  ;;  %v8879_v50 = vcombine.low %v4762_v52, %v4766_v36 }
 0xa7c   : > { %7983 = vmatprep.subr.bf16.mxu1 %v8728_v4  ;;  %8020 = vmatprep.subr.bf16.mxu0 %v8840_v56  ;;  %v4770_v45 = vld [vmem:[%s12292_s5 + $0xed8] sm:$0xff] }
 0xa7d   : > { %v7716_v6 = vpop.f32.mrb[28].mxu0  ;;  %v4774_v46 = vld [vmem:[%s12292_s5 + $0xef8] sm:$0xff] }
 0xa7e   : > { %v7717_v12 = vadd.f32 %v7716_v6, %v7676_v39  ;;  %v7718_v14 = vpop.f32.mrb[29].mxu0  ;;  %v8768_v39 = vcombine.high %v4650_v13, %v4654_v29  ;;  %v8888_v4 = vcombine.high %v4770_v45, %v4774_v46  ;;  %v4666_v56 = vld [vmem:[%s12292_s5 + $0xb98] sm:$0xff]  ;;  %v8887_v53 = vcombine.low %v4770_v45, %v4774_v46  ;;  %v4238_v29 = vld [vmem:[%s12287_s0 + $0x28] sm:$0xff] }
 0xa7f   : > { %v7719_v37 = vadd.f32 %v7718_v14, %v7678_v44  ;;  %v7720_v15 = vpop.f32.mrb[30].mxu0  ;;  %7984 = vmatpush1.bf16.msra.mxu1 %v8727_v63  ;;  %8021 = vmatpush1.bf16.msra.mxu0 %v8839_v54  ;;  %v4658_v44 = vld [vmem:[%s12292_s5 + $0xb58] sm:$0xff] }
 0xa80   : > { %v8053_v42 = vadd.f32 %v7717_v12, %v4285_v24  ;;  %v7721_v22 = vpop.f32.mrb[31].mxu0  ;;  %7985 = vmatprep.subr.bf16.mxu1 %v8736_v1  ;;  %8022 = vmatprep.subr.bf16.mxu0 %v8848_v3  ;;  %v8776_v47 = vcombine.high %v4658_v44, %v4662_v40  ;;  %v4670_v7 = vld [vmem:[%s12292_s5 + $0xbb8] sm:$0xff]  ;;  %v8775_v61 = vcombine.low %v4658_v44, %v4662_v40 }
 0xa81   : > { %v8054_v30 = vadd.f32 %v7719_v37, %v4286_v26  ;;  %v4782_v60 = vld [vmem:[%s12292_s5 + $0xf38] sm:$0xff]  ;;  %v8784_v62 = vcombine.high %v4666_v56, %v4670_v7  ;;  %v8783_v9 = vcombine.low %v4666_v56, %v4670_v7  ;;  %v8912_v37 = vcombine.high %v4794_v5, %v4798_v43 }
 0xa82   : > { %8061 = vst [vmem:[%s12294_s7 + $0x10] sm:$0xff] %v8053_v42  ;;  %v8896_v63 = vcombine.high %v4778_v58, %v4782_v60  ;;  %v4674_v54 = vld [vmem:[%s12292_s5 + $0xbd8] sm:$0xff]  ;;  %v8895_v6 = vcombine.low %v4778_v58, %v4782_v60 }
 0xa83   : > { %8062 = vst [vmem:[%s12294_s7 + $0x18] sm:$0xff] %v8054_v30  ;;  %7986 = vmatpush1.bf16.msra.mxu1 %v8735_v16  ;;  %8023 = vmatpush1.bf16.msra.mxu0 %v8847_v21  ;;  %v4678_v24 = vld [vmem:[%s12292_s5 + $0xbf8] sm:$0xff]  ;;  %v8911_v21 = vcombine.low %v4794_v5, %v4798_v43 }
 0xa84   : > { %7987 = vmatprep.subr.bf16.mxu1 %v8744_v49  ;;  %8024 = vmatprep.subr.bf16.mxu0 %v8856_v27  ;;  %v4786_v1 = vld [vmem:[%s12292_s5 + $0xf58] sm:$0xff]  ;;  %v8792_v26 = vcombine.high %v4674_v54, %v4678_v24  ;;  %v8791_v12 = vcombine.low %v4674_v54, %v4678_v24  ;;  %v4273_v54 = vsub.s32 7, %v10466_v51 }
 0xa85   : > { %v4790_v3 = vld [vmem:[%s12292_s5 + $0xf78] sm:$0xff] }
 0xa86   : > { %v8904_v11 = vcombine.high %v4786_v1, %v4790_v3  ;;  %v8903_v14 = vcombine.low %v4786_v1, %v4790_v3  ;;  %v4802_v15 = vld [vmem:[%s12292_s5 + $0xfd8] sm:$0xff] }
 0xa87   : > { %7988 = vmatpush1.bf16.msra.mxu1 %v8743_v10  ;;  %8025 = vmatpush1.bf16.msra.mxu0 %v8855_v34  ;;  %v4806_v16 = vld [vmem:[%s12292_s5 + $0xff8] sm:$0xff] }
 0xa88   : > { %7989 = vmatprep.subr.bf16.mxu1 %v8752_v57  ;;  %8026 = vmatprep.subr.bf16.mxu0 %v8864_v35  ;;  %v8920_v42 = vcombine.high %v4802_v15, %v4806_v16  ;;  %v8919_v22 = vcombine.low %v4802_v15, %v4806_v16  ;;  %v4261_v35 = vsub.s32 4, %v10466_v51  ;;  %v4240_v43 = vld [vmem:[%s12287_s0 + $0x38] sm:$0xff] }
 0xa8b   : > { %7990 = vmatpush1.bf16.msra.mxu1 %v8751_v23  ;;  %8027 = vmatpush1.bf16.msra.mxu0 %v8863_v2  ;;  %v9529_v2 = vld [vmem:[%s12293_s6] sm:$0xff] }
 0xa8c   : > { %7991 = vmatprep.subr.bf16.mxu1 %v8760_v8  ;;  %8028 = vmatprep.subr.bf16.mxu0 %v8872_v59  ;;  %v4262_v8 = vrot.slane %v9529_v2, %v4261_v35  ;;  %v4237_v59 = vld [vmem:[%s12287_s0 + $0x20] sm:$0xff]  ;;  %v4274_v5 = vrot.slane %v9529_v2, %v4273_v54 }
 0xa8e   : > { %v4287_v52 = vadd.f32 %v4262_v8, %v4237_v59 }
 0xa8f   : > { %7992 = vmatpush1.bf16.msra.mxu1 %v8759_v38  ;;  %8029 = vmatpush1.bf16.msra.mxu0 %v8871_v48 }
 0xa90   : > { %7993 = vmatprep.subr.bf16.mxu1 %v8768_v39  ;;  %8030 = vmatprep.subr.bf16.mxu0 %v8880_v41 }
 0xa93   : > { %7994 = vmatpush1.bf16.msra.mxu1 %v8767_v25  ;;  %8031 = vmatpush1.bf16.msra.mxu0 %v8879_v50 }
 0xa94   : > { %7995 = vmatprep.subr.bf16.mxu1 %v8776_v47  ;;  %8032 = vmatprep.subr.bf16.mxu0 %v8888_v4 }
 0xa97   : > { %7996 = vmatpush1.bf16.msra.mxu1 %v8775_v61  ;;  %8033 = vmatpush1.bf16.msra.mxu0 %v8887_v53 }
 0xa98   : > { %7997 = vmatprep.subr.bf16.mxu1 %v8784_v62  ;;  %8034 = vmatprep.subr.bf16.mxu0 %v8896_v63  ;;  %v4269_v62 = vsub.s32 6, %v10466_v51 }
 0xa9b   : > { %7998 = vmatpush1.bf16.msra.mxu1 %v8783_v9  ;;  %8035 = vmatpush1.bf16.msra.mxu0 %v8895_v6 }
 0xa9c   : > { %7999 = vmatprep.subr.bf16.mxu1 %v8792_v26  ;;  %8036 = vmatprep.subr.bf16.mxu0 %v8904_v11  ;;  %v4270_v26 = vrot.slane %v9529_v2, %v4269_v62  ;;  %v4239_v11 = vld [vmem:[%s12287_s0 + $0x30] sm:$0xff] }
 0xa9f   : > { %8000 = vmatpush1.bf16.msra.mxu1 %v8791_v12  ;;  %8037 = vmatpush1.bf16.msra.mxu0 %v8903_v14  ;;  %v4289_v12 = vadd.f32 %v4270_v26, %v4239_v11 }
 0xaa0   : > { %8038 = vmatprep.subr.bf16.mxu0 %v8912_v37  ;;  %v4290_v37 = vadd.f32 %v4274_v5, %v4240_v43 }
 0xaa2   : > { %8002 = vmatmul.mubr.bf16.vlgmr.msra.gmra.mrb[44].mxu1 %v11021_v32  ;;  %v4265_v32 = vsub.s32 5, %v10466_v51 }
 0xaa3   : > { %8039 = vmatpush1.bf16.msra.mxu0 %v8911_v21 }
 0xaa4   : > { %8040 = vmatprep.subr.bf16.mxu0 %v8920_v42  ;;  %v4266_v13 = vrot.slane %v9529_v2, %v4265_v32 }
 0xaa6   : > { %v4288_v38 = vadd.f32 %v4266_v13, %v4238_v29 }
 0xaa7   : > { %8041 = vmatpush1.bf16.msra.mxu0 %v8919_v22 }
 0xaaa   : > { %8043 = vmatmul.mubr.bf16.vlgmr.msra.gmra.mrb[44].mxu0 %v11051_v0 }
 0xab5   : > { %v7757_v49 = vpop.f32.mrb[32].mxu1 }
 0xab6   : > { %v7759_v27 = vpop.f32.mrb[33].mxu1 }
 0xab7   : > { %v7761_v28 = vpop.f32.mrb[34].mxu1 }
 0xab8   : > { %v7762_v30 = vpop.f32.mrb[35].mxu1 }
 0xabd   : > { %v7798_v31 = vpop.f32.mrb[32].mxu0 }
 0xabe   : > { %v7799_v33 = vadd.f32 %v7798_v31, %v7757_v49  ;;  %v7800_v55 = vpop.f32.mrb[33].mxu0 }
 0xabf   : > { %v7801_v10 = vadd.f32 %v7800_v55, %v7759_v27  ;;  %v7802_v34 = vpop.f32.mrb[34].mxu0 }
 0xac0   : > { %v7803_v57 = vpop.f32.mrb[35].mxu0 }
 0xaf5   : > { %v7839_v17 = vpop.f32.mrb[36].mxu1 }
 0xaf6   : > { %v7840_v18 = vadd.f32 %v7839_v17, %v7799_v33  ;;  %v7841_v19 = vpop.f32.mrb[37].mxu1 }
 0xaf7   : > { %v7842_v20 = vadd.f32 %v7841_v19, %v7801_v10  ;;  %v7843_v23 = vpop.f32.mrb[38].mxu1 }
 0xaf8   : > { %v7844_v0 = vpop.f32.mrb[39].mxu1 }
 0xafd   : > { %v7880_v36 = vpop.f32.mrb[36].mxu0 }
 0xafe   : > { %v7881_v48 = vadd.f32 %v7880_v36, %v7840_v18  ;;  %v7882_v39 = vpop.f32.mrb[37].mxu0 }
 0xaff   : > { %v7883_v41 = vadd.f32 %v7882_v39, %v7842_v20  ;;  %v7884_v44 = vpop.f32.mrb[38].mxu0 }
 0xb00   : > { %v8055_v40 = vadd.f32 %v7881_v48, %v4287_v52  ;;  %v7885_v45 = vpop.f32.mrb[39].mxu0 }
 0xb01   : > { %v8056_v46 = vadd.f32 %v7883_v41, %v4288_v38 }
 0xb02   : > { %8063 = vst [vmem:[%s12294_s7 + $0x20] sm:$0xff] %v8055_v40 }
 0xb03   : > { %8064 = vst [vmem:[%s12294_s7 + $0x28] sm:$0xff] %v8056_v46 }
 0xb35   : > { %v7921_v25 = vpop.f32.mrb[40].mxu1 }
 0xb36   : > { %v7923_v50 = vpop.f32.mrb[41].mxu1 }
 0xb37   : > { %v7925_v47 = vpop.f32.mrb[42].mxu1 }
 0xb38   : > { %v7926_v4 = vpop.f32.mrb[43].mxu1 }
 0xb3d   : > { %v7962_v56 = vpop.f32.mrb[40].mxu0 }
 0xb3e   : > { %v7963_v7 = vadd.f32 %v7962_v56, %v7921_v25  ;;  %v7964_v58 = vpop.f32.mrb[41].mxu0 }
 0xb3f   : > { %v7965_v60 = vadd.f32 %v7964_v58, %v7923_v50  ;;  %v7966_v61 = vpop.f32.mrb[42].mxu0 }
 0xb40   : > { %v7967_v53 = vpop.f32.mrb[43].mxu0 }
 0xb75   : > { %v8003_v63 = vpop.f32.mrb[44].mxu1 }
 0xb76   : > { %v8004_v24 = vadd.f32 %v8003_v63, %v7963_v7  ;;  %v8005_v1 = vpop.f32.mrb[45].mxu1 }
 0xb77   : > { %v8006_v3 = vadd.f32 %v8005_v1, %v7965_v60  ;;  %v8007_v9 = vpop.f32.mrb[46].mxu1 }
 0xb78   : > { %v8008_v6 = vpop.f32.mrb[47].mxu1 }
 0xb7d   : > { %v8044_v14 = vpop.f32.mrb[44].mxu0 }
 0xb7e   : > { %v8045_v15 = vadd.f32 %v8044_v14, %v8004_v24  ;;  %v8046_v51 = vpop.f32.mrb[45].mxu0 }
 0xb7f   : > { %v8047_v16 = vadd.f32 %v8046_v51, %v8006_v3  ;;  %v8048_v21 = vpop.f32.mrb[46].mxu0 }
 0xb80   : > { %v8057_v42 = vadd.f32 %v8045_v15, %v4289_v12  ;;  %v8049_v22 = vpop.f32.mrb[47].mxu0 }
 0xb81   : > { %v8058_v49 = vadd.f32 %v8047_v16, %v4290_v37 }
 0xb82   : > { %8065 = vst [vmem:[%s12294_s7 + $0x30] sm:$0xff] %v8057_v42 }
 0xb83   : > { %8066 = vst [vmem:[%s12294_s7 + $0x38] sm:$0xff] %v8058_v49 }
 0xb84 PF: > { %p14_p11 = scmp.ge.s32.totalorder %s9616_s28, 8   ;;  %s12295_s24 = smov %s9548_s25 }
 0xb85   : > { %s12296_s25 = smov %s9625_s8  ;;  %s12297_s26 = smov %s9616_s28 }
 0xb86   :  { %16 = sbr.rel (!%p14_p11) target bundleno = 2 (0x2), region = 114 }

// kernel: _lambda_.5
= control target key start
LH: loop header
LB: loop body
LE: loop exit
PB: predicated region body
PF: predicated region fallthrough
CT: control target
= control target key end

     0   :  { %s6095_s24 = smov 0   ;;  %s6097_s25 = smov 0   ;;  %s7390_s0 = inlined_call_operand.vmem [shape: f32[8,1024], index: 0, kind: input, shape index: {}]   ;;  %s7391_s1 = inlined_call_operand.vmem [shape: f32[1,1024], index: 1, kind: input, shape index: {}]   ;;  %s7392_s2 = inlined_call_operand.vmem [shape: f32[1,1024], index: 2, kind: input, shape index: {}, may-alias: {2,6}]   ;;  %s7393_s3 = inlined_call_operand.vmem [shape: bf16[1024,4096], index: 3, kind: input, shape index: {}]   ;;  %s7394_s4 = inlined_call_operand.vmem [shape: f32[1,4096], index: 4, kind: input, shape index: {}]   ;;  %s7395_s5 = inlined_call_operand.vmem [shape: bf16[4096,1024], index: 5, kind: input, shape index: {}]   ;;  %s7396_s6 = inlined_call_operand.vmem [shape: f32[1,1024], index: 6, kind: input, shape index: {}, may-alias: {2,6}]   ;;  %s7397_s7 = inlined_call_operand.vmem [shape: f32[8,1024], index: 7, kind: output, shape index: {}]  }
   0x1   :  { %s6099_s26 = smov 0  }
   0x2 LB: > { %s6111_s27 = sadd.s32 4294967295, %s6052_s26   ;;  %s6114_s28 = sadd.s32 1, %s6052_s26   ;;  %s6052_s26 = sphi %s6099_s26, %s7400_s26   ;;  %s6048_s25 = sphi %s6097_s25, %s7399_s25   ;;  %s6044_s24 = sphi %s6095_s24, %s7398_s24  }
   0x3   : > { %s84_s29 = ssub.s32 %s6052_s26, %s6114_s28  ;;  %s87_s30 = sadd.s32 1, %s6048_s25 }
   0x4   : > { %p85_p0 = scmp.eq.s32.totalorder %s84_s29, 0  ;;  %p94_p1 = scmp.ne.s32.totalorder %s6048_s25, %s6044_s24 }
   0x5   : > { %p95_p2 = scmp.eq.s32.totalorder %s6052_s26, 0  ;;  %p5031_p4 = scmp.ge.s32.totalorder %s6052_s26, 8 }
   0x6   : > { %s6123_s8 = scalar_select %p85_p0, %s6048_s25, %s87_s30  }
   0x7   : > { %p96_p3 = por %p95_p2, %p94_p1  ;;  %226 = sbr.rel (%p5031_p4) target bundleno = 146 (0x92), region = 32 }
   0xe   : > { %229 = sbr.rel (!%p96_p3) target bundleno = 146 (0x92), region = 36  ;;  %s231_s9 = sand.u32 (%p96_p3), 1, %s6048_s25  }
   0xf   : > { %s5569_s10 = sshll.u32 (%p96_p3), %s6052_s26, 4  ;;  %s5032_s11 = sshll.u32 (%p96_p3), %s231_s9, 11 }
  0x10   : > { %s6131_s14 = scalar_lea.vmem (%p96_p3), %s7393_s3, %s5569_s10  ;;  %s6136_s15 = scalar_lea.vmem (%p96_p3), [#allocation4], %s5032_s11 }
  0x11   : > { %v249_v0 = vld [vmem:[%s6131_s14] sm:$0xff] (%p96_p3)  ;;  %v251_v1 = vld [vmem:[%s6131_s14 + $0x8] sm:$0xff] (%p96_p3) }
  0x12   : > { %v253_v2 = vld [vmem:[%s6131_s14 + $0x80] sm:$0xff] (%p96_p3)  ;;  %250 = vst [vmem:[%s6136_s15] sm:$0xff] (%p96_p3), %v249_v0  ;;  %252 = vst [vmem:[%s6136_s15 + $0x8] sm:$0xff] (%p96_p3), %v251_v1  ;;  %v255_v3 = vld [vmem:[%s6131_s14 + $0x88] sm:$0xff] (%p96_p3) }
  0x13   : > { %254 = vst [vmem:[%s6136_s15 + $0x10] sm:$0xff] (%p96_p3), %v253_v2  ;;  %v257_v4 = vld [vmem:[%s6131_s14 + $0x100] sm:$0xff] (%p96_p3)  ;;  %v259_v5 = vld [vmem:[%s6131_s14 + $0x108] sm:$0xff] (%p96_p3)  ;;  %256 = vst [vmem:[%s6136_s15 + $0x18] sm:$0xff] (%p96_p3), %v255_v3 }
  0x14   : > { %258 = vst [vmem:[%s6136_s15 + $0x20] sm:$0xff] (%p96_p3), %v257_v4  ;;  %260 = vst [vmem:[%s6136_s15 + $0x28] sm:$0xff] (%p96_p3), %v259_v5  ;;  %v261_v6 = vld [vmem:[%s6131_s14 + $0x180] sm:$0xff] (%p96_p3)  ;;  %v263_v7 = vld [vmem:[%s6131_s14 + $0x188] sm:$0xff] (%p96_p3) }
  0x15   : > { %v265_v8 = vld [vmem:[%s6131_s14 + $0x200] sm:$0xff]  ;;  %262 = vst [vmem:[%s6136_s15 + $0x30] sm:$0xff] %v261_v6  ;;  %264 = vst [vmem:[%s6136_s15 + $0x38] sm:$0xff] %v263_v7  ;;  %v267_v9 = vld [vmem:[%s6131_s14 + $0x208] sm:$0xff] }
  0x16   : > { %266 = vst [vmem:[%s6136_s15 + $0x40] sm:$0xff] %v265_v8  ;;  %v269_v10 = vld [vmem:[%s6131_s14 + $0x280] sm:$0xff]  ;;  %v271_v11 = vld [vmem:[%s6131_s14 + $0x288] sm:$0xff]  ;;  %268 = vst [vmem:[%s6136_s15 + $0x48] sm:$0xff] %v267_v9 }
  0x17   : > { %270 = vst [vmem:[%s6136_s15 + $0x50] sm:$0xff] %v269_v10  ;;  %272 = vst [vmem:[%s6136_s15 + $0x58] sm:$0xff] %v271_v11  ;;  %v273_v12 = vld [vmem:[%s6131_s14 + $0x300] sm:$0xff]  ;;  %v275_v13 = vld [vmem:[%s6131_s14 + $0x308] sm:$0xff] }
  0x18   : > { %v277_v14 = vld [vmem:[%s6131_s14 + $0x380] sm:$0xff]  ;;  %274 = vst [vmem:[%s6136_s15 + $0x60] sm:$0xff] %v273_v12  ;;  %276 = vst [vmem:[%s6136_s15 + $0x68] sm:$0xff] %v275_v13  ;;  %v279_v15 = vld [vmem:[%s6131_s14 + $0x388] sm:$0xff] }
  0x19   : > { %278 = vst [vmem:[%s6136_s15 + $0x70] sm:$0xff] %v277_v14  ;;  %v281_v16 = vld [vmem:[%s6131_s14 + $0x400] sm:$0xff]  ;;  %v283_v17 = vld [vmem:[%s6131_s14 + $0x408] sm:$0xff]  ;;  %280 = vst [vmem:[%s6136_s15 + $0x78] sm:$0xff] %v279_v15 }
  0x1a   : > { %282 = vst [vmem:[%s6136_s15 + $0x80] sm:$0xff] %v281_v16  ;;  %284 = vst [vmem:[%s6136_s15 + $0x88] sm:$0xff] %v283_v17  ;;  %v285_v18 = vld [vmem:[%s6131_s14 + $0x480] sm:$0xff]  ;;  %v287_v19 = vld [vmem:[%s6131_s14 + $0x488] sm:$0xff] }
  0x1b   : > { %v289_v20 = vld [vmem:[%s6131_s14 + $0x500] sm:$0xff]  ;;  %286 = vst [vmem:[%s6136_s15 + $0x90] sm:$0xff] %v285_v18  ;;  %288 = vst [vmem:[%s6136_s15 + $0x98] sm:$0xff] %v287_v19  ;;  %v291_v21 = vld [vmem:[%s6131_s14 + $0x508] sm:$0xff] }
  0x1c   : > { %290 = vst [vmem:[%s6136_s15 + $0xa0] sm:$0xff] %v289_v20  ;;  %v293_v22 = vld [vmem:[%s6131_s14 + $0x580] sm:$0xff]  ;;  %v295_v23 = vld [vmem:[%s6131_s14 + $0x588] sm:$0xff]  ;;  %292 = vst [vmem:[%s6136_s15 + $0xa8] sm:$0xff] %v291_v21 }
  0x1d   : > { %294 = vst [vmem:[%s6136_s15 + $0xb0] sm:$0xff] %v293_v22  ;;  %296 = vst [vmem:[%s6136_s15 + $0xb8] sm:$0xff] %v295_v23  ;;  %v297_v24 = vld [vmem:[%s6131_s14 + $0x600] sm:$0xff]  ;;  %v299_v25 = vld [vmem:[%s6131_s14 + $0x608] sm:$0xff] }
  0x1e   : > { %v301_v26 = vld [vmem:[%s6131_s14 + $0x680] sm:$0xff]  ;;  %298 = vst [vmem:[%s6136_s15 + $0xc0] sm:$0xff] %v297_v24  ;;  %300 = vst [vmem:[%s6136_s15 + $0xc8] sm:$0xff] %v299_v25  ;;  %v303_v27 = vld [vmem:[%s6131_s14 + $0x688] sm:$0xff] }
  0x1f   : > { %302 = vst [vmem:[%s6136_s15 + $0xd0] sm:$0xff] %v301_v26  ;;  %v305_v28 = vld [vmem:[%s6131_s14 + $0x700] sm:$0xff]  ;;  %v307_v29 = vld [vmem:[%s6131_s14 + $0x708] sm:$0xff]  ;;  %304 = vst [vmem:[%s6136_s15 + $0xd8] sm:$0xff] %v303_v27 }
  0x20   : > { %306 = vst [vmem:[%s6136_s15 + $0xe0] sm:$0xff] %v305_v28  ;;  %308 = vst [vmem:[%s6136_s15 + $0xe8] sm:$0xff] %v307_v29  ;;  %v309_v30 = vld [vmem:[%s6131_s14 + $0x780] sm:$0xff]  ;;  %v311_v31 = vld [vmem:[%s6131_s14 + $0x788] sm:$0xff] }
  0x21   : > { %v313_v32 = vld [vmem:[%s6131_s14 + $0x800] sm:$0xff]  ;;  %310 = vst [vmem:[%s6136_s15 + $0xf0] sm:$0xff] %v309_v30  ;;  %312 = vst [vmem:[%s6136_s15 + $0xf8] sm:$0xff] %v311_v31  ;;  %v315_v33 = vld [vmem:[%s6131_s14 + $0x808] sm:$0xff] }
  0x22   : > { %314 = vst [vmem:[%s6136_s15 + $0x100] sm:$0xff] %v313_v32  ;;  %v317_v34 = vld [vmem:[%s6131_s14 + $0x880] sm:$0xff]  ;;  %v319_v35 = vld [vmem:[%s6131_s14 + $0x888] sm:$0xff]  ;;  %316 = vst [vmem:[%s6136_s15 + $0x108] sm:$0xff] %v315_v33 }
  0x23   : > { %318 = vst [vmem:[%s6136_s15 + $0x110] sm:$0xff] %v317_v34  ;;  %320 = vst [vmem:[%s6136_s15 + $0x118] sm:$0xff] %v319_v35  ;;  %v321_v36 = vld [vmem:[%s6131_s14 + $0x900] sm:$0xff]  ;;  %v323_v37 = vld [vmem:[%s6131_s14 + $0x908] sm:$0xff] }
  0x24   : > { %v325_v38 = vld [vmem:[%s6131_s14 + $0x980] sm:$0xff]  ;;  %322 = vst [vmem:[%s6136_s15 + $0x120] sm:$0xff] %v321_v36  ;;  %324 = vst [vmem:[%s6136_s15 + $0x128] sm:$0xff] %v323_v37  ;;  %v327_v39 = vld [vmem:[%s6131_s14 + $0x988] sm:$0xff] }
  0x25   : > { %326 = vst [vmem:[%s6136_s15 + $0x130] sm:$0xff] %v325_v38  ;;  %v329_v40 = vld [vmem:[%s6131_s14 + $0xa00] sm:$0xff]  ;;  %v331_v41 = vld [vmem:[%s6131_s14 + $0xa08] sm:$0xff]  ;;  %328 = vst [vmem:[%s6136_s15 + $0x138] sm:$0xff] %v327_v39 }
  0x26   : > { %330 = vst [vmem:[%s6136_s15 + $0x140] sm:$0xff] %v329_v40  ;;  %332 = vst [vmem:[%s6136_s15 + $0x148] sm:$0xff] %v331_v41  ;;  %v333_v42 = vld [vmem:[%s6131_s14 + $0xa80] sm:$0xff]  ;;  %v335_v43 = vld [vmem:[%s6131_s14 + $0xa88] sm:$0xff] }
  0x27   : > { %v337_v44 = vld [vmem:[%s6131_s14 + $0xb00] sm:$0xff]  ;;  %334 = vst [vmem:[%s6136_s15 + $0x150] sm:$0xff] %v333_v42  ;;  %336 = vst [vmem:[%s6136_s15 + $0x158] sm:$0xff] %v335_v43  ;;  %v339_v45 = vld [vmem:[%s6131_s14 + $0xb08] sm:$0xff] }
  0x28   : > { %338 = vst [vmem:[%s6136_s15 + $0x160] sm:$0xff] %v337_v44  ;;  %v341_v46 = vld [vmem:[%s6131_s14 + $0xb80] sm:$0xff]  ;;  %v343_v47 = vld [vmem:[%s6131_s14 + $0xb88] sm:$0xff]  ;;  %340 = vst [vmem:[%s6136_s15 + $0x168] sm:$0xff] %v339_v45 }
  0x29   : > { %342 = vst [vmem:[%s6136_s15 + $0x170] sm:$0xff] %v341_v46  ;;  %344 = vst [vmem:[%s6136_s15 + $0x178] sm:$0xff] %v343_v47  ;;  %v345_v48 = vld [vmem:[%s6131_s14 + $0xc00] sm:$0xff]  ;;  %v347_v49 = vld [vmem:[%s6131_s14 + $0xc08] sm:$0xff] }
  0x2a   : > { %v349_v50 = vld [vmem:[%s6131_s14 + $0xc80] sm:$0xff]  ;;  %346 = vst [vmem:[%s6136_s15 + $0x180] sm:$0xff] %v345_v48  ;;  %348 = vst [vmem:[%s6136_s15 + $0x188] sm:$0xff] %v347_v49  ;;  %v351_v51 = vld [vmem:[%s6131_s14 + $0xc88] sm:$0xff] }
  0x2b   : > { %350 = vst [vmem:[%s6136_s15 + $0x190] sm:$0xff] %v349_v50  ;;  %v353_v52 = vld [vmem:[%s6131_s14 + $0xd00] sm:$0xff]  ;;  %v355_v53 = vld [vmem:[%s6131_s14 + $0xd08] sm:$0xff]  ;;  %352 = vst [vmem:[%s6136_s15 + $0x198] sm:$0xff] %v351_v51 }
  0x2c   : > { %354 = vst [vmem:[%s6136_s15 + $0x1a0] sm:$0xff] %v353_v52  ;;  %356 = vst [vmem:[%s6136_s15 + $0x1a8] sm:$0xff] %v355_v53  ;;  %v357_v54 = vld [vmem:[%s6131_s14 + $0xd80] sm:$0xff]  ;;  %v359_v55 = vld [vmem:[%s6131_s14 + $0xd88] sm:$0xff] }
  0x2d   : > { %v361_v56 = vld [vmem:[%s6131_s14 + $0xe00] sm:$0xff]  ;;  %358 = vst [vmem:[%s6136_s15 + $0x1b0] sm:$0xff] %v357_v54  ;;  %360 = vst [vmem:[%s6136_s15 + $0x1b8] sm:$0xff] %v359_v55  ;;  %v363_v57 = vld [vmem:[%s6131_s14 + $0xe08] sm:$0xff] }
  0x2e   : > { %362 = vst [vmem:[%s6136_s15 + $0x1c0] sm:$0xff] %v361_v56  ;;  %v365_v58 = vld [vmem:[%s6131_s14 + $0xe80] sm:$0xff]  ;;  %v367_v59 = vld [vmem:[%s6131_s14 + $0xe88] sm:$0xff]  ;;  %364 = vst [vmem:[%s6136_s15 + $0x1c8] sm:$0xff] %v363_v57 }
  0x2f   : > { %366 = vst [vmem:[%s6136_s15 + $0x1d0] sm:$0xff] %v365_v58  ;;  %368 = vst [vmem:[%s6136_s15 + $0x1d8] sm:$0xff] %v367_v59  ;;  %v369_v60 = vld [vmem:[%s6131_s14 + $0xf00] sm:$0xff]  ;;  %v371_v61 = vld [vmem:[%s6131_s14 + $0xf08] sm:$0xff] }
  0x30   : > { %v373_v62 = vld [vmem:[%s6131_s14 + $0xf80] sm:$0xff]  ;;  %370 = vst [vmem:[%s6136_s15 + $0x1e0] sm:$0xff] %v369_v60  ;;  %372 = vst [vmem:[%s6136_s15 + $0x1e8] sm:$0xff] %v371_v61  ;;  %v375_v63 = vld [vmem:[%s6131_s14 + $0xf88] sm:$0xff] }
  0x31   : > { %374 = vst [vmem:[%s6136_s15 + $0x1f0] sm:$0xff] %v373_v62  ;;  %v377_v0 = vld [vmem:[%s6131_s14 + $0x1000] sm:$0xff]  ;;  %v379_v1 = vld [vmem:[%s6131_s14 + $0x1008] sm:$0xff]  ;;  %376 = vst [vmem:[%s6136_s15 + $0x1f8] sm:$0xff] %v375_v63 }
  0x32   : > { %378 = vst [vmem:[%s6136_s15 + $0x200] sm:$0xff] %v377_v0  ;;  %380 = vst [vmem:[%s6136_s15 + $0x208] sm:$0xff] %v379_v1  ;;  %v381_v2 = vld [vmem:[%s6131_s14 + $0x1080] sm:$0xff]  ;;  %v383_v3 = vld [vmem:[%s6131_s14 + $0x1088] sm:$0xff] }
  0x33   : > { %v385_v4 = vld [vmem:[%s6131_s14 + $0x1100] sm:$0xff]  ;;  %382 = vst [vmem:[%s6136_s15 + $0x210] sm:$0xff] %v381_v2  ;;  %384 = vst [vmem:[%s6136_s15 + $0x218] sm:$0xff] %v383_v3  ;;  %v387_v5 = vld [vmem:[%s6131_s14 + $0x1108] sm:$0xff] }
  0x34   : > { %386 = vst [vmem:[%s6136_s15 + $0x220] sm:$0xff] %v385_v4  ;;  %v389_v6 = vld [vmem:[%s6131_s14 + $0x1180] sm:$0xff]  ;;  %v391_v7 = vld [vmem:[%s6131_s14 + $0x1188] sm:$0xff]  ;;  %388 = vst [vmem:[%s6136_s15 + $0x228] sm:$0xff] %v387_v5 }
  0x35   : > { %390 = vst [vmem:[%s6136_s15 + $0x230] sm:$0xff] %v389_v6  ;;  %392 = vst [vmem:[%s6136_s15 + $0x238] sm:$0xff] %v391_v7  ;;  %v393_v8 = vld [vmem:[%s6131_s14 + $0x1200] sm:$0xff]  ;;  %v395_v9 = vld [vmem:[%s6131_s14 + $0x1208] sm:$0xff] }
  0x36   : > { %v397_v10 = vld [vmem:[%s6131_s14 + $0x1280] sm:$0xff]  ;;  %394 = vst [vmem:[%s6136_s15 + $0x240] sm:$0xff] %v393_v8  ;;  %396 = vst [vmem:[%s6136_s15 + $0x248] sm:$0xff] %v395_v9  ;;  %v399_v11 = vld [vmem:[%s6131_s14 + $0x1288] sm:$0xff] }
  0x37   : > { %398 = vst [vmem:[%s6136_s15 + $0x250] sm:$0xff] %v397_v10  ;;  %v401_v12 = vld [vmem:[%s6131_s14 + $0x1300] sm:$0xff]  ;;  %v403_v13 = vld [vmem:[%s6131_s14 + $0x1308] sm:$0xff]  ;;  %400 = vst [vmem:[%s6136_s15 + $0x258] sm:$0xff] %v399_v11 }
  0x38   : > { %402 = vst [vmem:[%s6136_s15 + $0x260] sm:$0xff] %v401_v12  ;;  %404 = vst [vmem:[%s6136_s15 + $0x268] sm:$0xff] %v403_v13  ;;  %v405_v14 = vld [vmem:[%s6131_s14 + $0x1380] sm:$0xff]  ;;  %v407_v15 = vld [vmem:[%s6131_s14 + $0x1388] sm:$0xff] }
  0x39   : > { %v409_v16 = vld [vmem:[%s6131_s14 + $0x1400] sm:$0xff]  ;;  %406 = vst [vmem:[%s6136_s15 + $0x270] sm:$0xff] %v405_v14  ;;  %408 = vst [vmem:[%s6136_s15 + $0x278] sm:$0xff] %v407_v15  ;;  %v411_v17 = vld [vmem:[%s6131_s14 + $0x1408] sm:$0xff] }
  0x3a   : > { %410 = vst [vmem:[%s6136_s15 + $0x280] sm:$0xff] %v409_v16  ;;  %v413_v18 = vld [vmem:[%s6131_s14 + $0x1480] sm:$0xff]  ;;  %v415_v19 = vld [vmem:[%s6131_s14 + $0x1488] sm:$0xff]  ;;  %412 = vst [vmem:[%s6136_s15 + $0x288] sm:$0xff] %v411_v17 }
  0x3b   : > { %414 = vst [vmem:[%s6136_s15 + $0x290] sm:$0xff] %v413_v18  ;;  %416 = vst [vmem:[%s6136_s15 + $0x298] sm:$0xff] %v415_v19  ;;  %v417_v20 = vld [vmem:[%s6131_s14 + $0x1500] sm:$0xff]  ;;  %v419_v21 = vld [vmem:[%s6131_s14 + $0x1508] sm:$0xff] }
  0x3c   : > { %v421_v22 = vld [vmem:[%s6131_s14 + $0x1580] sm:$0xff]  ;;  %418 = vst [vmem:[%s6136_s15 + $0x2a0] sm:$0xff] %v417_v20  ;;  %420 = vst [vmem:[%s6136_s15 + $0x2a8] sm:$0xff] %v419_v21  ;;  %v423_v23 = vld [vmem:[%s6131_s14 + $0x1588] sm:$0xff] }
  0x3d   : > { %422 = vst [vmem:[%s6136_s15 + $0x2b0] sm:$0xff] %v421_v22  ;;  %v425_v24 = vld [vmem:[%s6131_s14 + $0x1600] sm:$0xff]  ;;  %v427_v25 = vld [vmem:[%s6131_s14 + $0x1608] sm:$0xff]  ;;  %424 = vst [vmem:[%s6136_s15 + $0x2b8] sm:$0xff] %v423_v23 }
  0x3e   : > { %426 = vst [vmem:[%s6136_s15 + $0x2c0] sm:$0xff] %v425_v24  ;;  %428 = vst [vmem:[%s6136_s15 + $0x2c8] sm:$0xff] %v427_v25  ;;  %v429_v26 = vld [vmem:[%s6131_s14 + $0x1680] sm:$0xff]  ;;  %v431_v27 = vld [vmem:[%s6131_s14 + $0x1688] sm:$0xff] }
  0x3f   : > { %v433_v28 = vld [vmem:[%s6131_s14 + $0x1700] sm:$0xff]  ;;  %430 = vst [vmem:[%s6136_s15 + $0x2d0] sm:$0xff] %v429_v26  ;;  %432 = vst [vmem:[%s6136_s15 + $0x2d8] sm:$0xff] %v431_v27  ;;  %v435_v29 = vld [vmem:[%s6131_s14 + $0x1708] sm:$0xff] }
  0x40   : > { %434 = vst [vmem:[%s6136_s15 + $0x2e0] sm:$0xff] %v433_v28  ;;  %v437_v30 = vld [vmem:[%s6131_s14 + $0x1780] sm:$0xff]  ;;  %v439_v31 = vld [vmem:[%s6131_s14 + $0x1788] sm:$0xff]  ;;  %436 = vst [vmem:[%s6136_s15 + $0x2e8] sm:$0xff] %v435_v29 }
  0x41   : > { %438 = vst [vmem:[%s6136_s15 + $0x2f0] sm:$0xff] %v437_v30  ;;  %440 = vst [vmem:[%s6136_s15 + $0x2f8] sm:$0xff] %v439_v31  ;;  %v441_v32 = vld [vmem:[%s6131_s14 + $0x1800] sm:$0xff]  ;;  %v443_v33 = vld [vmem:[%s6131_s14 + $0x1808] sm:$0xff] }
  0x42   : > { %v445_v34 = vld [vmem:[%s6131_s14 + $0x1880] sm:$0xff]  ;;  %442 = vst [vmem:[%s6136_s15 + $0x300] sm:$0xff] %v441_v32  ;;  %444 = vst [vmem:[%s6136_s15 + $0x308] sm:$0xff] %v443_v33  ;;  %v447_v35 = vld [vmem:[%s6131_s14 + $0x1888] sm:$0xff] }
  0x43   : > { %446 = vst [vmem:[%s6136_s15 + $0x310] sm:$0xff] %v445_v34  ;;  %v449_v36 = vld [vmem:[%s6131_s14 + $0x1900] sm:$0xff]  ;;  %v451_v37 = vld [vmem:[%s6131_s14 + $0x1908] sm:$0xff]  ;;  %448 = vst [vmem:[%s6136_s15 + $0x318] sm:$0xff] %v447_v35 }
  0x44   : > { %450 = vst [vmem:[%s6136_s15 + $0x320] sm:$0xff] %v449_v36  ;;  %452 = vst [vmem:[%s6136_s15 + $0x328] sm:$0xff] %v451_v37  ;;  %v453_v38 = vld [vmem:[%s6131_s14 + $0x1980] sm:$0xff]  ;;  %v455_v39 = vld [vmem:[%s6131_s14 + $0x1988] sm:$0xff] }
  0x45   : > { %v457_v40 = vld [vmem:[%s6131_s14 + $0x1a00] sm:$0xff]  ;;  %454 = vst [vmem:[%s6136_s15 + $0x330] sm:$0xff] %v453_v38  ;;  %456 = vst [vmem:[%s6136_s15 + $0x338] sm:$0xff] %v455_v39  ;;  %v459_v41 = vld [vmem:[%s6131_s14 + $0x1a08] sm:$0xff] }
  0x46   : > { %458 = vst [vmem:[%s6136_s15 + $0x340] sm:$0xff] %v457_v40  ;;  %v461_v42 = vld [vmem:[%s6131_s14 + $0x1a80] sm:$0xff]  ;;  %v463_v43 = vld [vmem:[%s6131_s14 + $0x1a88] sm:$0xff]  ;;  %460 = vst [vmem:[%s6136_s15 + $0x348] sm:$0xff] %v459_v41 }
  0x47   : > { %462 = vst [vmem:[%s6136_s15 + $0x350] sm:$0xff] %v461_v42  ;;  %464 = vst [vmem:[%s6136_s15 + $0x358] sm:$0xff] %v463_v43  ;;  %v465_v44 = vld [vmem:[%s6131_s14 + $0x1b00] sm:$0xff]  ;;  %v467_v45 = vld [vmem:[%s6131_s14 + $0x1b08] sm:$0xff] }
  0x48   : > { %v469_v46 = vld [vmem:[%s6131_s14 + $0x1b80] sm:$0xff]  ;;  %466 = vst [vmem:[%s6136_s15 + $0x360] sm:$0xff] %v465_v44  ;;  %468 = vst [vmem:[%s6136_s15 + $0x368] sm:$0xff] %v467_v45  ;;  %v471_v47 = vld [vmem:[%s6131_s14 + $0x1b88] sm:$0xff] }
  0x49   : > { %470 = vst [vmem:[%s6136_s15 + $0x370] sm:$0xff] %v469_v46  ;;  %v473_v48 = vld [vmem:[%s6131_s14 + $0x1c00] sm:$0xff]  ;;  %v475_v49 = vld [vmem:[%s6131_s14 + $0x1c08] sm:$0xff]  ;;  %472 = vst [vmem:[%s6136_s15 + $0x378] sm:$0xff] %v471_v47 }
  0x4a   : > { %474 = vst [vmem:[%s6136_s15 + $0x380] sm:$0xff] %v473_v48  ;;  %476 = vst [vmem:[%s6136_s15 + $0x388] sm:$0xff] %v475_v49  ;;  %v477_v50 = vld [vmem:[%s6131_s14 + $0x1c80] sm:$0xff]  ;;  %v479_v51 = vld [vmem:[%s6131_s14 + $0x1c88] sm:$0xff] }
  0x4b   : > { %v481_v52 = vld [vmem:[%s6131_s14 + $0x1d00] sm:$0xff]  ;;  %478 = vst [vmem:[%s6136_s15 + $0x390] sm:$0xff] %v477_v50  ;;  %480 = vst [vmem:[%s6136_s15 + $0x398] sm:$0xff] %v479_v51  ;;  %v483_v53 = vld [vmem:[%s6131_s14 + $0x1d08] sm:$0xff] }
  0x4c   : > { %482 = vst [vmem:[%s6136_s15 + $0x3a0] sm:$0xff] %v481_v52  ;;  %v485_v54 = vld [vmem:[%s6131_s14 + $0x1d80] sm:$0xff]  ;;  %v487_v55 = vld [vmem:[%s6131_s14 + $0x1d88] sm:$0xff]  ;;  %484 = vst [vmem:[%s6136_s15 + $0x3a8] sm:$0xff] %v483_v53 }
  0x4d   : > { %486 = vst [vmem:[%s6136_s15 + $0x3b0] sm:$0xff] %v485_v54  ;;  %488 = vst [vmem:[%s6136_s15 + $0x3b8] sm:$0xff] %v487_v55  ;;  %v489_v56 = vld [vmem:[%s6131_s14 + $0x1e00] sm:$0xff]  ;;  %v491_v57 = vld [vmem:[%s6131_s14 + $0x1e08] sm:$0xff] }
  0x4e   : > { %v493_v58 = vld [vmem:[%s6131_s14 + $0x1e80] sm:$0xff]  ;;  %490 = vst [vmem:[%s6136_s15 + $0x3c0] sm:$0xff] %v489_v56  ;;  %492 = vst [vmem:[%s6136_s15 + $0x3c8] sm:$0xff] %v491_v57  ;;  %v495_v59 = vld [vmem:[%s6131_s14 + $0x1e88] sm:$0xff] }
  0x4f   : > { %494 = vst [vmem:[%s6136_s15 + $0x3d0] sm:$0xff] %v493_v58  ;;  %v497_v60 = vld [vmem:[%s6131_s14 + $0x1f00] sm:$0xff]  ;;  %v499_v61 = vld [vmem:[%s6131_s14 + $0x1f08] sm:$0xff]  ;;  %496 = vst [vmem:[%s6136_s15 + $0x3d8] sm:$0xff] %v495_v59 }
  0x50   : > { %498 = vst [vmem:[%s6136_s15 + $0x3e0] sm:$0xff] %v497_v60  ;;  %500 = vst [vmem:[%s6136_s15 + $0x3e8] sm:$0xff] %v499_v61  ;;  %v501_v62 = vld [vmem:[%s6131_s14 + $0x1f80] sm:$0xff]  ;;  %v503_v63 = vld [vmem:[%s6131_s14 + $0x1f88] sm:$0xff] }
  0x51   : > { %v505_v0 = vld [vmem:[%s6131_s14 + $0x2000] sm:$0xff]  ;;  %502 = vst [vmem:[%s6136_s15 + $0x3f0] sm:$0xff] %v501_v62  ;;  %504 = vst [vmem:[%s6136_s15 + $0x3f8] sm:$0xff] %v503_v63  ;;  %v507_v1 = vld [vmem:[%s6131_s14 + $0x2008] sm:$0xff] }
  0x52   : > { %506 = vst [vmem:[%s6136_s15 + $0x400] sm:$0xff] %v505_v0  ;;  %v509_v2 = vld [vmem:[%s6131_s14 + $0x2080] sm:$0xff]  ;;  %v511_v3 = vld [vmem:[%s6131_s14 + $0x2088] sm:$0xff]  ;;  %508 = vst [vmem:[%s6136_s15 + $0x408] sm:$0xff] %v507_v1 }
  0x53   : > { %510 = vst [vmem:[%s6136_s15 + $0x410] sm:$0xff] %v509_v2  ;;  %512 = vst [vmem:[%s6136_s15 + $0x418] sm:$0xff] %v511_v3  ;;  %v513_v4 = vld [vmem:[%s6131_s14 + $0x2100] sm:$0xff]  ;;  %v515_v5 = vld [vmem:[%s6131_s14 + $0x2108] sm:$0xff] }
  0x54   : > { %v517_v6 = vld [vmem:[%s6131_s14 + $0x2180] sm:$0xff]  ;;  %514 = vst [vmem:[%s6136_s15 + $0x420] sm:$0xff] %v513_v4  ;;  %516 = vst [vmem:[%s6136_s15 + $0x428] sm:$0xff] %v515_v5  ;;  %v519_v7 = vld [vmem:[%s6131_s14 + $0x2188] sm:$0xff] }
  0x55   : > { %518 = vst [vmem:[%s6136_s15 + $0x430] sm:$0xff] %v517_v6  ;;  %v521_v8 = vld [vmem:[%s6131_s14 + $0x2200] sm:$0xff]  ;;  %v523_v9 = vld [vmem:[%s6131_s14 + $0x2208] sm:$0xff]  ;;  %520 = vst [vmem:[%s6136_s15 + $0x438] sm:$0xff] %v519_v7 }
  0x56   : > { %522 = vst [vmem:[%s6136_s15 + $0x440] sm:$0xff] %v521_v8  ;;  %524 = vst [vmem:[%s6136_s15 + $0x448] sm:$0xff] %v523_v9  ;;  %v525_v10 = vld [vmem:[%s6131_s14 + $0x2280] sm:$0xff]  ;;  %v527_v11 = vld [vmem:[%s6131_s14 + $0x2288] sm:$0xff] }
  0x57   : > { %v529_v12 = vld [vmem:[%s6131_s14 + $0x2300] sm:$0xff]  ;;  %526 = vst [vmem:[%s6136_s15 + $0x450] sm:$0xff] %v525_v10  ;;  %528 = vst [vmem:[%s6136_s15 + $0x458] sm:$0xff] %v527_v11  ;;  %v531_v13 = vld [vmem:[%s6131_s14 + $0x2308] sm:$0xff] }
  0x58   : > { %530 = vst [vmem:[%s6136_s15 + $0x460] sm:$0xff] %v529_v12  ;;  %v533_v14 = vld [vmem:[%s6131_s14 + $0x2380] sm:$0xff]  ;;  %v535_v15 = vld [vmem:[%s6131_s14 + $0x2388] sm:$0xff]  ;;  %532 = vst [vmem:[%s6136_s15 + $0x468] sm:$0xff] %v531_v13 }
  0x59   : > { %534 = vst [vmem:[%s6136_s15 + $0x470] sm:$0xff] %v533_v14  ;;  %536 = vst [vmem:[%s6136_s15 + $0x478] sm:$0xff] %v535_v15  ;;  %v537_v16 = vld [vmem:[%s6131_s14 + $0x2400] sm:$0xff]  ;;  %v539_v17 = vld [vmem:[%s6131_s14 + $0x2408] sm:$0xff] }
  0x5a   : > { %v541_v18 = vld [vmem:[%s6131_s14 + $0x2480] sm:$0xff]  ;;  %538 = vst [vmem:[%s6136_s15 + $0x480] sm:$0xff] %v537_v16  ;;  %540 = vst [vmem:[%s6136_s15 + $0x488] sm:$0xff] %v539_v17  ;;  %v543_v19 = vld [vmem:[%s6131_s14 + $0x2488] sm:$0xff] }
  0x5b   : > { %542 = vst [vmem:[%s6136_s15 + $0x490] sm:$0xff] %v541_v18  ;;  %v545_v20 = vld [vmem:[%s6131_s14 + $0x2500] sm:$0xff]  ;;  %v547_v21 = vld [vmem:[%s6131_s14 + $0x2508] sm:$0xff]  ;;  %544 = vst [vmem:[%s6136_s15 + $0x498] sm:$0xff] %v543_v19 }
  0x5c   : > { %546 = vst [vmem:[%s6136_s15 + $0x4a0] sm:$0xff] %v545_v20  ;;  %548 = vst [vmem:[%s6136_s15 + $0x4a8] sm:$0xff] %v547_v21  ;;  %v549_v22 = vld [vmem:[%s6131_s14 + $0x2580] sm:$0xff]  ;;  %v551_v23 = vld [vmem:[%s6131_s14 + $0x2588] sm:$0xff] }
  0x5d   : > { %v553_v24 = vld [vmem:[%s6131_s14 + $0x2600] sm:$0xff]  ;;  %550 = vst [vmem:[%s6136_s15 + $0x4b0] sm:$0xff] %v549_v22  ;;  %552 = vst [vmem:[%s6136_s15 + $0x4b8] sm:$0xff] %v551_v23  ;;  %v555_v25 = vld [vmem:[%s6131_s14 + $0x2608] sm:$0xff] }
  0x5e   : > { %554 = vst [vmem:[%s6136_s15 + $0x4c0] sm:$0xff] %v553_v24  ;;  %v557_v26 = vld [vmem:[%s6131_s14 + $0x2680] sm:$0xff]  ;;  %v559_v27 = vld [vmem:[%s6131_s14 + $0x2688] sm:$0xff]  ;;  %556 = vst [vmem:[%s6136_s15 + $0x4c8] sm:$0xff] %v555_v25 }
  0x5f   : > { %558 = vst [vmem:[%s6136_s15 + $0x4d0] sm:$0xff] %v557_v26  ;;  %560 = vst [vmem:[%s6136_s15 + $0x4d8] sm:$0xff] %v559_v27  ;;  %v561_v28 = vld [vmem:[%s6131_s14 + $0x2700] sm:$0xff]  ;;  %v563_v29 = vld [vmem:[%s6131_s14 + $0x2708] sm:$0xff] }
  0x60   : > { %v565_v30 = vld [vmem:[%s6131_s14 + $0x2780] sm:$0xff]  ;;  %562 = vst [vmem:[%s6136_s15 + $0x4e0] sm:$0xff] %v561_v28  ;;  %564 = vst [vmem:[%s6136_s15 + $0x4e8] sm:$0xff] %v563_v29  ;;  %v567_v31 = vld [vmem:[%s6131_s14 + $0x2788] sm:$0xff] }
  0x61   : > { %566 = vst [vmem:[%s6136_s15 + $0x4f0] sm:$0xff] %v565_v30  ;;  %v569_v32 = vld [vmem:[%s6131_s14 + $0x2800] sm:$0xff]  ;;  %v571_v33 = vld [vmem:[%s6131_s14 + $0x2808] sm:$0xff]  ;;  %568 = vst [vmem:[%s6136_s15 + $0x4f8] sm:$0xff] %v567_v31 }
  0x62   : > { %570 = vst [vmem:[%s6136_s15 + $0x500] sm:$0xff] %v569_v32  ;;  %572 = vst [vmem:[%s6136_s15 + $0x508] sm:$0xff] %v571_v33  ;;  %v573_v34 = vld [vmem:[%s6131_s14 + $0x2880] sm:$0xff]  ;;  %v575_v35 = vld [vmem:[%s6131_s14 + $0x2888] sm:$0xff] }
  0x63   : > { %v577_v36 = vld [vmem:[%s6131_s14 + $0x2900] sm:$0xff]  ;;  %574 = vst [vmem:[%s6136_s15 + $0x510] sm:$0xff] %v573_v34  ;;  %576 = vst [vmem:[%s6136_s15 + $0x518] sm:$0xff] %v575_v35  ;;  %v579_v37 = vld [vmem:[%s6131_s14 + $0x2908] sm:$0xff] }
  0x64   : > { %578 = vst [vmem:[%s6136_s15 + $0x520] sm:$0xff] %v577_v36  ;;  %v581_v38 = vld [vmem:[%s6131_s14 + $0x2980] sm:$0xff]  ;;  %v583_v39 = vld [vmem:[%s6131_s14 + $0x2988] sm:$0xff]  ;;  %580 = vst [vmem:[%s6136_s15 + $0x528] sm:$0xff] %v579_v37 }
  0x65   : > { %582 = vst [vmem:[%s6136_s15 + $0x530] sm:$0xff] %v581_v38  ;;  %584 = vst [vmem:[%s6136_s15 + $0x538] sm:$0xff] %v583_v39  ;;  %v585_v40 = vld [vmem:[%s6131_s14 + $0x2a00] sm:$0xff]  ;;  %v587_v41 = vld [vmem:[%s6131_s14 + $0x2a08] sm:$0xff] }
  0x66   : > { %v589_v42 = vld [vmem:[%s6131_s14 + $0x2a80] sm:$0xff]  ;;  %586 = vst [vmem:[%s6136_s15 + $0x540] sm:$0xff] %v585_v40  ;;  %588 = vst [vmem:[%s6136_s15 + $0x548] sm:$0xff] %v587_v41  ;;  %v591_v43 = vld [vmem:[%s6131_s14 + $0x2a88] sm:$0xff] }
  0x67   : > { %590 = vst [vmem:[%s6136_s15 + $0x550] sm:$0xff] %v589_v42  ;;  %v593_v44 = vld [vmem:[%s6131_s14 + $0x2b00] sm:$0xff]  ;;  %v595_v45 = vld [vmem:[%s6131_s14 + $0x2b08] sm:$0xff]  ;;  %592 = vst [vmem:[%s6136_s15 + $0x558] sm:$0xff] %v591_v43 }
  0x68   : > { %594 = vst [vmem:[%s6136_s15 + $0x560] sm:$0xff] %v593_v44  ;;  %596 = vst [vmem:[%s6136_s15 + $0x568] sm:$0xff] %v595_v45  ;;  %v597_v46 = vld [vmem:[%s6131_s14 + $0x2b80] sm:$0xff]  ;;  %v599_v47 = vld [vmem:[%s6131_s14 + $0x2b88] sm:$0xff] }
  0x69   : > { %v601_v48 = vld [vmem:[%s6131_s14 + $0x2c00] sm:$0xff]  ;;  %598 = vst [vmem:[%s6136_s15 + $0x570] sm:$0xff] %v597_v46  ;;  %600 = vst [vmem:[%s6136_s15 + $0x578] sm:$0xff] %v599_v47  ;;  %v603_v49 = vld [vmem:[%s6131_s14 + $0x2c08] sm:$0xff] }
  0x6a   : > { %602 = vst [vmem:[%s6136_s15 + $0x580] sm:$0xff] %v601_v48  ;;  %v605_v50 = vld [vmem:[%s6131_s14 + $0x2c80] sm:$0xff]  ;;  %v607_v51 = vld [vmem:[%s6131_s14 + $0x2c88] sm:$0xff]  ;;  %604 = vst [vmem:[%s6136_s15 + $0x588] sm:$0xff] %v603_v49 }
  0x6b   : > { %606 = vst [vmem:[%s6136_s15 + $0x590] sm:$0xff] %v605_v50  ;;  %608 = vst [vmem:[%s6136_s15 + $0x598] sm:$0xff] %v607_v51  ;;  %v609_v52 = vld [vmem:[%s6131_s14 + $0x2d00] sm:$0xff]  ;;  %v611_v53 = vld [vmem:[%s6131_s14 + $0x2d08] sm:$0xff] }
  0x6c   : > { %v613_v54 = vld [vmem:[%s6131_s14 + $0x2d80] sm:$0xff]  ;;  %610 = vst [vmem:[%s6136_s15 + $0x5a0] sm:$0xff] %v609_v52  ;;  %612 = vst [vmem:[%s6136_s15 + $0x5a8] sm:$0xff] %v611_v53  ;;  %v615_v55 = vld [vmem:[%s6131_s14 + $0x2d88] sm:$0xff] }
  0x6d   : > { %614 = vst [vmem:[%s6136_s15 + $0x5b0] sm:$0xff] %v613_v54  ;;  %v617_v56 = vld [vmem:[%s6131_s14 + $0x2e00] sm:$0xff]  ;;  %v619_v57 = vld [vmem:[%s6131_s14 + $0x2e08] sm:$0xff]  ;;  %616 = vst [vmem:[%s6136_s15 + $0x5b8] sm:$0xff] %v615_v55 }
  0x6e   : > { %618 = vst [vmem:[%s6136_s15 + $0x5c0] sm:$0xff] %v617_v56  ;;  %620 = vst [vmem:[%s6136_s15 + $0x5c8] sm:$0xff] %v619_v57  ;;  %v621_v58 = vld [vmem:[%s6131_s14 + $0x2e80] sm:$0xff]  ;;  %v623_v59 = vld [vmem:[%s6131_s14 + $0x2e88] sm:$0xff] }
  0x6f   : > { %v625_v60 = vld [vmem:[%s6131_s14 + $0x2f00] sm:$0xff]  ;;  %622 = vst [vmem:[%s6136_s15 + $0x5d0] sm:$0xff] %v621_v58  ;;  %624 = vst [vmem:[%s6136_s15 + $0x5d8] sm:$0xff] %v623_v59  ;;  %v627_v61 = vld [vmem:[%s6131_s14 + $0x2f08] sm:$0xff] }
  0x70   : > { %626 = vst [vmem:[%s6136_s15 + $0x5e0] sm:$0xff] %v625_v60  ;;  %v629_v62 = vld [vmem:[%s6131_s14 + $0x2f80] sm:$0xff]  ;;  %v631_v63 = vld [vmem:[%s6131_s14 + $0x2f88] sm:$0xff]  ;;  %628 = vst [vmem:[%s6136_s15 + $0x5e8] sm:$0xff] %v627_v61 }
  0x71   : > { %630 = vst [vmem:[%s6136_s15 + $0x5f0] sm:$0xff] %v629_v62  ;;  %632 = vst [vmem:[%s6136_s15 + $0x5f8] sm:$0xff] %v631_v63  ;;  %v633_v0 = vld [vmem:[%s6131_s14 + $0x3000] sm:$0xff]  ;;  %v635_v1 = vld [vmem:[%s6131_s14 + $0x3008] sm:$0xff] }
  0x72   : > { %v637_v2 = vld [vmem:[%s6131_s14 + $0x3080] sm:$0xff]  ;;  %634 = vst [vmem:[%s6136_s15 + $0x600] sm:$0xff] %v633_v0  ;;  %636 = vst [vmem:[%s6136_s15 + $0x608] sm:$0xff] %v635_v1  ;;  %v639_v3 = vld [vmem:[%s6131_s14 + $0x3088] sm:$0xff] }
  0x73   : > { %638 = vst [vmem:[%s6136_s15 + $0x610] sm:$0xff] %v637_v2  ;;  %v641_v4 = vld [vmem:[%s6131_s14 + $0x3100] sm:$0xff]  ;;  %v643_v5 = vld [vmem:[%s6131_s14 + $0x3108] sm:$0xff]  ;;  %640 = vst [vmem:[%s6136_s15 + $0x618] sm:$0xff] %v639_v3 }
  0x74   : > { %642 = vst [vmem:[%s6136_s15 + $0x620] sm:$0xff] %v641_v4  ;;  %644 = vst [vmem:[%s6136_s15 + $0x628] sm:$0xff] %v643_v5  ;;  %v645_v6 = vld [vmem:[%s6131_s14 + $0x3180] sm:$0xff]  ;;  %v647_v7 = vld [vmem:[%s6131_s14 + $0x3188] sm:$0xff] }
  0x75   : > { %v649_v8 = vld [vmem:[%s6131_s14 + $0x3200] sm:$0xff]  ;;  %646 = vst [vmem:[%s6136_s15 + $0x630] sm:$0xff] %v645_v6  ;;  %648 = vst [vmem:[%s6136_s15 + $0x638] sm:$0xff] %v647_v7  ;;  %v651_v9 = vld [vmem:[%s6131_s14 + $0x3208] sm:$0xff] }
  0x76   : > { %650 = vst [vmem:[%s6136_s15 + $0x640] sm:$0xff] %v649_v8  ;;  %v653_v10 = vld [vmem:[%s6131_s14 + $0x3280] sm:$0xff]  ;;  %v655_v11 = vld [vmem:[%s6131_s14 + $0x3288] sm:$0xff]  ;;  %652 = vst [vmem:[%s6136_s15 + $0x648] sm:$0xff] %v651_v9 }
  0x77   : > { %654 = vst [vmem:[%s6136_s15 + $0x650] sm:$0xff] %v653_v10  ;;  %656 = vst [vmem:[%s6136_s15 + $0x658] sm:$0xff] %v655_v11  ;;  %v657_v12 = vld [vmem:[%s6131_s14 + $0x3300] sm:$0xff]  ;;  %v659_v13 = vld [vmem:[%s6131_s14 + $0x3308] sm:$0xff] }
  0x78   : > { %v661_v14 = vld [vmem:[%s6131_s14 + $0x3380] sm:$0xff]  ;;  %658 = vst [vmem:[%s6136_s15 + $0x660] sm:$0xff] %v657_v12  ;;  %660 = vst [vmem:[%s6136_s15 + $0x668] sm:$0xff] %v659_v13  ;;  %v663_v15 = vld [vmem:[%s6131_s14 + $0x3388] sm:$0xff] }
  0x79   : > { %662 = vst [vmem:[%s6136_s15 + $0x670] sm:$0xff] %v661_v14  ;;  %v665_v16 = vld [vmem:[%s6131_s14 + $0x3400] sm:$0xff]  ;;  %v667_v17 = vld [vmem:[%s6131_s14 + $0x3408] sm:$0xff]  ;;  %664 = vst [vmem:[%s6136_s15 + $0x678] sm:$0xff] %v663_v15 }
  0x7a   : > { %666 = vst [vmem:[%s6136_s15 + $0x680] sm:$0xff] %v665_v16  ;;  %668 = vst [vmem:[%s6136_s15 + $0x688] sm:$0xff] %v667_v17  ;;  %v669_v18 = vld [vmem:[%s6131_s14 + $0x3480] sm:$0xff]  ;;  %v671_v19 = vld [vmem:[%s6131_s14 + $0x3488] sm:$0xff] }
  0x7b   : > { %v673_v20 = vld [vmem:[%s6131_s14 + $0x3500] sm:$0xff]  ;;  %670 = vst [vmem:[%s6136_s15 + $0x690] sm:$0xff] %v669_v18  ;;  %672 = vst [vmem:[%s6136_s15 + $0x698] sm:$0xff] %v671_v19  ;;  %v675_v21 = vld [vmem:[%s6131_s14 + $0x3508] sm:$0xff] }
  0x7c   : > { %674 = vst [vmem:[%s6136_s15 + $0x6a0] sm:$0xff] %v673_v20  ;;  %v677_v22 = vld [vmem:[%s6131_s14 + $0x3580] sm:$0xff]  ;;  %v679_v23 = vld [vmem:[%s6131_s14 + $0x3588] sm:$0xff]  ;;  %676 = vst [vmem:[%s6136_s15 + $0x6a8] sm:$0xff] %v675_v21 }
  0x7d   : > { %678 = vst [vmem:[%s6136_s15 + $0x6b0] sm:$0xff] %v677_v22  ;;  %680 = vst [vmem:[%s6136_s15 + $0x6b8] sm:$0xff] %v679_v23  ;;  %v681_v24 = vld [vmem:[%s6131_s14 + $0x3600] sm:$0xff]  ;;  %v683_v25 = vld [vmem:[%s6131_s14 + $0x3608] sm:$0xff] }
  0x7e   : > { %v685_v26 = vld [vmem:[%s6131_s14 + $0x3680] sm:$0xff]  ;;  %682 = vst [vmem:[%s6136_s15 + $0x6c0] sm:$0xff] %v681_v24  ;;  %684 = vst [vmem:[%s6136_s15 + $0x6c8] sm:$0xff] %v683_v25  ;;  %v687_v27 = vld [vmem:[%s6131_s14 + $0x3688] sm:$0xff] }
  0x7f   : > { %686 = vst [vmem:[%s6136_s15 + $0x6d0] sm:$0xff] %v685_v26  ;;  %v689_v28 = vld [vmem:[%s6131_s14 + $0x3700] sm:$0xff]  ;;  %v691_v29 = vld [vmem:[%s6131_s14 + $0x3708] sm:$0xff]  ;;  %688 = vst [vmem:[%s6136_s15 + $0x6d8] sm:$0xff] %v687_v27 }
  0x80   : > { %690 = vst [vmem:[%s6136_s15 + $0x6e0] sm:$0xff] %v689_v28  ;;  %692 = vst [vmem:[%s6136_s15 + $0x6e8] sm:$0xff] %v691_v29  ;;  %v693_v30 = vld [vmem:[%s6131_s14 + $0x3780] sm:$0xff]  ;;  %v695_v31 = vld [vmem:[%s6131_s14 + $0x3788] sm:$0xff] }
  0x81   : > { %v697_v32 = vld [vmem:[%s6131_s14 + $0x3800] sm:$0xff]  ;;  %694 = vst [vmem:[%s6136_s15 + $0x6f0] sm:$0xff] %v693_v30  ;;  %696 = vst [vmem:[%s6136_s15 + $0x6f8] sm:$0xff] %v695_v31  ;;  %v699_v33 = vld [vmem:[%s6131_s14 + $0x3808] sm:$0xff] }
  0x82   : > { %698 = vst [vmem:[%s6136_s15 + $0x700] sm:$0xff] %v697_v32  ;;  %v701_v34 = vld [vmem:[%s6131_s14 + $0x3880] sm:$0xff]  ;;  %v703_v35 = vld [vmem:[%s6131_s14 + $0x3888] sm:$0xff]  ;;  %700 = vst [vmem:[%s6136_s15 + $0x708] sm:$0xff] %v699_v33 }
  0x83   : > { %702 = vst [vmem:[%s6136_s15 + $0x710] sm:$0xff] %v701_v34  ;;  %704 = vst [vmem:[%s6136_s15 + $0x718] sm:$0xff] %v703_v35  ;;  %v705_v36 = vld [vmem:[%s6131_s14 + $0x3900] sm:$0xff]  ;;  %v707_v37 = vld [vmem:[%s6131_s14 + $0x3908] sm:$0xff] }
  0x84   : > { %v709_v38 = vld [vmem:[%s6131_s14 + $0x3980] sm:$0xff]  ;;  %706 = vst [vmem:[%s6136_s15 + $0x720] sm:$0xff] %v705_v36  ;;  %708 = vst [vmem:[%s6136_s15 + $0x728] sm:$0xff] %v707_v37  ;;  %v711_v39 = vld [vmem:[%s6131_s14 + $0x3988] sm:$0xff] }
  0x85   : > { %710 = vst [vmem:[%s6136_s15 + $0x730] sm:$0xff] %v709_v38  ;;  %v713_v40 = vld [vmem:[%s6131_s14 + $0x3a00] sm:$0xff]  ;;  %v715_v41 = vld [vmem:[%s6131_s14 + $0x3a08] sm:$0xff]  ;;  %712 = vst [vmem:[%s6136_s15 + $0x738] sm:$0xff] %v711_v39 }
  0x86   : > { %714 = vst [vmem:[%s6136_s15 + $0x740] sm:$0xff] %v713_v40  ;;  %716 = vst [vmem:[%s6136_s15 + $0x748] sm:$0xff] %v715_v41  ;;  %v717_v42 = vld [vmem:[%s6131_s14 + $0x3a80] sm:$0xff]  ;;  %v719_v43 = vld [vmem:[%s6131_s14 + $0x3a88] sm:$0xff] }
  0x87   : > { %v721_v44 = vld [vmem:[%s6131_s14 + $0x3b00] sm:$0xff]  ;;  %718 = vst [vmem:[%s6136_s15 + $0x750] sm:$0xff] %v717_v42  ;;  %720 = vst [vmem:[%s6136_s15 + $0x758] sm:$0xff] %v719_v43  ;;  %v723_v45 = vld [vmem:[%s6131_s14 + $0x3b08] sm:$0xff] }
  0x88   : > { %722 = vst [vmem:[%s6136_s15 + $0x760] sm:$0xff] %v721_v44  ;;  %v725_v46 = vld [vmem:[%s6131_s14 + $0x3b80] sm:$0xff]  ;;  %v727_v47 = vld [vmem:[%s6131_s14 + $0x3b88] sm:$0xff]  ;;  %724 = vst [vmem:[%s6136_s15 + $0x768] sm:$0xff] %v723_v45 }
  0x89   : > { %726 = vst [vmem:[%s6136_s15 + $0x770] sm:$0xff] %v725_v46  ;;  %728 = vst [vmem:[%s6136_s15 + $0x778] sm:$0xff] %v727_v47  ;;  %v729_v48 = vld [vmem:[%s6131_s14 + $0x3c00] sm:$0xff]  ;;  %v731_v49 = vld [vmem:[%s6131_s14 + $0x3c08] sm:$0xff] }
  0x8a   : > { %v733_v50 = vld [vmem:[%s6131_s14 + $0x3c80] sm:$0xff]  ;;  %730 = vst [vmem:[%s6136_s15 + $0x780] sm:$0xff] %v729_v48  ;;  %732 = vst [vmem:[%s6136_s15 + $0x788] sm:$0xff] %v731_v49  ;;  %v735_v51 = vld [vmem:[%s6131_s14 + $0x3c88] sm:$0xff] }
  0x8b   : > { %734 = vst [vmem:[%s6136_s15 + $0x790] sm:$0xff] %v733_v50  ;;  %v737_v52 = vld [vmem:[%s6131_s14 + $0x3d00] sm:$0xff]  ;;  %v739_v53 = vld [vmem:[%s6131_s14 + $0x3d08] sm:$0xff]  ;;  %736 = vst [vmem:[%s6136_s15 + $0x798] sm:$0xff] %v735_v51 }
  0x8c   : > { %738 = vst [vmem:[%s6136_s15 + $0x7a0] sm:$0xff] %v737_v52  ;;  %740 = vst [vmem:[%s6136_s15 + $0x7a8] sm:$0xff] %v739_v53  ;;  %v741_v54 = vld [vmem:[%s6131_s14 + $0x3d80] sm:$0xff]  ;;  %v743_v55 = vld [vmem:[%s6131_s14 + $0x3d88] sm:$0xff] }
  0x8d   : > { %v745_v56 = vld [vmem:[%s6131_s14 + $0x3e00] sm:$0xff]  ;;  %742 = vst [vmem:[%s6136_s15 + $0x7b0] sm:$0xff] %v741_v54  ;;  %744 = vst [vmem:[%s6136_s15 + $0x7b8] sm:$0xff] %v743_v55  ;;  %v747_v57 = vld [vmem:[%s6131_s14 + $0x3e08] sm:$0xff] }
  0x8e   : > { %746 = vst [vmem:[%s6136_s15 + $0x7c0] sm:$0xff] %v745_v56  ;;  %v749_v58 = vld [vmem:[%s6131_s14 + $0x3e80] sm:$0xff]  ;;  %v751_v59 = vld [vmem:[%s6131_s14 + $0x3e88] sm:$0xff]  ;;  %748 = vst [vmem:[%s6136_s15 + $0x7c8] sm:$0xff] %v747_v57 }
  0x8f   : > { %750 = vst [vmem:[%s6136_s15 + $0x7d0] sm:$0xff] %v749_v58  ;;  %752 = vst [vmem:[%s6136_s15 + $0x7d8] sm:$0xff] %v751_v59  ;;  %v753_v60 = vld [vmem:[%s6131_s14 + $0x3f00] sm:$0xff]  ;;  %v755_v61 = vld [vmem:[%s6131_s14 + $0x3f08] sm:$0xff] }
  0x90   : > { %v757_v62 = vld [vmem:[%s6131_s14 + $0x3f80] sm:$0xff]  ;;  %754 = vst [vmem:[%s6136_s15 + $0x7e0] sm:$0xff] %v753_v60  ;;  %756 = vst [vmem:[%s6136_s15 + $0x7e8] sm:$0xff] %v755_v61  ;;  %v759_v63 = vld [vmem:[%s6131_s14 + $0x3f88] sm:$0xff] }
  0x91   : > { %758 = vst [vmem:[%s6136_s15 + $0x7f0] sm:$0xff] %v757_v62  ;;  %760 = vst [vmem:[%s6136_s15 + $0x7f8] sm:$0xff] %v759_v63 }
  0x92 PF: > { %p5035_p5 = scmp.ge.s32.totalorder %s6052_s26, 1  ;;  %p783_p6 = scmp.lt.s32.totalorder %s6052_s26, 9 }
  0x94   : > { %p784_p7 = pnand %p5035_p5, %p783_p6 }
  0x95   : > { %s790_s16 = sand.u32 (!%p784_p7), 1, %s6044_s24   ;;  %s5037_s17 = sshll.u32 (!%p784_p7), %s6111_s27, 2 }
  0x96   : > { %787 = sbr.rel (%p784_p7) target bundleno = 1428 (0x594), region = 67  ;;  %s5036_s18 = sshll.u32 (!%p784_p7), %s790_s16, 11 }
  0x97   : > { %p828_p8 = scmp.lt.s32.totalorder (!%p784_p7), %s5037_s17, 31  ;;  %s5038_s19 = sshll.u32 (!%p784_p7), %s6111_s27, 6 }
  0x98   : > { %p833_p9 = scmp.lt.s32.totalorder (!%p784_p7), %s5038_s19, 511  ;;  %s6663_s24 = scalar_lea.vmem (!%p784_p7), [#allocation4], %s5036_s18 }
  0x99   : > { %p5041_p10 = scmp.ne.s32.totalorder (!%p784_p7), %s6111_s27, 0 }
  0x9d   : > { %s7402_s17 = smov (!%p828_p8, %s5037_s17), 31  ;;  %s7404_s19 = smov (!%p833_p9, %s5038_s19), 511 }
  0x9e   : > { %s830_s22 = scalar_lea.vmem %s7394_s4, %s7402_s17  ;;  %s5570_s23 = sshll.u32 %s7404_s19, 5  ;;  %v843_v0 = vld [vmem:[%s7390_s0] sm:$0xff] (!%p5041_p10)  ;;  %v844_v1 = vld [vmem:[%s7390_s0 + $0x8] sm:$0xff] (!%p5041_p10)  ;;  %v845_v2 = vld [vmem:[%s7390_s0 + $0x10] sm:$0xff] (!%p5041_p10)  ;;  %v6054_v40 = vmov (!%p5041_p10), 0.0   ;;  %v901_v41 = vlaneseq (!%p5041_p10) }
  0x9f   : > { %s6661_s30 = scalar_lea.vmem %s7395_s5, %s5570_s23  ;;  %842 = sbr.rel (%p5041_p10) target bundleno = 502 (0x1f6), region = 75  ;;  %v853_v3 = vadd.f32 (!%p5041_p10), %v844_v1, %v843_v0  ;;  %v846_v4 = vld [vmem:[%s7390_s0 + $0x18] sm:$0xff] (!%p5041_p10)  ;;  %v847_v6 = vld [vmem:[%s7390_s0 + $0x20] sm:$0xff] (!%p5041_p10)  ;;  %v848_v8 = vld [vmem:[%s7390_s0 + $0x28] sm:$0xff] (!%p5041_p10)  ;;  %1034 = vst [vmem:[#allocation3] sm:$0xff] (!%p5041_p10), %v6054_v40 }
  0xa0   : > { %v849_v10 = vld [vmem:[%s7390_s0 + $0x30] sm:$0xff] (!%p5041_p10)  ;;  %v850_v12 = vld [vmem:[%s7390_s0 + $0x38] sm:$0xff] (!%p5041_p10)  ;;  %1035 = vst [vmem:[#allocation3 + $0x8] sm:$0xff] (!%p5041_p10), %v6054_v40  ;;  %1036 = vst [vmem:[#allocation3 + $0x10] sm:$0xff] (!%p5041_p10), %v6054_v40  ;;  %v902_v45 = vshrl.u32 (!%p5041_p10), %v901_v41, 7 }
  0xa1   : > { %v854_v5 = vadd.f32 (!%p5041_p10), %v853_v3, %v845_v2  ;;  %1037 = vst [vmem:[#allocation3 + $0x18] sm:$0xff] (!%p5041_p10), %v6054_v40  ;;  %1038 = vst [vmem:[#allocation3 + $0x20] sm:$0xff] (!%p5041_p10), %v6054_v40  ;;  %v851_v50 = vld [vmem:[%s7391_s1] sm:$0xff] (!%p5041_p10) }
  0xa2   : > { %1039 = vst [vmem:[#allocation3 + $0x28] sm:$0xff] (!%p5041_p10), %v6054_v40  ;;  %1040 = vst [vmem:[#allocation3 + $0x30] sm:$0xff] (!%p5041_p10), %v6054_v40  ;;  %v903_v46 = vsub.s32 (!%p5041_p10), 0, %v902_v45  ;;  %v907_v47 = vsub.s32 (!%p5041_p10), 1, %v902_v45  ;;  %v911_v48 = vsub.s32 (!%p5041_p10), 2, %v902_v45  ;;  %v915_v49 = vsub.s32 (!%p5041_p10), 3, %v902_v45 }
  0xa3   : > { %v855_v7 = vadd.f32 (!%p5041_p10), %v854_v5, %v846_v4  ;;  %1041 = vst [vmem:[#allocation3 + $0x38] sm:$0xff] (!%p5041_p10), %v6054_v40  ;;  %v919_v51 = vsub.s32 (!%p5041_p10), 4, %v902_v45  ;;  %v923_v52 = vsub.s32 (!%p5041_p10), 5, %v902_v45  ;;  %v927_v53 = vsub.s32 (!%p5041_p10), 6, %v902_v45  ;;  %v852_v55 = vld [vmem:[%s7392_s2] sm:$0xff] (!%p5041_p10) }
  0xa4   : > { %v931_v54 = vsub.s32 (!%p5041_p10), 7, %v902_v45  ;;  %v904_v56 = vrot.slane (!%p5041_p10), %v851_v50, %v903_v46  ;;  %v908_v57 = vrot.slane (!%p5041_p10), %v851_v50, %v907_v47  ;;  %v912_v58 = vrot.slane (!%p5041_p10), %v851_v50, %v911_v48 }
  0xa5   : > { %v856_v9 = vadd.f32 (!%p5041_p10), %v855_v7, %v847_v6  ;;  %v916_v59 = vrot.slane (!%p5041_p10), %v851_v50, %v915_v49  ;;  %v920_v60 = vrot.slane (!%p5041_p10), %v851_v50, %v919_v51  ;;  %v924_v61 = vrot.slane (!%p5041_p10), %v851_v50, %v923_v52 }
  0xa6   : > { %v928_v62 = vrot.slane %v851_v50, %v927_v53  ;;  %v932_v63 = vrot.slane %v851_v50, %v931_v54  ;;  %v965_v3 = vrot.slane %v852_v55, %v915_v49  ;;  %v969_v5 = vrot.slane %v852_v55, %v919_v51 }
  0xa7   : > { %v857_v11 = vadd.f32 %v856_v9, %v848_v8  ;;  %v977_v7 = vrot.slane %v852_v55, %v927_v53 }
  0xa9   : > { %v858_v13 = vadd.f32 %v857_v11, %v849_v10 }
  0xab   : > { %v859_v14 = vadd.f32 %v858_v13, %v850_v12 }
  0xad   : > { %860 = vadd.xlane.f32.xlu0 %v859_v14 }
 0x13a   : > { %v861_v15 = vpop.xlane.xlu0 %860 }
 0x13b   : > { %v863_v16 = vmul.f32 0.0009765625, %v861_v15 }
 0x13d   : > { %v6690_v17 = vsub.f32 %v843_v0, %v863_v16  ;;  %v6692_v18 = vsub.f32 %v844_v1, %v863_v16  ;;  %v6694_v19 = vsub.f32 %v845_v2, %v863_v16  ;;  %v6696_v20 = vsub.f32 %v846_v4, %v863_v16 }
 0x13e   : > { %v6702_v23 = vsub.f32 %v847_v6, %v863_v16  ;;  %v869_v26 = vsub.f32 %v848_v8, %v863_v16  ;;  %v870_v29 = vsub.f32 %v849_v10, %v863_v16  ;;  %v871_v32 = vsub.f32 %v850_v12, %v863_v16 }
 0x13f   : > { %v872_v21 = vmul.f32 %v6690_v17, %v6690_v17  ;;  %v873_v22 = vmul.f32 %v6692_v18, %v6692_v18  ;;  %v874_v24 = vmul.f32 %v6694_v19, %v6694_v19  ;;  %v875_v27 = vmul.f32 %v6696_v20, %v6696_v20 }
 0x140   : > { %v876_v30 = vmul.f32 %v6702_v23, %v6702_v23  ;;  %v877_v33 = vmul.f32 %v869_v26, %v869_v26  ;;  %v878_v35 = vmul.f32 %v870_v29, %v870_v29  ;;  %v879_v37 = vmul.f32 %v871_v32, %v871_v32 }
 0x141   : > { %v880_v25 = vadd.f32 %v873_v22, %v872_v21  ;;  %v953_v0 = vrot.slane %v852_v55, %v903_v46  ;;  %v957_v1 = vrot.slane %v852_v55, %v907_v47  ;;  %v961_v2 = vrot.slane %v852_v55, %v911_v48 }
 0x142   : > { %v973_v6 = vrot.slane %v852_v55, %v923_v52  ;;  %v981_v8 = vrot.slane %v852_v55, %v931_v54 }
 0x143   : > { %v881_v28 = vadd.f32 %v880_v25, %v874_v24 }
 0x145   : > { %v882_v31 = vadd.f32 %v881_v28, %v875_v27 }
 0x147   : > { %v883_v34 = vadd.f32 %v882_v31, %v876_v30 }
 0x149   : > { %v884_v36 = vadd.f32 %v883_v34, %v877_v33 }
 0x14b   : > { %v885_v38 = vadd.f32 %v884_v36, %v878_v35 }
 0x14d   : > { %v886_v39 = vadd.f32 %v885_v38, %v879_v37 }
 0x14f   : > { %887 = vadd.xlane.f32.xlu0 %v886_v39 }
 0x1dc   : > { %v888_v42 = vpop.xlane.xlu0 %887 }
 0x1dd   : > { %v889_v43 = vmul.f32 0.0009765625, %v888_v42 }
 0x1df   : > { %v890_v44 = vadd.f32 1e-06, %v889_v43 }
 0x1e1   : > { %5628 = vrsqrt.f32 %v890_v44 }
 0x1eb   : > { %v5629_v4 = vpop.eup %5628 }
 0x1ec   : > { %v892_v9 = vmul.f32 %v5629_v4, %v6690_v17  ;;  %v893_v10 = vmul.f32 %v5629_v4, %v6692_v18  ;;  %v894_v11 = vmul.f32 %v5629_v4, %v6694_v19  ;;  %v895_v12 = vmul.f32 %v5629_v4, %v6696_v20 }
 0x1ed   : > { %v896_v13 = vmul.f32 %v5629_v4, %v6702_v23  ;;  %v897_v14 = vmul.f32 %v5629_v4, %v869_v26  ;;  %v898_v15 = vmul.f32 %v5629_v4, %v870_v29  ;;  %v899_v16 = vmul.f32 %v5629_v4, %v871_v32 }
 0x1ee   : > { %v941_v21 = vmul.f32 %v904_v56, %v892_v9  ;;  %v942_v22 = vmul.f32 %v908_v57, %v893_v10  ;;  %v943_v24 = vmul.f32 %v912_v58, %v894_v11  ;;  %v944_v25 = vmul.f32 %v916_v59, %v895_v12 }
 0x1ef   : > { %v945_v27 = vmul.f32 %v920_v60, %v896_v13  ;;  %v946_v28 = vmul.f32 %v924_v61, %v897_v14  ;;  %v947_v30 = vmul.f32 %v928_v62, %v898_v15  ;;  %v948_v31 = vmul.f32 %v932_v63, %v899_v16 }
 0x1f0   : > { %v990_v17 = vadd.f32 %v953_v0, %v941_v21  ;;  %v991_v33 = vadd.f32 %v957_v1, %v942_v22  ;;  %v992_v18 = vadd.f32 %v961_v2, %v943_v24  ;;  %v993_v34 = vadd.f32 %v965_v3, %v944_v25 }
 0x1f1   : > { %v994_v19 = vadd.f32 %v969_v5, %v945_v27  ;;  %v995_v35 = vadd.f32 %v973_v6, %v946_v28  ;;  %v996_v20 = vadd.f32 %v977_v7, %v947_v30  ;;  %v997_v36 = vadd.f32 %v981_v8, %v948_v31 }
 0x1f2   : > { %v5571_v23 = vpack.c.bf16 %v991_v33, %v990_v17  ;;  %v5572_v26 = vpack.c.bf16 %v993_v34, %v992_v18 }
 0x1f3   : > { %v5573_v29 = vpack.c.bf16 %v995_v35, %v994_v19  ;;  %v5574_v32 = vpack.c.bf16 %v997_v36, %v996_v20 }
 0x1f4   : > { %1030 = vst [vmem:[#allocation2] sm:$0xff] %v5571_v23  ;;  %1031 = vst [vmem:[#allocation2 + $0x8] sm:$0xff] %v5572_v26 }
 0x1f5   : > { %1032 = vst [vmem:[#allocation2 + $0x10] sm:$0xff] %v5573_v29  ;;  %1033 = vst [vmem:[#allocation2 + $0x18] sm:$0xff] %v5574_v32 }
 0x1f6 PF: > { %v5630_v37 = vld [vmem:[%s6663_s24 + $0x4] ss:$16 sps:$4 sm:$0xff]   ;;  %v5632_v38 = vld [vmem:[%s6663_s24 + $0xc] ss:$16 sps:$4 sm:$0xff]   ;;  %v5634_v39 = vld [vmem:[%s6663_s24] ss:$16 sps:$4 sm:$0xff]  }
 0x1f7   : > { %2632 = vmatprep.subr.bf16.mxu0 %v5630_v37  ;;  %v5635_v40 = vld [vmem:[%s6663_s24 + $0x8] ss:$16 sps:$4 sm:$0xff]   ;;  %2796 = vmatprep.subr.bf16.mxu1 %v5632_v38  ;;  %v5636_v41 = vld [vmem:[%s6663_s24 + $0x24] ss:$16 sps:$4 sm:$0xff]   ;;  %v5638_v42 = vld [vmem:[%s6663_s24 + $0x2c] ss:$16 sps:$4 sm:$0xff]  }
 0x1f8   : > { %2633 = vmatpush1.bf16.msra.mxu0 %v5634_v39  ;;  %2797 = vmatpush1.bf16.msra.mxu1 %v5635_v40  ;;  %v5640_v43 = vld [vmem:[%s6663_s24 + $0x20] ss:$16 sps:$4 sm:$0xff]   ;;  %v5641_v44 = vld [vmem:[%s6663_s24 + $0x28] ss:$16 sps:$4 sm:$0xff]   ;;  %v5642_v45 = vld [vmem:[%s6663_s24 + $0x44] ss:$16 sps:$4 sm:$0xff]  }
 0x1f9   : > { %2634 = vmatprep.subr.bf16.mxu0 %v5636_v41  ;;  %2798 = vmatprep.subr.bf16.mxu1 %v5638_v42  ;;  %v5644_v46 = vld [vmem:[%s6663_s24 + $0x4c] ss:$16 sps:$4 sm:$0xff]   ;;  %v5646_v47 = vld [vmem:[%s6663_s24 + $0x40] ss:$16 sps:$4 sm:$0xff]   ;;  %v5647_v48 = vld [vmem:[%s6663_s24 + $0x48] ss:$16 sps:$4 sm:$0xff]  }
 0x1fa   : > { %v5648_v49 = vld [vmem:[%s6663_s24 + $0x64] ss:$16 sps:$4 sm:$0xff]   ;;  %v5650_v50 = vld [vmem:[%s6663_s24 + $0x6c] ss:$16 sps:$4 sm:$0xff]   ;;  %v5652_v51 = vld [vmem:[%s6663_s24 + $0x60] ss:$16 sps:$4 sm:$0xff]  }
 0x1fb   : > { %v5653_v52 = vld [vmem:[%s6663_s24 + $0x68] ss:$16 sps:$4 sm:$0xff]   ;;  %v5654_v53 = vld [vmem:[%s6663_s24 + $0x84] ss:$16 sps:$4 sm:$0xff]   ;;  %v5656_v54 = vld [vmem:[%s6663_s24 + $0x8c] ss:$16 sps:$4 sm:$0xff]  }
 0x1fc   : > { %2635 = vmatpush1.bf16.msra.mxu0 %v5640_v43  ;;  %2799 = vmatpush1.bf16.msra.mxu1 %v5641_v44  ;;  %v5658_v55 = vld [vmem:[%s6663_s24 + $0x80] ss:$16 sps:$4 sm:$0xff]   ;;  %v5659_v56 = vld [vmem:[%s6663_s24 + $0x88] ss:$16 sps:$4 sm:$0xff]   ;;  %v5660_v57 = vld [vmem:[%s6663_s24 + $0xa4] ss:$16 sps:$4 sm:$0xff]  }
 0x1fd   : > { %2636 = vmatprep.subr.bf16.mxu0 %v5642_v45  ;;  %2800 = vmatprep.subr.bf16.mxu1 %v5644_v46  ;;  %v5662_v58 = vld [vmem:[%s6663_s24 + $0xac] ss:$16 sps:$4 sm:$0xff]   ;;  %v5664_v59 = vld [vmem:[%s6663_s24 + $0xa0] ss:$16 sps:$4 sm:$0xff]   ;;  %v5665_v60 = vld [vmem:[%s6663_s24 + $0xa8] ss:$16 sps:$4 sm:$0xff]  }
 0x1fe   : > { %v5666_v61 = vld [vmem:[%s6663_s24 + $0xc4] ss:$16 sps:$4 sm:$0xff]   ;;  %v5668_v62 = vld [vmem:[%s6663_s24 + $0xcc] ss:$16 sps:$4 sm:$0xff]   ;;  %v5670_v63 = vld [vmem:[%s6663_s24 + $0xc0] ss:$16 sps:$4 sm:$0xff]  }
 0x1ff   : > { %v5671_v0 = vld [vmem:[%s6663_s24 + $0xc8] ss:$16 sps:$4 sm:$0xff]   ;;  %v5672_v1 = vld [vmem:[%s6663_s24 + $0xe4] ss:$16 sps:$4 sm:$0xff]   ;;  %v5674_v2 = vld [vmem:[%s6663_s24 + $0xec] ss:$16 sps:$4 sm:$0xff]  }
 0x200   : > { %2637 = vmatpush1.bf16.msra.mxu0 %v5646_v47  ;;  %2801 = vmatpush1.bf16.msra.mxu1 %v5647_v48  ;;  %v5676_v3 = vld [vmem:[%s6663_s24 + $0xe0] ss:$16 sps:$4 sm:$0xff]   ;;  %v5677_v4 = vld [vmem:[%s6663_s24 + $0xe8] ss:$16 sps:$4 sm:$0xff]   ;;  %v5678_v5 = vld [vmem:[%s6663_s24 + $0x104] ss:$16 sps:$4 sm:$0xff]  }
 0x201   : > { %2638 = vmatprep.subr.bf16.mxu0 %v5648_v49  ;;  %2802 = vmatprep.subr.bf16.mxu1 %v5650_v50  ;;  %v5680_v6 = vld [vmem:[%s6663_s24 + $0x10c] ss:$16 sps:$4 sm:$0xff]   ;;  %v5682_v7 = vld [vmem:[%s6663_s24 + $0x100] ss:$16 sps:$4 sm:$0xff]   ;;  %v5683_v8 = vld [vmem:[%s6663_s24 + $0x108] ss:$16 sps:$4 sm:$0xff]  }
 0x202   : > { %v5684_v9 = vld [vmem:[%s6663_s24 + $0x124] ss:$16 sps:$4 sm:$0xff]   ;;  %v5686_v10 = vld [vmem:[%s6663_s24 + $0x12c] ss:$16 sps:$4 sm:$0xff]   ;;  %v5688_v11 = vld [vmem:[%s6663_s24 + $0x120] ss:$16 sps:$4 sm:$0xff]  }
 0x203   : > { %v5689_v12 = vld [vmem:[%s6663_s24 + $0x128] ss:$16 sps:$4 sm:$0xff]   ;;  %v5690_v13 = vld [vmem:[%s6663_s24 + $0x144] ss:$16 sps:$4 sm:$0xff]   ;;  %v5692_v14 = vld [vmem:[%s6663_s24 + $0x14c] ss:$16 sps:$4 sm:$0xff]  }
 0x204   : > { %2639 = vmatpush1.bf16.msra.mxu0 %v5652_v51  ;;  %2803 = vmatpush1.bf16.msra.mxu1 %v5653_v52  ;;  %v5694_v15 = vld [vmem:[%s6663_s24 + $0x140] ss:$16 sps:$4 sm:$0xff]   ;;  %v5695_v16 = vld [vmem:[%s6663_s24 + $0x148] ss:$16 sps:$4 sm:$0xff]   ;;  %v5696_v21 = vld [vmem:[%s6663_s24 + $0x164] ss:$16 sps:$4 sm:$0xff]  }
 0x205   : > { %2640 = vmatprep.subr.bf16.mxu0 %v5654_v53  ;;  %2804 = vmatprep.subr.bf16.mxu1 %v5656_v54  ;;  %v5698_v22 = vld [vmem:[%s6663_s24 + $0x16c] ss:$16 sps:$4 sm:$0xff]   ;;  %v1042_v24 = vld [vmem:[#allocation2] sm:$0xff]  ;;  %v5701_v28 = vld [vmem:[%s6663_s24 + $0x168] ss:$16 sps:$4 sm:$0xff]   ;;  %p5566_p11 = scmp.ne.s32.totalorder %s6111_s27, 7 }
 0x206   : > { %v5700_v25 = vld [vmem:[%s6663_s24 + $0x160] ss:$16 sps:$4 sm:$0xff]   ;;  %v5047_v27 = vcombine.high %v1042_v24, %v1042_v24  ;;  %v5702_v30 = vld [vmem:[%s6663_s24 + $0x184] ss:$16 sps:$4 sm:$0xff]   ;;  %v5704_v31 = vld [vmem:[%s6663_s24 + $0x18c] ss:$16 sps:$4 sm:$0xff]   ;;  %v5046_v41 = vcombine.low %v1042_v24, %v1042_v24 }
 0x207   : > { %v5706_v17 = vld [vmem:[%s6663_s24 + $0x180] ss:$16 sps:$4 sm:$0xff]   ;;  %v5707_v33 = vld [vmem:[%s6663_s24 + $0x188] ss:$16 sps:$4 sm:$0xff]   ;;  %v5708_v18 = vld [vmem:[%s6663_s24 + $0x1a4] ss:$16 sps:$4 sm:$0xff]  }
 0x208   : > { %2641 = vmatpush1.bf16.msra.mxu0 %v5658_v55  ;;  %2805 = vmatpush1.bf16.msra.mxu1 %v5659_v56  ;;  %v5710_v34 = vld [vmem:[%s6663_s24 + $0x1ac] ss:$16 sps:$4 sm:$0xff]   ;;  %v5712_v19 = vld [vmem:[%s6663_s24 + $0x1a0] ss:$16 sps:$4 sm:$0xff]   ;;  %v5713_v35 = vld [vmem:[%s6663_s24 + $0x1a8] ss:$16 sps:$4 sm:$0xff]  }
 0x209   : > { %2642 = vmatprep.subr.bf16.mxu0 %v5660_v57  ;;  %2806 = vmatprep.subr.bf16.mxu1 %v5662_v58  ;;  %v5714_v20 = vld [vmem:[%s6663_s24 + $0x1c4] ss:$16 sps:$4 sm:$0xff]   ;;  %v5716_v36 = vld [vmem:[%s6663_s24 + $0x1cc] ss:$16 sps:$4 sm:$0xff]   ;;  %v5718_v23 = vld [vmem:[%s6663_s24 + $0x1c0] ss:$16 sps:$4 sm:$0xff]  }
 0x20a   : > { %2664 = vmatprep.mubr.bf16.mxu0 %v5047_v27  ;;  %2828 = vmatprep.mubr.bf16.mxu1 %v5047_v27  ;;  %v5719_v26 = vld [vmem:[%s6663_s24 + $0x1c8] ss:$16 sps:$4 sm:$0xff]   ;;  %v5720_v29 = vld [vmem:[%s6663_s24 + $0x1e4] ss:$16 sps:$4 sm:$0xff]   ;;  %v5722_v32 = vld [vmem:[%s6663_s24 + $0x1ec] ss:$16 sps:$4 sm:$0xff]  }
 0x20b   : > { %v5724_v37 = vld [vmem:[%s6663_s24 + $0x1e0] ss:$16 sps:$4 sm:$0xff]   ;;  %v5725_v38 = vld [vmem:[%s6663_s24 + $0x1e8] ss:$16 sps:$4 sm:$0xff]   ;;  %v5730_v39 = vld [vmem:[%s6663_s24 + $0x204] ss:$16 sps:$4 sm:$0xff]  }
 0x20c   : > { %2643 = vmatpush1.bf16.msra.mxu0 %v5664_v59  ;;  %2807 = vmatpush1.bf16.msra.mxu1 %v5665_v60  ;;  %v5733_v40 = vld [vmem:[%s6663_s24 + $0x20c] ss:$16 sps:$4 sm:$0xff]   ;;  %v5728_v42 = vld [vmem:[%s6663_s24 + $0x200] ss:$16 sps:$4 sm:$0xff]   ;;  %v5731_v43 = vld [vmem:[%s6663_s24 + $0x208] ss:$16 sps:$4 sm:$0xff]  }
 0x20d   : > { %2644 = vmatprep.subr.bf16.mxu0 %v5666_v61  ;;  %2808 = vmatprep.subr.bf16.mxu1 %v5668_v62  ;;  %v5736_v44 = vld [vmem:[%s6663_s24 + $0x224] ss:$16 sps:$4 sm:$0xff]   ;;  %v5739_v45 = vld [vmem:[%s6663_s24 + $0x22c] ss:$16 sps:$4 sm:$0xff]   ;;  %v5734_v46 = vld [vmem:[%s6663_s24 + $0x220] ss:$16 sps:$4 sm:$0xff]  }
 0x20e   : > { %v5737_v47 = vld [vmem:[%s6663_s24 + $0x228] ss:$16 sps:$4 sm:$0xff]   ;;  %v5742_v48 = vld [vmem:[%s6663_s24 + $0x244] ss:$16 sps:$4 sm:$0xff]   ;;  %v5745_v49 = vld [vmem:[%s6663_s24 + $0x24c] ss:$16 sps:$4 sm:$0xff]  }
 0x20f   : > { %v5740_v50 = vld [vmem:[%s6663_s24 + $0x240] ss:$16 sps:$4 sm:$0xff]   ;;  %v5743_v51 = vld [vmem:[%s6663_s24 + $0x248] ss:$16 sps:$4 sm:$0xff]   ;;  %v5748_v52 = vld [vmem:[%s6663_s24 + $0x264] ss:$16 sps:$4 sm:$0xff]  }
 0x210   : > { %2645 = vmatpush1.bf16.msra.mxu0 %v5670_v63  ;;  %2809 = vmatpush1.bf16.msra.mxu1 %v5671_v0  ;;  %v5751_v53 = vld [vmem:[%s6663_s24 + $0x26c] ss:$16 sps:$4 sm:$0xff]   ;;  %v5746_v54 = vld [vmem:[%s6663_s24 + $0x260] ss:$16 sps:$4 sm:$0xff]   ;;  %v5749_v55 = vld [vmem:[%s6663_s24 + $0x268] ss:$16 sps:$4 sm:$0xff]  }
 0x211   : > { %2646 = vmatprep.subr.bf16.mxu0 %v5672_v1  ;;  %2810 = vmatprep.subr.bf16.mxu1 %v5674_v2  ;;  %v5754_v56 = vld [vmem:[%s6663_s24 + $0x284] ss:$16 sps:$4 sm:$0xff]   ;;  %v5757_v57 = vld [vmem:[%s6663_s24 + $0x28c] ss:$16 sps:$4 sm:$0xff]   ;;  %v5752_v58 = vld [vmem:[%s6663_s24 + $0x280] ss:$16 sps:$4 sm:$0xff]  }
 0x212   : > { %v5755_v59 = vld [vmem:[%s6663_s24 + $0x288] ss:$16 sps:$4 sm:$0xff]   ;;  %v5760_v60 = vld [vmem:[%s6663_s24 + $0x2a4] ss:$16 sps:$4 sm:$0xff]   ;;  %v5763_v61 = vld [vmem:[%s6663_s24 + $0x2ac] ss:$16 sps:$4 sm:$0xff]  }
 0x213   : > { %v5758_v62 = vld [vmem:[%s6663_s24 + $0x2a0] ss:$16 sps:$4 sm:$0xff]   ;;  %v5761_v63 = vld [vmem:[%s6663_s24 + $0x2a8] ss:$16 sps:$4 sm:$0xff]   ;;  %v5766_v0 = vld [vmem:[%s6663_s24 + $0x2c4] ss:$16 sps:$4 sm:$0xff]  }
 0x214   : > { %2647 = vmatpush1.bf16.msra.mxu0 %v5676_v3  ;;  %2811 = vmatpush1.bf16.msra.mxu1 %v5677_v4  ;;  %v5769_v1 = vld [vmem:[%s6663_s24 + $0x2cc] ss:$16 sps:$4 sm:$0xff]   ;;  %v5764_v4 = vld [vmem:[%s6663_s24 + $0x2c0] ss:$16 sps:$4 sm:$0xff]   ;;  %v5791_v27 = vld [vmem:[%s6663_s24 + $0x348] ss:$16 sps:$4 sm:$0xff]  }
 0x215   : > { %2648 = vmatprep.subr.bf16.mxu0 %v5678_v5  ;;  %2812 = vmatprep.subr.bf16.mxu1 %v5680_v6  ;;  %v6811_v2 = vld [vmem:[#allocation2 + $0x8] sm:$0xff]  ;;  %v5772_v6 = vld [vmem:[%s6663_s24 + $0x2e4] ss:$16 sps:$4 sm:$0xff]  }
 0x216   : > { %v5049_v3 = vcombine.high %v6811_v2, %v6811_v2  ;;  %v5767_v5 = vld [vmem:[%s6663_s24 + $0x2c8] ss:$16 sps:$4 sm:$0xff]   ;;  %v5793_v24 = vld [vmem:[%s6663_s24 + $0x34c] ss:$16 sps:$4 sm:$0xff]  }
 0x218   : > { %2649 = vmatpush1.bf16.msra.mxu0 %v5682_v7  ;;  %2813 = vmatpush1.bf16.msra.mxu1 %v5683_v8  ;;  %v5775_v7 = vld [vmem:[%s6663_s24 + $0x2ec] ss:$16 sps:$4 sm:$0xff]   ;;  %v5770_v8 = vld [vmem:[%s6663_s24 + $0x2e0] ss:$16 sps:$4 sm:$0xff]  }
 0x219   : > { %2650 = vmatprep.subr.bf16.mxu0 %v5684_v9  ;;  %2814 = vmatprep.subr.bf16.mxu1 %v5686_v10  ;;  %v5773_v9 = vld [vmem:[%s6663_s24 + $0x2e8] ss:$16 sps:$4 sm:$0xff]   ;;  %v5778_v10 = vld [vmem:[%s6663_s24 + $0x304] ss:$16 sps:$4 sm:$0xff]  }
 0x21c   : > { %2651 = vmatpush1.bf16.msra.mxu0 %v5688_v11  ;;  %2815 = vmatpush1.bf16.msra.mxu1 %v5689_v12  ;;  %v5781_v11 = vld [vmem:[%s6663_s24 + $0x30c] ss:$16 sps:$4 sm:$0xff]   ;;  %v5776_v12 = vld [vmem:[%s6663_s24 + $0x300] ss:$16 sps:$4 sm:$0xff]  }
 0x21d   : > { %2652 = vmatprep.subr.bf16.mxu0 %v5690_v13  ;;  %2816 = vmatprep.subr.bf16.mxu1 %v5692_v14  ;;  %v5779_v13 = vld [vmem:[%s6663_s24 + $0x308] ss:$16 sps:$4 sm:$0xff]   ;;  %v5784_v14 = vld [vmem:[%s6663_s24 + $0x324] ss:$16 sps:$4 sm:$0xff]  }
 0x220   : > { %2653 = vmatpush1.bf16.msra.mxu0 %v5694_v15  ;;  %2817 = vmatpush1.bf16.msra.mxu1 %v5695_v16  ;;  %v5787_v15 = vld [vmem:[%s6663_s24 + $0x32c] ss:$16 sps:$4 sm:$0xff]   ;;  %v5782_v16 = vld [vmem:[%s6663_s24 + $0x320] ss:$16 sps:$4 sm:$0xff]  }
 0x221   : > { %2654 = vmatprep.subr.bf16.mxu0 %v5696_v21  ;;  %2818 = vmatprep.subr.bf16.mxu1 %v5698_v22  ;;  %v5785_v21 = vld [vmem:[%s6663_s24 + $0x328] ss:$16 sps:$4 sm:$0xff]   ;;  %v5790_v22 = vld [vmem:[%s6663_s24 + $0x344] ss:$16 sps:$4 sm:$0xff]  }
 0x224   : > { %2655 = vmatpush1.bf16.msra.mxu0 %v5700_v25  ;;  %2819 = vmatpush1.bf16.msra.mxu1 %v5701_v28  ;;  %v5788_v25 = vld [vmem:[%s6663_s24 + $0x340] ss:$16 sps:$4 sm:$0xff]   ;;  %v5796_v28 = vld [vmem:[%s6663_s24 + $0x364] ss:$16 sps:$4 sm:$0xff]  }
 0x225   : > { %2656 = vmatprep.subr.bf16.mxu0 %v5702_v30  ;;  %2820 = vmatprep.subr.bf16.mxu1 %v5704_v31  ;;  %v5799_v30 = vld [vmem:[%s6663_s24 + $0x36c] ss:$16 sps:$4 sm:$0xff]   ;;  %v5794_v31 = vld [vmem:[%s6663_s24 + $0x360] ss:$16 sps:$4 sm:$0xff]  }
 0x228   : > { %2657 = vmatpush1.bf16.msra.mxu0 %v5706_v17  ;;  %2821 = vmatpush1.bf16.msra.mxu1 %v5707_v33  ;;  %v5797_v17 = vld [vmem:[%s6663_s24 + $0x368] ss:$16 sps:$4 sm:$0xff]   ;;  %v5802_v33 = vld [vmem:[%s6663_s24 + $0x384] ss:$16 sps:$4 sm:$0xff]  }
 0x229   : > { %2658 = vmatprep.subr.bf16.mxu0 %v5708_v18  ;;  %2822 = vmatprep.subr.bf16.mxu1 %v5710_v34  ;;  %v5805_v18 = vld [vmem:[%s6663_s24 + $0x38c] ss:$16 sps:$4 sm:$0xff]   ;;  %v5800_v34 = vld [vmem:[%s6663_s24 + $0x380] ss:$16 sps:$4 sm:$0xff]  }
 0x22c   : > { %2659 = vmatpush1.bf16.msra.mxu0 %v5712_v19  ;;  %2823 = vmatpush1.bf16.msra.mxu1 %v5713_v35  ;;  %v5803_v19 = vld [vmem:[%s6663_s24 + $0x388] ss:$16 sps:$4 sm:$0xff]   ;;  %v5808_v35 = vld [vmem:[%s6663_s24 + $0x3a4] ss:$16 sps:$4 sm:$0xff]  }
 0x22d   : > { %2660 = vmatprep.subr.bf16.mxu0 %v5714_v20  ;;  %2824 = vmatprep.subr.bf16.mxu1 %v5716_v36  ;;  %v5811_v20 = vld [vmem:[%s6663_s24 + $0x3ac] ss:$16 sps:$4 sm:$0xff]   ;;  %v5806_v36 = vld [vmem:[%s6663_s24 + $0x3a0] ss:$16 sps:$4 sm:$0xff]  }
 0x230   : > { %2661 = vmatpush1.bf16.msra.mxu0 %v5718_v23  ;;  %2825 = vmatpush1.bf16.msra.mxu1 %v5719_v26  ;;  %v5809_v23 = vld [vmem:[%s6663_s24 + $0x3a8] ss:$16 sps:$4 sm:$0xff]   ;;  %v5814_v26 = vld [vmem:[%s6663_s24 + $0x3c4] ss:$16 sps:$4 sm:$0xff]  }
 0x231   : > { %2662 = vmatprep.subr.bf16.mxu0 %v5720_v29  ;;  %2826 = vmatprep.subr.bf16.mxu1 %v5722_v32  ;;  %v5817_v29 = vld [vmem:[%s6663_s24 + $0x3cc] ss:$16 sps:$4 sm:$0xff]   ;;  %v5812_v32 = vld [vmem:[%s6663_s24 + $0x3c0] ss:$16 sps:$4 sm:$0xff]  }
 0x234   : > { %2663 = vmatpush1.bf16.msra.mxu0 %v5724_v37  ;;  %2827 = vmatpush1.bf16.msra.mxu1 %v5725_v38  ;;  %v5815_v37 = vld [vmem:[%s6663_s24 + $0x3c8] ss:$16 sps:$4 sm:$0xff]   ;;  %v5820_v38 = vld [vmem:[%s6663_s24 + $0x3e4] ss:$16 sps:$4 sm:$0xff]  }
 0x235   : > { %2673 = vmatprep.subr.bf16.mxu0 %v5730_v39  ;;  %2837 = vmatprep.subr.bf16.mxu1 %v5733_v40  ;;  %v5823_v39 = vld [vmem:[%s6663_s24 + $0x3ec] ss:$16 sps:$4 sm:$0xff]   ;;  %v5818_v40 = vld [vmem:[%s6663_s24 + $0x3e0] ss:$16 sps:$4 sm:$0xff]  }
 0x237   : > { %2665 = vmatmul.mubr.bf16.vlgmr.msra.gmra.mrb[0].mxu0 %v5046_v41  ;;  %2829 = vmatmul.mubr.bf16.vlgmr.msra.gmra.mrb[0].mxu1 %v5046_v41  ;;  %v5821_v41 = vld [vmem:[%s6663_s24 + $0x3e8] ss:$16 sps:$4 sm:$0xff]  }
 0x238   : > { %2674 = vmatpush1.bf16.msra.mxu0 %v5728_v42  ;;  %2838 = vmatpush1.bf16.msra.mxu1 %v5731_v43  ;;  %v5828_v42 = vld [vmem:[%s6663_s24 + $0x404] ss:$16 sps:$4 sm:$0xff]   ;;  %v5831_v43 = vld [vmem:[%s6663_s24 + $0x40c] ss:$16 sps:$4 sm:$0xff]  }
 0x239   : > { %2675 = vmatprep.subr.bf16.mxu0 %v5736_v44  ;;  %2839 = vmatprep.subr.bf16.mxu1 %v5739_v45  ;;  %v5048_v44 = vcombine.low %v6811_v2, %v6811_v2  ;;  %v5826_v45 = vld [vmem:[%s6663_s24 + $0x400] ss:$16 sps:$4 sm:$0xff]   ;;  %v5861_v2 = vld [vmem:[%s6663_s24 + $0x4ac] ss:$16 sps:$4 sm:$0xff]  }
 0x23a   : > { %2705 = vmatprep.mubr.bf16.mxu0 %v5049_v3  ;;  %2869 = vmatprep.mubr.bf16.mxu1 %v5049_v3  ;;  %v5856_v3 = vld [vmem:[%s6663_s24 + $0x4a0] ss:$16 sps:$4 sm:$0xff]  }
 0x23c   : > { %2676 = vmatpush1.bf16.msra.mxu0 %v5734_v46  ;;  %2840 = vmatpush1.bf16.msra.mxu1 %v5737_v47  ;;  %v5829_v46 = vld [vmem:[%s6663_s24 + $0x408] ss:$16 sps:$4 sm:$0xff]   ;;  %v5834_v47 = vld [vmem:[%s6663_s24 + $0x424] ss:$16 sps:$4 sm:$0xff]  }
 0x23d   : > { %2677 = vmatprep.subr.bf16.mxu0 %v5742_v48  ;;  %2841 = vmatprep.subr.bf16.mxu1 %v5745_v49  ;;  %v6860_v48 = vld [vmem:[#allocation2 + $0x10] sm:$0xff]  ;;  %v5837_v49 = vld [vmem:[%s6663_s24 + $0x42c] ss:$16 sps:$4 sm:$0xff]  }
 0x240   : > { %2678 = vmatpush1.bf16.msra.mxu0 %v5740_v50  ;;  %2842 = vmatpush1.bf16.msra.mxu1 %v5743_v51  ;;  %v5051_v50 = vcombine.high %v6860_v48, %v6860_v48  ;;  %v5832_v51 = vld [vmem:[%s6663_s24 + $0x420] ss:$16 sps:$4 sm:$0xff]  }
 0x241   : > { %2679 = vmatprep.subr.bf16.mxu0 %v5748_v52  ;;  %2843 = vmatprep.subr.bf16.mxu1 %v5751_v53  ;;  %v5835_v52 = vld [vmem:[%s6663_s24 + $0x428] ss:$16 sps:$4 sm:$0xff]   ;;  %v5840_v53 = vld [vmem:[%s6663_s24 + $0x444] ss:$16 sps:$4 sm:$0xff]  }
 0x244   : > { %2680 = vmatpush1.bf16.msra.mxu0 %v5746_v54  ;;  %2844 = vmatpush1.bf16.msra.mxu1 %v5749_v55  ;;  %v5843_v54 = vld [vmem:[%s6663_s24 + $0x44c] ss:$16 sps:$4 sm:$0xff]   ;;  %v5838_v55 = vld [vmem:[%s6663_s24 + $0x440] ss:$16 sps:$4 sm:$0xff]  }
 0x245   : > { %2681 = vmatprep.subr.bf16.mxu0 %v5754_v56  ;;  %2845 = vmatprep.subr.bf16.mxu1 %v5757_v57  ;;  %v5841_v56 = vld [vmem:[%s6663_s24 + $0x448] ss:$16 sps:$4 sm:$0xff]   ;;  %v5846_v57 = vld [vmem:[%s6663_s24 + $0x464] ss:$16 sps:$4 sm:$0xff]  }
 0x248   : > { %2682 = vmatpush1.bf16.msra.mxu0 %v5752_v58  ;;  %2846 = vmatpush1.bf16.msra.mxu1 %v5755_v59  ;;  %v5849_v58 = vld [vmem:[%s6663_s24 + $0x46c] ss:$16 sps:$4 sm:$0xff]   ;;  %v5844_v59 = vld [vmem:[%s6663_s24 + $0x460] ss:$16 sps:$4 sm:$0xff]  }
 0x249   : > { %2683 = vmatprep.subr.bf16.mxu0 %v5760_v60  ;;  %2847 = vmatprep.subr.bf16.mxu1 %v5763_v61  ;;  %v5847_v60 = vld [vmem:[%s6663_s24 + $0x468] ss:$16 sps:$4 sm:$0xff]   ;;  %v5852_v61 = vld [vmem:[%s6663_s24 + $0x484] ss:$16 sps:$4 sm:$0xff]  }
 0x24c   : > { %2684 = vmatpush1.bf16.msra.mxu0 %v5758_v62  ;;  %2848 = vmatpush1.bf16.msra.mxu1 %v5761_v63  ;;  %v5855_v62 = vld [vmem:[%s6663_s24 + $0x48c] ss:$16 sps:$4 sm:$0xff]   ;;  %v5850_v63 = vld [vmem:[%s6663_s24 + $0x480] ss:$16 sps:$4 sm:$0xff]  }
 0x24d   : > { %2685 = vmatprep.subr.bf16.mxu0 %v5766_v0  ;;  %2849 = vmatprep.subr.bf16.mxu1 %v5769_v1  ;;  %v5853_v0 = vld [vmem:[%s6663_s24 + $0x488] ss:$16 sps:$4 sm:$0xff]   ;;  %v5858_v1 = vld [vmem:[%s6663_s24 + $0x4a4] ss:$16 sps:$4 sm:$0xff]  }
 0x250   : > { %2686 = vmatpush1.bf16.msra.mxu0 %v5764_v4  ;;  %2850 = vmatpush1.bf16.msra.mxu1 %v5767_v5  ;;  %v5859_v4 = vld [vmem:[%s6663_s24 + $0x4a8] ss:$16 sps:$4 sm:$0xff]   ;;  %v5864_v5 = vld [vmem:[%s6663_s24 + $0x4c4] ss:$16 sps:$4 sm:$0xff]  }
 0x251   : > { %2687 = vmatprep.subr.bf16.mxu0 %v5772_v6  ;;  %2851 = vmatprep.subr.bf16.mxu1 %v5775_v7  ;;  %v5867_v6 = vld [vmem:[%s6663_s24 + $0x4cc] ss:$16 sps:$4 sm:$0xff]   ;;  %v5862_v7 = vld [vmem:[%s6663_s24 + $0x4c0] ss:$16 sps:$4 sm:$0xff]  }
 0x254   : > { %2688 = vmatpush1.bf16.msra.mxu0 %v5770_v8  ;;  %2852 = vmatpush1.bf16.msra.mxu1 %v5773_v9  ;;  %v5865_v8 = vld [vmem:[%s6663_s24 + $0x4c8] ss:$16 sps:$4 sm:$0xff]   ;;  %v5870_v9 = vld [vmem:[%s6663_s24 + $0x4e4] ss:$16 sps:$4 sm:$0xff]  }
 0x255   : > { %2689 = vmatprep.subr.bf16.mxu0 %v5778_v10  ;;  %2853 = vmatprep.subr.bf16.mxu1 %v5781_v11  ;;  %v5873_v10 = vld [vmem:[%s6663_s24 + $0x4ec] ss:$16 sps:$4 sm:$0xff]   ;;  %v5868_v11 = vld [vmem:[%s6663_s24 + $0x4e0] ss:$16 sps:$4 sm:$0xff]  }
 0x258   : > { %2690 = vmatpush1.bf16.msra.mxu0 %v5776_v12  ;;  %2854 = vmatpush1.bf16.msra.mxu1 %v5779_v13  ;;  %v5871_v12 = vld [vmem:[%s6663_s24 + $0x4e8] ss:$16 sps:$4 sm:$0xff]   ;;  %v5876_v13 = vld [vmem:[%s6663_s24 + $0x504] ss:$16 sps:$4 sm:$0xff]  }
 0x259   : > { %2691 = vmatprep.subr.bf16.mxu0 %v5784_v14  ;;  %2855 = vmatprep.subr.bf16.mxu1 %v5787_v15  ;;  %v5879_v14 = vld [vmem:[%s6663_s24 + $0x50c] ss:$16 sps:$4 sm:$0xff]   ;;  %v5874_v15 = vld [vmem:[%s6663_s24 + $0x500] ss:$16 sps:$4 sm:$0xff]  }
 0x25c   : > { %2692 = vmatpush1.bf16.msra.mxu0 %v5782_v16  ;;  %2856 = vmatpush1.bf16.msra.mxu1 %v5785_v21  ;;  %v5877_v16 = vld [vmem:[%s6663_s24 + $0x508] ss:$16 sps:$4 sm:$0xff]   ;;  %v5882_v21 = vld [vmem:[%s6663_s24 + $0x524] ss:$16 sps:$4 sm:$0xff]  }
 0x25d   : > { %2693 = vmatprep.subr.bf16.mxu0 %v5790_v22  ;;  %2857 = vmatprep.subr.bf16.mxu1 %v5793_v24  ;;  %v5885_v22 = vld [vmem:[%s6663_s24 + $0x52c] ss:$16 sps:$4 sm:$0xff]   ;;  %v5880_v24 = vld [vmem:[%s6663_s24 + $0x520] ss:$16 sps:$4 sm:$0xff]  }
 0x260   : > { %2694 = vmatpush1.bf16.msra.mxu0 %v5788_v25  ;;  %2858 = vmatpush1.bf16.msra.mxu1 %v5791_v27  ;;  %v5883_v25 = vld [vmem:[%s6663_s24 + $0x528] ss:$16 sps:$4 sm:$0xff]   ;;  %v5888_v27 = vld [vmem:[%s6663_s24 + $0x544] ss:$16 sps:$4 sm:$0xff]  }
 0x261   : > { %2695 = vmatprep.subr.bf16.mxu0 %v5796_v28  ;;  %2859 = vmatprep.subr.bf16.mxu1 %v5799_v30  ;;  %v5891_v28 = vld [vmem:[%s6663_s24 + $0x54c] ss:$16 sps:$4 sm:$0xff]   ;;  %v5886_v30 = vld [vmem:[%s6663_s24 + $0x540] ss:$16 sps:$4 sm:$0xff]  }
 0x264   : > { %2696 = vmatpush1.bf16.msra.mxu0 %v5794_v31  ;;  %2860 = vmatpush1.bf16.msra.mxu1 %v5797_v17  ;;  %v5889_v31 = vld [vmem:[%s6663_s24 + $0x548] ss:$16 sps:$4 sm:$0xff]   ;;  %v5894_v17 = vld [vmem:[%s6663_s24 + $0x564] ss:$16 sps:$4 sm:$0xff]  }
 0x265   : > { %2697 = vmatprep.subr.bf16.mxu0 %v5802_v33  ;;  %2861 = vmatprep.subr.bf16.mxu1 %v5805_v18  ;;  %v5897_v33 = vld [vmem:[%s6663_s24 + $0x56c] ss:$16 sps:$4 sm:$0xff]   ;;  %v5892_v18 = vld [vmem:[%s6663_s24 + $0x560] ss:$16 sps:$4 sm:$0xff]  }
 0x268   : > { %2698 = vmatpush1.bf16.msra.mxu0 %v5800_v34  ;;  %2862 = vmatpush1.bf16.msra.mxu1 %v5803_v19  ;;  %v5895_v34 = vld [vmem:[%s6663_s24 + $0x568] ss:$16 sps:$4 sm:$0xff]   ;;  %v5900_v19 = vld [vmem:[%s6663_s24 + $0x584] ss:$16 sps:$4 sm:$0xff]  }
 0x269   : > { %2699 = vmatprep.subr.bf16.mxu0 %v5808_v35  ;;  %2863 = vmatprep.subr.bf16.mxu1 %v5811_v20  ;;  %v5903_v35 = vld [vmem:[%s6663_s24 + $0x58c] ss:$16 sps:$4 sm:$0xff]   ;;  %v5898_v20 = vld [vmem:[%s6663_s24 + $0x580] ss:$16 sps:$4 sm:$0xff]  }
 0x26c   : > { %2700 = vmatpush1.bf16.msra.mxu0 %v5806_v36  ;;  %2864 = vmatpush1.bf16.msra.mxu1 %v5809_v23  ;;  %v5901_v36 = vld [vmem:[%s6663_s24 + $0x588] ss:$16 sps:$4 sm:$0xff]   ;;  %v5906_v23 = vld [vmem:[%s6663_s24 + $0x5a4] ss:$16 sps:$4 sm:$0xff]  }
 0x26d   : > { %2701 = vmatprep.subr.bf16.mxu0 %v5814_v26  ;;  %2865 = vmatprep.subr.bf16.mxu1 %v5817_v29  ;;  %v5909_v26 = vld [vmem:[%s6663_s24 + $0x5ac] ss:$16 sps:$4 sm:$0xff]   ;;  %v5904_v29 = vld [vmem:[%s6663_s24 + $0x5a0] ss:$16 sps:$4 sm:$0xff]  }
 0x270   : > { %2702 = vmatpush1.bf16.msra.mxu0 %v5812_v32  ;;  %2866 = vmatpush1.bf16.msra.mxu1 %v5815_v37  ;;  %v5907_v32 = vld [vmem:[%s6663_s24 + $0x5a8] ss:$16 sps:$4 sm:$0xff]   ;;  %v5912_v37 = vld [vmem:[%s6663_s24 + $0x5c4] ss:$16 sps:$4 sm:$0xff]  }
 0x271   : > { %2703 = vmatprep.subr.bf16.mxu0 %v5820_v38  ;;  %2867 = vmatprep.subr.bf16.mxu1 %v5823_v39  ;;  %v5915_v38 = vld [vmem:[%s6663_s24 + $0x5cc] ss:$16 sps:$4 sm:$0xff]   ;;  %v5910_v39 = vld [vmem:[%s6663_s24 + $0x5c0] ss:$16 sps:$4 sm:$0xff]  }
 0x274   : > { %2704 = vmatpush1.bf16.msra.mxu0 %v5818_v40  ;;  %2868 = vmatpush1.bf16.msra.mxu1 %v5821_v41  ;;  %v5913_v40 = vld [vmem:[%s6663_s24 + $0x5c8] ss:$16 sps:$4 sm:$0xff]   ;;  %v5918_v41 = vld [vmem:[%s6663_s24 + $0x5e4] ss:$16 sps:$4 sm:$0xff]  }
 0x275   : > { %2714 = vmatprep.subr.bf16.mxu0 %v5828_v42  ;;  %2878 = vmatprep.subr.bf16.mxu1 %v5831_v43  ;;  %v5921_v42 = vld [vmem:[%s6663_s24 + $0x5ec] ss:$16 sps:$4 sm:$0xff]   ;;  %v5916_v43 = vld [vmem:[%s6663_s24 + $0x5e0] ss:$16 sps:$4 sm:$0xff]  }
 0x277   : > { %2706 = vmatmul.mubr.bf16.vlgmr.msra.gmra.mrb[0].mxu0 %v5048_v44  ;;  %2870 = vmatmul.mubr.bf16.vlgmr.msra.gmra.mrb[0].mxu1 %v5048_v44  ;;  %v5919_v44 = vld [vmem:[%s6663_s24 + $0x5e8] ss:$16 sps:$4 sm:$0xff]  }
 0x278   : > { %2715 = vmatpush1.bf16.msra.mxu0 %v5826_v45  ;;  %2879 = vmatpush1.bf16.msra.mxu1 %v5829_v46  ;;  %v5926_v45 = vld [vmem:[%s6663_s24 + $0x604] ss:$16 sps:$4 sm:$0xff]   ;;  %v5929_v46 = vld [vmem:[%s6663_s24 + $0x60c] ss:$16 sps:$4 sm:$0xff]  }
 0x279   : > { %2716 = vmatprep.subr.bf16.mxu0 %v5834_v47  ;;  %2880 = vmatprep.subr.bf16.mxu1 %v5837_v49  ;;  %v5050_v47 = vcombine.low %v6860_v48, %v6860_v48  ;;  %v6927_v49 = vld [vmem:[#allocation2 + $0x18] sm:$0xff]  ;;  %v5930_v48 = vld [vmem:[%s6663_s24 + $0x620] ss:$16 sps:$4 sm:$0xff]  }
 0x27a   : > { %2746 = vmatprep.mubr.bf16.mxu0 %v5051_v50  ;;  %2910 = vmatprep.mubr.bf16.mxu1 %v5051_v50  ;;  %v5924_v50 = vld [vmem:[%s6663_s24 + $0x600] ss:$16 sps:$4 sm:$0xff]  }
 0x27c   : > { %2717 = vmatpush1.bf16.msra.mxu0 %v5832_v51  ;;  %2881 = vmatpush1.bf16.msra.mxu1 %v5835_v52  ;;  %v5927_v51 = vld [vmem:[%s6663_s24 + $0x608] ss:$16 sps:$4 sm:$0xff]   ;;  %v5932_v52 = vld [vmem:[%s6663_s24 + $0x624] ss:$16 sps:$4 sm:$0xff]  }
 0x27d   : > { %2718 = vmatprep.subr.bf16.mxu0 %v5840_v53  ;;  %2882 = vmatprep.subr.bf16.mxu1 %v5843_v54  ;;  %v5935_v53 = vld [vmem:[%s6663_s24 + $0x62c] ss:$16 sps:$4 sm:$0xff]   ;;  %v5053_v54 = vcombine.high %v6927_v49, %v6927_v49 }
 0x280   : > { %2719 = vmatpush1.bf16.msra.mxu0 %v5838_v55  ;;  %2883 = vmatpush1.bf16.msra.mxu1 %v5841_v56  ;;  %v5933_v55 = vld [vmem:[%s6663_s24 + $0x628] ss:$16 sps:$4 sm:$0xff]   ;;  %v5938_v56 = vld [vmem:[%s6663_s24 + $0x644] ss:$16 sps:$4 sm:$0xff]  }
 0x281   : > { %2720 = vmatprep.subr.bf16.mxu0 %v5846_v57  ;;  %2884 = vmatprep.subr.bf16.mxu1 %v5849_v58  ;;  %v5941_v57 = vld [vmem:[%s6663_s24 + $0x64c] ss:$16 sps:$4 sm:$0xff]   ;;  %v5936_v58 = vld [vmem:[%s6663_s24 + $0x640] ss:$16 sps:$4 sm:$0xff]  }
 0x284   : > { %2721 = vmatpush1.bf16.msra.mxu0 %v5844_v59  ;;  %2885 = vmatpush1.bf16.msra.mxu1 %v5847_v60  ;;  %v5939_v59 = vld [vmem:[%s6663_s24 + $0x648] ss:$16 sps:$4 sm:$0xff]   ;;  %v5944_v60 = vld [vmem:[%s6663_s24 + $0x664] ss:$16 sps:$4 sm:$0xff]  }
 0x285   : > { %2722 = vmatprep.subr.bf16.mxu0 %v5852_v61  ;;  %2886 = vmatprep.subr.bf16.mxu1 %v5855_v62  ;;  %v5947_v61 = vld [vmem:[%s6663_s24 + $0x66c] ss:$16 sps:$4 sm:$0xff]   ;;  %v5942_v62 = vld [vmem:[%s6663_s24 + $0x660] ss:$16 sps:$4 sm:$0xff]  }
 0x288   : > { %2723 = vmatpush1.bf16.msra.mxu0 %v5850_v63  ;;  %2887 = vmatpush1.bf16.msra.mxu1 %v5853_v0  ;;  %v5945_v63 = vld [vmem:[%s6663_s24 + $0x668] ss:$16 sps:$4 sm:$0xff]   ;;  %v5950_v0 = vld [vmem:[%s6663_s24 + $0x684] ss:$16 sps:$4 sm:$0xff]  }
 0x289   : > { %2724 = vmatprep.subr.bf16.mxu0 %v5858_v1  ;;  %2888 = vmatprep.subr.bf16.mxu1 %v5861_v2  ;;  %v5953_v1 = vld [vmem:[%s6663_s24 + $0x68c] ss:$16 sps:$4 sm:$0xff]   ;;  %v5948_v2 = vld [vmem:[%s6663_s24 + $0x680] ss:$16 sps:$4 sm:$0xff]  }
 0x28c   : > { %2725 = vmatpush1.bf16.msra.mxu0 %v5856_v3  ;;  %2889 = vmatpush1.bf16.msra.mxu1 %v5859_v4  ;;  %v5951_v3 = vld [vmem:[%s6663_s24 + $0x688] ss:$16 sps:$4 sm:$0xff]   ;;  %v5956_v4 = vld [vmem:[%s6663_s24 + $0x6a4] ss:$16 sps:$4 sm:$0xff]  }
 0x28d   : > { %2726 = vmatprep.subr.bf16.mxu0 %v5864_v5  ;;  %2890 = vmatprep.subr.bf16.mxu1 %v5867_v6  ;;  %v5959_v5 = vld [vmem:[%s6663_s24 + $0x6ac] ss:$16 sps:$4 sm:$0xff]   ;;  %v5954_v6 = vld [vmem:[%s6663_s24 + $0x6a0] ss:$16 sps:$4 sm:$0xff]  }
 0x290   : > { %2727 = vmatpush1.bf16.msra.mxu0 %v5862_v7  ;;  %2891 = vmatpush1.bf16.msra.mxu1 %v5865_v8  ;;  %v5957_v7 = vld [vmem:[%s6663_s24 + $0x6a8] ss:$16 sps:$4 sm:$0xff]   ;;  %v5962_v8 = vld [vmem:[%s6663_s24 + $0x6c4] ss:$16 sps:$4 sm:$0xff]  }
 0x291   : > { %2728 = vmatprep.subr.bf16.mxu0 %v5870_v9  ;;  %2892 = vmatprep.subr.bf16.mxu1 %v5873_v10  ;;  %v5965_v9 = vld [vmem:[%s6663_s24 + $0x6cc] ss:$16 sps:$4 sm:$0xff]   ;;  %v5960_v10 = vld [vmem:[%s6663_s24 + $0x6c0] ss:$16 sps:$4 sm:$0xff]  }
 0x294   : > { %2729 = vmatpush1.bf16.msra.mxu0 %v5868_v11  ;;  %2893 = vmatpush1.bf16.msra.mxu1 %v5871_v12  ;;  %v5963_v11 = vld [vmem:[%s6663_s24 + $0x6c8] ss:$16 sps:$4 sm:$0xff]   ;;  %v5968_v12 = vld [vmem:[%s6663_s24 + $0x6e4] ss:$16 sps:$4 sm:$0xff]  }
 0x295   : > { %2730 = vmatprep.subr.bf16.mxu0 %v5876_v13  ;;  %2894 = vmatprep.subr.bf16.mxu1 %v5879_v14  ;;  %v5971_v13 = vld [vmem:[%s6663_s24 + $0x6ec] ss:$16 sps:$4 sm:$0xff]   ;;  %v5966_v14 = vld [vmem:[%s6663_s24 + $0x6e0] ss:$16 sps:$4 sm:$0xff]  }
 0x298   : > { %2731 = vmatpush1.bf16.msra.mxu0 %v5874_v15  ;;  %2895 = vmatpush1.bf16.msra.mxu1 %v5877_v16  ;;  %v5969_v15 = vld [vmem:[%s6663_s24 + $0x6e8] ss:$16 sps:$4 sm:$0xff]   ;;  %v5974_v16 = vld [vmem:[%s6663_s24 + $0x704] ss:$16 sps:$4 sm:$0xff]  }
 0x299   : > { %2732 = vmatprep.subr.bf16.mxu0 %v5882_v21  ;;  %2896 = vmatprep.subr.bf16.mxu1 %v5885_v22  ;;  %v5977_v21 = vld [vmem:[%s6663_s24 + $0x70c] ss:$16 sps:$4 sm:$0xff]   ;;  %v5972_v22 = vld [vmem:[%s6663_s24 + $0x700] ss:$16 sps:$4 sm:$0xff]  }
 0x29c   : > { %2733 = vmatpush1.bf16.msra.mxu0 %v5880_v24  ;;  %2897 = vmatpush1.bf16.msra.mxu1 %v5883_v25  ;;  %v5975_v24 = vld [vmem:[%s6663_s24 + $0x708] ss:$16 sps:$4 sm:$0xff]   ;;  %v5980_v25 = vld [vmem:[%s6663_s24 + $0x724] ss:$16 sps:$4 sm:$0xff]  }
 0x29d   : > { %2734 = vmatprep.subr.bf16.mxu0 %v5888_v27  ;;  %2898 = vmatprep.subr.bf16.mxu1 %v5891_v28  ;;  %v5983_v27 = vld [vmem:[%s6663_s24 + $0x72c] ss:$16 sps:$4 sm:$0xff]   ;;  %v5978_v28 = vld [vmem:[%s6663_s24 + $0x720] ss:$16 sps:$4 sm:$0xff]  }
 0x2a0   : > { %2735 = vmatpush1.bf16.msra.mxu0 %v5886_v30  ;;  %2899 = vmatpush1.bf16.msra.mxu1 %v5889_v31  ;;  %v5981_v30 = vld [vmem:[%s6663_s24 + $0x728] ss:$16 sps:$4 sm:$0xff]   ;;  %v5986_v31 = vld [vmem:[%s6663_s24 + $0x744] ss:$16 sps:$4 sm:$0xff]  }
 0x2a1   : > { %2736 = vmatprep.subr.bf16.mxu0 %v5894_v17  ;;  %2900 = vmatprep.subr.bf16.mxu1 %v5897_v33  ;;  %v5989_v17 = vld [vmem:[%s6663_s24 + $0x74c] ss:$16 sps:$4 sm:$0xff]   ;;  %v5984_v33 = vld [vmem:[%s6663_s24 + $0x740] ss:$16 sps:$4 sm:$0xff]  }
 0x2a4   : > { %2737 = vmatpush1.bf16.msra.mxu0 %v5892_v18  ;;  %2901 = vmatpush1.bf16.msra.mxu1 %v5895_v34  ;;  %v5987_v18 = vld [vmem:[%s6663_s24 + $0x748] ss:$16 sps:$4 sm:$0xff]   ;;  %v5992_v34 = vld [vmem:[%s6663_s24 + $0x764] ss:$16 sps:$4 sm:$0xff]  }
 0x2a5   : > { %2738 = vmatprep.subr.bf16.mxu0 %v5900_v19  ;;  %2902 = vmatprep.subr.bf16.mxu1 %v5903_v35  ;;  %v5995_v19 = vld [vmem:[%s6663_s24 + $0x76c] ss:$16 sps:$4 sm:$0xff]   ;;  %v5990_v35 = vld [vmem:[%s6663_s24 + $0x760] ss:$16 sps:$4 sm:$0xff]  }
 0x2a8   : > { %2739 = vmatpush1.bf16.msra.mxu0 %v5898_v20  ;;  %2903 = vmatpush1.bf16.msra.mxu1 %v5901_v36  ;;  %v5993_v20 = vld [vmem:[%s6663_s24 + $0x768] ss:$16 sps:$4 sm:$0xff]   ;;  %v5998_v36 = vld [vmem:[%s6663_s24 + $0x784] ss:$16 sps:$4 sm:$0xff]  }
 0x2a9   : > { %2740 = vmatprep.subr.bf16.mxu0 %v5906_v23  ;;  %2904 = vmatprep.subr.bf16.mxu1 %v5909_v26  ;;  %v6001_v23 = vld [vmem:[%s6663_s24 + $0x78c] ss:$16 sps:$4 sm:$0xff]   ;;  %v5996_v26 = vld [vmem:[%s6663_s24 + $0x780] ss:$16 sps:$4 sm:$0xff]  }
 0x2ac   : > { %2741 = vmatpush1.bf16.msra.mxu0 %v5904_v29  ;;  %2905 = vmatpush1.bf16.msra.mxu1 %v5907_v32  ;;  %v5999_v29 = vld [vmem:[%s6663_s24 + $0x788] ss:$16 sps:$4 sm:$0xff]   ;;  %v6004_v32 = vld [vmem:[%s6663_s24 + $0x7a4] ss:$16 sps:$4 sm:$0xff]  }
 0x2ad   : > { %2742 = vmatprep.subr.bf16.mxu0 %v5912_v37  ;;  %2906 = vmatprep.subr.bf16.mxu1 %v5915_v38  ;;  %v6007_v37 = vld [vmem:[%s6663_s24 + $0x7ac] ss:$16 sps:$4 sm:$0xff]   ;;  %v6002_v38 = vld [vmem:[%s6663_s24 + $0x7a0] ss:$16 sps:$4 sm:$0xff]  }
 0x2b0   : > { %2743 = vmatpush1.bf16.msra.mxu0 %v5910_v39  ;;  %2907 = vmatpush1.bf16.msra.mxu1 %v5913_v40  ;;  %v6005_v39 = vld [vmem:[%s6663_s24 + $0x7a8] ss:$16 sps:$4 sm:$0xff]   ;;  %v6010_v40 = vld [vmem:[%s6663_s24 + $0x7c4] ss:$16 sps:$4 sm:$0xff]  }
 0x2b1   : > { %2744 = vmatprep.subr.bf16.mxu0 %v5918_v41  ;;  %2908 = vmatprep.subr.bf16.mxu1 %v5921_v42  ;;  %v6013_v41 = vld [vmem:[%s6663_s24 + $0x7cc] ss:$16 sps:$4 sm:$0xff]   ;;  %v6008_v42 = vld [vmem:[%s6663_s24 + $0x7c0] ss:$16 sps:$4 sm:$0xff]  }
 0x2b4   : > { %2745 = vmatpush1.bf16.msra.mxu0 %v5916_v43  ;;  %2909 = vmatpush1.bf16.msra.mxu1 %v5919_v44  ;;  %v6011_v43 = vld [vmem:[%s6663_s24 + $0x7c8] ss:$16 sps:$4 sm:$0xff]   ;;  %v6016_v44 = vld [vmem:[%s6663_s24 + $0x7e4] ss:$16 sps:$4 sm:$0xff]  }
 0x2b5   : > { %2755 = vmatprep.subr.bf16.mxu0 %v5926_v45  ;;  %2919 = vmatprep.subr.bf16.mxu1 %v5929_v46  ;;  %v6019_v45 = vld [vmem:[%s6663_s24 + $0x7ec] ss:$16 sps:$4 sm:$0xff]   ;;  %v3008_v46 = vld [vmem:[%s6661_s30] sm:$0xff] }
 0x2b7   : > { %2747 = vmatmul.mubr.bf16.vlgmr.msra.gmra.mrb[0].mxu0 %v5050_v47  ;;  %2911 = vmatmul.mubr.bf16.vlgmr.msra.gmra.mrb[0].mxu1 %v5050_v47  ;;  %v3012_v47 = vld [vmem:[%s6661_s30 + $0x20] sm:$0xff] }
 0x2b8   : > { %2756 = vmatpush1.bf16.msra.mxu0 %v5924_v50  ;;  %2920 = vmatpush1.bf16.msra.mxu1 %v5927_v51  ;;  %v3136_v50 = vld [vmem:[%s6661_s30 + $0x400] sm:$0xff] }
 0x2b9   : > { %2757 = vmatprep.subr.bf16.mxu0 %v5932_v52  ;;  %2921 = vmatprep.subr.bf16.mxu1 %v5935_v53  ;;  %v3140_v51 = vld [vmem:[%s6661_s30 + $0x420] sm:$0xff]  ;;  %v6017_v53 = vld [vmem:[%s6663_s24 + $0x7e8] ss:$16 sps:$4 sm:$0xff]  }
 0x2ba   : > { %2787 = vmatprep.mubr.bf16.mxu0 %v5053_v54  ;;  %2951 = vmatprep.mubr.bf16.mxu1 %v5053_v54  ;;  %v6014_v52 = vld [vmem:[%s6663_s24 + $0x7e0] ss:$16 sps:$4 sm:$0xff]   ;;  %v5311_v54 = vcombine.high %v3008_v46, %v3012_v47 }
 0x2bc   : > { %2758 = vmatpush1.bf16.msra.mxu0 %v5930_v48  ;;  %2922 = vmatpush1.bf16.msra.mxu1 %v5933_v55  ;;  %v5439_v48 = vcombine.high %v3136_v50, %v3140_v51  ;;  %v3016_v55 = vld [vmem:[%s6661_s30 + $0x40] sm:$0xff] }
 0x2bd   : > { %2759 = vmatprep.subr.bf16.mxu0 %v5938_v56  ;;  %2923 = vmatprep.subr.bf16.mxu1 %v5941_v57  ;;  %v3020_v56 = vld [vmem:[%s6661_s30 + $0x60] sm:$0xff] }
 0x2be   : > { %v3144_v57 = vld [vmem:[%s6661_s30 + $0x440] sm:$0xff] }
 0x2c0   : > { %2760 = vmatpush1.bf16.msra.mxu0 %v5936_v58  ;;  %2924 = vmatpush1.bf16.msra.mxu1 %v5939_v59  ;;  %v3148_v58 = vld [vmem:[%s6661_s30 + $0x460] sm:$0xff]  ;;  %v5052_v59 = vcombine.low %v6927_v49, %v6927_v49  ;;  %v5318_v49 = vcombine.low %v3016_v55, %v3020_v56 }
 0x2c1   : > { %2761 = vmatprep.subr.bf16.mxu0 %v5944_v60  ;;  %2925 = vmatprep.subr.bf16.mxu1 %v5947_v61  ;;  %v5310_v60 = vcombine.low %v3008_v46, %v3012_v47  ;;  %v5438_v61 = vcombine.low %v3136_v50, %v3140_v51  ;;  %v3072_v51 = vld [vmem:[%s6661_s30 + $0x200] sm:$0xff] }
 0x2c4   : > { %2762 = vmatpush1.bf16.msra.mxu0 %v5942_v62  ;;  %2926 = vmatpush1.bf16.msra.mxu1 %v5945_v63  ;;  %v5319_v62 = vcombine.high %v3016_v55, %v3020_v56  ;;  %v5447_v63 = vcombine.high %v3144_v57, %v3148_v58 }
 0x2c5   : > { %2763 = vmatprep.subr.bf16.mxu0 %v5950_v0  ;;  %2927 = vmatprep.subr.bf16.mxu1 %v5953_v1  ;;  %v3024_v0 = vld [vmem:[%s6661_s30 + $0x80] sm:$0xff] }
 0x2c6   : > { %v3028_v1 = vld [vmem:[%s6661_s30 + $0xa0] sm:$0xff] }
 0x2c8   : > { %2764 = vmatpush1.bf16.msra.mxu0 %v5948_v2  ;;  %2928 = vmatpush1.bf16.msra.mxu1 %v5951_v3  ;;  %v3152_v2 = vld [vmem:[%s6661_s30 + $0x480] sm:$0xff] }
 0x2c9   : > { %2765 = vmatprep.subr.bf16.mxu0 %v5956_v4  ;;  %2929 = vmatprep.subr.bf16.mxu1 %v5959_v5  ;;  %v3156_v3 = vld [vmem:[%s6661_s30 + $0x4a0] sm:$0xff]  ;;  %v5446_v4 = vcombine.low %v3144_v57, %v3148_v58  ;;  %v5327_v5 = vcombine.high %v3024_v0, %v3028_v1 }
 0x2ca   : > { %v3080_v58 = vld [vmem:[%s6661_s30 + $0x240] sm:$0xff] }
 0x2cc   : > { %2766 = vmatpush1.bf16.msra.mxu0 %v5954_v6  ;;  %2930 = vmatpush1.bf16.msra.mxu1 %v5957_v7  ;;  %v5455_v6 = vcombine.high %v3152_v2, %v3156_v3  ;;  %v3032_v7 = vld [vmem:[%s6661_s30 + $0xc0] sm:$0xff] }
 0x2cd   : > { %2767 = vmatprep.subr.bf16.mxu0 %v5962_v8  ;;  %2931 = vmatprep.subr.bf16.mxu1 %v5965_v9  ;;  %v3036_v8 = vld [vmem:[%s6661_s30 + $0xe0] sm:$0xff] }
 0x2ce   : > { %v3160_v9 = vld [vmem:[%s6661_s30 + $0x4c0] sm:$0xff] }
 0x2d0   : > { %2768 = vmatpush1.bf16.msra.mxu0 %v5960_v10  ;;  %2932 = vmatpush1.bf16.msra.mxu1 %v5963_v11  ;;  %v3164_v10 = vld [vmem:[%s6661_s30 + $0x4e0] sm:$0xff]  ;;  %v5326_v11 = vcombine.low %v3024_v0, %v3028_v1 }
 0x2d1   : > { %2769 = vmatprep.subr.bf16.mxu0 %v5968_v12  ;;  %2933 = vmatprep.subr.bf16.mxu1 %v5971_v13  ;;  %v5454_v12 = vcombine.low %v3152_v2, %v3156_v3  ;;  %v5335_v13 = vcombine.high %v3032_v7, %v3036_v8  ;;  %v3088_v2 = vld [vmem:[%s6661_s30 + $0x280] sm:$0xff] }
 0x2d2   : > { %v3092_v3 = vld [vmem:[%s6661_s30 + $0x2a0] sm:$0xff] }
 0x2d4   : > { %2770 = vmatpush1.bf16.msra.mxu0 %v5966_v14  ;;  %2934 = vmatpush1.bf16.msra.mxu1 %v5969_v15  ;;  %v5463_v14 = vcombine.high %v3160_v9, %v3164_v10  ;;  %v3040_v15 = vld [vmem:[%s6661_s30 + $0x100] sm:$0xff] }
 0x2d5   : > { %2771 = vmatprep.subr.bf16.mxu0 %v5974_v16  ;;  %2935 = vmatprep.subr.bf16.mxu1 %v5977_v21  ;;  %v3044_v16 = vld [vmem:[%s6661_s30 + $0x120] sm:$0xff] }
 0x2d6   : > { %v3168_v21 = vld [vmem:[%s6661_s30 + $0x500] sm:$0xff] }
 0x2d8   : > { %2772 = vmatpush1.bf16.msra.mxu0 %v5972_v22  ;;  %2936 = vmatpush1.bf16.msra.mxu1 %v5975_v24  ;;  %v3172_v22 = vld [vmem:[%s6661_s30 + $0x520] sm:$0xff]  ;;  %v5334_v24 = vcombine.low %v3032_v7, %v3036_v8 }
 0x2d9   : > { %2773 = vmatprep.subr.bf16.mxu0 %v5980_v25  ;;  %2937 = vmatprep.subr.bf16.mxu1 %v5983_v27  ;;  %v5462_v25 = vcombine.low %v3160_v9, %v3164_v10  ;;  %v5343_v27 = vcombine.high %v3040_v15, %v3044_v16  ;;  %v3096_v9 = vld [vmem:[%s6661_s30 + $0x2c0] sm:$0xff] }
 0x2da   : > { %v3100_v10 = vld [vmem:[%s6661_s30 + $0x2e0] sm:$0xff] }
 0x2dc   : > { %2774 = vmatpush1.bf16.msra.mxu0 %v5978_v28  ;;  %2938 = vmatpush1.bf16.msra.mxu1 %v5981_v30  ;;  %v5471_v28 = vcombine.high %v3168_v21, %v3172_v22  ;;  %v3048_v30 = vld [vmem:[%s6661_s30 + $0x140] sm:$0xff] }
 0x2dd   : > { %2775 = vmatprep.subr.bf16.mxu0 %v5986_v31  ;;  %2939 = vmatprep.subr.bf16.mxu1 %v5989_v17  ;;  %v3052_v31 = vld [vmem:[%s6661_s30 + $0x160] sm:$0xff] }
 0x2de   : > { %v3176_v17 = vld [vmem:[%s6661_s30 + $0x540] sm:$0xff] }
 0x2e0   : > { %2776 = vmatpush1.bf16.msra.mxu0 %v5984_v33  ;;  %2940 = vmatpush1.bf16.msra.mxu1 %v5987_v18  ;;  %v3180_v33 = vld [vmem:[%s6661_s30 + $0x560] sm:$0xff]  ;;  %v5342_v18 = vcombine.low %v3040_v15, %v3044_v16 }
 0x2e1   : > { %2777 = vmatprep.subr.bf16.mxu0 %v5992_v34  ;;  %2941 = vmatprep.subr.bf16.mxu1 %v5995_v19  ;;  %v5470_v34 = vcombine.low %v3168_v21, %v3172_v22  ;;  %v5351_v19 = vcombine.high %v3048_v30, %v3052_v31  ;;  %v3104_v21 = vld [vmem:[%s6661_s30 + $0x300] sm:$0xff] }
 0x2e2   : > { %v3108_v22 = vld [vmem:[%s6661_s30 + $0x320] sm:$0xff] }
 0x2e4   : > { %2778 = vmatpush1.bf16.msra.mxu0 %v5990_v35  ;;  %2942 = vmatpush1.bf16.msra.mxu1 %v5993_v20  ;;  %v5479_v35 = vcombine.high %v3176_v17, %v3180_v33  ;;  %v3056_v20 = vld [vmem:[%s6661_s30 + $0x180] sm:$0xff] }
 0x2e5   : > { %2779 = vmatprep.subr.bf16.mxu0 %v5998_v36  ;;  %2943 = vmatprep.subr.bf16.mxu1 %v6001_v23  ;;  %v3060_v36 = vld [vmem:[%s6661_s30 + $0x1a0] sm:$0xff] }
 0x2e6   : > { %v3184_v23 = vld [vmem:[%s6661_s30 + $0x580] sm:$0xff] }
 0x2e8   : > { %2780 = vmatpush1.bf16.msra.mxu0 %v5996_v26  ;;  %2944 = vmatpush1.bf16.msra.mxu1 %v5999_v29  ;;  %v3188_v26 = vld [vmem:[%s6661_s30 + $0x5a0] sm:$0xff]  ;;  %v5350_v29 = vcombine.low %v3048_v30, %v3052_v31 }
 0x2e9   : > { %2781 = vmatprep.subr.bf16.mxu0 %v6004_v32  ;;  %2945 = vmatprep.subr.bf16.mxu1 %v6007_v37  ;;  %v5478_v32 = vcombine.low %v3176_v17, %v3180_v33  ;;  %v5359_v37 = vcombine.high %v3056_v20, %v3060_v36  ;;  %v3112_v30 = vld [vmem:[%s6661_s30 + $0x340] sm:$0xff] }
 0x2ea   : > { %v3116_v31 = vld [vmem:[%s6661_s30 + $0x360] sm:$0xff] }
 0x2ec   : > { %2782 = vmatpush1.bf16.msra.mxu0 %v6002_v38  ;;  %2946 = vmatpush1.bf16.msra.mxu1 %v6005_v39  ;;  %v5487_v38 = vcombine.high %v3184_v23, %v3188_v26  ;;  %v3064_v39 = vld [vmem:[%s6661_s30 + $0x1c0] sm:$0xff] }
 0x2ed   : > { %2783 = vmatprep.subr.bf16.mxu0 %v6010_v40  ;;  %2947 = vmatprep.subr.bf16.mxu1 %v6013_v41  ;;  %v3068_v40 = vld [vmem:[%s6661_s30 + $0x1e0] sm:$0xff] }
 0x2ee   : > { %v3192_v41 = vld [vmem:[%s6661_s30 + $0x5c0] sm:$0xff]  ;;  %v5366_v47 = vcombine.low %v3064_v39, %v3068_v40 }
 0x2f0   : > { %2784 = vmatpush1.bf16.msra.mxu0 %v6008_v42  ;;  %2948 = vmatpush1.bf16.msra.mxu1 %v6011_v43  ;;  %v3196_v42 = vld [vmem:[%s6661_s30 + $0x5e0] sm:$0xff]  ;;  %v5358_v43 = vcombine.low %v3056_v20, %v3060_v36 }
 0x2f1   : > { %2785 = vmatprep.subr.bf16.mxu0 %v6016_v44  ;;  %2949 = vmatprep.subr.bf16.mxu1 %v6019_v45  ;;  %v5486_v44 = vcombine.low %v3184_v23, %v3188_v26  ;;  %v5367_v45 = vcombine.high %v3064_v39, %v3068_v40  ;;  %v5495_v46 = vcombine.high %v3192_v41, %v3196_v42  ;;  %v3124_v36 = vld [vmem:[%s6661_s30 + $0x3a0] sm:$0xff] }
 0x2f2   : > { %v5494_v50 = vcombine.low %v3192_v41, %v3196_v42  ;;  %v3248_v23 = vld [vmem:[%s6661_s30 + $0x780] sm:$0xff] }
 0x2f3   : > { %v3252_v26 = vld [vmem:[%s6661_s30 + $0x7a0] sm:$0xff] }
 0x2f4   : > { %2786 = vmatpush1.bf16.msra.mxu0 %v6014_v52  ;;  %2950 = vmatpush1.bf16.msra.mxu1 %v6017_v53  ;;  %v3076_v52 = vld [vmem:[%s6661_s30 + $0x220] sm:$0xff] }
 0x2f5   : > { %4544 = vmatprep.subr.bf16.mxu0 %v5311_v54  ;;  %4585 = vmatprep.subr.bf16.mxu1 %v5439_v48  ;;  %v3200_v53 = vld [vmem:[%s6661_s30 + $0x600] sm:$0xff]  ;;  %v5375_v54 = vcombine.high %v3072_v51, %v3076_v52  ;;  %v5374_v55 = vcombine.low %v3072_v51, %v3076_v52  ;;  %v7060_v51 = vld [vmem:[%s6661_s30 + $0x8] sm:$0xff] }
 0x2f6   : > { %v3204_v48 = vld [vmem:[%s6661_s30 + $0x620] sm:$0xff]  ;;  %v7063_v52 = vld [vmem:[%s6661_s30 + $0x28] sm:$0xff] }
 0x2f7   : > { %2788 = vmatmul.mubr.bf16.vlgmr.msra.gmra.mrb[0].mxu0 %v5052_v59  ;;  %2952 = vmatmul.mubr.bf16.vlgmr.msra.gmra.mrb[0].mxu1 %v5052_v59  ;;  %v5502_v56 = vcombine.low %v3200_v53, %v3204_v48  ;;  %v5503_v57 = vcombine.high %v3200_v53, %v3204_v48  ;;  %v3084_v59 = vld [vmem:[%s6661_s30 + $0x260] sm:$0xff]  ;;  %v7066_v53 = vld [vmem:[%s6661_s30 + $0x408] sm:$0xff] }
 0x2f8   : > { %4545 = vmatpush1.bf16.msra.mxu0 %v5310_v60  ;;  %4586 = vmatpush1.bf16.msra.mxu1 %v5438_v61  ;;  %v3208_v60 = vld [vmem:[%s6661_s30 + $0x640] sm:$0xff]  ;;  %v5383_v61 = vcombine.high %v3080_v58, %v3084_v59  ;;  %v7071_v48 = vld [vmem:[%s6661_s30 + $0x428] sm:$0xff] }
 0x2f9   : > { %4546 = vmatprep.subr.bf16.mxu0 %v5319_v62  ;;  %4587 = vmatprep.subr.bf16.mxu1 %v5447_v63  ;;  %v3212_v62 = vld [vmem:[%s6661_s30 + $0x660] sm:$0xff]  ;;  %v5382_v63 = vcombine.low %v3080_v58, %v3084_v59  ;;  %v1304_v58 = vlaneseq }
 0x2fa   : > { %v5510_v0 = vcombine.low %v3208_v60, %v3212_v62  ;;  %v5511_v1 = vcombine.high %v3208_v60, %v3212_v62  ;;  %v3128_v39 = vld [vmem:[%s6661_s30 + $0x3c0] sm:$0xff] }
 0x2fb   : > { %v3132_v40 = vld [vmem:[%s6661_s30 + $0x3e0] sm:$0xff]  ;;  %v7079_v59 = vshrl.u32 %v1304_v58, 7 }
 0x2fc   : > { %4547 = vmatpush1.bf16.msra.mxu0 %v5318_v49  ;;  %4588 = vmatpush1.bf16.msra.mxu1 %v5446_v4  ;;  %v3216_v49 = vld [vmem:[%s6661_s30 + $0x680] sm:$0xff]  ;;  %v5391_v4 = vcombine.high %v3088_v2, %v3092_v3 }
 0x2fd   : > { %4548 = vmatprep.subr.bf16.mxu0 %v5327_v5  ;;  %4589 = vmatprep.subr.bf16.mxu1 %v5455_v6  ;;  %v3220_v5 = vld [vmem:[%s6661_s30 + $0x6a0] sm:$0xff]  ;;  %v5390_v6 = vcombine.low %v3088_v2, %v3092_v3  ;;  %v1306_v60 = vsub.s32 0, %v7079_v59 }
 0x2fe   : > { %v5518_v7 = vcombine.low %v3216_v49, %v3220_v5  ;;  %v5519_v8 = vcombine.high %v3216_v49, %v3220_v5  ;;  %v3256_v41 = vld [vmem:[%s6661_s30 + $0x7c0] sm:$0xff] }
 0x2ff   : > { %v3260_v42 = vld [vmem:[%s6661_s30 + $0x7e0] sm:$0xff] }
 0x300   : > { %4549 = vmatpush1.bf16.msra.mxu0 %v5326_v11  ;;  %4590 = vmatpush1.bf16.msra.mxu1 %v5454_v12  ;;  %v3224_v11 = vld [vmem:[%s6661_s30 + $0x6c0] sm:$0xff]  ;;  %v5399_v12 = vcombine.high %v3096_v9, %v3100_v10 }
 0x301   : > { %4550 = vmatprep.subr.bf16.mxu0 %v5335_v13  ;;  %4591 = vmatprep.subr.bf16.mxu1 %v5463_v14  ;;  %v3228_v13 = vld [vmem:[%s6661_s30 + $0x6e0] sm:$0xff]  ;;  %v5398_v14 = vcombine.low %v3096_v9, %v3100_v10 }
 0x302   : > { %v5526_v15 = vcombine.low %v3224_v11, %v3228_v13  ;;  %v5527_v16 = vcombine.high %v3224_v11, %v3228_v13  ;;  %v1302_v62 = vld [vmem:[%s830_s22] sm:$0xf] }
 0x304   : > { %4551 = vmatpush1.bf16.msra.mxu0 %v5334_v24  ;;  %4592 = vmatpush1.bf16.msra.mxu1 %v5462_v25  ;;  %v3232_v24 = vld [vmem:[%s6661_s30 + $0x700] sm:$0xff]  ;;  %v5406_v25 = vcombine.low %v3104_v21, %v3108_v22 }
 0x305   : > { %4552 = vmatprep.subr.bf16.mxu0 %v5343_v27  ;;  %4593 = vmatprep.subr.bf16.mxu1 %v5471_v28  ;;  %v5407_v27 = vcombine.high %v3104_v21, %v3108_v22  ;;  %v3236_v28 = vld [vmem:[%s6661_s30 + $0x720] sm:$0xff] }
 0x306   : > { %v5534_v17 = vcombine.low %v3232_v24, %v3236_v28  ;;  %v5535_v33 = vcombine.high %v3232_v24, %v3236_v28 }
 0x308   : > { %4553 = vmatpush1.bf16.msra.mxu0 %v5342_v18  ;;  %4594 = vmatpush1.bf16.msra.mxu1 %v5470_v34  ;;  %v5415_v18 = vcombine.high %v3112_v30, %v3116_v31  ;;  %v3240_v34 = vld [vmem:[%s6661_s30 + $0x740] sm:$0xff] }
 0x309   : > { %4554 = vmatprep.subr.bf16.mxu0 %v5351_v19  ;;  %4595 = vmatprep.subr.bf16.mxu1 %v5479_v35  ;;  %v3244_v19 = vld [vmem:[%s6661_s30 + $0x760] sm:$0xff] }
 0x30a   : > { %v3120_v35 = vld [vmem:[%s6661_s30 + $0x380] sm:$0xff]  ;;  %v5543_v20 = vcombine.high %v3240_v34, %v3244_v19 }
 0x30c   : > { %4555 = vmatpush1.bf16.msra.mxu0 %v5350_v29  ;;  %4596 = vmatpush1.bf16.msra.mxu1 %v5478_v32  ;;  %v5414_v29 = vcombine.low %v3112_v30, %v3116_v31  ;;  %v5542_v32 = vcombine.low %v3240_v34, %v3244_v19 }
 0x30d   : > { %4556 = vmatprep.subr.bf16.mxu0 %v5359_v37  ;;  %4597 = vmatprep.subr.bf16.mxu1 %v5487_v38  ;;  %v5423_v37 = vcombine.high %v3120_v35, %v3124_v36  ;;  %v5551_v38 = vcombine.high %v3248_v23, %v3252_v26 }
 0x310   : > { %4557 = vmatpush1.bf16.msra.mxu0 %v5358_v43  ;;  %4598 = vmatpush1.bf16.msra.mxu1 %v5486_v44  ;;  %v5422_v43 = vcombine.low %v3120_v35, %v3124_v36  ;;  %v5550_v44 = vcombine.low %v3248_v23, %v3252_v26 }
 0x311   : > { %4558 = vmatprep.subr.bf16.mxu0 %v5367_v45  ;;  %4599 = vmatprep.subr.bf16.mxu1 %v5495_v46  ;;  %v5431_v45 = vcombine.high %v3128_v39, %v3132_v40  ;;  %v5559_v46 = vcombine.high %v3256_v41, %v3260_v42 }
 0x314   : > { %4559 = vmatpush1.bf16.msra.mxu0 %v5366_v47  ;;  %4600 = vmatpush1.bf16.msra.mxu1 %v5494_v50  ;;  %v5430_v47 = vcombine.low %v3128_v39, %v3132_v40  ;;  %v5558_v50 = vcombine.low %v3256_v41, %v3260_v42 }
 0x315   : > { %4560 = vmatprep.subr.bf16.mxu0 %v5375_v54  ;;  %4601 = vmatprep.subr.bf16.mxu1 %v5503_v57  ;;  %v5313_v54 = vcombine.high %v7060_v51, %v7063_v52  ;;  %v5441_v57 = vcombine.high %v7066_v53, %v7071_v48 }
 0x318   : > { %4561 = vmatpush1.bf16.msra.mxu0 %v5374_v55  ;;  %4602 = vmatpush1.bf16.msra.mxu1 %v5502_v56  ;;  %v5312_v55 = vcombine.low %v7060_v51, %v7063_v52  ;;  %v5440_v56 = vcombine.low %v7066_v53, %v7071_v48  ;;  %v3037_v51 = vld [vmem:[%s6661_s30 + $0xe8] sm:$0xff] }
 0x319   : > { %4562 = vmatprep.subr.bf16.mxu0 %v5383_v61  ;;  %4603 = vmatprep.subr.bf16.mxu1 %v5511_v1  ;;  %v1314_v61 = vsub.s32 2, %v7079_v59  ;;  %v1307_v1 = vrot.slane %v1302_v62, %v1306_v60  ;;  %v3161_v52 = vld [vmem:[%s6661_s30 + $0x4c8] sm:$0xff] }
 0x31b   : > { %v1315_v2 = vrot.slane %v1302_v62, %v1314_v61 }
 0x31c   : > { %4563 = vmatpush1.bf16.msra.mxu0 %v5382_v63  ;;  %4604 = vmatpush1.bf16.msra.mxu1 %v5510_v0  ;;  %v1310_v63 = vsub.s32 1, %v7079_v59  ;;  %v1318_v0 = vsub.s32 3, %v7079_v59 }
 0x31d   : > { %4564 = vmatprep.subr.bf16.mxu0 %v5391_v4  ;;  %4605 = vmatprep.subr.bf16.mxu1 %v5519_v8 }
 0x31e   : > { %v1311_v3 = vrot.slane %v1302_v62, %v1310_v63  ;;  %v1319_v49 = vrot.slane %v1302_v62, %v1318_v0  ;;  %v3017_v62 = vld [vmem:[%s6661_s30 + $0x48] sm:$0xff] }
 0x320   : > { %4565 = vmatpush1.bf16.msra.mxu0 %v5390_v6  ;;  %4606 = vmatpush1.bf16.msra.mxu1 %v5518_v7 }
 0x321   : > { %4566 = vmatprep.subr.bf16.mxu0 %v5399_v12  ;;  %4607 = vmatprep.subr.bf16.mxu1 %v5527_v16 }
 0x324   : > { %4567 = vmatpush1.bf16.msra.mxu0 %v5398_v14  ;;  %4608 = vmatpush1.bf16.msra.mxu1 %v5526_v15 }
 0x325   : > { %4568 = vmatprep.subr.bf16.mxu0 %v5407_v27  ;;  %4609 = vmatprep.subr.bf16.mxu1 %v5535_v33 }
 0x328   : > { %4569 = vmatpush1.bf16.msra.mxu0 %v5406_v25  ;;  %4610 = vmatpush1.bf16.msra.mxu1 %v5534_v17 }
 0x329   : > { %4570 = vmatprep.subr.bf16.mxu0 %v5415_v18  ;;  %4611 = vmatprep.subr.bf16.mxu1 %v5543_v20 }
 0x32c   : > { %4571 = vmatpush1.bf16.msra.mxu0 %v5414_v29  ;;  %4612 = vmatpush1.bf16.msra.mxu1 %v5542_v32 }
 0x32d   : > { %4572 = vmatprep.subr.bf16.mxu0 %v5423_v37  ;;  %4613 = vmatprep.subr.bf16.mxu1 %v5551_v38 }
 0x330   : > { %4573 = vmatpush1.bf16.msra.mxu0 %v5422_v43  ;;  %4614 = vmatpush1.bf16.msra.mxu1 %v5550_v44 }
 0x331   : > { %4574 = vmatprep.subr.bf16.mxu0 %v5431_v45  ;;  %4615 = vmatprep.subr.bf16.mxu1 %v5559_v46 }
 0x334   : > { %4575 = vmatpush1.bf16.msra.mxu0 %v5430_v47  ;;  %4616 = vmatpush1.bf16.msra.mxu1 %v5558_v50 }
 0x335   : > { %4626 = vmatprep.subr.bf16.mxu0 %v5313_v54  ;;  %4667 = vmatprep.subr.bf16.mxu1 %v5441_v57 }
 0x3ca   : > { %v2789_v4 = vpop.f32.mrb[0].mxu0  ;;  %v2953_v5 = vpop.f32.mrb[0].mxu1 }
 0x3cb   : > { %v5575_v6 = vadd.f32 %v2789_v4, %v1307_v1  ;;  %v5577_v7 = vadd.f32 %v2953_v5, %v1315_v2  ;;  %v2791_v8 = vpop.f32.mrb[1].mxu0  ;;  %v2955_v9 = vpop.f32.mrb[1].mxu1  ;;  %v3021_v1 = vld [vmem:[%s6661_s30 + $0x68] sm:$0xff] }
 0x3cc   : > { %v5576_v10 = vadd.f32 %v2791_v8, %v1311_v3  ;;  %v5578_v11 = vadd.f32 %v2955_v9, %v1319_v49  ;;  %v2793_v12 = vpop.f32.mrb[2].mxu0  ;;  %v2957_v13 = vpop.f32.mrb[2].mxu1  ;;  %v3145_v3 = vld [vmem:[%s6661_s30 + $0x448] sm:$0xff] }
 0x3cd   : > { %v2960_v14 = vmul.f32 %v5575_v6, %v5575_v6  ;;  %v2962_v15 = vmul.f32 %v5577_v7, %v5577_v7  ;;  %v2794_v16 = vpop.f32.mrb[3].mxu0  ;;  %v2958_v21 = vpop.f32.mrb[3].mxu1  ;;  %v3149_v49 = vld [vmem:[%s6661_s30 + $0x468] sm:$0xff]  ;;  %v5320_v13 = vcombine.low %v3017_v62, %v3021_v1 }
 0x3ce   : > { %v2961_v22 = vmul.f32 %v5576_v10, %v5576_v10  ;;  %v2963_v24 = vmul.f32 %v5578_v11, %v5578_v11  ;;  %v3025_v9 = vld [vmem:[%s6661_s30 + $0x88] sm:$0xff] }
 0x3cf   : > { %v2964_v25 = vmul.f32 %v5575_v6, %v2960_v14  ;;  %v2966_v27 = vmul.f32 %v5577_v7, %v2962_v15  ;;  %v3157_v12 = vld [vmem:[%s6661_s30 + $0x4a8] sm:$0xff]  ;;  %v5448_v14 = vcombine.low %v3145_v3, %v3149_v49 }
 0x3d0   : > { %v2965_v28 = vmul.f32 %v5576_v10, %v2961_v22  ;;  %v2967_v30 = vmul.f32 %v5578_v11, %v2963_v24  ;;  %v3033_v21 = vld [vmem:[%s6661_s30 + $0xc8] sm:$0xff] }
 0x3d1   : > { %v2968_v31 = vmul.f32 0.044715, %v2964_v25  ;;  %v2970_v17 = vmul.f32 0.044715, %v2966_v27  ;;  %v3041_v24 = vld [vmem:[%s6661_s30 + $0x108] sm:$0xff] }
 0x3d2   : > { %v2969_v33 = vmul.f32 0.044715, %v2965_v28  ;;  %v2971_v18 = vmul.f32 0.044715, %v2967_v30  ;;  %v3045_v25 = vld [vmem:[%s6661_s30 + $0x128] sm:$0xff]  ;;  %v5336_v30 = vcombine.low %v3033_v21, %v3037_v51 }
 0x3d3   : > { %v2972_v34 = vadd.f32 %v5575_v6, %v2968_v31  ;;  %v2974_v19 = vadd.f32 %v5577_v7, %v2970_v17  ;;  %v3169_v27 = vld [vmem:[%s6661_s30 + $0x508] sm:$0xff]  ;;  %v5345_v17 = vcombine.high %v3041_v24, %v3045_v25 }
 0x3d4   : > { %v2973_v35 = vadd.f32 %v5576_v10, %v2969_v33  ;;  %v2975_v20 = vadd.f32 %v5578_v11, %v2971_v18  ;;  %v3173_v28 = vld [vmem:[%s6661_s30 + $0x528] sm:$0xff] }
 0x3d5   : > { %v2976_v36 = vmul.f32 0.7978846, %v2972_v34  ;;  %v2978_v23 = vmul.f32 0.7978846, %v2974_v19  ;;  %v5473_v33 = vcombine.high %v3169_v27, %v3173_v28  ;;  %v3049_v18 = vld [vmem:[%s6661_s30 + $0x148] sm:$0xff] }
 0x3d6   : > { %v2977_v26 = vmul.f32 0.7978846, %v2973_v35  ;;  %v2979_v29 = vmul.f32 0.7978846, %v2975_v20  ;;  %v3053_v34 = vld [vmem:[%s6661_s30 + $0x168] sm:$0xff]  ;;  %v5344_v20 = vcombine.low %v3041_v24, %v3045_v25 }
 0x3d7   : > { %6022 = vtanh.f32 %v2976_v36  ;;  %v3177_v19 = vld [vmem:[%s6661_s30 + $0x548] sm:$0xff]  ;;  %v5472_v36 = vcombine.low %v3169_v27, %v3173_v28 }
 0x3d8   : > { %6024 = vtanh.f32 %v2978_v23  ;;  %v3181_v35 = vld [vmem:[%s6661_s30 + $0x568] sm:$0xff]  ;;  %v5353_v23 = vcombine.high %v3049_v18, %v3053_v34 }
 0x3d9   : > { %6026 = vtanh.f32 %v2977_v26  ;;  %v5481_v26 = vcombine.high %v3177_v19, %v3181_v35  ;;  %v3097_v25 = vld [vmem:[%s6661_s30 + $0x2c8] sm:$0xff] }
 0x3da   : > { %6028 = vtanh.f32 %v2979_v29  ;;  %v3057_v29 = vld [vmem:[%s6661_s30 + $0x188] sm:$0xff] }
 0x3db   : > { %v3101_v27 = vld [vmem:[%s6661_s30 + $0x2e8] sm:$0xff] }
 0x3dc   : > { %v3225_v28 = vld [vmem:[%s6661_s30 + $0x6c8] sm:$0xff] }
 0x3e1   : > { %v6023_v32 = vpop.eup %6022 }
 0x3e2   : > { %v6025_v37 = vpop.eup %6024  ;;  %v2984_v38 = vadd.f32 1.0, %v6023_v32  ;;  %v3061_v32 = vld [vmem:[%s6661_s30 + $0x1a8] sm:$0xff] }
 0x3e3   : > { %v6027_v39 = vpop.eup %6026  ;;  %v2986_v40 = vadd.f32 1.0, %v6025_v37  ;;  %v3185_v37 = vld [vmem:[%s6661_s30 + $0x588] sm:$0xff] }
 0x3e4   : > { %v6029_v41 = vpop.eup %6028  ;;  %v2985_v42 = vadd.f32 1.0, %v6027_v39  ;;  %v2988_v43 = vmul.f32 0.5, %v2984_v38  ;;  %v3189_v38 = vld [vmem:[%s6661_s30 + $0x5a8] sm:$0xff]  ;;  %v5352_v39 = vcombine.low %v3049_v18, %v3053_v34 }
 0x3e5   : > { %v2987_v44 = vadd.f32 1.0, %v6029_v41  ;;  %v2990_v45 = vmul.f32 0.5, %v2986_v40  ;;  %v5480_v40 = vcombine.low %v3177_v19, %v3181_v35  ;;  %v5361_v41 = vcombine.high %v3057_v29, %v3061_v32  ;;  %v3105_v34 = vld [vmem:[%s6661_s30 + $0x308] sm:$0xff] }
 0x3e6   : > { %v2989_v46 = vmul.f32 0.5, %v2985_v42  ;;  %v2992_v50 = vmul.f32 %v5575_v6, %v2988_v43  ;;  %v5321_v6 = vcombine.high %v3017_v62, %v3021_v1  ;;  %v5489_v42 = vcombine.high %v3185_v37, %v3189_v38  ;;  %v3065_v43 = vld [vmem:[%s6661_s30 + $0x1c8] sm:$0xff] }
 0x3e7   : > { %v2991_v47 = vmul.f32 0.5, %v2987_v44  ;;  %v2994_v57 = vmul.f32 %v5577_v7, %v2990_v45  ;;  %v3029_v7 = vld [vmem:[%s6661_s30 + $0xa8] sm:$0xff] }
 0x3e8   : > { %v2993_v54 = vmul.f32 %v5576_v10, %v2989_v46  ;;  %v7106_v5 = vpack.c.bf16 %v2992_v50, %v2992_v50  ;;  %v5449_v10 = vcombine.high %v3145_v3, %v3149_v49  ;;  %v5329_v15 = vcombine.high %v3025_v9, %v3029_v7  ;;  %v3069_v44 = vld [vmem:[%s6661_s30 + $0x1e8] sm:$0xff] }
 0x3e9   : > { %v2995_v58 = vmul.f32 %v5578_v11, %v2991_v47  ;;  %v7109_v8 = vpack.c.bf16 %v2994_v57, %v2994_v57  ;;  %v3153_v11 = vld [vmem:[%s6661_s30 + $0x488] sm:$0xff]  ;;  %v5328_v53 = vcombine.low %v3025_v9, %v3029_v7  ;;  %v5360_v47 = vcombine.low %v3057_v29, %v3061_v32 }
 0x3ea   : > { %v7100_v2 = vpack.c.bf16 %v2993_v54, %v2993_v54  ;;  %v5457_v16 = vcombine.high %v3153_v11, %v3157_v12  ;;  %v5456_v48 = vcombine.low %v3153_v11, %v3157_v12  ;;  %v3193_v45 = vld [vmem:[%s6661_s30 + $0x5c8] sm:$0xff]  ;;  %v5488_v50 = vcombine.low %v3185_v37, %v3189_v38 }
 0x3eb   : > { %v7104_v4 = vpack.c.bf16 %v2995_v58, %v2995_v58  ;;  %v3197_v46 = vld [vmem:[%s6661_s30 + $0x5e8] sm:$0xff]  ;;  %v5369_v54 = vcombine.high %v3065_v43, %v3069_v44  ;;  %v5368_v49 = vcombine.low %v3065_v43, %v3069_v44 }
 0x3ec   : > { %4576 = vmatprep.mubr.bf16.mxu0 %v7100_v2  ;;  %v5497_v57 = vcombine.high %v3193_v45, %v3197_v46  ;;  %v3073_v58 = vld [vmem:[%s6661_s30 + $0x208] sm:$0xff] }
 0x3ed   : > { %4617 = vmatprep.mubr.bf16.mxu1 %v7104_v4  ;;  %4577 = vmatmul.mubr.bf16.vlgmr.msra.gmra.mrb[4].mxu0 %v7106_v5  ;;  %v3077_v62 = vld [vmem:[%s6661_s30 + $0x228] sm:$0xff] }
 0x3ee   : > { %4618 = vmatmul.mubr.bf16.vlgmr.msra.gmra.mrb[4].mxu1 %v7109_v8  ;;  %4627 = vmatpush1.bf16.msra.mxu0 %v5312_v55  ;;  %v3165_v55 = vld [vmem:[%s6661_s30 + $0x4e8] sm:$0xff]  ;;  %v5377_v9 = vcombine.high %v3073_v58, %v3077_v62 }
 0x3ef   : > { %4668 = vmatpush1.bf16.msra.mxu1 %v5440_v56  ;;  %4658 = vmatprep.mubr.bf16.mxu0 %v7100_v2  ;;  %v5337_v56 = vcombine.high %v3033_v21, %v3037_v51  ;;  %v5465_v22 = vcombine.high %v3161_v52, %v3165_v55  ;;  %v5464_v31 = vcombine.low %v3161_v52, %v3165_v55  ;;  %v3201_v1 = vld [vmem:[%s6661_s30 + $0x608] sm:$0xff] }
 0x3f0   : > { %4699 = vmatprep.mubr.bf16.mxu1 %v7104_v4  ;;  %4628 = vmatprep.subr.bf16.mxu0 %v5321_v6  ;;  %v3205_v3 = vld [vmem:[%s6661_s30 + $0x628] sm:$0xff]  ;;  %v5496_v6 = vcombine.low %v3193_v45, %v3197_v46 }
 0x3f1   : > { %4669 = vmatprep.subr.bf16.mxu1 %v5449_v10  ;;  %v5505_v7 = vcombine.high %v3201_v1, %v3205_v3  ;;  %v3081_v10 = vld [vmem:[%s6661_s30 + $0x248] sm:$0xff] }
 0x3f2   : > { %4629 = vmatpush1.bf16.msra.mxu0 %v5320_v13  ;;  %v3085_v11 = vld [vmem:[%s6661_s30 + $0x268] sm:$0xff] }
 0x3f3   : > { %4670 = vmatpush1.bf16.msra.mxu1 %v5448_v14  ;;  %4630 = vmatprep.subr.bf16.mxu0 %v5329_v15  ;;  %v3209_v12 = vld [vmem:[%s6661_s30 + $0x648] sm:$0xff]  ;;  %v5376_v14 = vcombine.low %v3073_v58, %v3077_v62  ;;  %v5504_v15 = vcombine.low %v3201_v1, %v3205_v3 }
 0x3f4   : > { %4671 = vmatprep.subr.bf16.mxu1 %v5457_v16  ;;  %v3213_v13 = vld [vmem:[%s6661_s30 + $0x668] sm:$0xff]  ;;  %v5385_v16 = vcombine.high %v3081_v10, %v3085_v11 }
 0x3f5   : > { %v5513_v21 = vcombine.high %v3209_v12, %v3213_v13  ;;  %v3089_v51 = vld [vmem:[%s6661_s30 + $0x288] sm:$0xff] }
 0x3f6   : > { %4631 = vmatpush1.bf16.msra.mxu0 %v5328_v53  ;;  %v3093_v52 = vld [vmem:[%s6661_s30 + $0x2a8] sm:$0xff] }
 0x3f7   : > { %4672 = vmatpush1.bf16.msra.mxu1 %v5456_v48  ;;  %4632 = vmatprep.subr.bf16.mxu0 %v5337_v56  ;;  %v3217_v55 = vld [vmem:[%s6661_s30 + $0x688] sm:$0xff]  ;;  %v5384_v48 = vcombine.low %v3081_v10, %v3085_v11  ;;  %v5512_v56 = vcombine.low %v3209_v12, %v3213_v13  ;;  %v3010_v11 = vld [vmem:[%s6661_s30 + $0x10] sm:$0xff] }
 0x3f8   : > { %4673 = vmatprep.subr.bf16.mxu1 %v5465_v22  ;;  %v3221_v53 = vld [vmem:[%s6661_s30 + $0x6a8] sm:$0xff]  ;;  %v5393_v22 = vcombine.high %v3089_v51, %v3093_v52  ;;  %v3014_v12 = vld [vmem:[%s6661_s30 + $0x30] sm:$0xff] }
 0x3f9   : > { %v5521_v24 = vcombine.high %v3217_v55, %v3221_v53  ;;  %v3109_v19 = vld [vmem:[%s6661_s30 + $0x328] sm:$0xff]  ;;  %v3138_v13 = vld [vmem:[%s6661_s30 + $0x410] sm:$0xff] }
 0x3fa   : > { %4633 = vmatpush1.bf16.msra.mxu0 %v5336_v30  ;;  %v3229_v30 = vld [vmem:[%s6661_s30 + $0x6e8] sm:$0xff] }
 0x3fb   : > { %4674 = vmatpush1.bf16.msra.mxu1 %v5464_v31  ;;  %4634 = vmatprep.subr.bf16.mxu0 %v5345_v17  ;;  %v5392_v31 = vcombine.low %v3089_v51, %v3093_v52  ;;  %v5520_v17 = vcombine.low %v3217_v55, %v3221_v53  ;;  %v5529_v18 = vcombine.high %v3225_v28, %v3229_v30  ;;  %v3233_v35 = vld [vmem:[%s6661_s30 + $0x708] sm:$0xff]  ;;  %v3018_v52 = vld [vmem:[%s6661_s30 + $0x50] sm:$0xff] }
 0x3fc   : > { %4675 = vmatprep.subr.bf16.mxu1 %v5473_v33  ;;  %v5401_v33 = vcombine.high %v3097_v25, %v3101_v27  ;;  %v3113_v32 = vld [vmem:[%s6661_s30 + $0x348] sm:$0xff]  ;;  %v3022_v55 = vld [vmem:[%s6661_s30 + $0x70] sm:$0xff]  ;;  %v5314_v53 = vcombine.low %v3010_v11, %v3014_v12 }
 0x3fd   : > { %v3117_v37 = vld [vmem:[%s6661_s30 + $0x368] sm:$0xff] }
 0x3fe   : > { %4635 = vmatpush1.bf16.msra.mxu0 %v5344_v20  ;;  %v3237_v20 = vld [vmem:[%s6661_s30 + $0x728] sm:$0xff] }
 0x3ff   : > { %4676 = vmatpush1.bf16.msra.mxu1 %v5472_v36  ;;  %4636 = vmatprep.subr.bf16.mxu0 %v5353_v23  ;;  %v5400_v36 = vcombine.low %v3097_v25, %v3101_v27  ;;  %v5528_v23 = vcombine.low %v3225_v28, %v3229_v30  ;;  %v5537_v29 = vcombine.high %v3233_v35, %v3237_v20  ;;  %v3241_v38 = vld [vmem:[%s6661_s30 + $0x748] sm:$0xff]  ;;  %v3026_v25 = vld [vmem:[%s6661_s30 + $0x90] sm:$0xff] }
 0x400   : > { %4677 = vmatprep.subr.bf16.mxu1 %v5481_v26  ;;  %v5409_v26 = vcombine.high %v3105_v34, %v3109_v19  ;;  %v3121_v44 = vld [vmem:[%s6661_s30 + $0x388] sm:$0xff]  ;;  %v3030_v27 = vld [vmem:[%s6661_s30 + $0xb0] sm:$0xff] }
 0x401   : > { %v3125_v45 = vld [vmem:[%s6661_s30 + $0x3a8] sm:$0xff]  ;;  %v3154_v30 = vld [vmem:[%s6661_s30 + $0x490] sm:$0xff] }
 0x402   : > { %4637 = vmatpush1.bf16.msra.mxu0 %v5352_v39  ;;  %v3245_v39 = vld [vmem:[%s6661_s30 + $0x768] sm:$0xff] }
 0x403   : > { %4678 = vmatpush1.bf16.msra.mxu1 %v5480_v40  ;;  %4638 = vmatprep.subr.bf16.mxu0 %v5361_v41  ;;  %v5408_v40 = vcombine.low %v3105_v34, %v3109_v19  ;;  %v5536_v41 = vcombine.low %v3233_v35, %v3237_v20  ;;  %v5545_v43 = vcombine.high %v3241_v38, %v3245_v39  ;;  %v3249_v46 = vld [vmem:[%s6661_s30 + $0x788] sm:$0xff]  ;;  %v3034_v19 = vld [vmem:[%s6661_s30 + $0xd0] sm:$0xff] }
 0x404   : > { %4679 = vmatprep.subr.bf16.mxu1 %v5489_v42  ;;  %v5417_v42 = vcombine.high %v3113_v32, %v3117_v37  ;;  %v3129_v62 = vld [vmem:[%s6661_s30 + $0x3c8] sm:$0xff]  ;;  %v3038_v35 = vld [vmem:[%s6661_s30 + $0xf0] sm:$0xff] }
 0x405   : > { %v3133_v1 = vld [vmem:[%s6661_s30 + $0x3e8] sm:$0xff]  ;;  %v3162_v20 = vld [vmem:[%s6661_s30 + $0x4d0] sm:$0xff] }
 0x406   : > { %4639 = vmatpush1.bf16.msra.mxu0 %v5360_v47  ;;  %v3253_v47 = vld [vmem:[%s6661_s30 + $0x7a8] sm:$0xff] }
 0x407   : > { %4680 = vmatpush1.bf16.msra.mxu1 %v5488_v50  ;;  %4640 = vmatprep.subr.bf16.mxu0 %v5369_v54  ;;  %v5416_v50 = vcombine.low %v3113_v32, %v3117_v37  ;;  %v5544_v54 = vcombine.low %v3241_v38, %v3245_v39  ;;  %v5553_v58 = vcombine.high %v3249_v46, %v3253_v47  ;;  %v3257_v3 = vld [vmem:[%s6661_s30 + $0x7c8] sm:$0xff]  ;;  %v3042_v37 = vld [vmem:[%s6661_s30 + $0x110] sm:$0xff] }
 0x408   : > { %4681 = vmatprep.subr.bf16.mxu1 %v5497_v57  ;;  %v5425_v57 = vcombine.high %v3121_v44, %v3125_v45  ;;  %v3046_v38 = vld [vmem:[%s6661_s30 + $0x130] sm:$0xff] }
 0x409   : > { %v3170_v39 = vld [vmem:[%s6661_s30 + $0x510] sm:$0xff] }
 0x40a   : > { %4641 = vmatpush1.bf16.msra.mxu0 %v5368_v49  ;;  %v3261_v49 = vld [vmem:[%s6661_s30 + $0x7e8] sm:$0xff] }
 0x40b   : > { %4682 = vmatpush1.bf16.msra.mxu1 %v5496_v6  ;;  %4642 = vmatprep.subr.bf16.mxu0 %v5377_v9  ;;  %v5424_v6 = vcombine.low %v3121_v44, %v3125_v45  ;;  %v5552_v9 = vcombine.low %v3249_v46, %v3253_v47  ;;  %v5561_v10 = vcombine.high %v3257_v3, %v3261_v49  ;;  %v3050_v45 = vld [vmem:[%s6661_s30 + $0x150] sm:$0xff] }
 0x40c   : > { %4683 = vmatprep.subr.bf16.mxu1 %v5505_v7  ;;  %v5433_v7 = vcombine.high %v3129_v62, %v3133_v1  ;;  %v3054_v46 = vld [vmem:[%s6661_s30 + $0x170] sm:$0xff] }
 0x40d   : > { %v3178_v47 = vld [vmem:[%s6661_s30 + $0x550] sm:$0xff] }
 0x40e   : > { %4643 = vmatpush1.bf16.msra.mxu0 %v5376_v14  ;;  %v3142_v14 = vld [vmem:[%s6661_s30 + $0x430] sm:$0xff] }
 0x40f   : > { %4684 = vmatpush1.bf16.msra.mxu1 %v5504_v15  ;;  %4644 = vmatprep.subr.bf16.mxu0 %v5385_v16  ;;  %v5432_v15 = vcombine.low %v3129_v62, %v3133_v1  ;;  %v5560_v16 = vcombine.low %v3257_v3, %v3261_v49  ;;  %v5443_v51 = vcombine.high %v3138_v13, %v3142_v14  ;;  %v3058_v1 = vld [vmem:[%s6661_s30 + $0x190] sm:$0xff] }
 0x410   : > { %4685 = vmatprep.subr.bf16.mxu1 %v5513_v21  ;;  %v5315_v21 = vcombine.high %v3010_v11, %v3014_v12  ;;  %v3062_v3 = vld [vmem:[%s6661_s30 + $0x1b0] sm:$0xff] }
 0x411   : > { %v3186_v49 = vld [vmem:[%s6661_s30 + $0x590] sm:$0xff] }
 0x412   : > { %4645 = vmatpush1.bf16.msra.mxu0 %v5384_v48  ;;  %v3146_v48 = vld [vmem:[%s6661_s30 + $0x450] sm:$0xff] }
 0x413   : > { %4686 = vmatpush1.bf16.msra.mxu1 %v5512_v56  ;;  %4646 = vmatprep.subr.bf16.mxu0 %v5393_v22  ;;  %v3150_v56 = vld [vmem:[%s6661_s30 + $0x470] sm:$0xff]  ;;  %v5442_v22 = vcombine.low %v3138_v13, %v3142_v14 }
 0x414   : > { %4687 = vmatprep.subr.bf16.mxu1 %v5521_v24  ;;  %v5323_v24 = vcombine.high %v3018_v52, %v3022_v55  ;;  %v5451_v28 = vcombine.high %v3146_v48, %v3150_v56  ;;  %v3066_v12 = vld [vmem:[%s6661_s30 + $0x1d0] sm:$0xff] }
 0x415   : > { %v3070_v13 = vld [vmem:[%s6661_s30 + $0x1f0] sm:$0xff] }
 0x416   : > { %4647 = vmatpush1.bf16.msra.mxu0 %v5392_v31  ;;  %v3158_v31 = vld [vmem:[%s6661_s30 + $0x4b0] sm:$0xff] }
 0x417   : > { %4688 = vmatpush1.bf16.msra.mxu1 %v5520_v17  ;;  %4648 = vmatprep.subr.bf16.mxu0 %v5401_v33  ;;  %v5322_v17 = vcombine.low %v3018_v52, %v3022_v55  ;;  %v5450_v33 = vcombine.low %v3146_v48, %v3150_v56  ;;  %v5459_v34 = vcombine.high %v3154_v30, %v3158_v31  ;;  %v3194_v14 = vld [vmem:[%s6661_s30 + $0x5d0] sm:$0xff] }
 0x418   : > { %4689 = vmatprep.subr.bf16.mxu1 %v5529_v18  ;;  %v5331_v18 = vcombine.high %v3026_v25, %v3030_v27  ;;  %v3074_v55 = vld [vmem:[%s6661_s30 + $0x210] sm:$0xff] }
 0x419   : > { %v3202_v48 = vld [vmem:[%s6661_s30 + $0x610] sm:$0xff] }
 0x41a   : > { %4649 = vmatpush1.bf16.msra.mxu0 %v5400_v36  ;;  %v3166_v36 = vld [vmem:[%s6661_s30 + $0x4f0] sm:$0xff] }
 0x41b   : > { %4690 = vmatpush1.bf16.msra.mxu1 %v5528_v23  ;;  %4650 = vmatprep.subr.bf16.mxu0 %v5409_v26  ;;  %v5330_v23 = vcombine.low %v3026_v25, %v3030_v27  ;;  %v5458_v26 = vcombine.low %v3154_v30, %v3158_v31  ;;  %v5467_v32 = vcombine.high %v3162_v20, %v3166_v36  ;;  %v3206_v56 = vld [vmem:[%s6661_s30 + $0x630] sm:$0xff] }
 0x41c   : > { %4691 = vmatprep.subr.bf16.mxu1 %v5537_v29  ;;  %v5339_v29 = vcombine.high %v3034_v19, %v3038_v35  ;;  %v5507_v27 = vcombine.high %v3202_v48, %v3206_v56  ;;  %v3086_v30 = vld [vmem:[%s6661_s30 + $0x270] sm:$0xff] }
 0x41d   : > { %v3210_v31 = vld [vmem:[%s6661_s30 + $0x650] sm:$0xff] }
 0x41e   : > { %4651 = vmatpush1.bf16.msra.mxu0 %v5408_v40  ;;  %v3174_v40 = vld [vmem:[%s6661_s30 + $0x530] sm:$0xff] }
 0x41f   : > { %4692 = vmatpush1.bf16.msra.mxu1 %v5536_v41  ;;  %4652 = vmatprep.subr.bf16.mxu0 %v5417_v42  ;;  %v5338_v41 = vcombine.low %v3034_v19, %v3038_v35  ;;  %v5466_v42 = vcombine.low %v3162_v20, %v3166_v36  ;;  %v5475_v44 = vcombine.high %v3170_v39, %v3174_v40  ;;  %v3090_v35 = vld [vmem:[%s6661_s30 + $0x290] sm:$0xff] }
 0x420   : > { %4693 = vmatprep.subr.bf16.mxu1 %v5545_v43  ;;  %v5347_v43 = vcombine.high %v3042_v37, %v3046_v38  ;;  %v3094_v20 = vld [vmem:[%s6661_s30 + $0x2b0] sm:$0xff] }
 0x421   : > { %v3218_v36 = vld [vmem:[%s6661_s30 + $0x690] sm:$0xff] }
 0x422   : > { %4653 = vmatpush1.bf16.msra.mxu0 %v5416_v50  ;;  %v3182_v50 = vld [vmem:[%s6661_s30 + $0x570] sm:$0xff] }
 0x423   : > { %4694 = vmatpush1.bf16.msra.mxu1 %v5544_v54  ;;  %4654 = vmatprep.subr.bf16.mxu0 %v5425_v57  ;;  %v5346_v54 = vcombine.low %v3042_v37, %v3046_v38  ;;  %v5474_v57 = vcombine.low %v3170_v39, %v3174_v40  ;;  %v5483_v62 = vcombine.high %v3178_v47, %v3182_v50  ;;  %v3098_v38 = vld [vmem:[%s6661_s30 + $0x2d0] sm:$0xff] }
 0x424   : > { %4695 = vmatprep.subr.bf16.mxu1 %v5553_v58  ;;  %v5355_v58 = vcombine.high %v3050_v45, %v3054_v46  ;;  %v3102_v39 = vld [vmem:[%s6661_s30 + $0x2f0] sm:$0xff] }
 0x425   : > { %v3226_v40 = vld [vmem:[%s6661_s30 + $0x6d0] sm:$0xff] }
 0x426   : > { %4655 = vmatpush1.bf16.msra.mxu0 %v5424_v6  ;;  %v3190_v6 = vld [vmem:[%s6661_s30 + $0x5b0] sm:$0xff] }
 0x427   : > { %4696 = vmatpush1.bf16.msra.mxu1 %v5552_v9  ;;  %4656 = vmatprep.subr.bf16.mxu0 %v5433_v7  ;;  %v5354_v9 = vcombine.low %v3050_v45, %v3054_v46  ;;  %v5482_v7 = vcombine.low %v3178_v47, %v3182_v50  ;;  %v5491_v11 = vcombine.high %v3186_v49, %v3190_v6  ;;  %v3106_v46 = vld [vmem:[%s6661_s30 + $0x310] sm:$0xff] }
 0x428   : > { %4697 = vmatprep.subr.bf16.mxu1 %v5561_v10  ;;  %v5363_v10 = vcombine.high %v3058_v1, %v3062_v3  ;;  %v3110_v47 = vld [vmem:[%s6661_s30 + $0x330] sm:$0xff] }
 0x429   : > { %v3234_v50 = vld [vmem:[%s6661_s30 + $0x710] sm:$0xff] }
 0x42a   : > { %4657 = vmatpush1.bf16.msra.mxu0 %v5432_v15  ;;  %v3198_v15 = vld [vmem:[%s6661_s30 + $0x5f0] sm:$0xff] }
 0x42b   : > { %4698 = vmatpush1.bf16.msra.mxu1 %v5560_v16  ;;  %4708 = vmatprep.subr.bf16.mxu0 %v5315_v21  ;;  %v5362_v16 = vcombine.low %v3058_v1, %v3062_v3  ;;  %v5490_v21 = vcombine.low %v3186_v49, %v3190_v6  ;;  %v5499_v52 = vcombine.high %v3194_v14, %v3198_v15  ;;  %v3114_v3 = vld [vmem:[%s6661_s30 + $0x350] sm:$0xff] }
 0x42c   : > { %4749 = vmatprep.subr.bf16.mxu1 %v5443_v51  ;;  %v5371_v51 = vcombine.high %v3066_v12, %v3070_v13  ;;  %v3118_v49 = vld [vmem:[%s6661_s30 + $0x370] sm:$0xff] }
 0x42d   : > { %4659 = vmatmul.mubr.bf16.vlgmr.msra.gmra.mrb[8].mxu0 %v7106_v5  ;;  %v3242_v6 = vld [vmem:[%s6661_s30 + $0x750] sm:$0xff] }
 0x42e   : > { %4700 = vmatmul.mubr.bf16.vlgmr.msra.gmra.mrb[8].mxu1 %v7109_v8  ;;  %4709 = vmatpush1.bf16.msra.mxu0 %v5314_v53  ;;  %v3078_v53 = vld [vmem:[%s6661_s30 + $0x230] sm:$0xff] }
 0x42f   : > { %4740 = vmatprep.mubr.bf16.mxu0 %v7100_v2  ;;  %4750 = vmatpush1.bf16.msra.mxu1 %v5442_v22  ;;  %v5370_v22 = vcombine.low %v3066_v12, %v3070_v13  ;;  %v5379_v25 = vcombine.high %v3074_v55, %v3078_v53  ;;  %v3122_v13 = vld [vmem:[%s6661_s30 + $0x390] sm:$0xff] }
 0x430   : > { %4781 = vmatprep.mubr.bf16.mxu1 %v7104_v4  ;;  %4710 = vmatprep.subr.bf16.mxu0 %v5323_v24  ;;  %v5498_v24 = vcombine.low %v3194_v14, %v3198_v15  ;;  %v3126_v14 = vld [vmem:[%s6661_s30 + $0x3b0] sm:$0xff] }
 0x431   : > { %4751 = vmatprep.subr.bf16.mxu1 %v5451_v28  ;;  %v3082_v28 = vld [vmem:[%s6661_s30 + $0x250] sm:$0xff] }
 0x432   : > { %4711 = vmatpush1.bf16.msra.mxu0 %v5322_v17  ;;  %v3214_v17 = vld [vmem:[%s6661_s30 + $0x670] sm:$0xff] }
 0x433   : > { %4752 = vmatpush1.bf16.msra.mxu1 %v5450_v33  ;;  %4712 = vmatprep.subr.bf16.mxu0 %v5331_v18  ;;  %v5378_v33 = vcombine.low %v3074_v55, %v3078_v53  ;;  %v5506_v18 = vcombine.low %v3202_v48, %v3206_v56  ;;  %v5515_v19 = vcombine.high %v3210_v31, %v3214_v17  ;;  %v3250_v15 = vld [vmem:[%s6661_s30 + $0x790] sm:$0xff] }
 0x434   : > { %4753 = vmatprep.subr.bf16.mxu1 %v5459_v34  ;;  %v5387_v34 = vcombine.high %v3082_v28, %v3086_v30  ;;  %v3130_v53 = vld [vmem:[%s6661_s30 + $0x3d0] sm:$0xff] }
 0x435   : > { %v3134_v48 = vld [vmem:[%s6661_s30 + $0x3f0] sm:$0xff] }
 0x436   : > { %4713 = vmatpush1.bf16.msra.mxu0 %v5330_v23  ;;  %v3222_v23 = vld [vmem:[%s6661_s30 + $0x6b0] sm:$0xff] }
 0x437   : > { %4754 = vmatpush1.bf16.msra.mxu1 %v5458_v26  ;;  %4714 = vmatprep.subr.bf16.mxu0 %v5339_v29  ;;  %v5386_v26 = vcombine.low %v3082_v28, %v3086_v30  ;;  %v5514_v29 = vcombine.low %v3210_v31, %v3214_v17  ;;  %v5523_v37 = vcombine.high %v3218_v36, %v3222_v23  ;;  %v3258_v56 = vld [vmem:[%s6661_s30 + $0x7d0] sm:$0xff]  ;;  %v3011_v30 = vld [vmem:[%s6661_s30 + $0x18] sm:$0xff] }
 0x438   : > { %4755 = vmatprep.subr.bf16.mxu1 %v5467_v32  ;;  %v5395_v32 = vcombine.high %v3090_v35, %v3094_v20  ;;  %v3015_v31 = vld [vmem:[%s6661_s30 + $0x38] sm:$0xff] }
 0x439   : > { %v3139_v17 = vld [vmem:[%s6661_s30 + $0x418] sm:$0xff] }
 0x43a   : > { %4715 = vmatpush1.bf16.msra.mxu0 %v5338_v41  ;;  %v3230_v41 = vld [vmem:[%s6661_s30 + $0x6f0] sm:$0xff] }
 0x43b   : > { %4756 = vmatpush1.bf16.msra.mxu1 %v5466_v42  ;;  %4716 = vmatprep.subr.bf16.mxu0 %v5347_v43  ;;  %v5394_v42 = vcombine.low %v3090_v35, %v3094_v20  ;;  %v5522_v43 = vcombine.low %v3218_v36, %v3222_v23  ;;  %v5531_v45 = vcombine.high %v3226_v40, %v3230_v41  ;;  %v3019_v20 = vld [vmem:[%s6661_s30 + $0x58] sm:$0xff] }
 0x43c   : > { %4757 = vmatprep.subr.bf16.mxu1 %v5475_v44  ;;  %v5403_v44 = vcombine.high %v3098_v38, %v3102_v39  ;;  %v3023_v36 = vld [vmem:[%s6661_s30 + $0x78] sm:$0xff]  ;;  %v5316_v23 = vcombine.low %v3011_v30, %v3015_v31 }
 0x43e   : > { %4717 = vmatpush1.bf16.msra.mxu0 %v5346_v54  ;;  %v3238_v54 = vld [vmem:[%s6661_s30 + $0x730] sm:$0xff] }
 0x43f   : > { %4758 = vmatpush1.bf16.msra.mxu1 %v5474_v57  ;;  %4718 = vmatprep.subr.bf16.mxu0 %v5355_v58  ;;  %v5402_v57 = vcombine.low %v3098_v38, %v3102_v39  ;;  %v5530_v58 = vcombine.low %v3226_v40, %v3230_v41  ;;  %v5539_v1 = vcombine.high %v3234_v50, %v3238_v54  ;;  %v3027_v38 = vld [vmem:[%s6661_s30 + $0x98] sm:$0xff] }
 0x440   : > { %4759 = vmatprep.subr.bf16.mxu1 %v5483_v62  ;;  %v5411_v62 = vcombine.high %v3106_v46, %v3110_v47  ;;  %v3031_v39 = vld [vmem:[%s6661_s30 + $0xb8] sm:$0xff] }
 0x441   : > { %v3155_v41 = vld [vmem:[%s6661_s30 + $0x498] sm:$0xff] }
 0x442   : > { %4719 = vmatpush1.bf16.msra.mxu0 %v5354_v9  ;;  %v3246_v9 = vld [vmem:[%s6661_s30 + $0x770] sm:$0xff] }
 0x443   : > { %4760 = vmatpush1.bf16.msra.mxu1 %v5482_v7  ;;  %4720 = vmatprep.subr.bf16.mxu0 %v5363_v10  ;;  %v5410_v7 = vcombine.low %v3106_v46, %v3110_v47  ;;  %v5538_v10 = vcombine.low %v3234_v50, %v3238_v54  ;;  %v5547_v12 = vcombine.high %v3242_v6, %v3246_v9  ;;  %v3035_v47 = vld [vmem:[%s6661_s30 + $0xd8] sm:$0xff] }
 0x444   : > { %4761 = vmatprep.subr.bf16.mxu1 %v5491_v11  ;;  %v5419_v11 = vcombine.high %v3114_v3, %v3118_v49  ;;  %v3039_v50 = vld [vmem:[%s6661_s30 + $0xf8] sm:$0xff] }
 0x445   : > { %v3163_v54 = vld [vmem:[%s6661_s30 + $0x4d8] sm:$0xff] }
 0x446   : > { %4721 = vmatpush1.bf16.msra.mxu0 %v5362_v16  ;;  %v3254_v16 = vld [vmem:[%s6661_s30 + $0x7b0] sm:$0xff] }
 0x447   : > { %4762 = vmatpush1.bf16.msra.mxu1 %v5490_v21  ;;  %4722 = vmatprep.subr.bf16.mxu0 %v5371_v51  ;;  %v5418_v21 = vcombine.low %v3114_v3, %v3118_v49  ;;  %v5546_v51 = vcombine.low %v3242_v6, %v3246_v9  ;;  %v5555_v55 = vcombine.high %v3250_v15, %v3254_v16  ;;  %v3047_v3 = vld [vmem:[%s6661_s30 + $0x138] sm:$0xff] }
 0x448   : > { %4763 = vmatprep.subr.bf16.mxu1 %v5499_v52  ;;  %v5427_v52 = vcombine.high %v3122_v13, %v3126_v14  ;;  %v3171_v49 = vld [vmem:[%s6661_s30 + $0x518] sm:$0xff]  ;;  %v5340_v9 = vcombine.low %v3035_v47, %v3039_v50 }
 0x449   : > { %v3175_v6 = vld [vmem:[%s6661_s30 + $0x538] sm:$0xff] }
 0x44a   : > { %4723 = vmatpush1.bf16.msra.mxu0 %v5370_v22  ;;  %v3262_v22 = vld [vmem:[%s6661_s30 + $0x7f0] sm:$0xff] }
 0x44b   : > { %4764 = vmatpush1.bf16.msra.mxu1 %v5498_v24  ;;  %4724 = vmatprep.subr.bf16.mxu0 %v5379_v25  ;;  %v5426_v24 = vcombine.low %v3122_v13, %v3126_v14  ;;  %v5554_v25 = vcombine.low %v3250_v15, %v3254_v16  ;;  %v5563_v28 = vcombine.high %v3258_v56, %v3262_v22  ;;  %v3055_v13 = vld [vmem:[%s6661_s30 + $0x178] sm:$0xff] }
 0x44c   : > { %4765 = vmatprep.subr.bf16.mxu1 %v5507_v27  ;;  %v5435_v27 = vcombine.high %v3130_v53, %v3134_v48  ;;  %v3179_v14 = vld [vmem:[%s6661_s30 + $0x558] sm:$0xff] }
 0x44d   : > { %v3183_v15 = vld [vmem:[%s6661_s30 + $0x578] sm:$0xff] }
 0x44e   : > { %4725 = vmatpush1.bf16.msra.mxu0 %v5378_v33  ;;  %v3143_v33 = vld [vmem:[%s6661_s30 + $0x438] sm:$0xff] }
 0x44f   : > { %4766 = vmatpush1.bf16.msra.mxu1 %v5506_v18  ;;  %4726 = vmatprep.subr.bf16.mxu0 %v5387_v34  ;;  %v5434_v18 = vcombine.low %v3130_v53, %v3134_v48  ;;  %v5562_v34 = vcombine.low %v3258_v56, %v3262_v22  ;;  %v5445_v35 = vcombine.high %v3139_v17, %v3143_v33  ;;  %v3063_v53 = vld [vmem:[%s6661_s30 + $0x1b8] sm:$0xff] }
 0x450   : > { %4767 = vmatprep.subr.bf16.mxu1 %v5515_v19  ;;  %v5317_v19 = vcombine.high %v3011_v30, %v3015_v31  ;;  %v3187_v48 = vld [vmem:[%s6661_s30 + $0x598] sm:$0xff] }
 0x451   : > { %v3191_v56 = vld [vmem:[%s6661_s30 + $0x5b8] sm:$0xff] }
 0x452   : > { %4727 = vmatpush1.bf16.msra.mxu0 %v5386_v26  ;;  %v3147_v26 = vld [vmem:[%s6661_s30 + $0x458] sm:$0xff] }
 0x453   : > { %4768 = vmatpush1.bf16.msra.mxu1 %v5514_v29  ;;  %4728 = vmatprep.subr.bf16.mxu0 %v5395_v32  ;;  %v3151_v29 = vld [vmem:[%s6661_s30 + $0x478] sm:$0xff]  ;;  %v5444_v32 = vcombine.low %v3139_v17, %v3143_v33 }
 0x454   : > { %4769 = vmatprep.subr.bf16.mxu1 %v5523_v37  ;;  %v5325_v37 = vcombine.high %v3019_v20, %v3023_v36  ;;  %v5453_v40 = vcombine.high %v3147_v26, %v3151_v29  ;;  %v3071_v30 = vld [vmem:[%s6661_s30 + $0x1f8] sm:$0xff] }
 0x455   : > { %v3195_v31 = vld [vmem:[%s6661_s30 + $0x5d8] sm:$0xff] }
 0x456   : > { %4729 = vmatpush1.bf16.msra.mxu0 %v5394_v42  ;;  %v3159_v42 = vld [vmem:[%s6661_s30 + $0x4b8] sm:$0xff] }
 0x457   : > { %4770 = vmatpush1.bf16.msra.mxu1 %v5522_v43  ;;  %4730 = vmatprep.subr.bf16.mxu0 %v5403_v44  ;;  %v5324_v43 = vcombine.low %v3019_v20, %v3023_v36  ;;  %v5452_v44 = vcombine.low %v3147_v26, %v3151_v29  ;;  %v5461_v46 = vcombine.high %v3155_v41, %v3159_v42  ;;  %v3199_v17 = vld [vmem:[%s6661_s30 + $0x5f8] sm:$0xff] }
 0x458   : > { %4771 = vmatprep.subr.bf16.mxu1 %v5531_v45  ;;  %v5333_v45 = vcombine.high %v3027_v38, %v3031_v39  ;;  %v3079_v20 = vld [vmem:[%s6661_s30 + $0x238] sm:$0xff]  ;;  %v5500_v29 = vcombine.low %v3195_v31, %v3199_v17 }
 0x459   : > { %v3203_v36 = vld [vmem:[%s6661_s30 + $0x618] sm:$0xff] }
 0x45a   : > { %4731 = vmatpush1.bf16.msra.mxu0 %v5402_v57  ;;  %v3167_v57 = vld [vmem:[%s6661_s30 + $0x4f8] sm:$0xff] }
 0x45b   : > { %4772 = vmatpush1.bf16.msra.mxu1 %v5530_v58  ;;  %4732 = vmatprep.subr.bf16.mxu0 %v5411_v62  ;;  %v5332_v58 = vcombine.low %v3027_v38, %v3031_v39  ;;  %v5341_v62 = vcombine.high %v3035_v47, %v3039_v50  ;;  %v3083_v38 = vld [vmem:[%s6661_s30 + $0x258] sm:$0xff] }
 0x45c   : > { %4773 = vmatprep.subr.bf16.mxu1 %v5539_v1  ;;  %v3043_v1 = vld [vmem:[%s6661_s30 + $0x118] sm:$0xff] }
 0x45d   : > { %v5348_v16 = vcombine.low %v3043_v1, %v3047_v3  ;;  %v3087_v39 = vld [vmem:[%s6661_s30 + $0x278] sm:$0xff] }
 0x45e   : > { %4733 = vmatpush1.bf16.msra.mxu0 %v5410_v7  ;;  %v5468_v7 = vcombine.low %v3163_v54, %v3167_v57  ;;  %v3095_v47 = vld [vmem:[%s6661_s30 + $0x2b8] sm:$0xff] }
 0x45f   : > { %4774 = vmatpush1.bf16.msra.mxu1 %v5538_v10  ;;  %4734 = vmatprep.subr.bf16.mxu0 %v5419_v11  ;;  %v5349_v10 = vcombine.high %v3043_v1, %v3047_v3  ;;  %v5477_v11 = vcombine.high %v3171_v49, %v3175_v6  ;;  %v3219_v50 = vld [vmem:[%s6661_s30 + $0x698] sm:$0xff] }
 0x460   : > { %4775 = vmatprep.subr.bf16.mxu1 %v5547_v12  ;;  %v3051_v12 = vld [vmem:[%s6661_s30 + $0x158] sm:$0xff] }
 0x461   : > { %v5356_v22 = vcombine.low %v3051_v12, %v3055_v13  ;;  %v3103_v1 = vld [vmem:[%s6661_s30 + $0x2f8] sm:$0xff] }
 0x462   : > { %4735 = vmatpush1.bf16.msra.mxu0 %v5418_v21  ;;  %v5476_v21 = vcombine.low %v3171_v49, %v3175_v6  ;;  %v3227_v3 = vld [vmem:[%s6661_s30 + $0x6d8] sm:$0xff] }
 0x463   : > { %4776 = vmatpush1.bf16.msra.mxu1 %v5546_v51  ;;  %4736 = vmatprep.subr.bf16.mxu0 %v5427_v52  ;;  %v5357_v51 = vcombine.high %v3051_v12, %v3055_v13  ;;  %v5485_v52 = vcombine.high %v3179_v14, %v3183_v15  ;;  %v3231_v49 = vld [vmem:[%s6661_s30 + $0x6f8] sm:$0xff] }
 0x464   : > { %4777 = vmatprep.subr.bf16.mxu1 %v5555_v55  ;;  %v3059_v55 = vld [vmem:[%s6661_s30 + $0x198] sm:$0xff] }
 0x465   : > { %v5364_v33 = vcombine.low %v3059_v55, %v3063_v53  ;;  %v3111_v12 = vld [vmem:[%s6661_s30 + $0x338] sm:$0xff] }
 0x466   : > { %4737 = vmatpush1.bf16.msra.mxu0 %v5426_v24  ;;  %v5484_v24 = vcombine.low %v3179_v14, %v3183_v15  ;;  %v3235_v13 = vld [vmem:[%s6661_s30 + $0x718] sm:$0xff] }
 0x467   : > { %4778 = vmatpush1.bf16.msra.mxu1 %v5554_v25  ;;  %4738 = vmatprep.subr.bf16.mxu0 %v5435_v27  ;;  %v5365_v25 = vcombine.high %v3059_v55, %v3063_v53  ;;  %v5493_v27 = vcombine.high %v3187_v48, %v3191_v56  ;;  %v3239_v14 = vld [vmem:[%s6661_s30 + $0x738] sm:$0xff] }
 0x468   : > { %4779 = vmatprep.subr.bf16.mxu1 %v5563_v28  ;;  %v3067_v28 = vld [vmem:[%s6661_s30 + $0x1d8] sm:$0xff] }
 0x469   : > { %v5372_v26 = vcombine.low %v3067_v28, %v3071_v30  ;;  %v3119_v55 = vld [vmem:[%s6661_s30 + $0x378] sm:$0xff] }
 0x46a   : > { %4739 = vmatpush1.bf16.msra.mxu0 %v5434_v18  ;;  %v5492_v18 = vcombine.low %v3187_v48, %v3191_v56  ;;  %v3243_v53 = vld [vmem:[%s6661_s30 + $0x758] sm:$0xff] }
 0x46b   : > { %4780 = vmatpush1.bf16.msra.mxu1 %v5562_v34  ;;  %4790 = vmatprep.subr.bf16.mxu0 %v5317_v19  ;;  %v5373_v34 = vcombine.high %v3067_v28, %v3071_v30  ;;  %v5501_v19 = vcombine.high %v3195_v31, %v3199_v17  ;;  %v3247_v48 = vld [vmem:[%s6661_s30 + $0x778] sm:$0xff] }
 0x46c   : > { %4831 = vmatprep.subr.bf16.mxu1 %v5445_v35  ;;  %v3075_v35 = vld [vmem:[%s6661_s30 + $0x218] sm:$0xff] }
 0x46d   : > { %4741 = vmatmul.mubr.bf16.vlgmr.msra.gmra.mrb[12].mxu0 %v7106_v5  ;;  %v3127_v28 = vld [vmem:[%s6661_s30 + $0x3b8] sm:$0xff] }
 0x46e   : > { %4782 = vmatmul.mubr.bf16.vlgmr.msra.gmra.mrb[12].mxu1 %v7109_v8  ;;  %4791 = vmatpush1.bf16.msra.mxu0 %v5316_v23  ;;  %v3207_v23 = vld [vmem:[%s6661_s30 + $0x638] sm:$0xff] }
 0x46f   : > { %4822 = vmatprep.mubr.bf16.mxu0 %v7100_v2  ;;  %4832 = vmatpush1.bf16.msra.mxu1 %v5444_v32  ;;  %v5460_v2 = vcombine.low %v3155_v41, %v3159_v42  ;;  %v5381_v32 = vcombine.high %v3075_v35, %v3079_v20  ;;  %v3215_v41 = vld [vmem:[%s6661_s30 + $0x678] sm:$0xff]  ;;  %v5380_v42 = vcombine.low %v3075_v35, %v3079_v20 }
 0x470   : > { %4863 = vmatprep.mubr.bf16.mxu1 %v7104_v4  ;;  %4792 = vmatprep.subr.bf16.mxu0 %v5325_v37  ;;  %v5469_v4 = vcombine.high %v3163_v54, %v3167_v57  ;;  %v5509_v37 = vcombine.high %v3203_v36, %v3207_v23  ;;  %v3223_v54 = vld [vmem:[%s6661_s30 + $0x6b8] sm:$0xff]  ;;  %v5388_v57 = vcombine.low %v3083_v38, %v3087_v39 }
 0x471   : > { %4833 = vmatprep.subr.bf16.mxu1 %v5453_v40  ;;  %v3211_v40 = vld [vmem:[%s6661_s30 + $0x658] sm:$0xff] }
 0x472   : > { %4793 = vmatpush1.bf16.msra.mxu0 %v5324_v43  ;;  %v5508_v43 = vcombine.low %v3203_v36, %v3207_v23  ;;  %v3251_v30 = vld [vmem:[%s6661_s30 + $0x798] sm:$0xff] }
 0x473   : > { %4834 = vmatpush1.bf16.msra.mxu1 %v5452_v44  ;;  %4794 = vmatprep.subr.bf16.mxu0 %v5333_v45  ;;  %v5389_v44 = vcombine.high %v3083_v38, %v3087_v39  ;;  %v5517_v45 = vcombine.high %v3211_v40, %v3215_v41  ;;  %v3255_v31 = vld [vmem:[%s6661_s30 + $0x7b8] sm:$0xff] }
 0x474   : > { %4835 = vmatprep.subr.bf16.mxu1 %v5461_v46  ;;  %v3091_v46 = vld [vmem:[%s6661_s30 + $0x298] sm:$0xff] }
 0x475   : > { %v5396_v6 = vcombine.low %v3091_v46, %v3095_v47  ;;  %v3135_v35 = vld [vmem:[%s6661_s30 + $0x3f8] sm:$0xff] }
 0x476   : > { %4795 = vmatpush1.bf16.msra.mxu0 %v5332_v58  ;;  %v5516_v58 = vcombine.low %v3211_v40, %v3215_v41  ;;  %v3259_v20 = vld [vmem:[%s6661_s30 + $0x7d8] sm:$0xff]  ;;  %v2996_v40 = vld [vmem:[#allocation3] sm:$0xff] }
 0x477   : > { %4836 = vmatpush1.bf16.msra.mxu1 %v5460_v2  ;;  %4796 = vmatprep.subr.bf16.mxu0 %v5341_v62  ;;  %v5397_v2 = vcombine.high %v3091_v46, %v3095_v47  ;;  %v5525_v62 = vcombine.high %v3219_v50, %v3223_v54  ;;  %v3263_v36 = vld [vmem:[%s6661_s30 + $0x7f8] sm:$0xff] }
 0x478   : > { %4837 = vmatprep.subr.bf16.mxu1 %v5469_v4  ;;  %v3099_v4 = vld [vmem:[%s6661_s30 + $0x2d8] sm:$0xff]  ;;  %v5564_v38 = vcombine.low %v3259_v20, %v3263_v36 }
 0x479   : > { %v5404_v15 = vcombine.low %v3099_v4, %v3103_v1 }
 0x47a   : > { %4797 = vmatpush1.bf16.msra.mxu0 %v5340_v9  ;;  %v5524_v9 = vcombine.low %v3219_v50, %v3223_v54 }
 0x47b   : > { %4838 = vmatpush1.bf16.msra.mxu1 %v5468_v7  ;;  %4798 = vmatprep.subr.bf16.mxu0 %v5349_v10  ;;  %v5405_v7 = vcombine.high %v3099_v4, %v3103_v1  ;;  %v5533_v10 = vcombine.high %v3227_v3, %v3231_v49 }
 0x47c   : > { %4839 = vmatprep.subr.bf16.mxu1 %v5477_v11  ;;  %v3107_v11 = vld [vmem:[%s6661_s30 + $0x318] sm:$0xff] }
 0x47d   : > { %v5412_v56 = vcombine.low %v3107_v11, %v3111_v12 }
 0x47e   : > { %4799 = vmatpush1.bf16.msra.mxu0 %v5348_v16  ;;  %v5532_v16 = vcombine.low %v3227_v3, %v3231_v49  ;;  %v2999_v3 = vld [vmem:[#allocation3 + $0x18] sm:$0xff] }
 0x47f   : > { %4840 = vmatpush1.bf16.msra.mxu1 %v5476_v21  ;;  %4800 = vmatprep.subr.bf16.mxu0 %v5357_v51  ;;  %v5413_v21 = vcombine.high %v3107_v11, %v3111_v12  ;;  %v5541_v51 = vcombine.high %v3235_v13, %v3239_v14 }
 0x480   : > { %4841 = vmatprep.subr.bf16.mxu1 %v5485_v52  ;;  %v3115_v52 = vld [vmem:[%s6661_s30 + $0x358] sm:$0xff] }
 0x481   : > { %v5420_v17 = vcombine.low %v3115_v52, %v3119_v55 }
 0x482   : > { %4801 = vmatpush1.bf16.msra.mxu0 %v5356_v22  ;;  %v5540_v22 = vcombine.low %v3235_v13, %v3239_v14 }
 0x483   : > { %4842 = vmatpush1.bf16.msra.mxu1 %v5484_v24  ;;  %4802 = vmatprep.subr.bf16.mxu0 %v5365_v25  ;;  %v5421_v24 = vcombine.high %v3115_v52, %v3119_v55  ;;  %v5549_v25 = vcombine.high %v3243_v53, %v3247_v48  ;;  %v3001_v52 = vld [vmem:[#allocation3 + $0x28] sm:$0xff] }
 0x484   : > { %4843 = vmatprep.subr.bf16.mxu1 %v5493_v27  ;;  %v3123_v27 = vld [vmem:[%s6661_s30 + $0x398] sm:$0xff] }
 0x485   : > { %v5428_v23 = vcombine.low %v3123_v27, %v3127_v28 }
 0x486   : > { %4803 = vmatpush1.bf16.msra.mxu0 %v5364_v33  ;;  %v5548_v33 = vcombine.low %v3243_v53, %v3247_v48 }
 0x487   : > { %4844 = vmatpush1.bf16.msra.mxu1 %v5492_v18  ;;  %4804 = vmatprep.subr.bf16.mxu0 %v5373_v34  ;;  %v5429_v18 = vcombine.high %v3123_v27, %v3127_v28  ;;  %v5557_v34 = vcombine.high %v3251_v30, %v3255_v31 }
 0x488   : > { %4845 = vmatprep.subr.bf16.mxu1 %v5501_v19  ;;  %v3131_v19 = vld [vmem:[%s6661_s30 + $0x3d8] sm:$0xff] }
 0x48a   : > { %4805 = vmatpush1.bf16.msra.mxu0 %v5372_v26  ;;  %v5556_v26 = vcombine.low %v3251_v30, %v3255_v31  ;;  %v3002_v30 = vld [vmem:[#allocation3 + $0x30] sm:$0xff] }
 0x48b   : > { %4846 = vmatpush1.bf16.msra.mxu1 %v5500_v29  ;;  %4806 = vmatprep.subr.bf16.mxu0 %v5381_v32  ;;  %v5437_v29 = vcombine.high %v3131_v19, %v3135_v35  ;;  %v5565_v32 = vcombine.high %v3259_v20, %v3263_v36 }
 0x48c   : > { %4847 = vmatprep.subr.bf16.mxu1 %v5509_v37  ;;  %v5436_v37 = vcombine.low %v3131_v19, %v3135_v35 }
 0x48e   : > { %4807 = vmatpush1.bf16.msra.mxu0 %v5380_v42 }
 0x48f   : > { %4848 = vmatpush1.bf16.msra.mxu1 %v5508_v43  ;;  %4808 = vmatprep.subr.bf16.mxu0 %v5389_v44  ;;  %v2997_v44 = vld [vmem:[#allocation3 + $0x8] sm:$0xff] }
 0x490   : > { %4849 = vmatprep.subr.bf16.mxu1 %v5517_v45 }
 0x492   : > { %4809 = vmatpush1.bf16.msra.mxu0 %v5388_v57 }
 0x493   : > { %4850 = vmatpush1.bf16.msra.mxu1 %v5516_v58  ;;  %4810 = vmatprep.subr.bf16.mxu0 %v5397_v2 }
 0x494   : > { %4851 = vmatprep.subr.bf16.mxu1 %v5525_v62 }
 0x496   : > { %4811 = vmatpush1.bf16.msra.mxu0 %v5396_v6 }
 0x497   : > { %4852 = vmatpush1.bf16.msra.mxu1 %v5524_v9  ;;  %4812 = vmatprep.subr.bf16.mxu0 %v5405_v7 }
 0x498   : > { %4853 = vmatprep.subr.bf16.mxu1 %v5533_v10 }
 0x49a   : > { %4813 = vmatpush1.bf16.msra.mxu0 %v5404_v15  ;;  %v3000_v15 = vld [vmem:[#allocation3 + $0x20] sm:$0xff] }
 0x49b   : > { %4854 = vmatpush1.bf16.msra.mxu1 %v5532_v16  ;;  %4814 = vmatprep.subr.bf16.mxu0 %v5413_v21 }
 0x49c   : > { %4855 = vmatprep.subr.bf16.mxu1 %v5541_v51 }
 0x49e   : > { %4815 = vmatpush1.bf16.msra.mxu0 %v5412_v56 }
 0x49f   : > { %4856 = vmatpush1.bf16.msra.mxu1 %v5540_v22  ;;  %4816 = vmatprep.subr.bf16.mxu0 %v5421_v24 }
 0x4a0   : > { %4857 = vmatprep.subr.bf16.mxu1 %v5549_v25 }
 0x4a2   : > { %4817 = vmatpush1.bf16.msra.mxu0 %v5420_v17 }
 0x4a3   : > { %4858 = vmatpush1.bf16.msra.mxu1 %v5548_v33  ;;  %4818 = vmatprep.subr.bf16.mxu0 %v5429_v18  ;;  %v3003_v18 = vld [vmem:[#allocation3 + $0x38] sm:$0xff] }
 0x4a4   : > { %4859 = vmatprep.subr.bf16.mxu1 %v5557_v34 }
 0x4a6   : > { %4819 = vmatpush1.bf16.msra.mxu0 %v5428_v23 }
 0x4a7   : > { %4860 = vmatpush1.bf16.msra.mxu1 %v5556_v26  ;;  %4820 = vmatprep.subr.bf16.mxu0 %v5437_v29 }
 0x4a8   : > { %4861 = vmatprep.subr.bf16.mxu1 %v5565_v32 }
 0x4aa   : > { %4821 = vmatpush1.bf16.msra.mxu0 %v5436_v37  ;;  %v4900_v37 = vld [vmem:[%s7390_s0] sm:$0xff] (!%p5566_p11) }
 0x4ab   : > { %4862 = vmatpush1.bf16.msra.mxu1 %v5564_v38  ;;  %v4916_v38 = vld [vmem:[%s7396_s6] sm:$0xff] (!%p5566_p11) }
 0x4ad   : > { %4823 = vmatmul.mubr.bf16.vlgmr.msra.gmra.mrb[16].mxu0 %v7106_v5  ;;  %v2998_v5 = vld [vmem:[#allocation3 + $0x10] sm:$0xff] }
 0x4ae   : > { %4864 = vmatmul.mubr.bf16.vlgmr.msra.gmra.mrb[16].mxu1 %v7109_v8 }
 0x4c0   : > { %v4578_v39 = vpop.f32.mrb[4].mxu0 }
 0x4c1   : > { %v4619_v41 = vpop.f32.mrb[4].mxu1  ;;  %v4580_v42 = vpop.f32.mrb[5].mxu0 }
 0x4c2   : > { %v4620_v43 = vadd.f32 %v4619_v41, %v4578_v39  ;;  %v4621_v45 = vpop.f32.mrb[5].mxu1  ;;  %v4582_v46 = vpop.f32.mrb[6].mxu0  ;;  %v4936_v39 = vsub.s32 (!%p5566_p11), 4, %v7079_v59  ;;  %v4944_v41 = vsub.s32 (!%p5566_p11), 6, %v7079_v59 }
 0x4c3   : > { %v4622_v47 = vadd.f32 %v4621_v45, %v4580_v42  ;;  %v4623_v50 = vpop.f32.mrb[6].mxu1  ;;  %v4583_v54 = vpop.f32.mrb[7].mxu0  ;;  %v4901_v45 = vld [vmem:[%s7390_s0 + $0x8] sm:$0xff] (!%p5566_p11)  ;;  %v4925_v46 = vrot.slane (!%p5566_p11), %v4916_v38, %v1310_v63 }
 0x4c4   : > { %v4872_v57 = vadd.f32 %v4620_v43, %v2996_v40  ;;  %v4624_v58 = vpop.f32.mrb[7].mxu1  ;;  %v4940_v40 = vsub.s32 (!%p5566_p11), 5, %v7079_v59  ;;  %v4921_v43 = vrot.slane (!%p5566_p11), %v4916_v38, %v1306_v60  ;;  %v4929_v50 = vrot.slane (!%p5566_p11), %v4916_v38, %v1314_v61  ;;  %v4903_v60 = vld [vmem:[%s7390_s0 + $0x18] sm:$0xff] (!%p5566_p11)  ;;  %v4904_v61 = vld [vmem:[%s7390_s0 + $0x20] sm:$0xff] (!%p5566_p11) }
 0x4c5   : > { %v4873_v2 = vadd.f32 %v4622_v47, %v2997_v44 }
 0x4c6   : > { %4880 = vst [vmem:[#allocation3] sm:$0xff] %v4872_v57  ;;  %v4902_v57 = vld [vmem:[%s7390_s0 + $0x10] sm:$0xff] (!%p5566_p11) }
 0x4c7   : > { %4881 = vst [vmem:[#allocation3 + $0x8] sm:$0xff] %v4873_v2  ;;  %v4933_v2 = vrot.slane (!%p5566_p11), %v4916_v38, %v1318_v0  ;;  %v4906_v0 = vld [vmem:[%s7390_s0 + $0x30] sm:$0xff] (!%p5566_p11) }
 0x4cd   : > { %v4892_v32 = vld [vmem:[#allocation3] sm:$0xff] (!%p5566_p11) }
 0x4ce   : > { %v4908_v42 = vadd.f32 (!%p5566_p11), %v4900_v37, %v4892_v32  ;;  %v4893_v44 = vld [vmem:[#allocation3 + $0x8] sm:$0xff] (!%p5566_p11) }
 0x4cf   : > { %v4909_v54 = vadd.f32 (!%p5566_p11), %v4901_v45, %v4893_v44 }
 0x4d0   : > { %v4958_v63 = vadd.f32 (!%p5566_p11), %v4921_v43, %v4908_v42 }
 0x4d2   : > { %4966 = vst [vmem:[%s7397_s7] sm:$0xff] (!%p5566_p11), %v4958_v63 }
 0x500   : > { %v4660_v62 = vpop.f32.mrb[8].mxu0 }
 0x501   : > { %v4701_v4 = vpop.f32.mrb[8].mxu1  ;;  %v4662_v8 = vpop.f32.mrb[9].mxu0 }
 0x502   : > { %v4702_v1 = vadd.f32 %v4701_v4, %v4660_v62  ;;  %v4703_v49 = vpop.f32.mrb[9].mxu1  ;;  %v4664_v6 = vpop.f32.mrb[10].mxu0  ;;  %v4937_v62 = vrot.slane (!%p5566_p11), %v4916_v38, %v4936_v39 }
 0x503   : > { %v4704_v9 = vadd.f32 %v4703_v49, %v4662_v8  ;;  %v4705_v7 = vpop.f32.mrb[10].mxu1  ;;  %v4665_v10 = vpop.f32.mrb[11].mxu0  ;;  %v4945_v49 = vrot.slane (!%p5566_p11), %v4916_v38, %v4944_v41  ;;  %v4959_v6 = vadd.f32 (!%p5566_p11), %v4925_v46, %v4909_v54 }
 0x504   : > { %v4874_v11 = vadd.f32 %v4702_v1, %v2998_v5  ;;  %v4706_v12 = vpop.f32.mrb[11].mxu1  ;;  %v4941_v5 = vrot.slane (!%p5566_p11), %v4916_v38, %v4940_v40  ;;  %v4905_v7 = vld [vmem:[%s7390_s0 + $0x28] sm:$0xff] (!%p5566_p11) }
 0x505   : > { %v4875_v13 = vadd.f32 %v4704_v9, %v2999_v3  ;;  %4967 = vst [vmem:[%s7397_s7 + $0x8] sm:$0xff] (!%p5566_p11), %v4959_v6 }
 0x506   : > { %4882 = vst [vmem:[#allocation3 + $0x10] sm:$0xff] %v4874_v11  ;;  %v4948_v11 = vsub.s32 (!%p5566_p11), 7, %v7079_v59 }
 0x507   : > { %4883 = vst [vmem:[#allocation3 + $0x18] sm:$0xff] %v4875_v13 }
 0x508   : > { %v4949_v59 = vrot.slane (!%p5566_p11), %v4916_v38, %v4948_v11 }
 0x50d   : > { %v4894_v47 = vld [vmem:[#allocation3 + $0x10] sm:$0xff] (!%p5566_p11) }
 0x50e   : > { %v4895_v58 = vld [vmem:[#allocation3 + $0x18] sm:$0xff] (!%p5566_p11)  ;;  %v4910_v4 = vadd.f32 (!%p5566_p11), %v4902_v57, %v4894_v47 }
 0x50f   : > { %v4911_v8 = vadd.f32 (!%p5566_p11), %v4903_v60, %v4895_v58 }
 0x510   : > { %v4960_v12 = vadd.f32 (!%p5566_p11), %v4929_v50, %v4910_v4 }
 0x511   : > { %v4961_v13 = vadd.f32 (!%p5566_p11), %v4933_v2, %v4911_v8 }
 0x512   : > { %4968 = vst [vmem:[%s7397_s7 + $0x10] sm:$0xff] (!%p5566_p11), %v4960_v12 }
 0x513   : > { %4969 = vst [vmem:[%s7397_s7 + $0x18] sm:$0xff] (!%p5566_p11), %v4961_v13 }
 0x540   : > { %v4742_v14 = vpop.f32.mrb[12].mxu0 }
 0x541   : > { %v4783_v16 = vpop.f32.mrb[12].mxu1  ;;  %v4744_v21 = vpop.f32.mrb[13].mxu0 }
 0x542   : > { %v4784_v51 = vadd.f32 %v4783_v16, %v4742_v14  ;;  %v4785_v55 = vpop.f32.mrb[13].mxu1  ;;  %v4746_v53 = vpop.f32.mrb[14].mxu0 }
 0x543   : > { %v4786_v48 = vadd.f32 %v4785_v55, %v4744_v21  ;;  %v4787_v56 = vpop.f32.mrb[14].mxu1  ;;  %v4747_v22 = vpop.f32.mrb[15].mxu0  ;;  %v4907_v21 = vld [vmem:[%s7390_s0 + $0x38] sm:$0xff] (!%p5566_p11) }
 0x544   : > { %v4876_v24 = vadd.f32 %v4784_v51, %v3000_v15  ;;  %v4788_v25 = vpop.f32.mrb[15].mxu1 }
 0x545   : > { %v4877_v27 = vadd.f32 %v4786_v48, %v3001_v52 }
 0x546   : > { %4884 = vst [vmem:[#allocation3 + $0x20] sm:$0xff] %v4876_v24 }
 0x547   : > { %4885 = vst [vmem:[#allocation3 + $0x28] sm:$0xff] %v4877_v27 }
 0x54d   : > { %v4896_v1 = vld [vmem:[#allocation3 + $0x20] sm:$0xff] (!%p5566_p11) }
 0x54e   : > { %v4897_v3 = vld [vmem:[#allocation3 + $0x28] sm:$0xff] (!%p5566_p11)  ;;  %v4912_v9 = vadd.f32 (!%p5566_p11), %v4904_v61, %v4896_v1 }
 0x54f   : > { %v4913_v14 = vadd.f32 (!%p5566_p11), %v4905_v7, %v4897_v3 }
 0x550   : > { %v4962_v51 = vadd.f32 (!%p5566_p11), %v4937_v62, %v4912_v9 }
 0x551   : > { %v4963_v55 = vadd.f32 (!%p5566_p11), %v4941_v5, %v4913_v14 }
 0x552   : > { %4970 = vst [vmem:[%s7397_s7 + $0x20] sm:$0xff] (!%p5566_p11), %v4962_v51 }
 0x553   : > { %4971 = vst [vmem:[%s7397_s7 + $0x28] sm:$0xff] (!%p5566_p11), %v4963_v55 }
 0x580   : > { %v4824_v28 = vpop.f32.mrb[16].mxu0 }
 0x581   : > { %v4865_v31 = vpop.f32.mrb[16].mxu1  ;;  %v4826_v17 = vpop.f32.mrb[17].mxu0  ;;  %4891 = sbr.rel (%p5566_p11) target bundleno = 1428 (0x594), region = 79 }
 0x582   : > { %v4866_v33 = vadd.f32 %v4865_v31, %v4824_v28  ;;  %v4867_v34 = vpop.f32.mrb[17].mxu1  ;;  %v4828_v19 = vpop.f32.mrb[18].mxu0 }
 0x583   : > { %v4868_v35 = vadd.f32 %v4867_v34, %v4826_v17  ;;  %v4869_v20 = vpop.f32.mrb[18].mxu1  ;;  %v4829_v36 = vpop.f32.mrb[19].mxu0 }
 0x584   : > { %v4878_v23 = vadd.f32 %v4866_v33, %v3002_v30  ;;  %v4870_v26 = vpop.f32.mrb[19].mxu1 }
 0x585   : > { %v4879_v29 = vadd.f32 %v4868_v35, %v3003_v18 }
 0x586   : > { %4886 = vst [vmem:[#allocation3 + $0x30] sm:$0xff] %v4878_v23 }
 0x587   : > { %4887 = vst [vmem:[#allocation3 + $0x38] sm:$0xff] %v4879_v29 }
 0x58d   : > { %v4898_v10 = vld [vmem:[#allocation3 + $0x30] sm:$0xff] }
 0x58e   : > { %v4914_v15 = vadd.f32 %v4906_v0, %v4898_v10  ;;  %v4899_v16 = vld [vmem:[#allocation3 + $0x38] sm:$0xff] }
 0x58f   : > { %v4915_v52 = vadd.f32 %v4907_v21, %v4899_v16 }
 0x590   : > { %v4964_v53 = vadd.f32 %v4945_v49, %v4914_v15 }
 0x591   : > { %v4965_v48 = vadd.f32 %v4949_v59, %v4915_v52 }
 0x592   : > { %4972 = vst [vmem:[%s7397_s7 + $0x30] sm:$0xff] %v4964_v53 }
 0x593   : > { %4973 = vst [vmem:[%s7397_s7 + $0x38] sm:$0xff] %v4965_v48 }
 0x594 PF: > { %p14_p12 = scmp.ge.s32.totalorder %s6114_s28, 10   ;;  %s7398_s24 = smov %s6048_s25 }
 0x595   : > { %s7399_s25 = smov %s6123_s8  ;;  %s7400_s26 = smov %s6114_s28 }
 0x596   :  { %16 = sbr.rel (!%p14_p12) target bundleno = 2 (0x2), region = 116 }

</bundles_post_ra>
